<compile_context>
chip_gen: v7x
topology: tpu7x:2x2x1
jax: 0.10.0
libtpu: 0.0.40
codegen_flags: <defaults>
</compile_context>

<pallas_src>
import functools
import math

import jax
import jax.numpy as jnp
import numpy as np
from jax.experimental import pallas as pl
from jax.experimental.pallas import tpu as pltpu


def _round_up(x, m):
    return ((x + m - 1) // m) * m


def _eq_conv_transpose_kernel(x_ref, w_ref, b_ref, o_ref, *, kh, kw, oh, ow):
    # x_ref: (1, HP, WP, Cin_p)   dilated+padded image for this batch element
    # w_ref: (kh*kw, Cin_p, Cout_p)  pre-scaled, pre-flipped, pre-transposed weight
    # b_ref: (1, Cout_p)
    # o_ref: (1, OH*OW, Cout_p)   lane-dense output slab
    cin = x_ref.shape[-1]
    cout = o_ref.shape[-1]

    acc = jnp.zeros((oh * ow, cout), jnp.float32)
    # kh*kw is small and static -> unrolled taps; each tap is one big MXU matmul.
    for ki in range(kh):
        for kj in range(kw):
            patch = x_ref[0, ki:ki + oh, kj:kj + ow, :]            # (oh, ow, cin)
            acc = acc + jnp.dot(
                patch.reshape(oh * ow, cin),
                w_ref[ki * kw + kj],
                preferred_element_type=jnp.float32,
            )
    acc = acc + b_ref[...]                                          # (1, cout) broadcast
    o_ref[0] = acc.astype(o_ref.dtype)


def equal_conv_transpose2d(x, weight, bias=None, *, stride=1, padding=0):
    """x: (N, Cin, H, W) f32; weight: (Cin, Cout, kH, kW); bias: (Cout,) or None."""
    N, Cin, H, W = x.shape
    Cin_w, Cout, kH, kW = weight.shape
    assert Cin == Cin_w
    s, p = stride, padding

    OH = (H - 1) * s - 2 * p + kH
    OW = (W - 1) * s - 2 * p + kW
    scale = 1.0 / math.sqrt(Cin * kH * kW)

    ph, pw = kH - 1 - p, kW - 1 - p
    # TODO(synk): support padding >= kernel_size by cropping the dilated input.
    assert ph >= 0 and pw >= 0, "padding >= kernel_size not supported"

    cin_p = _round_up(Cin, 8)      # sublane alignment for the weight / contraction
    cout_p = _round_up(Cout, 128)  # lane-dense output stores

    # ---- host-side data movement (no FLOPs) -------------------------------
    # NCHW -> NHWC, zero-dilate by stride, pad spatially by (k-1-p), pad channels.
    x_nhwc = jnp.transpose(x, (0, 2, 3, 1))
    HD, WD = (H - 1) * s + 1, (W - 1) * s + 1
    x_dil = jnp.zeros((N, HD, WD, Cin), x.dtype).at[:, ::s, ::s, :].set(x_nhwc)
    x_dp = jnp.pad(x_dil, ((0, 0), (ph, ph), (pw, pw), (0, cin_p - Cin)))
    HP, WP = HD + 2 * ph, WD + 2 * pw

    # Pre-scale + spatially flip + transpose the weight ONCE so the kernel feeds
    # the MXU directly (no per-step rescale, no in-kernel transpose).
    w_t = jnp.flip(weight, axis=(2, 3)) * scale           # (Cin, Cout, kH, kW)
    w_t = jnp.transpose(w_t, (2, 3, 0, 1))                # (kH, kW, Cin, Cout)
    w_t = jnp.pad(w_t, ((0, 0), (0, 0), (0, cin_p - Cin), (0, cout_p - Cout)))
    w_t = w_t.reshape(kH * kW, cin_p, cout_p)

    if bias is None:
        b2d = jnp.zeros((1, cout_p), x.dtype)
    else:
        b2d = jnp.pad(bias.astype(x.dtype).reshape(1, Cout),
                      ((0, 0), (0, cout_p - Cout)))

    kernel = functools.partial(_eq_conv_transpose_kernel, kh=kH, kw=kW, oh=OH, ow=OW)

    # TODO(synk): for very large feature maps / channel counts, add an output-row
    # grid axis (overlapping input slabs via in-kernel pl.ds) to bound VMEM.
    out_flat = pl.pallas_call(
        kernel,
        out_shape=jax.ShapeDtypeStruct((N, OH * OW, cout_p), x.dtype),
        grid_spec=pltpu.PrefetchScalarGridSpec(
            num_scalar_prefetch=0,
            grid=(N,),
            in_specs=[
                pl.BlockSpec((1, HP, WP, cin_p), lambda n: (n, 0, 0, 0)),   # image
                pl.BlockSpec((kH * kW, cin_p, cout_p), lambda n: (0, 0, 0)),  # weight (resident)
                pl.BlockSpec((1, cout_p), lambda n: (0, 0)),                # bias (resident)
            ],
            out_specs=pl.BlockSpec((1, OH * OW, cout_p), lambda n: (n, 0, 0)),
        ),
        compiler_params=pltpu.CompilerParams(
            dimension_semantics=("parallel",),   # batch elements shard across TCs (v7x)
        ),
    )(x_dp, w_t, b2d)

    out = out_flat[:, :, :Cout].reshape(N, OH, OW, Cout)
    return jnp.transpose(out, (0, 3, 1, 2))   # back to NCHW


def _reference_conv_transpose2d(x, weight, bias, stride, padding):
    """Direct scatter-formulation reference (matches PyTorch F.conv_transpose2d)."""
    x = np.asarray(x, np.float64)
    w = np.asarray(weight, np.float64)
    N, Cin, H, W = x.shape
    _, Cout, kH, kW = w.shape
    scale = 1.0 / math.sqrt(Cin * kH * kW)
    w = w * scale
    OH = (H - 1) * stride - 2 * padding + kH
    OW = (W - 1) * stride - 2 * padding + kW
    full = np.zeros((N, Cout, (H - 1) * stride + kH, (W - 1) * stride + kW), np.float64)
    for n in range(N):
        for iy in range(H):
            for ix in range(W):
                contrib = np.einsum('c,cokl->okl', x[n, :, iy, ix], w)
                full[n, :, iy * stride:iy * stride + kH,
                     ix * stride:ix * stride + kW] += contrib
    out = full[:, :, padding:padding + OH, padding:padding + OW]
    if bias is not None:
        out = out + np.asarray(bias, np.float64)[None, :, None, None]
    return out.astype(np.float32)


if __name__ == "__main__":
    key = jax.random.PRNGKey(0)
    k1, k2, k3, k4 = jax.random.split(key, 4)

    # Config 1: stride-2 upsampling layer (typical decoder block), with bias.
    N, Cin, H, W = 2, 4, 16, 16
    Cout, ksize, stride, pad = 8, 4, 2, 1
    x = jax.random.normal(k1, (N, Cin, H, W), dtype=jnp.float32)
    w = jax.random.normal(k2, (Cin, Cout, ksize, ksize), dtype=jnp.float32)
    b = jax.random.normal(k3, (Cout,), dtype=jnp.float32) * 0.1

    out = jax.block_until_ready(
        equal_conv_transpose2d(x, w, b, stride=stride, padding=pad))
    ref = _reference_conv_transpose2d(x, w, b, stride, pad)
    assert out.shape == (N, Cout, 32, 32), out.shape
    err = np.abs(np.asarray(out) - ref).max()
    assert np.allclose(np.asarray(out), ref, atol=1e-4, rtol=1e-4), err

    # Config 2: stride-1, padding-1, no bias.
    Cout2, ksize2, stride2, pad2 = 8, 3, 1, 1
    w2 = jax.random.normal(k4, (Cin, Cout2, ksize2, ksize2), dtype=jnp.float32)
    out2 = jax.block_until_ready(
        equal_conv_transpose2d(x, w2, None, stride=stride2, padding=pad2))
    ref2 = _reference_conv_transpose2d(x, w2, None, stride2, pad2)
    assert out2.shape == (N, Cout2, 16, 16), out2.shape
    err2 = np.abs(np.asarray(out2) - ref2).max()
    assert np.allclose(np.asarray(out2), ref2, atol=1e-4, rtol=1e-4), err2

    print("KERNEL_OK")
</pallas_src>

<mosaic_0001>
module attributes {stable_mosaic.version = 11 : i64} {
  func.func @_eq_conv_transpose_kernel(%arg0: i32, %arg1: memref<1x35x35x8xf32, #tpu.memory_space<vmem>>, %arg2: memref<16x8x128xf32, #tpu.memory_space<vmem>>, %arg3: memref<1x128xf32, #tpu.memory_space<vmem>>, %arg4: memref<1x1024x128xf32, #tpu.memory_space<vmem>>) attributes {dimension_semantics = [#tpu.dimension_semantics<parallel>], iteration_bounds = array<i64: 2>, scalar_prefetch = 0 : i64, scratch_operands = 0 : i64, tpu.core_type = #tpu.core_type<tc>, window_params = [{transform_indices = @transform_0, window_bounds = array<i64: 1, 35, 35, 8>}, {pipeline_mode = #tpu.pipeline_mode<synchronous>, transform_indices = @transform_1, window_bounds = array<i64: 16, 8, 128>}, {pipeline_mode = #tpu.pipeline_mode<synchronous>, transform_indices = @transform_2, window_bounds = array<i64: 1, 128>}, {transform_indices = @transform_3, window_bounds = array<i64: 1, 1024, 128>}]} {
    %cst = arith.constant 0.000000e+00 : f32
    %0 = vector.broadcast %cst : f32 to vector<1024x128xf32>
    %c0 = arith.constant 0 : index
    %c0_0 = arith.constant 0 : index
    %c0_1 = arith.constant 0 : index
    %c0_2 = arith.constant 0 : index
    %1 = vector.load %arg1[%c0, %c0_0, %c0_1, %c0_2] : memref<1x35x35x8xf32, #tpu.memory_space<vmem>>, vector<1x32x32x8xf32>
    %2 = vector.shape_cast %1 : vector<1x32x32x8xf32> to vector<32x32x8xf32>
    %3 = vector.shape_cast %2 : vector<32x32x8xf32> to vector<1024x8xf32>
    %c0_3 = arith.constant 0 : index
    %c0_4 = arith.constant 0 : index
    %c0_5 = arith.constant 0 : index
    %4 = vector.load %arg2[%c0_3, %c0_4, %c0_5] : memref<16x8x128xf32, #tpu.memory_space<vmem>>, vector<1x8x128xf32>
    %5 = vector.shape_cast %4 : vector<1x8x128xf32> to vector<8x128xf32>
    %cst_6 = arith.constant dense<0.000000e+00> : vector<1024x128xf32>
    %6 = tpu.matmul %3, %5, %cst_6 {dimension_numbers = #tpu.dot_dimension_numbers<[1], [0], [0], [1], [0, 0, 1, 1], [], []>} : vector<1024x8xf32>, vector<8x128xf32>, vector<1024x128xf32> -> vector<1024x128xf32>
    %7 = arith.addf %0, %6 : vector<1024x128xf32>
    %c0_7 = arith.constant 0 : index
    %c0_8 = arith.constant 0 : index
    %c1 = arith.constant 1 : index
    %c0_9 = arith.constant 0 : index
    %8 = vector.load %arg1[%c0_7, %c0_8, %c1, %c0_9] : memref<1x35x35x8xf32, #tpu.memory_space<vmem>>, vector<1x32x32x8xf32>
    %9 = vector.shape_cast %8 : vector<1x32x32x8xf32> to vector<32x32x8xf32>
    %10 = vector.shape_cast %9 : vector<32x32x8xf32> to vector<1024x8xf32>
    %c1_10 = arith.constant 1 : index
    %c0_11 = arith.constant 0 : index
    %c0_12 = arith.constant 0 : index
    %11 = vector.load %arg2[%c1_10, %c0_11, %c0_12] : memref<16x8x128xf32, #tpu.memory_space<vmem>>, vector<1x8x128xf32>
    %12 = vector.shape_cast %11 : vector<1x8x128xf32> to vector<8x128xf32>
    %cst_13 = arith.constant dense<0.000000e+00> : vector<1024x128xf32>
    %13 = tpu.matmul %10, %12, %cst_13 {dimension_numbers = #tpu.dot_dimension_numbers<[1], [0], [0], [1], [0, 0, 1, 1], [], []>} : vector<1024x8xf32>, vector<8x128xf32>, vector<1024x128xf32> -> vector<1024x128xf32>
    %14 = arith.addf %7, %13 : vector<1024x128xf32>
    %c0_14 = arith.constant 0 : index
    %c0_15 = arith.constant 0 : index
    %c2 = arith.constant 2 : index
    %c0_16 = arith.constant 0 : index
    %15 = vector.load %arg1[%c0_14, %c0_15, %c2, %c0_16] : memref<1x35x35x8xf32, #tpu.memory_space<vmem>>, vector<1x32x32x8xf32>
    %16 = vector.shape_cast %15 : vector<1x32x32x8xf32> to vector<32x32x8xf32>
    %17 = vector.shape_cast %16 : vector<32x32x8xf32> to vector<1024x8xf32>
    %c2_17 = arith.constant 2 : index
    %c0_18 = arith.constant 0 : index
    %c0_19 = arith.constant 0 : index
    %18 = vector.load %arg2[%c2_17, %c0_18, %c0_19] : memref<16x8x128xf32, #tpu.memory_space<vmem>>, vector<1x8x128xf32>
    %19 = vector.shape_cast %18 : vector<1x8x128xf32> to vector<8x128xf32>
    %cst_20 = arith.constant dense<0.000000e+00> : vector<1024x128xf32>
    %20 = tpu.matmul %17, %19, %cst_20 {dimension_numbers = #tpu.dot_dimension_numbers<[1], [0], [0], [1], [0, 0, 1, 1], [], []>} : vector<1024x8xf32>, vector<8x128xf32>, vector<1024x128xf32> -> vector<1024x128xf32>
    %21 = arith.addf %14, %20 : vector<1024x128xf32>
    %c0_21 = arith.constant 0 : index
    %c0_22 = arith.constant 0 : index
    %c3 = arith.constant 3 : index
    %c0_23 = arith.constant 0 : index
    %22 = vector.load %arg1[%c0_21, %c0_22, %c3, %c0_23] : memref<1x35x35x8xf32, #tpu.memory_space<vmem>>, vector<1x32x32x8xf32>
    %23 = vector.shape_cast %22 : vector<1x32x32x8xf32> to vector<32x32x8xf32>
    %24 = vector.shape_cast %23 : vector<32x32x8xf32> to vector<1024x8xf32>
    %c3_24 = arith.constant 3 : index
    %c0_25 = arith.constant 0 : index
    %c0_26 = arith.constant 0 : index
    %25 = vector.load %arg2[%c3_24, %c0_25, %c0_26] : memref<16x8x128xf32, #tpu.memory_space<vmem>>, vector<1x8x128xf32>
    %26 = vector.shape_cast %25 : vector<1x8x128xf32> to vector<8x128xf32>
    %cst_27 = arith.constant dense<0.000000e+00> : vector<1024x128xf32>
    %27 = tpu.matmul %24, %26, %cst_27 {dimension_numbers = #tpu.dot_dimension_numbers<[1], [0], [0], [1], [0, 0, 1, 1], [], []>} : vector<1024x8xf32>, vector<8x128xf32>, vector<1024x128xf32> -> vector<1024x128xf32>
    %28 = arith.addf %21, %27 : vector<1024x128xf32>
    %c0_28 = arith.constant 0 : index
    %c1_29 = arith.constant 1 : index
    %c0_30 = arith.constant 0 : index
    %c0_31 = arith.constant 0 : index
    %29 = vector.load %arg1[%c0_28, %c1_29, %c0_30, %c0_31] : memref<1x35x35x8xf32, #tpu.memory_space<vmem>>, vector<1x32x32x8xf32>
    %30 = vector.shape_cast %29 : vector<1x32x32x8xf32> to vector<32x32x8xf32>
    %31 = vector.shape_cast %30 : vector<32x32x8xf32> to vector<1024x8xf32>
    %c4 = arith.constant 4 : index
    %c0_32 = arith.constant 0 : index
    %c0_33 = arith.constant 0 : index
    %32 = vector.load %arg2[%c4, %c0_32, %c0_33] : memref<16x8x128xf32, #tpu.memory_space<vmem>>, vector<1x8x128xf32>
    %33 = vector.shape_cast %32 : vector<1x8x128xf32> to vector<8x128xf32>
    %cst_34 = arith.constant dense<0.000000e+00> : vector<1024x128xf32>
    %34 = tpu.matmul %31, %33, %cst_34 {dimension_numbers = #tpu.dot_dimension_numbers<[1], [0], [0], [1], [0, 0, 1, 1], [], []>} : vector<1024x8xf32>, vector<8x128xf32>, vector<1024x128xf32> -> vector<1024x128xf32>
    %35 = arith.addf %28, %34 : vector<1024x128xf32>
    %c0_35 = arith.constant 0 : index
    %c1_36 = arith.constant 1 : index
    %c1_37 = arith.constant 1 : index
    %c0_38 = arith.constant 0 : index
    %36 = vector.load %arg1[%c0_35, %c1_36, %c1_37, %c0_38] : memref<1x35x35x8xf32, #tpu.memory_space<vmem>>, vector<1x32x32x8xf32>
    %37 = vector.shape_cast %36 : vector<1x32x32x8xf32> to vector<32x32x8xf32>
    %38 = vector.shape_cast %37 : vector<32x32x8xf32> to vector<1024x8xf32>
    %c5 = arith.constant 5 : index
    %c0_39 = arith.constant 0 : index
    %c0_40 = arith.constant 0 : index
    %39 = vector.load %arg2[%c5, %c0_39, %c0_40] : memref<16x8x128xf32, #tpu.memory_space<vmem>>, vector<1x8x128xf32>
    %40 = vector.shape_cast %39 : vector<1x8x128xf32> to vector<8x128xf32>
    %cst_41 = arith.constant dense<0.000000e+00> : vector<1024x128xf32>
    %41 = tpu.matmul %38, %40, %cst_41 {dimension_numbers = #tpu.dot_dimension_numbers<[1], [0], [0], [1], [0, 0, 1, 1], [], []>} : vector<1024x8xf32>, vector<8x128xf32>, vector<1024x128xf32> -> vector<1024x128xf32>
    %42 = arith.addf %35, %41 : vector<1024x128xf32>
    %c0_42 = arith.constant 0 : index
    %c1_43 = arith.constant 1 : index
    %c2_44 = arith.constant 2 : index
    %c0_45 = arith.constant 0 : index
    %43 = vector.load %arg1[%c0_42, %c1_43, %c2_44, %c0_45] : memref<1x35x35x8xf32, #tpu.memory_space<vmem>>, vector<1x32x32x8xf32>
    %44 = vector.shape_cast %43 : vector<1x32x32x8xf32> to vector<32x32x8xf32>
    %45 = vector.shape_cast %44 : vector<32x32x8xf32> to vector<1024x8xf32>
    %c6 = arith.constant 6 : index
    %c0_46 = arith.constant 0 : index
    %c0_47 = arith.constant 0 : index
    %46 = vector.load %arg2[%c6, %c0_46, %c0_47] : memref<16x8x128xf32, #tpu.memory_space<vmem>>, vector<1x8x128xf32>
    %47 = vector.shape_cast %46 : vector<1x8x128xf32> to vector<8x128xf32>
    %cst_48 = arith.constant dense<0.000000e+00> : vector<1024x128xf32>
    %48 = tpu.matmul %45, %47, %cst_48 {dimension_numbers = #tpu.dot_dimension_numbers<[1], [0], [0], [1], [0, 0, 1, 1], [], []>} : vector<1024x8xf32>, vector<8x128xf32>, vector<1024x128xf32> -> vector<1024x128xf32>
    %49 = arith.addf %42, %48 : vector<1024x128xf32>
    %c0_49 = arith.constant 0 : index
    %c1_50 = arith.constant 1 : index
    %c3_51 = arith.constant 3 : index
    %c0_52 = arith.constant 0 : index
    %50 = vector.load %arg1[%c0_49, %c1_50, %c3_51, %c0_52] : memref<1x35x35x8xf32, #tpu.memory_space<vmem>>, vector<1x32x32x8xf32>
    %51 = vector.shape_cast %50 : vector<1x32x32x8xf32> to vector<32x32x8xf32>
    %52 = vector.shape_cast %51 : vector<32x32x8xf32> to vector<1024x8xf32>
    %c7 = arith.constant 7 : index
    %c0_53 = arith.constant 0 : index
    %c0_54 = arith.constant 0 : index
    %53 = vector.load %arg2[%c7, %c0_53, %c0_54] : memref<16x8x128xf32, #tpu.memory_space<vmem>>, vector<1x8x128xf32>
    %54 = vector.shape_cast %53 : vector<1x8x128xf32> to vector<8x128xf32>
    %cst_55 = arith.constant dense<0.000000e+00> : vector<1024x128xf32>
    %55 = tpu.matmul %52, %54, %cst_55 {dimension_numbers = #tpu.dot_dimension_numbers<[1], [0], [0], [1], [0, 0, 1, 1], [], []>} : vector<1024x8xf32>, vector<8x128xf32>, vector<1024x128xf32> -> vector<1024x128xf32>
    %56 = arith.addf %49, %55 : vector<1024x128xf32>
    %c0_56 = arith.constant 0 : index
    %c2_57 = arith.constant 2 : index
    %c0_58 = arith.constant 0 : index
    %c0_59 = arith.constant 0 : index
    %57 = vector.load %arg1[%c0_56, %c2_57, %c0_58, %c0_59] : memref<1x35x35x8xf32, #tpu.memory_space<vmem>>, vector<1x32x32x8xf32>
    %58 = vector.shape_cast %57 : vector<1x32x32x8xf32> to vector<32x32x8xf32>
    %59 = vector.shape_cast %58 : vector<32x32x8xf32> to vector<1024x8xf32>
    %c8 = arith.constant 8 : index
    %c0_60 = arith.constant 0 : index
    %c0_61 = arith.constant 0 : index
    %60 = vector.load %arg2[%c8, %c0_60, %c0_61] : memref<16x8x128xf32, #tpu.memory_space<vmem>>, vector<1x8x128xf32>
    %61 = vector.shape_cast %60 : vector<1x8x128xf32> to vector<8x128xf32>
    %cst_62 = arith.constant dense<0.000000e+00> : vector<1024x128xf32>
    %62 = tpu.matmul %59, %61, %cst_62 {dimension_numbers = #tpu.dot_dimension_numbers<[1], [0], [0], [1], [0, 0, 1, 1], [], []>} : vector<1024x8xf32>, vector<8x128xf32>, vector<1024x128xf32> -> vector<1024x128xf32>
    %63 = arith.addf %56, %62 : vector<1024x128xf32>
    %c0_63 = arith.constant 0 : index
    %c2_64 = arith.constant 2 : index
    %c1_65 = arith.constant 1 : index
    %c0_66 = arith.constant 0 : index
    %64 = vector.load %arg1[%c0_63, %c2_64, %c1_65, %c0_66] : memref<1x35x35x8xf32, #tpu.memory_space<vmem>>, vector<1x32x32x8xf32>
    %65 = vector.shape_cast %64 : vector<1x32x32x8xf32> to vector<32x32x8xf32>
    %66 = vector.shape_cast %65 : vector<32x32x8xf32> to vector<1024x8xf32>
    %c9 = arith.constant 9 : index
    %c0_67 = arith.constant 0 : index
    %c0_68 = arith.constant 0 : index
    %67 = vector.load %arg2[%c9, %c0_67, %c0_68] : memref<16x8x128xf32, #tpu.memory_space<vmem>>, vector<1x8x128xf32>
    %68 = vector.shape_cast %67 : vector<1x8x128xf32> to vector<8x128xf32>
    %cst_69 = arith.constant dense<0.000000e+00> : vector<1024x128xf32>
    %69 = tpu.matmul %66, %68, %cst_69 {dimension_numbers = #tpu.dot_dimension_numbers<[1], [0], [0], [1], [0, 0, 1, 1], [], []>} : vector<1024x8xf32>, vector<8x128xf32>, vector<1024x128xf32> -> vector<1024x128xf32>
    %70 = arith.addf %63, %69 : vector<1024x128xf32>
    %c0_70 = arith.constant 0 : index
    %c2_71 = arith.constant 2 : index
    %c2_72 = arith.constant 2 : index
    %c0_73 = arith.constant 0 : index
    %71 = vector.load %arg1[%c0_70, %c2_71, %c2_72, %c0_73] : memref<1x35x35x8xf32, #tpu.memory_space<vmem>>, vector<1x32x32x8xf32>
    %72 = vector.shape_cast %71 : vector<1x32x32x8xf32> to vector<32x32x8xf32>
    %73 = vector.shape_cast %72 : vector<32x32x8xf32> to vector<1024x8xf32>
    %c10 = arith.constant 10 : index
    %c0_74 = arith.constant 0 : index
    %c0_75 = arith.constant 0 : index
    %74 = vector.load %arg2[%c10, %c0_74, %c0_75] : memref<16x8x128xf32, #tpu.memory_space<vmem>>, vector<1x8x128xf32>
    %75 = vector.shape_cast %74 : vector<1x8x128xf32> to vector<8x128xf32>
    %cst_76 = arith.constant dense<0.000000e+00> : vector<1024x128xf32>
    %76 = tpu.matmul %73, %75, %cst_76 {dimension_numbers = #tpu.dot_dimension_numbers<[1], [0], [0], [1], [0, 0, 1, 1], [], []>} : vector<1024x8xf32>, vector<8x128xf32>, vector<1024x128xf32> -> vector<1024x128xf32>
    %77 = arith.addf %70, %76 : vector<1024x128xf32>
    %c0_77 = arith.constant 0 : index
    %c2_78 = arith.constant 2 : index
    %c3_79 = arith.constant 3 : index
    %c0_80 = arith.constant 0 : index
    %78 = vector.load %arg1[%c0_77, %c2_78, %c3_79, %c0_80] : memref<1x35x35x8xf32, #tpu.memory_space<vmem>>, vector<1x32x32x8xf32>
    %79 = vector.shape_cast %78 : vector<1x32x32x8xf32> to vector<32x32x8xf32>
    %80 = vector.shape_cast %79 : vector<32x32x8xf32> to vector<1024x8xf32>
    %c11 = arith.constant 11 : index
    %c0_81 = arith.constant 0 : index
    %c0_82 = arith.constant 0 : index
    %81 = vector.load %arg2[%c11, %c0_81, %c0_82] : memref<16x8x128xf32, #tpu.memory_space<vmem>>, vector<1x8x128xf32>
    %82 = vector.shape_cast %81 : vector<1x8x128xf32> to vector<8x128xf32>
    %cst_83 = arith.constant dense<0.000000e+00> : vector<1024x128xf32>
    %83 = tpu.matmul %80, %82, %cst_83 {dimension_numbers = #tpu.dot_dimension_numbers<[1], [0], [0], [1], [0, 0, 1, 1], [], []>} : vector<1024x8xf32>, vector<8x128xf32>, vector<1024x128xf32> -> vector<1024x128xf32>
    %84 = arith.addf %77, %83 : vector<1024x128xf32>
    %c0_84 = arith.constant 0 : index
    %c3_85 = arith.constant 3 : index
    %c0_86 = arith.constant 0 : index
    %c0_87 = arith.constant 0 : index
    %85 = vector.load %arg1[%c0_84, %c3_85, %c0_86, %c0_87] : memref<1x35x35x8xf32, #tpu.memory_space<vmem>>, vector<1x32x32x8xf32>
    %86 = vector.shape_cast %85 : vector<1x32x32x8xf32> to vector<32x32x8xf32>
    %87 = vector.shape_cast %86 : vector<32x32x8xf32> to vector<1024x8xf32>
    %c12 = arith.constant 12 : index
    %c0_88 = arith.constant 0 : index
    %c0_89 = arith.constant 0 : index
    %88 = vector.load %arg2[%c12, %c0_88, %c0_89] : memref<16x8x128xf32, #tpu.memory_space<vmem>>, vector<1x8x128xf32>
    %89 = vector.shape_cast %88 : vector<1x8x128xf32> to vector<8x128xf32>
    %cst_90 = arith.constant dense<0.000000e+00> : vector<1024x128xf32>
    %90 = tpu.matmul %87, %89, %cst_90 {dimension_numbers = #tpu.dot_dimension_numbers<[1], [0], [0], [1], [0, 0, 1, 1], [], []>} : vector<1024x8xf32>, vector<8x128xf32>, vector<1024x128xf32> -> vector<1024x128xf32>
    %91 = arith.addf %84, %90 : vector<1024x128xf32>
    %c0_91 = arith.constant 0 : index
    %c3_92 = arith.constant 3 : index
    %c1_93 = arith.constant 1 : index
    %c0_94 = arith.constant 0 : index
    %92 = vector.load %arg1[%c0_91, %c3_92, %c1_93, %c0_94] : memref<1x35x35x8xf32, #tpu.memory_space<vmem>>, vector<1x32x32x8xf32>
    %93 = vector.shape_cast %92 : vector<1x32x32x8xf32> to vector<32x32x8xf32>
    %94 = vector.shape_cast %93 : vector<32x32x8xf32> to vector<1024x8xf32>
    %c13 = arith.constant 13 : index
    %c0_95 = arith.constant 0 : index
    %c0_96 = arith.constant 0 : index
    %95 = vector.load %arg2[%c13, %c0_95, %c0_96] : memref<16x8x128xf32, #tpu.memory_space<vmem>>, vector<1x8x128xf32>
    %96 = vector.shape_cast %95 : vector<1x8x128xf32> to vector<8x128xf32>
    %cst_97 = arith.constant dense<0.000000e+00> : vector<1024x128xf32>
    %97 = tpu.matmul %94, %96, %cst_97 {dimension_numbers = #tpu.dot_dimension_numbers<[1], [0], [0], [1], [0, 0, 1, 1], [], []>} : vector<1024x8xf32>, vector<8x128xf32>, vector<1024x128xf32> -> vector<1024x128xf32>
    %98 = arith.addf %91, %97 : vector<1024x128xf32>
    %c0_98 = arith.constant 0 : index
    %c3_99 = arith.constant 3 : index
    %c2_100 = arith.constant 2 : index
    %c0_101 = arith.constant 0 : index
    %99 = vector.load %arg1[%c0_98, %c3_99, %c2_100, %c0_101] : memref<1x35x35x8xf32, #tpu.memory_space<vmem>>, vector<1x32x32x8xf32>
    %100 = vector.shape_cast %99 : vector<1x32x32x8xf32> to vector<32x32x8xf32>
    %101 = vector.shape_cast %100 : vector<32x32x8xf32> to vector<1024x8xf32>
    %c14 = arith.constant 14 : index
    %c0_102 = arith.constant 0 : index
    %c0_103 = arith.constant 0 : index
    %102 = vector.load %arg2[%c14, %c0_102, %c0_103] : memref<16x8x128xf32, #tpu.memory_space<vmem>>, vector<1x8x128xf32>
    %103 = vector.shape_cast %102 : vector<1x8x128xf32> to vector<8x128xf32>
    %cst_104 = arith.constant dense<0.000000e+00> : vector<1024x128xf32>
    %104 = tpu.matmul %101, %103, %cst_104 {dimension_numbers = #tpu.dot_dimension_numbers<[1], [0], [0], [1], [0, 0, 1, 1], [], []>} : vector<1024x8xf32>, vector<8x128xf32>, vector<1024x128xf32> -> vector<1024x128xf32>
    %105 = arith.addf %98, %104 : vector<1024x128xf32>
    %c0_105 = arith.constant 0 : index
    %c3_106 = arith.constant 3 : index
    %c3_107 = arith.constant 3 : index
    %c0_108 = arith.constant 0 : index
    %106 = vector.load %arg1[%c0_105, %c3_106, %c3_107, %c0_108] : memref<1x35x35x8xf32, #tpu.memory_space<vmem>>, vector<1x32x32x8xf32>
    %107 = vector.shape_cast %106 : vector<1x32x32x8xf32> to vector<32x32x8xf32>
    %108 = vector.shape_cast %107 : vector<32x32x8xf32> to vector<1024x8xf32>
    %c15 = arith.constant 15 : index
    %c0_109 = arith.constant 0 : index
    %c0_110 = arith.constant 0 : index
    %109 = vector.load %arg2[%c15, %c0_109, %c0_110] : memref<16x8x128xf32, #tpu.memory_space<vmem>>, vector<1x8x128xf32>
    %110 = vector.shape_cast %109 : vector<1x8x128xf32> to vector<8x128xf32>
    %cst_111 = arith.constant dense<0.000000e+00> : vector<1024x128xf32>
    %111 = tpu.matmul %108, %110, %cst_111 {dimension_numbers = #tpu.dot_dimension_numbers<[1], [0], [0], [1], [0, 0, 1, 1], [], []>} : vector<1024x8xf32>, vector<8x128xf32>, vector<1024x128xf32> -> vector<1024x128xf32>
    %112 = arith.addf %105, %111 : vector<1024x128xf32>
    %c0_112 = arith.constant 0 : index
    %c0_113 = arith.constant 0 : index
    %113 = vector.load %arg3[%c0_112, %c0_113] : memref<1x128xf32, #tpu.memory_space<vmem>>, vector<1x128xf32>
    %114 = vector.broadcast %113 : vector<1x128xf32> to vector<1024x128xf32>
    %115 = arith.addf %112, %114 : vector<1024x128xf32>
    %c0_114 = arith.constant 0 : index
    %c0_115 = arith.constant 0 : index
    %c0_116 = arith.constant 0 : index
    %116 = vector.load %arg4[%c0_114, %c0_115, %c0_116] : memref<1x1024x128xf32, #tpu.memory_space<vmem>>, vector<1x1024x128xf32>
    %117 = vector.shape_cast %116 : vector<1x1024x128xf32> to vector<1024x128xf32>
    %118 = vector.shape_cast %115 : vector<1024x128xf32> to vector<1x1024x128xf32>
    tpu.vector_store %arg4[%c0_114, %c0_115, %c0_116], %118 {strides = array<i32>} : memref<1x1024x128xf32, #tpu.memory_space<vmem>>, vector<1x1024x128xf32>,
    return
  }
  func.func @transform_0(%arg0: i32) -> (i32, i32, i32, i32) {
    %c0_i32 = arith.constant 0 : i32
    %c0_i32_0 = arith.constant 0 : i32
    %c0_i32_1 = arith.constant 0 : i32
    %c0_i32_2 = arith.constant 0 : i32
    return %arg0, %c0_i32, %c0_i32_0, %c0_i32_1 : i32, i32, i32, i32
  }
  func.func @transform_1(%arg0: i32) -> (i32, i32, i32) {
    %c0_i32 = arith.constant 0 : i32
    %c0_i32_0 = arith.constant 0 : i32
    %c0_i32_1 = arith.constant 0 : i32
    %c0_i32_2 = arith.constant 0 : i32
    return %c0_i32, %c0_i32_0, %c0_i32_1 : i32, i32, i32
  }
  func.func @transform_2(%arg0: i32) -> (i32, i32) {
    %c0_i32 = arith.constant 0 : i32
    %c0_i32_0 = arith.constant 0 : i32
    %c0_i32_1 = arith.constant 0 : i32
    return %c0_i32, %c0_i32_0 : i32, i32
  }
  func.func @transform_3(%arg0: i32) -> (i32, i32, i32) {
    %c0_i32 = arith.constant 0 : i32
    %c0_i32_0 = arith.constant 0 : i32
    %c0_i32_1 = arith.constant 0 : i32
    return %arg0, %c0_i32, %c0_i32_0 : i32, i32, i32
  }
}

</mosaic_0001>

<bundles_post_ra>
// kernel: tpu_custom_call.1
= control target key start
LH: loop header
LB: loop body
LE: loop exit
PB: predicated region body
PF: predicated region fallthrough
CT: control target
= control target key end

     0   :  { %8 = vsyncpa [#allocation3], 0  ;;  %s36907_s0 = inlined_call_operand.vmem [shape: f32[2,35,35,8], index: 0, kind: input, shape index: {}]   ;;  %s36908_s1 = inlined_call_operand.vmem [shape: f32[16,8,128], index: 1, kind: input, shape index: {}]   ;;  %s36909_s2 = inlined_call_operand.vmem [shape: f32[1,128], index: 2, kind: input, shape index: {}]   ;;  %s36910_s3 = inlined_call_operand.hbm [shape: f32[2,1024,128], index: 3, kind: output, shape index: {}]  }
   0x1   :  { %10 = vsyncpa [#allocation3 + $0x1], 0  ;;  %s32637_s12 = smov 0   ;;  %s32639_s13 = smov 0  }
   0x2   :  { %s32641_s14 = smov 0   ;;  %s32643_s15 = smov 0  }
   0x3 LB: > { %s32658_s16 = sadd.s32 4294967295, %s32612_s15   ;;  %s21807_s17 = sadd.s32 4294967294, %s32612_s15   ;;  %s32612_s15 = sphi %s32643_s15, %s37105_s15   ;;  %s32608_s14 = sphi %s32641_s14, %s37104_s14   ;;  %s32604_s13 = sphi %s32639_s13, %s37103_s13   ;;  %s32600_s12 = sphi %s32637_s12, %s37102_s12  }
   0x4   : > { %s32662_s18 = sadd.s32 1, %s32612_s15   ;;  %s91_s19 = sadd.s32 1, %s32608_s14 }
   0x5   : > { %s88_s20 = ssub.s32 %s32612_s15, %s32662_s18  ;;  %p101_p0 = scmp.ne.s32.totalorder %s32608_s14, %s32604_s13 }
   0x6   : > { %p89_p1 = scmp.eq.s32.totalorder %s88_s20, 0  ;;  %p102_p2 = scmp.eq.s32.totalorder %s32658_s16, 1 }
   0x7   : > { %p107_p3 = scmp.ne.s32.totalorder %s32604_s13, %s32600_s12  ;;  %p108_p4 = scmp.eq.s32.totalorder %s21807_s17, 1 }
   0x8   : > { %s32673_s21 = scalar_select %p89_p1, %s32608_s14, %s91_s19  }
   0x9   : > { %p32675_p5 = por %p102_p2, %p101_p0  ;;  %p32679_p6 = por %p108_p4, %p107_p3 }
   0xa   : > { %p21810_p7 = scmp.ge.s32.totalorder %s32612_s15, 1  ;;  %p140_p8 = scmp.lt.s32.totalorder %s32612_s15, 3 }
   0xc   : > { %p141_p9 = pnand %p21810_p7, %p140_p8 }
   0xe   : > { %144 = sbr.rel (%p141_p9) target bundleno = 2306 (0x902), region = 32 }
  0x15   : > { %v21813_v0 = vld [vmem:[%s36908_s1 + $0x8] sm:$0xff]  ;;  %v23484_v1 = vld [vmem:[%s36908_s1 + $0x40] sm:$0xff]  ;;  %p164_p10 = scmp.lt.s32.totalorder %s32658_s16, 1  ;;  %vm428_vm0 = vcmask 64512   ;;  %s161_s26 = sand.u32 1, %s32604_s13  }
  0x16   : > { %v297_v2 = vld [vmem:[%s36908_s1] sm:$0xff]  ;;  %27483 = vmatprep.subr.mxu1 %v21813_v0  ;;  %29035 = vmatprep.subr.mxu0 %v23484_v1  ;;  %v23741_v3 = vld [vmem:[%s36908_s1 + $0x48] sm:$0xff]  ;;  %s21811_s27 = sshll.u32 %s161_s26, 10  ;;  %s32614_s17 = smov [#allocation2]  }
  0x17   : > { %27484 = vmatpush3.msra.mxu1 %v21813_v0  ;;  %29036 = vmatpush3.msra.mxu0 %v23484_v1  ;;  %s165_s5 = scalar_select %p164_p10, %s32658_s16, 1 }
  0x18   : > { %27677 = vmatprep.subr.mxu1 %v297_v2  ;;  %29229 = vmatprep.subr.mxu0 %v23741_v3  ;;  %s36495_s30 = scalar_lea.vmem [#allocation2], %s21811_s27  ;;  %s32554_s19 = sshll.u32 %s32614_s17, 4  ;;  %s32555_s19 = int_to_ptr.vmem [resolvable:$false] %s32554_s19 }
  0x19   : > { %s32507_s6 = smul.u32 1400, %s165_s5  ;;  %s25418_s5 = sshll.u32 %s32658_s16, 14 }
  0x1a   : > { %s36857_s10 = scalar_lea.hbm %s36910_s3, %s25418_s5  ;;  %s36866_s16 = scalar_lea.sflag [#allocation3], %s161_s26 }
  0x1b   : > { %s32702_s9 = scalar_lea.vmem %s36907_s0, %s32507_s6  ;;  %s21745_s6 = sshll.u32 %s36495_s30, 4  ;;  %s36859_s6 = int_to_ptr.vmem [resolvable:$true] %s21745_s6 }
  0x1c   : > { %v298_v4 = vld [vmem:[%s32702_s9 + $0x1] sm:$0xff]  ;;  %v23356_v5 = vld [vmem:[%s32702_s9 + $0x50] sm:$0xff]  ;;  %v23357_v7 = vld [vmem:[%s32702_s9 + $0x58] sm:$0xff]  ;;  %s32550_s11 = scalar_lea.vmem %s36859_s6, 16384  ;;  %s32556_s20 = scalar_lea.vmem %s32555_s19, 32768 }
  0x1d   : > { %v299_v6 = vld [vmem:[%s32702_s9 + $0x9] sm:$0xff]  ;;  %27485 = vmatprep.mubr.msk.f32.mxu1 %vm428_vm0, %v298_v4  ;;  %29037 = vmatprep.mubr.msk.f32.mxu0 %vm428_vm0, %v23356_v5  ;;  %v300_v8 = vld [vmem:[%s32702_s9 + $0x11] sm:$0xff]  ;;  %v23358_v9 = vld [vmem:[%s32702_s9 + $0x60] sm:$0xff]  ;;  %p32551_p11 = scmp.ne.s32.totalorder %s36859_s6, %s32550_s11  ;;  %p32557_p0 = scmp.lt.s32.totalorder %s36859_s6, %s32555_s19 }
  0x1e   : > { %27486 = vmatmul.mubr.msk.f32.vlgmr.msra.gmra.mrb[0].mxu1 %vm428_vm0, %v299_v6  ;;  %29038 = vmatmul.mubr.msk.f32.vlgmr.msra.gmra.mrb[0].mxu0 %vm428_vm0, %v23357_v7  ;;  %v301_v10 = vld [vmem:[%s32702_s9 + $0x19] sm:$0xff]  ;;  %v23359_v11 = vld [vmem:[%s32702_s9 + $0x68] sm:$0xff]  ;;  %v303_v14 = vld [vmem:[%s32702_s9 + $0x31] sm:$0xff]  ;;  %p32558_p1 = scmp.lt.s32.totalorder %s32556_s20, %s32550_s11 }
  0x1f   : > { %27678 = vmatpush3.msra.mxu1 %v297_v2  ;;  %29230 = vmatpush3.msra.mxu0 %v23741_v3  ;;  %v302_v12 = vld [vmem:[%s32702_s9 + $0x29] sm:$0xff]  ;;  %v23360_v13 = vld [vmem:[%s32702_s9 + $0x78] sm:$0xff]  ;;  %v23361_v15 = vld [vmem:[%s32702_s9 + $0x80] sm:$0xff]  ;;  %p32552_p12 = pnand %p32551_p11, %p32675_p5 }
  0x20   : > { %27488 = vmatprep.mubr.msk.f32.mxu1 %vm428_vm0, %v300_v8  ;;  %29040 = vmatprep.mubr.msk.f32.mxu0 %vm428_vm0, %v23358_v9  ;;  %v304_v16 = vld [vmem:[%s32702_s9 + $0x39] sm:$0xff]  ;;  %v23362_v17 = vld [vmem:[%s32702_s9 + $0x88] sm:$0xff]  ;;  %v23363_v19 = vld [vmem:[%s32702_s9 + $0x90] sm:$0xff]  ;;  %p32559_p2 = por %p32558_p1, %p32557_p0 }
  0x21   : > { %v305_v18 = vld [vmem:[%s32702_s9 + $0x41] sm:$0xff]  ;;  %v32735_v20 = vld [vmem:[%s32702_s9 + $0x51] sm:$0xff]  ;;  %v32744_v22 = vld [vmem:[%s32702_s9 + $0x59] sm:$0xff]  ;;  %p32553_p13 = pneg %p32552_p12 }
  0x22   : > { %27489 = vmatmul.mubr.msk.f32.gmra.mrb[2].mxu1 %vm428_vm0, %v301_v10  ;;  %29041 = vmatmul.mubr.msk.f32.gmra.mrb[2].mxu0 %vm428_vm0, %v23359_v11  ;;  %v23364_v21 = vld [vmem:[%s32702_s9 + $0xa0] sm:$0xff]  ;;  %v23365_v23 = vld [vmem:[%s32702_s9 + $0xa8] sm:$0xff]  ;;  %v23366_v25 = vld [vmem:[%s32702_s9 + $0xb0] sm:$0xff] }
  0x23   : > { %27491 = vmatprep.mubr.msk.f32.mxu1 %vm428_vm0, %v302_v12  ;;  %29043 = vmatprep.mubr.msk.f32.mxu0 %vm428_vm0, %v23360_v13  ;;  %v32748_v24 = vld [vmem:[%s32702_s9 + $0x61] sm:$0xff]  ;;  %v32758_v26 = vld [vmem:[%s32702_s9 + $0x69] sm:$0xff]  ;;  %v23367_v27 = vld [vmem:[%s32702_s9 + $0xb8] sm:$0xff]  ;;  %p32560_p3 = pnand %p32559_p2, %p32553_p13 }
  0x24   : > { %v32762_v28 = vld [vmem:[%s32702_s9 + $0x79] sm:$0xff]  ;;  %v23368_v29 = vld [vmem:[%s32702_s9 + $0xc8] sm:$0xff]  ;;  %v23369_v31 = vld [vmem:[%s32702_s9 + $0xd0] sm:$0xff] }
  0x25   : > { %v32772_v30 = vld [vmem:[%s32702_s9 + $0x81] sm:$0xff]  ;;  %v32776_v32 = vld [vmem:[%s32702_s9 + $0x89] sm:$0xff]  ;;  %v23370_v33 = vld [vmem:[%s32702_s9 + $0xd8] sm:$0xff] }
  0x26   : > { %27492 = vmatmul.mubr.msk.f32.gmra.mrb[4].mxu1 %vm428_vm0, %v303_v14  ;;  %29044 = vmatmul.mubr.msk.f32.gmra.mrb[4].mxu0 %vm428_vm0, %v23361_v15  ;;  %v32786_v34 = vld [vmem:[%s32702_s9 + $0x91] sm:$0xff]  ;;  %v23371_v35 = vld [vmem:[%s32702_s9 + $0xe0] sm:$0xff]  ;;  %v32800_v38 = vld [vmem:[%s32702_s9 + $0xa9] sm:$0xff] }
  0x27   : > { %27494 = vmatprep.mubr.msk.f32.mxu1 %vm428_vm0, %v304_v16  ;;  %29046 = vmatprep.mubr.msk.f32.mxu0 %vm428_vm0, %v23362_v17  ;;  %v32790_v36 = vld [vmem:[%s32702_s9 + $0xa1] sm:$0xff]  ;;  %v23372_v37 = vld [vmem:[%s32702_s9 + $0xf0] sm:$0xff]  ;;  %v23373_v39 = vld [vmem:[%s32702_s9 + $0xf8] sm:$0xff] }
  0x28   : > { %v32804_v40 = vld [vmem:[%s32702_s9 + $0xb1] sm:$0xff]  ;;  %v23374_v41 = vld [vmem:[%s32702_s9 + $0x100] sm:$0xff]  ;;  %v23375_v43 = vld [vmem:[%s32702_s9 + $0x108] sm:$0xff] }
  0x29   : > { %v32814_v42 = vld [vmem:[%s32702_s9 + $0xb9] sm:$0xff]  ;;  %v32818_v44 = vld [vmem:[%s32702_s9 + $0xc9] sm:$0xff]  ;;  %v32828_v46 = vld [vmem:[%s32702_s9 + $0xd1] sm:$0xff] }
  0x2a   : > { %27495 = vmatmul.mubr.msk.f32.gmra.mrb[6].mxu1 %vm428_vm0, %v305_v18  ;;  %29047 = vmatmul.mubr.msk.f32.gmra.mrb[6].mxu0 %vm428_vm0, %v23363_v19  ;;  %v23376_v45 = vld [vmem:[%s32702_s9 + $0x118] sm:$0xff]  ;;  %v23377_v47 = vld [vmem:[%s32702_s9 + $0x120] sm:$0xff]  ;;  %v23378_v49 = vld [vmem:[%s32702_s9 + $0x128] sm:$0xff] }
  0x2b   : > { %27497 = vmatprep.mubr.msk.f32.mxu1 %vm428_vm0, %v32735_v20  ;;  %29049 = vmatprep.mubr.msk.f32.mxu0 %vm428_vm0, %v23364_v21  ;;  %v32832_v48 = vld [vmem:[%s32702_s9 + $0xd9] sm:$0xff]  ;;  %v32842_v50 = vld [vmem:[%s32702_s9 + $0xe1] sm:$0xff]  ;;  %v23379_v51 = vld [vmem:[%s32702_s9 + $0x130] sm:$0xff] }
  0x2c   : > { %v32846_v52 = vld [vmem:[%s32702_s9 + $0xf1] sm:$0xff]  ;;  %v23380_v53 = vld [vmem:[%s32702_s9 + $0x140] sm:$0xff]  ;;  %v23381_v55 = vld [vmem:[%s32702_s9 + $0x148] sm:$0xff] }
  0x2d   : > { %v32856_v54 = vld [vmem:[%s32702_s9 + $0xf9] sm:$0xff]  ;;  %v32860_v56 = vld [vmem:[%s32702_s9 + $0x101] sm:$0xff]  ;;  %v23382_v57 = vld [vmem:[%s32702_s9 + $0x150] sm:$0xff] }
  0x2e   : > { %27498 = vmatmul.mubr.msk.f32.gmra.mrb[8].mxu1 %vm428_vm0, %v32744_v22  ;;  %29050 = vmatmul.mubr.msk.f32.gmra.mrb[8].mxu0 %vm428_vm0, %v23365_v23  ;;  %v32870_v58 = vld [vmem:[%s32702_s9 + $0x109] sm:$0xff]  ;;  %v23383_v59 = vld [vmem:[%s32702_s9 + $0x158] sm:$0xff]  ;;  %v32884_v62 = vld [vmem:[%s32702_s9 + $0x121] sm:$0xff] }
  0x2f   : > { %27500 = vmatprep.mubr.msk.f32.mxu1 %vm428_vm0, %v32748_v24  ;;  %29052 = vmatprep.mubr.msk.f32.mxu0 %vm428_vm0, %v23366_v25  ;;  %v32874_v60 = vld [vmem:[%s32702_s9 + $0x119] sm:$0xff]  ;;  %v23384_v61 = vld [vmem:[%s32702_s9 + $0x168] sm:$0xff]  ;;  %v23385_v63 = vld [vmem:[%s32702_s9 + $0x170] sm:$0xff] }
  0x30   : > { %v32888_v0 = vld [vmem:[%s32702_s9 + $0x129] sm:$0xff]  ;;  %v23386_v1 = vld [vmem:[%s32702_s9 + $0x178] sm:$0xff]  ;;  %v23387_v3 = vld [vmem:[%s32702_s9 + $0x180] sm:$0xff] }
  0x31   : > { %v32898_v2 = vld [vmem:[%s32702_s9 + $0x131] sm:$0xff]  ;;  %v32902_v4 = vld [vmem:[%s32702_s9 + $0x141] sm:$0xff]  ;;  %v32912_v6 = vld [vmem:[%s32702_s9 + $0x149] sm:$0xff] }
  0x32   : > { %27501 = vmatmul.mubr.msk.f32.gmra.mrb[10].mxu1 %vm428_vm0, %v32758_v26  ;;  %29053 = vmatmul.mubr.msk.f32.gmra.mrb[10].mxu0 %vm428_vm0, %v23367_v27  ;;  %v23388_v5 = vld [vmem:[%s32702_s9 + $0x190] sm:$0xff]  ;;  %v23389_v7 = vld [vmem:[%s32702_s9 + $0x198] sm:$0xff]  ;;  %v23390_v9 = vld [vmem:[%s32702_s9 + $0x1a0] sm:$0xff] }
  0x33   : > { %27503 = vmatprep.mubr.msk.f32.mxu1 %vm428_vm0, %v32762_v28  ;;  %29055 = vmatprep.mubr.msk.f32.mxu0 %vm428_vm0, %v23368_v29  ;;  %v32916_v8 = vld [vmem:[%s32702_s9 + $0x151] sm:$0xff]  ;;  %v32926_v10 = vld [vmem:[%s32702_s9 + $0x159] sm:$0xff]  ;;  %v23391_v11 = vld [vmem:[%s32702_s9 + $0x1a8] sm:$0xff] }
  0x34   : > { %v32930_v12 = vld [vmem:[%s32702_s9 + $0x169] sm:$0xff]  ;;  %v23392_v13 = vld [vmem:[%s32702_s9 + $0x1b8] sm:$0xff]  ;;  %v23393_v15 = vld [vmem:[%s32702_s9 + $0x1c0] sm:$0xff] }
  0x35   : > { %v32940_v14 = vld [vmem:[%s32702_s9 + $0x171] sm:$0xff]  ;;  %v32944_v16 = vld [vmem:[%s32702_s9 + $0x179] sm:$0xff]  ;;  %v23394_v17 = vld [vmem:[%s32702_s9 + $0x1c8] sm:$0xff] }
  0x36   : > { %27504 = vmatmul.mubr.msk.f32.gmra.mrb[12].mxu1 %vm428_vm0, %v32772_v30  ;;  %29056 = vmatmul.mubr.msk.f32.gmra.mrb[12].mxu0 %vm428_vm0, %v23369_v31  ;;  %v32954_v18 = vld [vmem:[%s32702_s9 + $0x181] sm:$0xff]  ;;  %v23395_v19 = vld [vmem:[%s32702_s9 + $0x1d0] sm:$0xff]  ;;  %v32968_v25 = vld [vmem:[%s32702_s9 + $0x199] sm:$0xff] }
  0x37   : > { %27506 = vmatprep.mubr.msk.f32.mxu1 %vm428_vm0, %v32776_v32  ;;  %29058 = vmatprep.mubr.msk.f32.mxu0 %vm428_vm0, %v23370_v33  ;;  %v32958_v21 = vld [vmem:[%s32702_s9 + $0x191] sm:$0xff]  ;;  %v23396_v23 = vld [vmem:[%s32702_s9 + $0x1e0] sm:$0xff]  ;;  %v23397_v27 = vld [vmem:[%s32702_s9 + $0x1e8] sm:$0xff] }
  0x38   : > { %v32972_v29 = vld [vmem:[%s32702_s9 + $0x1a1] sm:$0xff]  ;;  %v23398_v31 = vld [vmem:[%s32702_s9 + $0x1f0] sm:$0xff] }
  0x39   : > { %v32982_v33 = vld [vmem:[%s32702_s9 + $0x1a9] sm:$0xff] }
  0x3a   : > { %27507 = vmatmul.mubr.msk.f32.gmra.mrb[14].mxu1 %vm428_vm0, %v32786_v34  ;;  %29059 = vmatmul.mubr.msk.f32.gmra.mrb[14].mxu0 %vm428_vm0, %v23371_v35  ;;  %v23399_v35 = vld [vmem:[%s32702_s9 + $0x1f8] sm:$0xff] }
  0x3b   : > { %27509 = vmatprep.mubr.msk.f32.mxu1 %vm428_vm0, %v32790_v36  ;;  %29061 = vmatprep.mubr.msk.f32.mxu0 %vm428_vm0, %v23372_v37  ;;  %v32986_v37 = vld [vmem:[%s32702_s9 + $0x1b9] sm:$0xff] }
  0x3e   : > { %27510 = vmatmul.mubr.msk.f32.gmra.mrb[16].mxu1 %vm428_vm0, %v32800_v38  ;;  %29062 = vmatmul.mubr.msk.f32.gmra.mrb[16].mxu0 %vm428_vm0, %v23373_v39  ;;  %v23400_v39 = vld [vmem:[%s32702_s9 + $0x208] sm:$0xff] }
  0x3f   : > { %27512 = vmatprep.mubr.msk.f32.mxu1 %vm428_vm0, %v32804_v40  ;;  %29064 = vmatprep.mubr.msk.f32.mxu0 %vm428_vm0, %v23374_v41  ;;  %v32996_v41 = vld [vmem:[%s32702_s9 + $0x1c1] sm:$0xff] }
  0x42   : > { %27513 = vmatmul.mubr.msk.f32.gmra.mrb[18].mxu1 %vm428_vm0, %v32814_v42  ;;  %29065 = vmatmul.mubr.msk.f32.gmra.mrb[18].mxu0 %vm428_vm0, %v23375_v43  ;;  %v23401_v43 = vld [vmem:[%s32702_s9 + $0x210] sm:$0xff] }
  0x43   : > { %27515 = vmatprep.mubr.msk.f32.mxu1 %vm428_vm0, %v32818_v44  ;;  %29067 = vmatprep.mubr.msk.f32.mxu0 %vm428_vm0, %v23376_v45  ;;  %v33000_v45 = vld [vmem:[%s32702_s9 + $0x1c9] sm:$0xff] }
  0x46   : > { %27516 = vmatmul.mubr.msk.f32.gmra.mrb[20].mxu1 %vm428_vm0, %v32828_v46  ;;  %29068 = vmatmul.mubr.msk.f32.gmra.mrb[20].mxu0 %vm428_vm0, %v23377_v47  ;;  %v23402_v47 = vld [vmem:[%s32702_s9 + $0x218] sm:$0xff] }
  0x47   : > { %27518 = vmatprep.mubr.msk.f32.mxu1 %vm428_vm0, %v32832_v48  ;;  %29070 = vmatprep.mubr.msk.f32.mxu0 %vm428_vm0, %v23378_v49  ;;  %v33010_v49 = vld [vmem:[%s32702_s9 + $0x1d1] sm:$0xff] }
  0x4a   : > { %27519 = vmatmul.mubr.msk.f32.gmra.mrb[22].mxu1 %vm428_vm0, %v32842_v50  ;;  %29071 = vmatmul.mubr.msk.f32.gmra.mrb[22].mxu0 %vm428_vm0, %v23379_v51  ;;  %v23403_v51 = vld [vmem:[%s32702_s9 + $0x220] sm:$0xff] }
  0x4b   : > { %27521 = vmatprep.mubr.msk.f32.mxu1 %vm428_vm0, %v32846_v52  ;;  %29073 = vmatprep.mubr.msk.f32.mxu0 %vm428_vm0, %v23380_v53  ;;  %v33014_v53 = vld [vmem:[%s32702_s9 + $0x1e1] sm:$0xff] }
  0x4e   : > { %27522 = vmatmul.mubr.msk.f32.gmra.mrb[24].mxu1 %vm428_vm0, %v32856_v54  ;;  %29074 = vmatmul.mubr.msk.f32.gmra.mrb[24].mxu0 %vm428_vm0, %v23381_v55  ;;  %v23404_v55 = vld [vmem:[%s32702_s9 + $0x230] sm:$0xff] }
  0x4f   : > { %27524 = vmatprep.mubr.msk.f32.mxu1 %vm428_vm0, %v32860_v56  ;;  %29076 = vmatprep.mubr.msk.f32.mxu0 %vm428_vm0, %v23382_v57  ;;  %v33024_v57 = vld [vmem:[%s32702_s9 + $0x1e9] sm:$0xff] }
  0x52   : > { %27525 = vmatmul.mubr.msk.f32.gmra.mrb[26].mxu1 %vm428_vm0, %v32870_v58  ;;  %29077 = vmatmul.mubr.msk.f32.gmra.mrb[26].mxu0 %vm428_vm0, %v23383_v59  ;;  %v23405_v59 = vld [vmem:[%s32702_s9 + $0x238] sm:$0xff] }
  0x53   : > { %27527 = vmatprep.mubr.msk.f32.mxu1 %vm428_vm0, %v32874_v60  ;;  %29079 = vmatprep.mubr.msk.f32.mxu0 %vm428_vm0, %v23384_v61  ;;  %v33028_v61 = vld [vmem:[%s32702_s9 + $0x1f1] sm:$0xff] }
  0x56   : > { %27528 = vmatmul.mubr.msk.f32.gmra.mrb[28].mxu1 %vm428_vm0, %v32884_v62  ;;  %29080 = vmatmul.mubr.msk.f32.gmra.mrb[28].mxu0 %vm428_vm0, %v23385_v63  ;;  %v23406_v63 = vld [vmem:[%s32702_s9 + $0x240] sm:$0xff] }
  0x57   : > { %27530 = vmatprep.mubr.msk.f32.mxu1 %vm428_vm0, %v32888_v0  ;;  %29082 = vmatprep.mubr.msk.f32.mxu0 %vm428_vm0, %v23386_v1  ;;  %v33038_v1 = vld [vmem:[%s32702_s9 + $0x1f9] sm:$0xff] }
  0x5a   : > { %27531 = vmatmul.mubr.msk.f32.gmra.mrb[30].mxu1 %vm428_vm0, %v32898_v2  ;;  %29083 = vmatmul.mubr.msk.f32.gmra.mrb[30].mxu0 %vm428_vm0, %v23387_v3  ;;  %v23407_v3 = vld [vmem:[%s32702_s9 + $0x248] sm:$0xff] }
  0x5b   : > { %27533 = vmatprep.mubr.msk.f32.mxu1 %vm428_vm0, %v32902_v4  ;;  %29085 = vmatprep.mubr.msk.f32.mxu0 %vm428_vm0, %v23388_v5  ;;  %v33042_v5 = vld [vmem:[%s32702_s9 + $0x209] sm:$0xff] }
  0x5e   : > { %27534 = vmatmul.mubr.msk.f32.gmra.mrb[32].mxu1 %vm428_vm0, %v32912_v6  ;;  %29086 = vmatmul.mubr.msk.f32.gmra.mrb[32].mxu0 %vm428_vm0, %v23389_v7  ;;  %v23408_v7 = vld [vmem:[%s32702_s9 + $0x258] sm:$0xff] }
  0x5f   : > { %27536 = vmatprep.mubr.msk.f32.mxu1 %vm428_vm0, %v32916_v8  ;;  %29088 = vmatprep.mubr.msk.f32.mxu0 %vm428_vm0, %v23390_v9  ;;  %v33052_v9 = vld [vmem:[%s32702_s9 + $0x211] sm:$0xff] }
  0x62   : > { %27537 = vmatmul.mubr.msk.f32.gmra.mrb[34].mxu1 %vm428_vm0, %v32926_v10  ;;  %29089 = vmatmul.mubr.msk.f32.gmra.mrb[34].mxu0 %vm428_vm0, %v23391_v11  ;;  %v23409_v11 = vld [vmem:[%s32702_s9 + $0x260] sm:$0xff] }
  0x63   : > { %27539 = vmatprep.mubr.msk.f32.mxu1 %vm428_vm0, %v32930_v12  ;;  %29091 = vmatprep.mubr.msk.f32.mxu0 %vm428_vm0, %v23392_v13  ;;  %v33056_v13 = vld [vmem:[%s32702_s9 + $0x219] sm:$0xff] }
  0x66   : > { %27540 = vmatmul.mubr.msk.f32.gmra.mrb[36].mxu1 %vm428_vm0, %v32940_v14  ;;  %29092 = vmatmul.mubr.msk.f32.gmra.mrb[36].mxu0 %vm428_vm0, %v23393_v15  ;;  %v23410_v15 = vld [vmem:[%s32702_s9 + $0x268] sm:$0xff] }
  0x67   : > { %27542 = vmatprep.mubr.msk.f32.mxu1 %vm428_vm0, %v32944_v16  ;;  %29094 = vmatprep.mubr.msk.f32.mxu0 %vm428_vm0, %v23394_v17  ;;  %v33066_v17 = vld [vmem:[%s32702_s9 + $0x221] sm:$0xff] }
  0x6a   : > { %27543 = vmatmul.mubr.msk.f32.gmra.mrb[38].mxu1 %vm428_vm0, %v32954_v18  ;;  %29095 = vmatmul.mubr.msk.f32.gmra.mrb[38].mxu0 %vm428_vm0, %v23395_v19  ;;  %v23411_v19 = vld [vmem:[%s32702_s9 + $0x270] sm:$0xff] }
  0x6b   : > { %27545 = vmatprep.mubr.msk.f32.mxu1 %vm428_vm0, %v32958_v21  ;;  %29097 = vmatprep.mubr.msk.f32.mxu0 %vm428_vm0, %v23396_v23  ;;  %v33070_v23 = vld [vmem:[%s32702_s9 + $0x231] sm:$0xff] }
  0x6e   : > { %27546 = vmatmul.mubr.msk.f32.gmra.mrb[40].mxu1 %vm428_vm0, %v32968_v25  ;;  %29098 = vmatmul.mubr.msk.f32.gmra.mrb[40].mxu0 %vm428_vm0, %v23397_v27  ;;  %v23412_v27 = vld [vmem:[%s32702_s9 + $0x280] sm:$0xff] }
  0x6f   : > { %27548 = vmatprep.mubr.msk.f32.mxu1 %vm428_vm0, %v32972_v29  ;;  %29100 = vmatprep.mubr.msk.f32.mxu0 %vm428_vm0, %v23398_v31  ;;  %v33080_v31 = vld [vmem:[%s32702_s9 + $0x239] sm:$0xff] }
  0x72   : > { %27549 = vmatmul.mubr.msk.f32.gmra.mrb[42].mxu1 %vm428_vm0, %v32982_v33  ;;  %29101 = vmatmul.mubr.msk.f32.gmra.mrb[42].mxu0 %vm428_vm0, %v23399_v35  ;;  %v23413_v35 = vld [vmem:[%s32702_s9 + $0x288] sm:$0xff] }
  0x73   : > { %27551 = vmatprep.mubr.msk.f32.mxu1 %vm428_vm0, %v32986_v37  ;;  %29103 = vmatprep.mubr.msk.f32.mxu0 %vm428_vm0, %v23400_v39  ;;  %v33084_v39 = vld [vmem:[%s32702_s9 + $0x241] sm:$0xff] }
  0x76   : > { %27552 = vmatmul.mubr.msk.f32.gmra.mrb[44].mxu1 %vm428_vm0, %v32996_v41  ;;  %29104 = vmatmul.mubr.msk.f32.gmra.mrb[44].mxu0 %vm428_vm0, %v23401_v43  ;;  %v23414_v43 = vld [vmem:[%s32702_s9 + $0x290] sm:$0xff] }
  0x77   : > { %27554 = vmatprep.mubr.msk.f32.mxu1 %vm428_vm0, %v33000_v45  ;;  %29106 = vmatprep.mubr.msk.f32.mxu0 %vm428_vm0, %v23402_v47  ;;  %v33094_v47 = vld [vmem:[%s32702_s9 + $0x249] sm:$0xff] }
  0x7a   : > { %27555 = vmatmul.mubr.msk.f32.gmra.mrb[46].mxu1 %vm428_vm0, %v33010_v49  ;;  %29107 = vmatmul.mubr.msk.f32.gmra.mrb[46].mxu0 %vm428_vm0, %v23403_v51  ;;  %v23415_v51 = vld [vmem:[%s32702_s9 + $0x298] sm:$0xff] }
  0x7b   : > { %27557 = vmatprep.mubr.msk.f32.mxu1 %vm428_vm0, %v33014_v53  ;;  %29109 = vmatprep.mubr.msk.f32.mxu0 %vm428_vm0, %v23404_v55  ;;  %v33098_v55 = vld [vmem:[%s32702_s9 + $0x259] sm:$0xff] }
  0x7e   : > { %27558 = vmatmul.mubr.msk.f32.gmra.mrb[48].mxu1 %vm428_vm0, %v33024_v57  ;;  %29110 = vmatmul.mubr.msk.f32.gmra.mrb[48].mxu0 %vm428_vm0, %v23405_v59  ;;  %v23416_v59 = vld [vmem:[%s32702_s9 + $0x2a8] sm:$0xff] }
  0x7f   : > { %27560 = vmatprep.mubr.msk.f32.mxu1 %vm428_vm0, %v33028_v61  ;;  %29112 = vmatprep.mubr.msk.f32.mxu0 %vm428_vm0, %v23406_v63  ;;  %v33108_v63 = vld [vmem:[%s32702_s9 + $0x261] sm:$0xff] }
  0x82   : > { %27561 = vmatmul.mubr.msk.f32.gmra.mrb[50].mxu1 %vm428_vm0, %v33038_v1  ;;  %29113 = vmatmul.mubr.msk.f32.gmra.mrb[50].mxu0 %vm428_vm0, %v23407_v3  ;;  %v23417_v3 = vld [vmem:[%s32702_s9 + $0x2b0] sm:$0xff] }
  0x83   : > { %27563 = vmatprep.mubr.msk.f32.mxu1 %vm428_vm0, %v33042_v5  ;;  %29115 = vmatprep.mubr.msk.f32.mxu0 %vm428_vm0, %v23408_v7  ;;  %v33112_v7 = vld [vmem:[%s32702_s9 + $0x269] sm:$0xff] }
  0x84   : > { %36976 = vst [vmem:[#allocation5_spill] sm:$0xff] %v33112_v7 }
  0x86   : > { %27564 = vmatmul.mubr.msk.f32.gmra.mrb[52].mxu1 %vm428_vm0, %v33052_v9  ;;  %29116 = vmatmul.mubr.msk.f32.gmra.mrb[52].mxu0 %vm428_vm0, %v23409_v11  ;;  %v23418_v11 = vld [vmem:[%s32702_s9 + $0x2b8] sm:$0xff] }
  0x87   : > { %27566 = vmatprep.mubr.msk.f32.mxu1 %vm428_vm0, %v33056_v13  ;;  %29118 = vmatprep.mubr.msk.f32.mxu0 %vm428_vm0, %v23410_v15  ;;  %v33122_v15 = vld [vmem:[%s32702_s9 + $0x271] sm:$0xff] }
  0x88   : > { %36977 = vst [vmem:[#allocation6_spill] sm:$0xff] %v33122_v15 }
  0x8a   : > { %27567 = vmatmul.mubr.msk.f32.gmra.mrb[54].mxu1 %vm428_vm0, %v33066_v17  ;;  %29119 = vmatmul.mubr.msk.f32.gmra.mrb[54].mxu0 %vm428_vm0, %v23411_v19  ;;  %v23419_v19 = vld [vmem:[%s32702_s9 + $0x2c0] sm:$0xff] }
  0x8b   : > { %27569 = vmatprep.mubr.msk.f32.mxu1 %vm428_vm0, %v33070_v23  ;;  %29121 = vmatprep.mubr.msk.f32.mxu0 %vm428_vm0, %v23412_v27  ;;  %v33126_v27 = vld [vmem:[%s32702_s9 + $0x281] sm:$0xff] }
  0x8c   : > { %36978 = vst [vmem:[#allocation7_spill] sm:$0xff] %v33126_v27 }
  0x8e   : > { %27570 = vmatmul.mubr.msk.f32.gmra.mrb[56].mxu1 %vm428_vm0, %v33080_v31  ;;  %29122 = vmatmul.mubr.msk.f32.gmra.mrb[56].mxu0 %vm428_vm0, %v23413_v35  ;;  %v23420_v35 = vld [vmem:[%s32702_s9 + $0x2d0] sm:$0xff] }
  0x8f   : > { %27572 = vmatprep.mubr.msk.f32.mxu1 %vm428_vm0, %v33084_v39  ;;  %29124 = vmatprep.mubr.msk.f32.mxu0 %vm428_vm0, %v23414_v43  ;;  %v33133_v43 = vld [vmem:[%s32702_s9 + $0x289] sm:$0xff] }
  0x90   : > { %36979 = vst [vmem:[#allocation8_spill] sm:$0xff] %v33133_v43 }
  0x92   : > { %27573 = vmatmul.mubr.msk.f32.gmra.mrb[58].mxu1 %vm428_vm0, %v33094_v47  ;;  %29125 = vmatmul.mubr.msk.f32.gmra.mrb[58].mxu0 %vm428_vm0, %v23415_v51  ;;  %v23421_v51 = vld [vmem:[%s32702_s9 + $0x2d8] sm:$0xff] }
  0x93   : > { %27575 = vmatprep.mubr.msk.f32.mxu1 %vm428_vm0, %v33098_v55  ;;  %29127 = vmatprep.mubr.msk.f32.mxu0 %vm428_vm0, %v23416_v59  ;;  %v33142_v59 = vld [vmem:[%s36908_s1 + $0x10] sm:$0xff] }
  0x94   : > { %27871 = vmatprep.subr.mxu1 %v33142_v59 }
  0x96   : > { %27576 = vmatmul.mubr.msk.f32.gmra.mrb[60].mxu1 %vm428_vm0, %v33108_v63  ;;  %29128 = vmatmul.mubr.msk.f32.gmra.mrb[60].mxu0 %vm428_vm0, %v23417_v3  ;;  %v33147_v3 = vld [vmem:[%s36908_s1 + $0x50] sm:$0xff] }
  0x97   : > { %27578 = vmatprep.mubr.msk.f32.mxu1 %vm428_vm0, %v33112_v7  ;;  %29130 = vmatprep.mubr.msk.f32.mxu0 %vm428_vm0, %v23418_v11  ;;  %v33150_v11 = vld [vmem:[%s32702_s9 + $0x291] sm:$0xff] }
  0x98   : > { %36980 = vst [vmem:[#allocation9_spill] sm:$0xff] %v33150_v11  ;;  %29423 = vmatprep.subr.mxu0 %v33147_v3  ;;  %v23424_v7 = vld [vmem:[%s32702_s9 + $0x2f8] sm:$0xff] }
  0x9a   : > { %27579 = vmatmul.mubr.msk.f32.gmra.mrb[62].mxu1 %vm428_vm0, %v33122_v15  ;;  %29131 = vmatmul.mubr.msk.f32.gmra.mrb[62].mxu0 %vm428_vm0, %v23419_v19  ;;  %v23422_v19 = vld [vmem:[%s32702_s9 + $0x2e0] sm:$0xff]  ;;  %v33166_v15 = vld [vmem:[%s32702_s9 + $0x2a9] sm:$0xff] }
  0x9b   : > { %27581 = vmatprep.mubr.msk.f32.mxu1 %vm428_vm0, %v33126_v27  ;;  %29133 = vmatprep.mubr.msk.f32.mxu0 %vm428_vm0, %v23420_v35  ;;  %v33162_v35 = vld [vmem:[%s32702_s9 + $0x299] sm:$0xff]  ;;  %v23423_v27 = vld [vmem:[%s32702_s9 + $0x2e8] sm:$0xff]  ;;  %36982 = vst [vmem:[#allocation11_spill] sm:$0xff] %v33166_v15 }
  0x9c   : > { %36981 = vst [vmem:[#allocation10_spill] sm:$0xff] %v33162_v35 }
  0x9e   : > { %27582 = vmatmul.mubr.msk.f32.gmra.mrb[64].mxu1 %vm428_vm0, %v33133_v43  ;;  %29134 = vmatmul.mubr.msk.f32.gmra.mrb[64].mxu0 %vm428_vm0, %v23421_v51  ;;  %v33176_v51 = vld [vmem:[%s32702_s9 + $0x2b1] sm:$0xff]  ;;  %v23426_v43 = vld [vmem:[%s32702_s9 + $0x308] sm:$0xff] }
  0x9f   : > { %27584 = vmatprep.mubr.msk.f32.mxu1 %vm428_vm0, %v33150_v11  ;;  %29136 = vmatprep.mubr.msk.f32.mxu0 %vm428_vm0, %v23422_v19  ;;  %36983 = vst [vmem:[#allocation12_spill] sm:$0xff] %v33176_v51  ;;  %v23425_v19 = vld [vmem:[%s32702_s9 + $0x300] sm:$0xff] }
  0xa0   : > { %v33180_v11 = vld [vmem:[%s32702_s9 + $0x2b9] sm:$0xff] }
  0xa1   : > { %36984 = vst [vmem:[#allocation13_spill] sm:$0xff] %v33180_v11 }
  0xa2   : > { %27585 = vmatmul.mubr.msk.f32.gmra.mrb[66].mxu1 %vm428_vm0, %v33162_v35  ;;  %29137 = vmatmul.mubr.msk.f32.gmra.mrb[66].mxu0 %vm428_vm0, %v23423_v27  ;;  %v23427_v27 = vld [vmem:[%s32702_s9 + $0x310] sm:$0xff]  ;;  %v23428_v35 = vld [vmem:[%s32702_s9 + $0x320] sm:$0xff] }
  0xa3   : > { %27587 = vmatprep.mubr.msk.f32.mxu1 %vm428_vm0, %v33166_v15  ;;  %29139 = vmatprep.mubr.msk.f32.mxu0 %vm428_vm0, %v23424_v7  ;;  %v33190_v7 = vld [vmem:[%s32702_s9 + $0x2c1] sm:$0xff]  ;;  %v33194_v15 = vld [vmem:[%s32702_s9 + $0x2d1] sm:$0xff] }
  0xa4   : > { %36985 = vst [vmem:[#allocation14_spill] sm:$0xff] %v33190_v7  ;;  %36986 = vst [vmem:[#allocation15_spill] sm:$0xff] %v33194_v15 }
  0xa6   : > { %27588 = vmatmul.mubr.msk.f32.gmra.mrb[68].mxu1 %vm428_vm0, %v33176_v51  ;;  %29140 = vmatmul.mubr.msk.f32.gmra.mrb[68].mxu0 %vm428_vm0, %v23425_v19  ;;  %v23429_v19 = vld [vmem:[%s32702_s9 + $0x328] sm:$0xff]  ;;  %v23430_v51 = vld [vmem:[%s32702_s9 + $0x330] sm:$0xff] }
  0xa7   : > { %27590 = vmatprep.mubr.msk.f32.mxu1 %vm428_vm0, %v33180_v11  ;;  %29142 = vmatprep.mubr.msk.f32.mxu0 %vm428_vm0, %v23426_v43  ;;  %v33204_v43 = vld [vmem:[%s32702_s9 + $0x2d9] sm:$0xff]  ;;  %v33208_v11 = vld [vmem:[%s32702_s9 + $0x2e1] sm:$0xff] }
  0xa8   : > { %36987 = vst [vmem:[#allocation16_spill] sm:$0xff] %v33204_v43  ;;  %36988 = vst [vmem:[#allocation17_spill] sm:$0xff] %v33208_v11 }
  0xaa   : > { %27591 = vmatmul.mubr.msk.f32.gmra.mrb[70].mxu1 %vm428_vm0, %v33190_v7  ;;  %29143 = vmatmul.mubr.msk.f32.gmra.mrb[70].mxu0 %vm428_vm0, %v23427_v27  ;;  %v23431_v27 = vld [vmem:[%s32702_s9 + $0x338] sm:$0xff]  ;;  %v23432_v7 = vld [vmem:[%s32702_s9 + $0x348] sm:$0xff] }
  0xab   : > { %27593 = vmatprep.mubr.msk.f32.mxu1 %vm428_vm0, %v33194_v15  ;;  %29145 = vmatprep.mubr.msk.f32.mxu0 %vm428_vm0, %v23428_v35  ;;  %v33218_v35 = vld [vmem:[%s32702_s9 + $0x2e9] sm:$0xff]  ;;  %v33222_v15 = vld [vmem:[%s32702_s9 + $0x2f9] sm:$0xff] }
  0xac   : > { %36989 = vst [vmem:[#allocation18_spill] sm:$0xff] %v33218_v35  ;;  %36990 = vst [vmem:[#allocation19_spill] sm:$0xff] %v33222_v15 }
  0xae   : > { %27594 = vmatmul.mubr.msk.f32.gmra.mrb[72].mxu1 %vm428_vm0, %v33204_v43  ;;  %29146 = vmatmul.mubr.msk.f32.gmra.mrb[72].mxu0 %vm428_vm0, %v23429_v19  ;;  %v23433_v19 = vld [vmem:[%s32702_s9 + $0x350] sm:$0xff]  ;;  %v23434_v43 = vld [vmem:[%s32702_s9 + $0x358] sm:$0xff] }
  0xaf   : > { %27596 = vmatprep.mubr.msk.f32.mxu1 %vm428_vm0, %v33208_v11  ;;  %29148 = vmatprep.mubr.msk.f32.mxu0 %vm428_vm0, %v23430_v51  ;;  %v33232_v51 = vld [vmem:[%s32702_s9 + $0x301] sm:$0xff]  ;;  %v33236_v11 = vld [vmem:[%s32702_s9 + $0x309] sm:$0xff] }
  0xb0   : > { %36991 = vst [vmem:[#allocation20_spill] sm:$0xff] %v33232_v51  ;;  %36992 = vst [vmem:[#allocation21_spill] sm:$0xff] %v33236_v11 }
  0xb2   : > { %27597 = vmatmul.mubr.msk.f32.gmra.mrb[74].mxu1 %vm428_vm0, %v33218_v35  ;;  %29149 = vmatmul.mubr.msk.f32.gmra.mrb[74].mxu0 %vm428_vm0, %v23431_v27  ;;  %v23435_v27 = vld [vmem:[%s32702_s9 + $0x360] sm:$0xff]  ;;  %v23436_v35 = vld [vmem:[%s32702_s9 + $0x370] sm:$0xff] }
  0xb3   : > { %27599 = vmatprep.mubr.msk.f32.mxu1 %vm428_vm0, %v33222_v15  ;;  %29151 = vmatprep.mubr.msk.f32.mxu0 %vm428_vm0, %v23432_v7  ;;  %v33246_v7 = vld [vmem:[%s32702_s9 + $0x311] sm:$0xff]  ;;  %v33250_v15 = vld [vmem:[%s32702_s9 + $0x321] sm:$0xff] }
  0xb4   : > { %36993 = vst [vmem:[#allocation22_spill] sm:$0xff] %v33246_v7  ;;  %36994 = vst [vmem:[#allocation23_spill] sm:$0xff] %v33250_v15 }
  0xb6   : > { %27600 = vmatmul.mubr.msk.f32.gmra.mrb[76].mxu1 %vm428_vm0, %v33232_v51  ;;  %29152 = vmatmul.mubr.msk.f32.gmra.mrb[76].mxu0 %vm428_vm0, %v23433_v19  ;;  %v23437_v19 = vld [vmem:[%s32702_s9 + $0x378] sm:$0xff]  ;;  %v23438_v51 = vld [vmem:[%s32702_s9 + $0x380] sm:$0xff] }
  0xb7   : > { %27602 = vmatprep.mubr.msk.f32.mxu1 %vm428_vm0, %v33236_v11  ;;  %29154 = vmatprep.mubr.msk.f32.mxu0 %vm428_vm0, %v23434_v43  ;;  %v33260_v43 = vld [vmem:[%s32702_s9 + $0x329] sm:$0xff]  ;;  %v33264_v11 = vld [vmem:[%s32702_s9 + $0x331] sm:$0xff] }
  0xb8   : > { %36995 = vst [vmem:[#allocation24_spill] sm:$0xff] %v33260_v43  ;;  %36996 = vst [vmem:[#allocation25_spill] sm:$0xff] %v33264_v11 }
  0xba   : > { %27603 = vmatmul.mubr.msk.f32.gmra.mrb[78].mxu1 %vm428_vm0, %v33246_v7  ;;  %29155 = vmatmul.mubr.msk.f32.gmra.mrb[78].mxu0 %vm428_vm0, %v23435_v27  ;;  %v23439_v27 = vld [vmem:[%s32702_s9 + $0x388] sm:$0xff]  ;;  %v23440_v7 = vld [vmem:[%s32702_s9 + $0x398] sm:$0xff] }
  0xbb   : > { %27605 = vmatprep.mubr.msk.f32.mxu1 %vm428_vm0, %v33250_v15  ;;  %29157 = vmatprep.mubr.msk.f32.mxu0 %vm428_vm0, %v23436_v35  ;;  %v33274_v35 = vld [vmem:[%s32702_s9 + $0x339] sm:$0xff]  ;;  %v33278_v15 = vld [vmem:[%s32702_s9 + $0x349] sm:$0xff] }
  0xbc   : > { %36997 = vst [vmem:[#allocation26_spill] sm:$0xff] %v33274_v35  ;;  %36998 = vst [vmem:[#allocation27_spill] sm:$0xff] %v33278_v15 }
  0xbe   : > { %27606 = vmatmul.mubr.msk.f32.gmra.mrb[80].mxu1 %vm428_vm0, %v33260_v43  ;;  %29158 = vmatmul.mubr.msk.f32.gmra.mrb[80].mxu0 %vm428_vm0, %v23437_v19  ;;  %v23441_v19 = vld [vmem:[%s32702_s9 + $0x3a0] sm:$0xff]  ;;  %v23442_v43 = vld [vmem:[%s32702_s9 + $0x3a8] sm:$0xff] }
  0xbf   : > { %27608 = vmatprep.mubr.msk.f32.mxu1 %vm428_vm0, %v33264_v11  ;;  %29160 = vmatprep.mubr.msk.f32.mxu0 %vm428_vm0, %v23438_v51  ;;  %v33288_v51 = vld [vmem:[%s32702_s9 + $0x351] sm:$0xff]  ;;  %v33292_v11 = vld [vmem:[%s32702_s9 + $0x359] sm:$0xff] }
  0xc0   : > { %36999 = vst [vmem:[#allocation28_spill] sm:$0xff] %v33288_v51  ;;  %37000 = vst [vmem:[#allocation29_spill] sm:$0xff] %v33292_v11 }
  0xc2   : > { %27609 = vmatmul.mubr.msk.f32.gmra.mrb[82].mxu1 %vm428_vm0, %v33274_v35  ;;  %29161 = vmatmul.mubr.msk.f32.gmra.mrb[82].mxu0 %vm428_vm0, %v23439_v27  ;;  %v23443_v27 = vld [vmem:[%s32702_s9 + $0x3b0] sm:$0xff]  ;;  %v23444_v35 = vld [vmem:[%s32702_s9 + $0x3c0] sm:$0xff] }
  0xc3   : > { %27611 = vmatprep.mubr.msk.f32.mxu1 %vm428_vm0, %v33278_v15  ;;  %29163 = vmatprep.mubr.msk.f32.mxu0 %vm428_vm0, %v23440_v7  ;;  %v33302_v7 = vld [vmem:[%s32702_s9 + $0x361] sm:$0xff]  ;;  %v33306_v15 = vld [vmem:[%s32702_s9 + $0x371] sm:$0xff] }
  0xc4   : > { %37001 = vst [vmem:[#allocation30_spill] sm:$0xff] %v33302_v7  ;;  %37002 = vst [vmem:[#allocation31_spill] sm:$0xff] %v33306_v15 }
  0xc6   : > { %27612 = vmatmul.mubr.msk.f32.gmra.mrb[84].mxu1 %vm428_vm0, %v33288_v51  ;;  %29164 = vmatmul.mubr.msk.f32.gmra.mrb[84].mxu0 %vm428_vm0, %v23441_v19  ;;  %v23445_v19 = vld [vmem:[%s32702_s9 + $0x3c8] sm:$0xff]  ;;  %v23446_v51 = vld [vmem:[%s32702_s9 + $0x3d0] sm:$0xff] }
  0xc7   : > { %27614 = vmatprep.mubr.msk.f32.mxu1 %vm428_vm0, %v33292_v11  ;;  %29166 = vmatprep.mubr.msk.f32.mxu0 %vm428_vm0, %v23442_v43  ;;  %v33316_v43 = vld [vmem:[%s32702_s9 + $0x379] sm:$0xff]  ;;  %v33320_v11 = vld [vmem:[%s32702_s9 + $0x381] sm:$0xff] }
  0xc8   : > { %37003 = vst [vmem:[#allocation32_spill] sm:$0xff] %v33316_v43  ;;  %37004 = vst [vmem:[#allocation33_spill] sm:$0xff] %v33320_v11 }
  0xca   : > { %27615 = vmatmul.mubr.msk.f32.gmra.mrb[86].mxu1 %vm428_vm0, %v33302_v7  ;;  %29167 = vmatmul.mubr.msk.f32.gmra.mrb[86].mxu0 %vm428_vm0, %v23443_v27  ;;  %v23447_v27 = vld [vmem:[%s32702_s9 + $0x3d8] sm:$0xff]  ;;  %v23448_v7 = vld [vmem:[%s32702_s9 + $0x3e8] sm:$0xff] }
  0xcb   : > { %27617 = vmatprep.mubr.msk.f32.mxu1 %vm428_vm0, %v33306_v15  ;;  %29169 = vmatprep.mubr.msk.f32.mxu0 %vm428_vm0, %v23444_v35  ;;  %v33330_v35 = vld [vmem:[%s32702_s9 + $0x389] sm:$0xff]  ;;  %v33334_v15 = vld [vmem:[%s32702_s9 + $0x399] sm:$0xff] }
  0xcc   : > { %37005 = vst [vmem:[#allocation34_spill] sm:$0xff] %v33330_v35  ;;  %37006 = vst [vmem:[#allocation35_spill] sm:$0xff] %v33334_v15 }
  0xce   : > { %27618 = vmatmul.mubr.msk.f32.gmra.mrb[88].mxu1 %vm428_vm0, %v33316_v43  ;;  %29170 = vmatmul.mubr.msk.f32.gmra.mrb[88].mxu0 %vm428_vm0, %v23445_v19  ;;  %v23449_v19 = vld [vmem:[%s32702_s9 + $0x3f0] sm:$0xff]  ;;  %v23450_v43 = vld [vmem:[%s32702_s9 + $0x3f8] sm:$0xff] }
  0xcf   : > { %27620 = vmatprep.mubr.msk.f32.mxu1 %vm428_vm0, %v33320_v11  ;;  %29172 = vmatprep.mubr.msk.f32.mxu0 %vm428_vm0, %v23446_v51  ;;  %v33344_v51 = vld [vmem:[%s32702_s9 + $0x3a1] sm:$0xff]  ;;  %v33348_v11 = vld [vmem:[%s32702_s9 + $0x3a9] sm:$0xff] }
  0xd0   : > { %37007 = vst [vmem:[#allocation36_spill] sm:$0xff] %v33344_v51  ;;  %37008 = vst [vmem:[#allocation37_spill] sm:$0xff] %v33348_v11 }
  0xd2   : > { %27621 = vmatmul.mubr.msk.f32.gmra.mrb[90].mxu1 %vm428_vm0, %v33330_v35  ;;  %29173 = vmatmul.mubr.msk.f32.gmra.mrb[90].mxu0 %vm428_vm0, %v23447_v27  ;;  %v23451_v27 = vld [vmem:[%s32702_s9 + $0x400] sm:$0xff]  ;;  %v23452_v35 = vld [vmem:[%s32702_s9 + $0x410] sm:$0xff] }
  0xd3   : > { %27623 = vmatprep.mubr.msk.f32.mxu1 %vm428_vm0, %v33334_v15  ;;  %29175 = vmatprep.mubr.msk.f32.mxu0 %vm428_vm0, %v23448_v7  ;;  %v33358_v7 = vld [vmem:[%s32702_s9 + $0x3b1] sm:$0xff]  ;;  %v33362_v15 = vld [vmem:[%s32702_s9 + $0x3c1] sm:$0xff] }
  0xd4   : > { %37009 = vst [vmem:[#allocation38_spill] sm:$0xff] %v33358_v7  ;;  %37010 = vst [vmem:[#allocation39_spill] sm:$0xff] %v33362_v15 }
  0xd6   : > { %27624 = vmatmul.mubr.msk.f32.gmra.mrb[92].mxu1 %vm428_vm0, %v33344_v51  ;;  %29176 = vmatmul.mubr.msk.f32.gmra.mrb[92].mxu0 %vm428_vm0, %v23449_v19  ;;  %v23453_v19 = vld [vmem:[%s32702_s9 + $0x418] sm:$0xff]  ;;  %v23454_v51 = vld [vmem:[%s32702_s9 + $0x420] sm:$0xff] }
  0xd7   : > { %27626 = vmatprep.mubr.msk.f32.mxu1 %vm428_vm0, %v33348_v11  ;;  %29178 = vmatprep.mubr.msk.f32.mxu0 %vm428_vm0, %v23450_v43  ;;  %v33372_v43 = vld [vmem:[%s32702_s9 + $0x3c9] sm:$0xff]  ;;  %v33376_v11 = vld [vmem:[%s32702_s9 + $0x3d1] sm:$0xff] }
  0xd8   : > { %37011 = vst [vmem:[#allocation40_spill] sm:$0xff] %v33372_v43  ;;  %37012 = vst [vmem:[#allocation41_spill] sm:$0xff] %v33376_v11 }
  0xda   : > { %27627 = vmatmul.mubr.msk.f32.gmra.mrb[94].mxu1 %vm428_vm0, %v33358_v7  ;;  %29179 = vmatmul.mubr.msk.f32.gmra.mrb[94].mxu0 %vm428_vm0, %v23451_v27  ;;  %v23455_v27 = vld [vmem:[%s32702_s9 + $0x428] sm:$0xff]  ;;  %v23456_v7 = vld [vmem:[%s32702_s9 + $0x438] sm:$0xff] }
  0xdb   : > { %27629 = vmatprep.mubr.msk.f32.mxu1 %vm428_vm0, %v33362_v15  ;;  %29181 = vmatprep.mubr.msk.f32.mxu0 %vm428_vm0, %v23452_v35  ;;  %v33386_v35 = vld [vmem:[%s32702_s9 + $0x3d9] sm:$0xff]  ;;  %v33390_v15 = vld [vmem:[%s32702_s9 + $0x3e9] sm:$0xff] }
  0xdc   : > { %37013 = vst [vmem:[#allocation42_spill] sm:$0xff] %v33386_v35  ;;  %37014 = vst [vmem:[#allocation43_spill] sm:$0xff] %v33390_v15 }
  0xde   : > { %27630 = vmatmul.mubr.msk.f32.gmra.mrb[96].mxu1 %vm428_vm0, %v33372_v43  ;;  %29182 = vmatmul.mubr.msk.f32.gmra.mrb[96].mxu0 %vm428_vm0, %v23453_v19  ;;  %v23457_v19 = vld [vmem:[%s32702_s9 + $0x440] sm:$0xff]  ;;  %v23458_v43 = vld [vmem:[%s32702_s9 + $0x448] sm:$0xff] }
  0xdf   : > { %27632 = vmatprep.mubr.msk.f32.mxu1 %vm428_vm0, %v33376_v11  ;;  %29184 = vmatprep.mubr.msk.f32.mxu0 %vm428_vm0, %v23454_v51  ;;  %v33400_v51 = vld [vmem:[%s32702_s9 + $0x3f1] sm:$0xff]  ;;  %v33404_v11 = vld [vmem:[%s32702_s9 + $0x3f9] sm:$0xff] }
  0xe0   : > { %37015 = vst [vmem:[#allocation44_spill] sm:$0xff] %v33400_v51  ;;  %37016 = vst [vmem:[#allocation45_spill] sm:$0xff] %v33404_v11 }
  0xe2   : > { %27633 = vmatmul.mubr.msk.f32.gmra.mrb[98].mxu1 %vm428_vm0, %v33386_v35  ;;  %29185 = vmatmul.mubr.msk.f32.gmra.mrb[98].mxu0 %vm428_vm0, %v23455_v27  ;;  %v23459_v27 = vld [vmem:[%s32702_s9 + $0x450] sm:$0xff]  ;;  %v23460_v35 = vld [vmem:[%s32702_s9 + $0x460] sm:$0xff] }
  0xe3   : > { %27635 = vmatprep.mubr.msk.f32.mxu1 %vm428_vm0, %v33390_v15  ;;  %29187 = vmatprep.mubr.msk.f32.mxu0 %vm428_vm0, %v23456_v7  ;;  %v33414_v7 = vld [vmem:[%s32702_s9 + $0x401] sm:$0xff]  ;;  %v33418_v15 = vld [vmem:[%s32702_s9 + $0x411] sm:$0xff] }
  0xe4   : > { %37017 = vst [vmem:[#allocation46_spill] sm:$0xff] %v33414_v7  ;;  %37018 = vst [vmem:[#allocation47_spill] sm:$0xff] %v33418_v15 }
  0xe6   : > { %27636 = vmatmul.mubr.msk.f32.gmra.mrb[100].mxu1 %vm428_vm0, %v33400_v51  ;;  %29188 = vmatmul.mubr.msk.f32.gmra.mrb[100].mxu0 %vm428_vm0, %v23457_v19  ;;  %v23461_v19 = vld [vmem:[%s32702_s9 + $0x468] sm:$0xff]  ;;  %v23462_v51 = vld [vmem:[%s32702_s9 + $0x470] sm:$0xff] }
  0xe7   : > { %27638 = vmatprep.mubr.msk.f32.mxu1 %vm428_vm0, %v33404_v11  ;;  %29190 = vmatprep.mubr.msk.f32.mxu0 %vm428_vm0, %v23458_v43  ;;  %v33428_v43 = vld [vmem:[%s32702_s9 + $0x419] sm:$0xff]  ;;  %v33432_v11 = vld [vmem:[%s32702_s9 + $0x421] sm:$0xff] }
  0xe8   : > { %37019 = vst [vmem:[#allocation48_spill] sm:$0xff] %v33428_v43  ;;  %37020 = vst [vmem:[#allocation49_spill] sm:$0xff] %v33432_v11 }
  0xea   : > { %27639 = vmatmul.mubr.msk.f32.gmra.mrb[102].mxu1 %vm428_vm0, %v33414_v7  ;;  %29191 = vmatmul.mubr.msk.f32.gmra.mrb[102].mxu0 %vm428_vm0, %v23459_v27  ;;  %v23463_v27 = vld [vmem:[%s32702_s9 + $0x478] sm:$0xff]  ;;  %v23464_v7 = vld [vmem:[%s32702_s9 + $0x488] sm:$0xff] }
  0xeb   : > { %27641 = vmatprep.mubr.msk.f32.mxu1 %vm428_vm0, %v33418_v15  ;;  %29193 = vmatprep.mubr.msk.f32.mxu0 %vm428_vm0, %v23460_v35  ;;  %v33442_v35 = vld [vmem:[%s32702_s9 + $0x429] sm:$0xff]  ;;  %v33446_v15 = vld [vmem:[%s32702_s9 + $0x439] sm:$0xff] }
  0xec   : > { %37021 = vst [vmem:[#allocation50_spill] sm:$0xff] %v33442_v35  ;;  %37022 = vst [vmem:[#allocation51_spill] sm:$0xff] %v33446_v15 }
  0xee   : > { %27642 = vmatmul.mubr.msk.f32.gmra.mrb[104].mxu1 %vm428_vm0, %v33428_v43  ;;  %29194 = vmatmul.mubr.msk.f32.gmra.mrb[104].mxu0 %vm428_vm0, %v23461_v19  ;;  %v23465_v19 = vld [vmem:[%s32702_s9 + $0x490] sm:$0xff]  ;;  %v23466_v43 = vld [vmem:[%s32702_s9 + $0x498] sm:$0xff] }
  0xef   : > { %27644 = vmatprep.mubr.msk.f32.mxu1 %vm428_vm0, %v33432_v11  ;;  %29196 = vmatprep.mubr.msk.f32.mxu0 %vm428_vm0, %v23462_v51  ;;  %v33456_v51 = vld [vmem:[%s32702_s9 + $0x441] sm:$0xff]  ;;  %v33460_v11 = vld [vmem:[%s32702_s9 + $0x449] sm:$0xff] }
  0xf0   : > { %37023 = vst [vmem:[#allocation52_spill] sm:$0xff] %v33456_v51  ;;  %37024 = vst [vmem:[#allocation53_spill] sm:$0xff] %v33460_v11 }
  0xf2   : > { %27645 = vmatmul.mubr.msk.f32.gmra.mrb[106].mxu1 %vm428_vm0, %v33442_v35  ;;  %29197 = vmatmul.mubr.msk.f32.gmra.mrb[106].mxu0 %vm428_vm0, %v23463_v27  ;;  %v23467_v27 = vld [vmem:[%s32702_s9 + $0x4a0] sm:$0xff]  ;;  %v23468_v35 = vld [vmem:[%s32702_s9 + $0x4b0] sm:$0xff] }
  0xf3   : > { %27647 = vmatprep.mubr.msk.f32.mxu1 %vm428_vm0, %v33446_v15  ;;  %29199 = vmatprep.mubr.msk.f32.mxu0 %vm428_vm0, %v23464_v7  ;;  %v33470_v7 = vld [vmem:[%s32702_s9 + $0x451] sm:$0xff]  ;;  %v33474_v15 = vld [vmem:[%s32702_s9 + $0x461] sm:$0xff] }
  0xf4   : > { %37025 = vst [vmem:[#allocation54_spill] sm:$0xff] %v33470_v7  ;;  %37026 = vst [vmem:[#allocation55_spill] sm:$0xff] %v33474_v15 }
  0xf6   : > { %27648 = vmatmul.mubr.msk.f32.gmra.mrb[108].mxu1 %vm428_vm0, %v33456_v51  ;;  %29200 = vmatmul.mubr.msk.f32.gmra.mrb[108].mxu0 %vm428_vm0, %v23465_v19  ;;  %v23469_v19 = vld [vmem:[%s32702_s9 + $0x4b8] sm:$0xff]  ;;  %v23470_v51 = vld [vmem:[%s32702_s9 + $0x4c0] sm:$0xff] }
  0xf7   : > { %27650 = vmatprep.mubr.msk.f32.mxu1 %vm428_vm0, %v33460_v11  ;;  %29202 = vmatprep.mubr.msk.f32.mxu0 %vm428_vm0, %v23466_v43  ;;  %v33484_v43 = vld [vmem:[%s32702_s9 + $0x469] sm:$0xff]  ;;  %v33488_v11 = vld [vmem:[%s32702_s9 + $0x471] sm:$0xff] }
  0xf8   : > { %37027 = vst [vmem:[#allocation56_spill] sm:$0xff] %v33484_v43  ;;  %37028 = vst [vmem:[#allocation57_spill] sm:$0xff] %v33488_v11 }
  0xfa   : > { %27651 = vmatmul.mubr.msk.f32.gmra.mrb[110].mxu1 %vm428_vm0, %v33470_v7  ;;  %29203 = vmatmul.mubr.msk.f32.gmra.mrb[110].mxu0 %vm428_vm0, %v23467_v27  ;;  %v23471_v27 = vld [vmem:[%s32702_s9 + $0x4c8] sm:$0xff]  ;;  %v23472_v7 = vld [vmem:[%s32702_s9 + $0x4d8] sm:$0xff] }
  0xfb   : > { %27653 = vmatprep.mubr.msk.f32.mxu1 %vm428_vm0, %v33474_v15  ;;  %29205 = vmatprep.mubr.msk.f32.mxu0 %vm428_vm0, %v23468_v35  ;;  %v33498_v35 = vld [vmem:[%s32702_s9 + $0x479] sm:$0xff]  ;;  %v33502_v15 = vld [vmem:[%s32702_s9 + $0x489] sm:$0xff] }
  0xfc   : > { %37029 = vst [vmem:[#allocation58_spill] sm:$0xff] %v33498_v35  ;;  %37030 = vst [vmem:[#allocation59_spill] sm:$0xff] %v33502_v15 }
  0xfe   : > { %27654 = vmatmul.mubr.msk.f32.gmra.mrb[112].mxu1 %vm428_vm0, %v33484_v43  ;;  %29206 = vmatmul.mubr.msk.f32.gmra.mrb[112].mxu0 %vm428_vm0, %v23469_v19  ;;  %v23473_v19 = vld [vmem:[%s32702_s9 + $0x4e0] sm:$0xff]  ;;  %v23474_v43 = vld [vmem:[%s32702_s9 + $0x4e8] sm:$0xff] }
  0xff   : > { %27656 = vmatprep.mubr.msk.f32.mxu1 %vm428_vm0, %v33488_v11  ;;  %29208 = vmatprep.mubr.msk.f32.mxu0 %vm428_vm0, %v23470_v51  ;;  %v33512_v51 = vld [vmem:[%s32702_s9 + $0x491] sm:$0xff]  ;;  %v33516_v11 = vld [vmem:[%s32702_s9 + $0x499] sm:$0xff] }
 0x100   : > { %37031 = vst [vmem:[#allocation60_spill] sm:$0xff] %v33512_v51  ;;  %37032 = vst [vmem:[#allocation61_spill] sm:$0xff] %v33516_v11 }
 0x102   : > { %27657 = vmatmul.mubr.msk.f32.gmra.mrb[114].mxu1 %vm428_vm0, %v33498_v35  ;;  %29209 = vmatmul.mubr.msk.f32.gmra.mrb[114].mxu0 %vm428_vm0, %v23471_v27  ;;  %v23475_v27 = vld [vmem:[%s32702_s9 + $0x4f0] sm:$0xff]  ;;  %v23476_v35 = vld [vmem:[%s32702_s9 + $0x500] sm:$0xff] }
 0x103   : > { %27659 = vmatprep.mubr.msk.f32.mxu1 %vm428_vm0, %v33502_v15  ;;  %29211 = vmatprep.mubr.msk.f32.mxu0 %vm428_vm0, %v23472_v7  ;;  %v33526_v7 = vld [vmem:[%s32702_s9 + $0x4a1] sm:$0xff]  ;;  %v33530_v15 = vld [vmem:[%s32702_s9 + $0x4b1] sm:$0xff] }
 0x104   : > { %37033 = vst [vmem:[#allocation62_spill] sm:$0xff] %v33526_v7  ;;  %37034 = vst [vmem:[#allocation63_spill] sm:$0xff] %v33530_v15 }
 0x106   : > { %27660 = vmatmul.mubr.msk.f32.gmra.mrb[116].mxu1 %vm428_vm0, %v33512_v51  ;;  %29212 = vmatmul.mubr.msk.f32.gmra.mrb[116].mxu0 %vm428_vm0, %v23473_v19  ;;  %v23477_v19 = vld [vmem:[%s32702_s9 + $0x508] sm:$0xff]  ;;  %v23478_v51 = vld [vmem:[%s32702_s9 + $0x510] sm:$0xff] }
 0x107   : > { %27662 = vmatprep.mubr.msk.f32.mxu1 %vm428_vm0, %v33516_v11  ;;  %29214 = vmatprep.mubr.msk.f32.mxu0 %vm428_vm0, %v23474_v43  ;;  %v33540_v43 = vld [vmem:[%s32702_s9 + $0x4b9] sm:$0xff]  ;;  %v33544_v11 = vld [vmem:[%s32702_s9 + $0x4c1] sm:$0xff] }
 0x108   : > { %37035 = vst [vmem:[#allocation64_spill] sm:$0xff] %v33540_v43  ;;  %37036 = vst [vmem:[#allocation65_spill] sm:$0xff] %v33544_v11 }
 0x10a   : > { %27663 = vmatmul.mubr.msk.f32.gmra.mrb[118].mxu1 %vm428_vm0, %v33526_v7  ;;  %29215 = vmatmul.mubr.msk.f32.gmra.mrb[118].mxu0 %vm428_vm0, %v23475_v27  ;;  %v23479_v27 = vld [vmem:[%s32702_s9 + $0x518] sm:$0xff]  ;;  %v23480_v7 = vld [vmem:[%s32702_s9 + $0x528] sm:$0xff] }
 0x10b   : > { %27665 = vmatprep.mubr.msk.f32.mxu1 %vm428_vm0, %v33530_v15  ;;  %29217 = vmatprep.mubr.msk.f32.mxu0 %vm428_vm0, %v23476_v35  ;;  %v33554_v35 = vld [vmem:[%s32702_s9 + $0x4c9] sm:$0xff]  ;;  %v33558_v15 = vld [vmem:[%s32702_s9 + $0x4d9] sm:$0xff] }
 0x10c   : > { %37037 = vst [vmem:[#allocation66_spill] sm:$0xff] %v33558_v15 }
 0x10e   : > { %27666 = vmatmul.mubr.msk.f32.gmra.mrb[120].mxu1 %vm428_vm0, %v33540_v43  ;;  %29218 = vmatmul.mubr.msk.f32.gmra.mrb[120].mxu0 %vm428_vm0, %v23477_v19  ;;  %v23481_v19 = vld [vmem:[%s32702_s9 + $0x530] sm:$0xff]  ;;  %v23482_v43 = vld [vmem:[%s32702_s9 + $0x538] sm:$0xff] }
 0x10f   : > { %27668 = vmatprep.mubr.msk.f32.mxu1 %vm428_vm0, %v33544_v11  ;;  %29220 = vmatprep.mubr.msk.f32.mxu0 %vm428_vm0, %v23478_v51  ;;  %v33568_v51 = vld [vmem:[%s32702_s9 + $0x4e1] sm:$0xff]  ;;  %v33572_v11 = vld [vmem:[%s32702_s9 + $0x4e9] sm:$0xff] }
 0x110   : > { %37038 = vst [vmem:[#allocation67_spill] sm:$0xff] %v33572_v11 }
 0x112   : > { %27669 = vmatmul.mubr.msk.f32.gmra.mrb[122].mxu1 %vm428_vm0, %v33554_v35  ;;  %29221 = vmatmul.mubr.msk.f32.gmra.mrb[122].mxu0 %vm428_vm0, %v23479_v27  ;;  %v23483_v27 = vld [vmem:[%s32702_s9 + $0x540] sm:$0xff] }
 0x113   : > { %27671 = vmatprep.mubr.msk.f32.mxu1 %vm428_vm0, %v33558_v15  ;;  %29223 = vmatprep.mubr.msk.f32.mxu0 %vm428_vm0, %v23480_v7  ;;  %v33582_v7 = vld [vmem:[%s32702_s9 + $0x4f1] sm:$0xff]  ;;  %v169_v15 = vld [vmem:[%s32702_s9] sm:$0xff] }
 0x116   : > { %27672 = vmatmul.mubr.msk.f32.gmra.mrb[124].mxu1 %vm428_vm0, %v33568_v51  ;;  %29224 = vmatmul.mubr.msk.f32.gmra.mrb[124].mxu0 %vm428_vm0, %v23481_v19  ;;  %v170_v19 = vld [vmem:[%s32702_s9 + $0x8] sm:$0xff] }
 0x117   : > { %27674 = vmatprep.mubr.msk.f32.mxu1 %vm428_vm0, %v33572_v11  ;;  %29226 = vmatprep.mubr.msk.f32.mxu0 %vm428_vm0, %v23482_v43  ;;  %v171_v11 = vld [vmem:[%s32702_s9 + $0x10] sm:$0xff]  ;;  %v172_v43 = vld [vmem:[%s32702_s9 + $0x18] sm:$0xff] }
 0x11a   : > { %27675 = vmatmul.mubr.msk.f32.gmra.mrb[126].mxu1 %vm428_vm0, %v33582_v7  ;;  %29227 = vmatmul.mubr.msk.f32.gmra.mrb[126].mxu0 %vm428_vm0, %v23483_v27  ;;  %v37042_v27 = vld [vmem:[#allocation8_spill] sm:$0xff] }
 0x11b   : > { %27679 = vmatprep.mubr.msk.f32.mxu1 %vm428_vm0, %v169_v15  ;;  %29231 = vmatprep.mubr.msk.f32.mxu0 %vm428_vm0, %v32735_v20  ;;  %v173_v20 = vld [vmem:[%s32702_s9 + $0x28] sm:$0xff]  ;;  %v175_v15 = vld [vmem:[%s32702_s9 + $0x38] sm:$0xff] }
 0x11e   : > { %27680 = vmatmul.mubr.msk.f32.vlgmr.msra.gmra.mrb[0].mxu1 %vm428_vm0, %v170_v19  ;;  %29232 = vmatmul.mubr.msk.f32.vlgmr.msra.gmra.mrb[0].mxu0 %vm428_vm0, %v32744_v22  ;;  %v174_v22 = vld [vmem:[%s32702_s9 + $0x30] sm:$0xff] }
 0x11f   : > { %27872 = vmatpush3.msra.mxu1 %v33142_v59  ;;  %29424 = vmatpush3.msra.mxu0 %v33147_v3  ;;  %v225_v59 = vld [vmem:[%s32702_s9 + $0x230] sm:$0xff]  ;;  %v37040_v3 = vld [vmem:[#allocation6_spill] sm:$0xff] }
 0x120   : > { %27682 = vmatprep.mubr.msk.f32.mxu1 %vm428_vm0, %v171_v11  ;;  %29234 = vmatprep.mubr.msk.f32.mxu0 %vm428_vm0, %v32748_v24  ;;  %v176_v24 = vld [vmem:[%s32702_s9 + $0x40] sm:$0xff]  ;;  %v37043_v19 = vld [vmem:[#allocation9_spill] sm:$0xff] }
 0x121   : > { %v227_v11 = vld [vmem:[%s32702_s9 + $0x240] sm:$0xff] }
 0x122   : > { %27683 = vmatmul.mubr.msk.f32.gmra.mrb[2].mxu1 %vm428_vm0, %v172_v43  ;;  %29235 = vmatmul.mubr.msk.f32.gmra.mrb[2].mxu0 %vm428_vm0, %v32758_v26  ;;  %v177_v26 = vld [vmem:[%s32702_s9 + $0x50] sm:$0xff]  ;;  %v228_v43 = vld [vmem:[%s32702_s9 + $0x248] sm:$0xff] }
 0x123   : > { %27685 = vmatprep.mubr.msk.f32.mxu1 %vm428_vm0, %v173_v20  ;;  %29237 = vmatprep.mubr.msk.f32.mxu0 %vm428_vm0, %v32762_v28  ;;  %v178_v28 = vld [vmem:[%s32702_s9 + $0x58] sm:$0xff] }
 0x124   : > { %v229_v20 = vld [vmem:[%s32702_s9 + $0x258] sm:$0xff] }
 0x126   : > { %27686 = vmatmul.mubr.msk.f32.gmra.mrb[4].mxu1 %vm428_vm0, %v174_v22  ;;  %29238 = vmatmul.mubr.msk.f32.gmra.mrb[4].mxu0 %vm428_vm0, %v32772_v30  ;;  %v179_v30 = vld [vmem:[%s32702_s9 + $0x60] sm:$0xff]  ;;  %v37044_v22 = vld [vmem:[#allocation10_spill] sm:$0xff] }
 0x127   : > { %27688 = vmatprep.mubr.msk.f32.mxu1 %vm428_vm0, %v175_v15  ;;  %29240 = vmatprep.mubr.msk.f32.mxu0 %vm428_vm0, %v32776_v32  ;;  %v180_v32 = vld [vmem:[%s32702_s9 + $0x68] sm:$0xff]  ;;  %v37045_v15 = vld [vmem:[#allocation11_spill] sm:$0xff] }
 0x12a   : > { %27689 = vmatmul.mubr.msk.f32.gmra.mrb[6].mxu1 %vm428_vm0, %v176_v24  ;;  %29241 = vmatmul.mubr.msk.f32.gmra.mrb[6].mxu0 %vm428_vm0, %v32786_v34  ;;  %v181_v34 = vld [vmem:[%s32702_s9 + $0x78] sm:$0xff]  ;;  %v230_v24 = vld [vmem:[%s32702_s9 + $0x260] sm:$0xff] }
 0x12b   : > { %27691 = vmatprep.mubr.msk.f32.mxu1 %vm428_vm0, %v177_v26  ;;  %29243 = vmatprep.mubr.msk.f32.mxu0 %vm428_vm0, %v32790_v36  ;;  %v182_v36 = vld [vmem:[%s32702_s9 + $0x80] sm:$0xff]  ;;  %v231_v26 = vld [vmem:[%s32702_s9 + $0x268] sm:$0xff] }
 0x12e   : > { %27692 = vmatmul.mubr.msk.f32.gmra.mrb[8].mxu1 %vm428_vm0, %v178_v28  ;;  %29244 = vmatmul.mubr.msk.f32.gmra.mrb[8].mxu0 %vm428_vm0, %v32800_v38  ;;  %v183_v38 = vld [vmem:[%s32702_s9 + $0x88] sm:$0xff] }
 0x12f   : > { %27694 = vmatprep.mubr.msk.f32.mxu1 %vm428_vm0, %v179_v30  ;;  %29246 = vmatprep.mubr.msk.f32.mxu0 %vm428_vm0, %v32804_v40  ;;  %v184_v40 = vld [vmem:[%s32702_s9 + $0x90] sm:$0xff]  ;;  %v37046_v28 = vld [vmem:[#allocation12_spill] sm:$0xff] }
 0x130   : > { %v37047_v30 = vld [vmem:[#allocation13_spill] sm:$0xff] }
 0x132   : > { %27695 = vmatmul.mubr.msk.f32.gmra.mrb[10].mxu1 %vm428_vm0, %v180_v32  ;;  %29247 = vmatmul.mubr.msk.f32.gmra.mrb[10].mxu0 %vm428_vm0, %v32814_v42  ;;  %v185_v42 = vld [vmem:[%s32702_s9 + $0xa0] sm:$0xff]  ;;  %v232_v32 = vld [vmem:[%s32702_s9 + $0x270] sm:$0xff] }
 0x133   : > { %27697 = vmatprep.mubr.msk.f32.mxu1 %vm428_vm0, %v181_v34  ;;  %29249 = vmatprep.mubr.msk.f32.mxu0 %vm428_vm0, %v32818_v44  ;;  %v186_v44 = vld [vmem:[%s32702_s9 + $0xa8] sm:$0xff]  ;;  %v233_v34 = vld [vmem:[%s32702_s9 + $0x280] sm:$0xff] }
 0x136   : > { %27698 = vmatmul.mubr.msk.f32.gmra.mrb[12].mxu1 %vm428_vm0, %v182_v36  ;;  %29250 = vmatmul.mubr.msk.f32.gmra.mrb[12].mxu0 %vm428_vm0, %v32828_v46  ;;  %v187_v46 = vld [vmem:[%s32702_s9 + $0xb0] sm:$0xff]  ;;  %v37048_v36 = vld [vmem:[#allocation14_spill] sm:$0xff] }
 0x137   : > { %27700 = vmatprep.mubr.msk.f32.mxu1 %vm428_vm0, %v183_v38  ;;  %29252 = vmatprep.mubr.msk.f32.mxu0 %vm428_vm0, %v32832_v48  ;;  %v188_v48 = vld [vmem:[%s32702_s9 + $0xb8] sm:$0xff]  ;;  %v37049_v38 = vld [vmem:[#allocation15_spill] sm:$0xff] }
 0x13a   : > { %27701 = vmatmul.mubr.msk.f32.gmra.mrb[14].mxu1 %vm428_vm0, %v184_v40  ;;  %29253 = vmatmul.mubr.msk.f32.gmra.mrb[14].mxu0 %vm428_vm0, %v32842_v50  ;;  %v189_v50 = vld [vmem:[%s32702_s9 + $0xc8] sm:$0xff] }
 0x13b   : > { %27703 = vmatprep.mubr.msk.f32.mxu1 %vm428_vm0, %v185_v42  ;;  %29255 = vmatprep.mubr.msk.f32.mxu0 %vm428_vm0, %v32846_v52  ;;  %v190_v52 = vld [vmem:[%s32702_s9 + $0xd0] sm:$0xff]  ;;  %v234_v40 = vld [vmem:[%s32702_s9 + $0x288] sm:$0xff]  ;;  %v33854_v42 = vld [vmem:[%s36908_s1 + $0x18] sm:$0xff] }
 0x13c   : > { %28065 = vmatprep.subr.mxu1 %v33854_v42 }
 0x13e   : > { %27704 = vmatmul.mubr.msk.f32.gmra.mrb[16].mxu1 %vm428_vm0, %v186_v44  ;;  %29256 = vmatmul.mubr.msk.f32.gmra.mrb[16].mxu0 %vm428_vm0, %v32856_v54  ;;  %v191_v54 = vld [vmem:[%s32702_s9 + $0xd8] sm:$0xff] }
 0x13f   : > { %27706 = vmatprep.mubr.msk.f32.mxu1 %vm428_vm0, %v187_v46  ;;  %29258 = vmatprep.mubr.msk.f32.mxu0 %vm428_vm0, %v32860_v56  ;;  %v192_v56 = vld [vmem:[%s32702_s9 + $0xe0] sm:$0xff]  ;;  %v33859_v44 = vld [vmem:[%s36908_s1 + $0x58] sm:$0xff]  ;;  %v235_v46 = vld [vmem:[%s32702_s9 + $0x290] sm:$0xff] }
 0x140   : > { %29617 = vmatprep.subr.mxu0 %v33859_v44 }
 0x142   : > { %27707 = vmatmul.mubr.msk.f32.gmra.mrb[18].mxu1 %vm428_vm0, %v188_v48  ;;  %29259 = vmatmul.mubr.msk.f32.gmra.mrb[18].mxu0 %vm428_vm0, %v32870_v58  ;;  %v193_v58 = vld [vmem:[%s32702_s9 + $0xf0] sm:$0xff]  ;;  %v37050_v48 = vld [vmem:[#allocation16_spill] sm:$0xff] }
 0x143   : > { %27709 = vmatprep.mubr.msk.f32.mxu1 %vm428_vm0, %v189_v50  ;;  %29261 = vmatprep.mubr.msk.f32.mxu0 %vm428_vm0, %v32874_v60  ;;  %v194_v60 = vld [vmem:[%s32702_s9 + $0xf8] sm:$0xff]  ;;  %v37051_v50 = vld [vmem:[#allocation17_spill] sm:$0xff] }
 0x146   : > { %27710 = vmatmul.mubr.msk.f32.gmra.mrb[20].mxu1 %vm428_vm0, %v190_v52  ;;  %29262 = vmatmul.mubr.msk.f32.gmra.mrb[20].mxu0 %vm428_vm0, %v32884_v62  ;;  %v195_v62 = vld [vmem:[%s32702_s9 + $0x100] sm:$0xff]  ;;  %v236_v52 = vld [vmem:[%s32702_s9 + $0x298] sm:$0xff] }
 0x147   : > { %27712 = vmatprep.mubr.msk.f32.mxu1 %vm428_vm0, %v191_v54  ;;  %29264 = vmatprep.mubr.msk.f32.mxu0 %vm428_vm0, %v32888_v0  ;;  %v196_v0 = vld [vmem:[%s32702_s9 + $0x108] sm:$0xff] }
 0x148   : > { %v237_v54 = vld [vmem:[%s32702_s9 + $0x2a8] sm:$0xff] }
 0x14a   : > { %27713 = vmatmul.mubr.msk.f32.gmra.mrb[22].mxu1 %vm428_vm0, %v192_v56  ;;  %29265 = vmatmul.mubr.msk.f32.gmra.mrb[22].mxu0 %vm428_vm0, %v32898_v2  ;;  %v197_v2 = vld [vmem:[%s32702_s9 + $0x118] sm:$0xff] }
 0x14b   : > { %27715 = vmatprep.mubr.msk.f32.mxu1 %vm428_vm0, %v193_v58  ;;  %29267 = vmatprep.mubr.msk.f32.mxu0 %vm428_vm0, %v32902_v4  ;;  %v198_v4 = vld [vmem:[%s32702_s9 + $0x120] sm:$0xff]  ;;  %v37052_v56 = vld [vmem:[#allocation18_spill] sm:$0xff] }
 0x14c   : > { %v37053_v58 = vld [vmem:[#allocation19_spill] sm:$0xff] }
 0x14e   : > { %27716 = vmatmul.mubr.msk.f32.gmra.mrb[24].mxu1 %vm428_vm0, %v194_v60  ;;  %29268 = vmatmul.mubr.msk.f32.gmra.mrb[24].mxu0 %vm428_vm0, %v32912_v6  ;;  %v199_v6 = vld [vmem:[%s32702_s9 + $0x128] sm:$0xff]  ;;  %v238_v60 = vld [vmem:[%s32702_s9 + $0x2b0] sm:$0xff] }
 0x14f   : > { %27718 = vmatprep.mubr.msk.f32.mxu1 %vm428_vm0, %v195_v62  ;;  %29270 = vmatprep.mubr.msk.f32.mxu0 %vm428_vm0, %v32916_v8  ;;  %v200_v8 = vld [vmem:[%s32702_s9 + $0x130] sm:$0xff]  ;;  %v239_v62 = vld [vmem:[%s32702_s9 + $0x2b8] sm:$0xff] }
 0x152   : > { %27719 = vmatmul.mubr.msk.f32.gmra.mrb[26].mxu1 %vm428_vm0, %v196_v0  ;;  %29271 = vmatmul.mubr.msk.f32.gmra.mrb[26].mxu0 %vm428_vm0, %v32926_v10  ;;  %v201_v10 = vld [vmem:[%s32702_s9 + $0x140] sm:$0xff]  ;;  %v37054_v0 = vld [vmem:[#allocation20_spill] sm:$0xff] }
 0x153   : > { %27721 = vmatprep.mubr.msk.f32.mxu1 %vm428_vm0, %v197_v2  ;;  %29273 = vmatprep.mubr.msk.f32.mxu0 %vm428_vm0, %v32930_v12  ;;  %v202_v12 = vld [vmem:[%s32702_s9 + $0x148] sm:$0xff]  ;;  %v37055_v2 = vld [vmem:[#allocation21_spill] sm:$0xff] }
 0x156   : > { %27722 = vmatmul.mubr.msk.f32.gmra.mrb[28].mxu1 %vm428_vm0, %v198_v4  ;;  %29274 = vmatmul.mubr.msk.f32.gmra.mrb[28].mxu0 %vm428_vm0, %v32940_v14  ;;  %v203_v14 = vld [vmem:[%s32702_s9 + $0x150] sm:$0xff]  ;;  %v240_v4 = vld [vmem:[%s32702_s9 + $0x2c0] sm:$0xff] }
 0x157   : > { %27724 = vmatprep.mubr.msk.f32.mxu1 %vm428_vm0, %v199_v6  ;;  %29276 = vmatprep.mubr.msk.f32.mxu0 %vm428_vm0, %v32944_v16  ;;  %v204_v16 = vld [vmem:[%s32702_s9 + $0x158] sm:$0xff]  ;;  %v241_v6 = vld [vmem:[%s32702_s9 + $0x2d0] sm:$0xff] }
 0x15a   : > { %27725 = vmatmul.mubr.msk.f32.gmra.mrb[30].mxu1 %vm428_vm0, %v200_v8  ;;  %29277 = vmatmul.mubr.msk.f32.gmra.mrb[30].mxu0 %vm428_vm0, %v32954_v18  ;;  %v205_v18 = vld [vmem:[%s32702_s9 + $0x168] sm:$0xff]  ;;  %v37056_v8 = vld [vmem:[#allocation22_spill] sm:$0xff] }
 0x15b   : > { %27727 = vmatprep.mubr.msk.f32.mxu1 %vm428_vm0, %v201_v10  ;;  %29279 = vmatprep.mubr.msk.f32.mxu0 %vm428_vm0, %v32958_v21  ;;  %v206_v21 = vld [vmem:[%s32702_s9 + $0x170] sm:$0xff]  ;;  %v37057_v10 = vld [vmem:[#allocation23_spill] sm:$0xff] }
 0x15e   : > { %27728 = vmatmul.mubr.msk.f32.gmra.mrb[32].mxu1 %vm428_vm0, %v202_v12  ;;  %29280 = vmatmul.mubr.msk.f32.gmra.mrb[32].mxu0 %vm428_vm0, %v32968_v25  ;;  %v207_v25 = vld [vmem:[%s32702_s9 + $0x178] sm:$0xff] }
 0x15f   : > { %27730 = vmatprep.mubr.msk.f32.mxu1 %vm428_vm0, %v203_v14  ;;  %29282 = vmatprep.mubr.msk.f32.mxu0 %vm428_vm0, %v32972_v29  ;;  %v208_v29 = vld [vmem:[%s32702_s9 + $0x180] sm:$0xff]  ;;  %v242_v12 = vld [vmem:[%s32702_s9 + $0x2d8] sm:$0xff] }
 0x160   : > { %v243_v14 = vld [vmem:[%s32702_s9 + $0x2e0] sm:$0xff] }
 0x162   : > { %27731 = vmatmul.mubr.msk.f32.gmra.mrb[34].mxu1 %vm428_vm0, %v204_v16  ;;  %29283 = vmatmul.mubr.msk.f32.gmra.mrb[34].mxu0 %vm428_vm0, %v32982_v33  ;;  %v209_v33 = vld [vmem:[%s32702_s9 + $0x190] sm:$0xff]  ;;  %v37058_v16 = vld [vmem:[#allocation24_spill] sm:$0xff] }
 0x163   : > { %27733 = vmatprep.mubr.msk.f32.mxu1 %vm428_vm0, %v205_v18  ;;  %29285 = vmatprep.mubr.msk.f32.mxu0 %vm428_vm0, %v32986_v37  ;;  %v210_v37 = vld [vmem:[%s32702_s9 + $0x198] sm:$0xff]  ;;  %v37059_v18 = vld [vmem:[#allocation25_spill] sm:$0xff] }
 0x166   : > { %27734 = vmatmul.mubr.msk.f32.gmra.mrb[36].mxu1 %vm428_vm0, %v206_v21  ;;  %29286 = vmatmul.mubr.msk.f32.gmra.mrb[36].mxu0 %vm428_vm0, %v32996_v41  ;;  %v211_v41 = vld [vmem:[%s32702_s9 + $0x1a0] sm:$0xff]  ;;  %v244_v21 = vld [vmem:[%s32702_s9 + $0x2e8] sm:$0xff] }
 0x167   : > { %27736 = vmatprep.mubr.msk.f32.mxu1 %vm428_vm0, %v207_v25  ;;  %29288 = vmatprep.mubr.msk.f32.mxu0 %vm428_vm0, %v33000_v45  ;;  %v212_v45 = vld [vmem:[%s32702_s9 + $0x1a8] sm:$0xff]  ;;  %v245_v25 = vld [vmem:[%s32702_s9 + $0x2f8] sm:$0xff] }
 0x16a   : > { %27737 = vmatmul.mubr.msk.f32.gmra.mrb[38].mxu1 %vm428_vm0, %v208_v29  ;;  %29289 = vmatmul.mubr.msk.f32.gmra.mrb[38].mxu0 %vm428_vm0, %v33010_v49  ;;  %v213_v49 = vld [vmem:[%s32702_s9 + $0x1b8] sm:$0xff] }
 0x16b   : > { %27739 = vmatprep.mubr.msk.f32.mxu1 %vm428_vm0, %v209_v33  ;;  %29291 = vmatprep.mubr.msk.f32.mxu0 %vm428_vm0, %v33014_v53  ;;  %v214_v53 = vld [vmem:[%s32702_s9 + $0x1c0] sm:$0xff]  ;;  %v37060_v29 = vld [vmem:[#allocation26_spill] sm:$0xff] }
 0x16c   : > { %v37061_v33 = vld [vmem:[#allocation27_spill] sm:$0xff] }
 0x16e   : > { %27740 = vmatmul.mubr.msk.f32.gmra.mrb[40].mxu1 %vm428_vm0, %v210_v37  ;;  %29292 = vmatmul.mubr.msk.f32.gmra.mrb[40].mxu0 %vm428_vm0, %v33024_v57  ;;  %v215_v57 = vld [vmem:[%s32702_s9 + $0x1c8] sm:$0xff]  ;;  %v246_v37 = vld [vmem:[%s32702_s9 + $0x300] sm:$0xff] }
 0x16f   : > { %27742 = vmatprep.mubr.msk.f32.mxu1 %vm428_vm0, %v211_v41  ;;  %29294 = vmatprep.mubr.msk.f32.mxu0 %vm428_vm0, %v33028_v61  ;;  %v216_v61 = vld [vmem:[%s32702_s9 + $0x1d0] sm:$0xff]  ;;  %v247_v41 = vld [vmem:[%s32702_s9 + $0x308] sm:$0xff] }
 0x172   : > { %27743 = vmatmul.mubr.msk.f32.gmra.mrb[42].mxu1 %vm428_vm0, %v212_v45  ;;  %29295 = vmatmul.mubr.msk.f32.gmra.mrb[42].mxu0 %vm428_vm0, %v33038_v1  ;;  %v217_v1 = vld [vmem:[%s32702_s9 + $0x1e0] sm:$0xff]  ;;  %v37062_v45 = vld [vmem:[#allocation28_spill] sm:$0xff] }
 0x173   : > { %27745 = vmatprep.mubr.msk.f32.mxu1 %vm428_vm0, %v213_v49  ;;  %29297 = vmatprep.mubr.msk.f32.mxu0 %vm428_vm0, %v33042_v5  ;;  %v218_v5 = vld [vmem:[%s32702_s9 + $0x1e8] sm:$0xff]  ;;  %v37063_v49 = vld [vmem:[#allocation29_spill] sm:$0xff] }
 0x176   : > { %27746 = vmatmul.mubr.msk.f32.gmra.mrb[44].mxu1 %vm428_vm0, %v214_v53  ;;  %29298 = vmatmul.mubr.msk.f32.gmra.mrb[44].mxu0 %vm428_vm0, %v33052_v9  ;;  %v219_v9 = vld [vmem:[%s32702_s9 + $0x1f0] sm:$0xff] }
 0x177   : > { %27748 = vmatprep.mubr.msk.f32.mxu1 %vm428_vm0, %v215_v57  ;;  %29300 = vmatprep.mubr.msk.f32.mxu0 %vm428_vm0, %v33056_v13  ;;  %v220_v13 = vld [vmem:[%s32702_s9 + $0x1f8] sm:$0xff]  ;;  %v248_v53 = vld [vmem:[%s32702_s9 + $0x310] sm:$0xff]  ;;  %v249_v57 = vld [vmem:[%s32702_s9 + $0x320] sm:$0xff] }
 0x17a   : > { %27749 = vmatmul.mubr.msk.f32.gmra.mrb[46].mxu1 %vm428_vm0, %v216_v61  ;;  %29301 = vmatmul.mubr.msk.f32.gmra.mrb[46].mxu0 %vm428_vm0, %v33066_v17  ;;  %v221_v17 = vld [vmem:[%s32702_s9 + $0x208] sm:$0xff]  ;;  %v37064_v61 = vld [vmem:[#allocation30_spill] sm:$0xff] }
 0x17b   : > { %27751 = vmatprep.mubr.msk.f32.mxu1 %vm428_vm0, %v217_v1  ;;  %29303 = vmatprep.mubr.msk.f32.mxu0 %vm428_vm0, %v33070_v23  ;;  %v222_v23 = vld [vmem:[%s32702_s9 + $0x210] sm:$0xff]  ;;  %v37065_v1 = vld [vmem:[#allocation31_spill] sm:$0xff] }
 0x17e   : > { %27752 = vmatmul.mubr.msk.f32.gmra.mrb[48].mxu1 %vm428_vm0, %v218_v5  ;;  %29304 = vmatmul.mubr.msk.f32.gmra.mrb[48].mxu0 %vm428_vm0, %v33080_v31  ;;  %v223_v31 = vld [vmem:[%s32702_s9 + $0x218] sm:$0xff]  ;;  %v250_v5 = vld [vmem:[%s32702_s9 + $0x328] sm:$0xff] }
 0x17f   : > { %27754 = vmatprep.mubr.msk.f32.mxu1 %vm428_vm0, %v219_v9  ;;  %29306 = vmatprep.mubr.msk.f32.mxu0 %vm428_vm0, %v33084_v39  ;;  %v37039_v39 = vld [vmem:[#allocation5_spill] sm:$0xff] }
 0x180   : > { %v251_v9 = vld [vmem:[%s32702_s9 + $0x330] sm:$0xff] }
 0x182   : > { %27755 = vmatmul.mubr.msk.f32.gmra.mrb[50].mxu1 %vm428_vm0, %v220_v13  ;;  %29307 = vmatmul.mubr.msk.f32.gmra.mrb[50].mxu0 %vm428_vm0, %v33094_v47  ;;  %v224_v47 = vld [vmem:[%s32702_s9 + $0x220] sm:$0xff]  ;;  %v37066_v13 = vld [vmem:[#allocation32_spill] sm:$0xff] }
 0x183   : > { %27757 = vmatprep.mubr.msk.f32.mxu1 %vm428_vm0, %v221_v17  ;;  %29309 = vmatprep.mubr.msk.f32.mxu0 %vm428_vm0, %v33098_v55  ;;  %v37041_v55 = vld [vmem:[#allocation7_spill] sm:$0xff]  ;;  %v37067_v17 = vld [vmem:[#allocation33_spill] sm:$0xff] }
 0x186   : > { %27758 = vmatmul.mubr.msk.f32.gmra.mrb[52].mxu1 %vm428_vm0, %v222_v23  ;;  %29310 = vmatmul.mubr.msk.f32.gmra.mrb[52].mxu0 %vm428_vm0, %v33108_v63  ;;  %v226_v63 = vld [vmem:[%s32702_s9 + $0x238] sm:$0xff] }
 0x187   : > { %27760 = vmatprep.mubr.msk.f32.mxu1 %vm428_vm0, %v223_v31  ;;  %29312 = vmatprep.mubr.msk.f32.mxu0 %vm428_vm0, %v37039_v39  ;;  %v252_v23 = vld [vmem:[%s32702_s9 + $0x338] sm:$0xff]  ;;  %v253_v31 = vld [vmem:[%s32702_s9 + $0x348] sm:$0xff] }
 0x188   : > { %v37068_v39 = vld [vmem:[#allocation34_spill] sm:$0xff] }
 0x18a   : > { %27761 = vmatmul.mubr.msk.f32.gmra.mrb[54].mxu1 %vm428_vm0, %v224_v47  ;;  %29313 = vmatmul.mubr.msk.f32.gmra.mrb[54].mxu0 %vm428_vm0, %v37040_v3  ;;  %v37069_v47 = vld [vmem:[#allocation35_spill] sm:$0xff]  ;;  %v255_v3 = vld [vmem:[%s32702_s9 + $0x358] sm:$0xff] }
 0x18b   : > { %27763 = vmatprep.mubr.msk.f32.mxu1 %vm428_vm0, %v225_v59  ;;  %29315 = vmatprep.mubr.msk.f32.mxu0 %vm428_vm0, %v37041_v55  ;;  %v254_v59 = vld [vmem:[%s32702_s9 + $0x350] sm:$0xff]  ;;  %v37070_v55 = vld [vmem:[#allocation36_spill] sm:$0xff] }
 0x18e   : > { %27764 = vmatmul.mubr.msk.f32.gmra.mrb[56].mxu1 %vm428_vm0, %v226_v63  ;;  %29316 = vmatmul.mubr.msk.f32.gmra.mrb[56].mxu0 %vm428_vm0, %v37042_v27  ;;  %v37071_v63 = vld [vmem:[#allocation37_spill] sm:$0xff] }
 0x18f   : > { %27766 = vmatprep.mubr.msk.f32.mxu1 %vm428_vm0, %v227_v11  ;;  %29318 = vmatprep.mubr.msk.f32.mxu0 %vm428_vm0, %v37043_v19  ;;  %v256_v11 = vld [vmem:[%s32702_s9 + $0x360] sm:$0xff]  ;;  %v257_v27 = vld [vmem:[%s32702_s9 + $0x370] sm:$0xff]  ;;  %v37072_v19 = vld [vmem:[#allocation38_spill] sm:$0xff] }
 0x192   : > { %27767 = vmatmul.mubr.msk.f32.gmra.mrb[58].mxu1 %vm428_vm0, %v228_v43  ;;  %29319 = vmatmul.mubr.msk.f32.gmra.mrb[58].mxu0 %vm428_vm0, %v37044_v22  ;;  %v37073_v43 = vld [vmem:[#allocation39_spill] sm:$0xff] }
 0x193   : > { %27769 = vmatprep.mubr.msk.f32.mxu1 %vm428_vm0, %v229_v20  ;;  %29321 = vmatprep.mubr.msk.f32.mxu0 %vm428_vm0, %v37045_v15  ;;  %v258_v20 = vld [vmem:[%s32702_s9 + $0x378] sm:$0xff]  ;;  %v259_v22 = vld [vmem:[%s32702_s9 + $0x380] sm:$0xff]  ;;  %v37074_v15 = vld [vmem:[#allocation40_spill] sm:$0xff] }
 0x196   : > { %27770 = vmatmul.mubr.msk.f32.gmra.mrb[60].mxu1 %vm428_vm0, %v230_v24  ;;  %29322 = vmatmul.mubr.msk.f32.gmra.mrb[60].mxu0 %vm428_vm0, %v37046_v28  ;;  %v37075_v24 = vld [vmem:[#allocation41_spill] sm:$0xff]  ;;  %v261_v28 = vld [vmem:[%s32702_s9 + $0x398] sm:$0xff] }
 0x197   : > { %27772 = vmatprep.mubr.msk.f32.mxu1 %vm428_vm0, %v231_v26  ;;  %29324 = vmatprep.mubr.msk.f32.mxu0 %vm428_vm0, %v37047_v30  ;;  %v260_v26 = vld [vmem:[%s32702_s9 + $0x388] sm:$0xff]  ;;  %v37076_v30 = vld [vmem:[#allocation42_spill] sm:$0xff] }
 0x19a   : > { %27773 = vmatmul.mubr.msk.f32.gmra.mrb[62].mxu1 %vm428_vm0, %v232_v32  ;;  %29325 = vmatmul.mubr.msk.f32.gmra.mrb[62].mxu0 %vm428_vm0, %v37048_v36  ;;  %v37077_v32 = vld [vmem:[#allocation43_spill] sm:$0xff]  ;;  %v263_v36 = vld [vmem:[%s32702_s9 + $0x3a8] sm:$0xff] }
 0x19b   : > { %27775 = vmatprep.mubr.msk.f32.mxu1 %vm428_vm0, %v233_v34  ;;  %29327 = vmatprep.mubr.msk.f32.mxu0 %vm428_vm0, %v37049_v38  ;;  %v262_v34 = vld [vmem:[%s32702_s9 + $0x3a0] sm:$0xff]  ;;  %v37078_v38 = vld [vmem:[#allocation44_spill] sm:$0xff] }
 0x19e   : > { %27776 = vmatmul.mubr.msk.f32.gmra.mrb[64].mxu1 %vm428_vm0, %v234_v40  ;;  %29328 = vmatmul.mubr.msk.f32.gmra.mrb[64].mxu0 %vm428_vm0, %v37050_v48  ;;  %v37079_v40 = vld [vmem:[#allocation45_spill] sm:$0xff]  ;;  %v265_v48 = vld [vmem:[%s32702_s9 + $0x3c0] sm:$0xff] }
 0x19f   : > { %27778 = vmatprep.mubr.msk.f32.mxu1 %vm428_vm0, %v235_v46  ;;  %29330 = vmatprep.mubr.msk.f32.mxu0 %vm428_vm0, %v37051_v50  ;;  %v264_v46 = vld [vmem:[%s32702_s9 + $0x3b0] sm:$0xff]  ;;  %v37080_v50 = vld [vmem:[#allocation46_spill] sm:$0xff] }
 0x1a2   : > { %27779 = vmatmul.mubr.msk.f32.gmra.mrb[66].mxu1 %vm428_vm0, %v236_v52  ;;  %29331 = vmatmul.mubr.msk.f32.gmra.mrb[66].mxu0 %vm428_vm0, %v37052_v56  ;;  %v37081_v52 = vld [vmem:[#allocation47_spill] sm:$0xff]  ;;  %v267_v56 = vld [vmem:[%s32702_s9 + $0x3d0] sm:$0xff] }
 0x1a3   : > { %27781 = vmatprep.mubr.msk.f32.mxu1 %vm428_vm0, %v237_v54  ;;  %29333 = vmatprep.mubr.msk.f32.mxu0 %vm428_vm0, %v37053_v58  ;;  %v266_v54 = vld [vmem:[%s32702_s9 + $0x3c8] sm:$0xff] }
 0x1a4   : > { %v37082_v58 = vld [vmem:[#allocation48_spill] sm:$0xff] }
 0x1a6   : > { %27782 = vmatmul.mubr.msk.f32.gmra.mrb[68].mxu1 %vm428_vm0, %v238_v60  ;;  %29334 = vmatmul.mubr.msk.f32.gmra.mrb[68].mxu0 %vm428_vm0, %v37054_v0  ;;  %v37083_v60 = vld [vmem:[#allocation49_spill] sm:$0xff]  ;;  %v269_v0 = vld [vmem:[%s32702_s9 + $0x3e8] sm:$0xff] }
 0x1a7   : > { %27784 = vmatprep.mubr.msk.f32.mxu1 %vm428_vm0, %v239_v62  ;;  %29336 = vmatprep.mubr.msk.f32.mxu0 %vm428_vm0, %v37055_v2  ;;  %v268_v62 = vld [vmem:[%s32702_s9 + $0x3d8] sm:$0xff] }
 0x1a8   : > { %v37084_v2 = vld [vmem:[#allocation50_spill] sm:$0xff] }
 0x1aa   : > { %27785 = vmatmul.mubr.msk.f32.gmra.mrb[70].mxu1 %vm428_vm0, %v240_v4  ;;  %29337 = vmatmul.mubr.msk.f32.gmra.mrb[70].mxu0 %vm428_vm0, %v37056_v8  ;;  %v37085_v4 = vld [vmem:[#allocation51_spill] sm:$0xff]  ;;  %v271_v8 = vld [vmem:[%s32702_s9 + $0x3f8] sm:$0xff] }
 0x1ab   : > { %27787 = vmatprep.mubr.msk.f32.mxu1 %vm428_vm0, %v241_v6  ;;  %29339 = vmatprep.mubr.msk.f32.mxu0 %vm428_vm0, %v37057_v10  ;;  %v270_v6 = vld [vmem:[%s32702_s9 + $0x3f0] sm:$0xff]  ;;  %v37086_v10 = vld [vmem:[#allocation52_spill] sm:$0xff] }
 0x1ae   : > { %27788 = vmatmul.mubr.msk.f32.gmra.mrb[72].mxu1 %vm428_vm0, %v242_v12  ;;  %29340 = vmatmul.mubr.msk.f32.gmra.mrb[72].mxu0 %vm428_vm0, %v37058_v16  ;;  %v37087_v12 = vld [vmem:[#allocation53_spill] sm:$0xff] }
 0x1af   : > { %27790 = vmatprep.mubr.msk.f32.mxu1 %vm428_vm0, %v243_v14  ;;  %29342 = vmatprep.mubr.msk.f32.mxu0 %vm428_vm0, %v37059_v18  ;;  %v272_v14 = vld [vmem:[%s32702_s9 + $0x400] sm:$0xff]  ;;  %v273_v16 = vld [vmem:[%s32702_s9 + $0x410] sm:$0xff]  ;;  %v37088_v18 = vld [vmem:[#allocation54_spill] sm:$0xff] }
 0x1b2   : > { %27791 = vmatmul.mubr.msk.f32.gmra.mrb[74].mxu1 %vm428_vm0, %v244_v21  ;;  %29343 = vmatmul.mubr.msk.f32.gmra.mrb[74].mxu0 %vm428_vm0, %v37060_v29  ;;  %v37089_v21 = vld [vmem:[#allocation55_spill] sm:$0xff] }
 0x1b3   : > { %27793 = vmatprep.mubr.msk.f32.mxu1 %vm428_vm0, %v245_v25  ;;  %29345 = vmatprep.mubr.msk.f32.mxu0 %vm428_vm0, %v37061_v33  ;;  %v274_v25 = vld [vmem:[%s32702_s9 + $0x418] sm:$0xff]  ;;  %v275_v29 = vld [vmem:[%s32702_s9 + $0x420] sm:$0xff]  ;;  %v37090_v33 = vld [vmem:[#allocation56_spill] sm:$0xff] }
 0x1b6   : > { %27794 = vmatmul.mubr.msk.f32.gmra.mrb[76].mxu1 %vm428_vm0, %v246_v37  ;;  %29346 = vmatmul.mubr.msk.f32.gmra.mrb[76].mxu0 %vm428_vm0, %v37062_v45  ;;  %v37091_v37 = vld [vmem:[#allocation57_spill] sm:$0xff]  ;;  %v277_v45 = vld [vmem:[%s32702_s9 + $0x438] sm:$0xff] }
 0x1b7   : > { %27796 = vmatprep.mubr.msk.f32.mxu1 %vm428_vm0, %v247_v41  ;;  %29348 = vmatprep.mubr.msk.f32.mxu0 %vm428_vm0, %v37063_v49  ;;  %v276_v41 = vld [vmem:[%s32702_s9 + $0x428] sm:$0xff]  ;;  %v37092_v49 = vld [vmem:[#allocation58_spill] sm:$0xff] }
 0x1ba   : > { %27797 = vmatmul.mubr.msk.f32.gmra.mrb[78].mxu1 %vm428_vm0, %v248_v53  ;;  %29349 = vmatmul.mubr.msk.f32.gmra.mrb[78].mxu0 %vm428_vm0, %v37064_v61  ;;  %v37093_v53 = vld [vmem:[#allocation59_spill] sm:$0xff]  ;;  %v279_v61 = vld [vmem:[%s32702_s9 + $0x448] sm:$0xff] }
 0x1bb   : > { %27799 = vmatprep.mubr.msk.f32.mxu1 %vm428_vm0, %v249_v57  ;;  %29351 = vmatprep.mubr.msk.f32.mxu0 %vm428_vm0, %v37065_v1  ;;  %v278_v57 = vld [vmem:[%s32702_s9 + $0x440] sm:$0xff]  ;;  %v37094_v1 = vld [vmem:[#allocation60_spill] sm:$0xff] }
 0x1be   : > { %27800 = vmatmul.mubr.msk.f32.gmra.mrb[80].mxu1 %vm428_vm0, %v250_v5  ;;  %29352 = vmatmul.mubr.msk.f32.gmra.mrb[80].mxu0 %vm428_vm0, %v37066_v13  ;;  %v37095_v5 = vld [vmem:[#allocation61_spill] sm:$0xff]  ;;  %v281_v13 = vld [vmem:[%s32702_s9 + $0x460] sm:$0xff] }
 0x1bf   : > { %27802 = vmatprep.mubr.msk.f32.mxu1 %vm428_vm0, %v251_v9  ;;  %29354 = vmatprep.mubr.msk.f32.mxu0 %vm428_vm0, %v37067_v17  ;;  %v280_v9 = vld [vmem:[%s32702_s9 + $0x450] sm:$0xff]  ;;  %v37096_v17 = vld [vmem:[#allocation62_spill] sm:$0xff] }
 0x1c2   : > { %27803 = vmatmul.mubr.msk.f32.gmra.mrb[82].mxu1 %vm428_vm0, %v252_v23  ;;  %29355 = vmatmul.mubr.msk.f32.gmra.mrb[82].mxu0 %vm428_vm0, %v37068_v39  ;;  %v37097_v23 = vld [vmem:[#allocation63_spill] sm:$0xff]  ;;  %v283_v39 = vld [vmem:[%s32702_s9 + $0x470] sm:$0xff] }
 0x1c3   : > { %27805 = vmatprep.mubr.msk.f32.mxu1 %vm428_vm0, %v253_v31  ;;  %29357 = vmatprep.mubr.msk.f32.mxu0 %vm428_vm0, %v37069_v47  ;;  %v282_v31 = vld [vmem:[%s32702_s9 + $0x468] sm:$0xff] }
 0x1c4   : > { %v37098_v47 = vld [vmem:[#allocation64_spill] sm:$0xff] }
 0x1c6   : > { %27806 = vmatmul.mubr.msk.f32.gmra.mrb[84].mxu1 %vm428_vm0, %v254_v59  ;;  %29358 = vmatmul.mubr.msk.f32.gmra.mrb[84].mxu0 %vm428_vm0, %v37070_v55  ;;  %v37099_v59 = vld [vmem:[#allocation65_spill] sm:$0xff]  ;;  %v285_v55 = vld [vmem:[%s32702_s9 + $0x488] sm:$0xff] }
 0x1c7   : > { %27808 = vmatprep.mubr.msk.f32.mxu1 %vm428_vm0, %v255_v3  ;;  %29360 = vmatprep.mubr.msk.f32.mxu0 %vm428_vm0, %v37071_v63  ;;  %v284_v3 = vld [vmem:[%s32702_s9 + $0x478] sm:$0xff] }
 0x1c8   : > { %v37100_v63 = vld [vmem:[#allocation66_spill] sm:$0xff] }
 0x1ca   : > { %27809 = vmatmul.mubr.msk.f32.gmra.mrb[86].mxu1 %vm428_vm0, %v256_v11  ;;  %29361 = vmatmul.mubr.msk.f32.gmra.mrb[86].mxu0 %vm428_vm0, %v37072_v19  ;;  %v286_v11 = vld [vmem:[%s32702_s9 + $0x490] sm:$0xff]  ;;  %v37101_v19 = vld [vmem:[#allocation67_spill] sm:$0xff] }
 0x1cb   : > { %27811 = vmatprep.mubr.msk.f32.mxu1 %vm428_vm0, %v257_v27  ;;  %29363 = vmatprep.mubr.msk.f32.mxu0 %vm428_vm0, %v37073_v43  ;;  %v287_v27 = vld [vmem:[%s32702_s9 + $0x498] sm:$0xff]  ;;  %v289_v43 = vld [vmem:[%s32702_s9 + $0x4b0] sm:$0xff] }
 0x1ce   : > { %27812 = vmatmul.mubr.msk.f32.gmra.mrb[88].mxu1 %vm428_vm0, %v258_v20  ;;  %29364 = vmatmul.mubr.msk.f32.gmra.mrb[88].mxu0 %vm428_vm0, %v37074_v15  ;;  %v23733_v20 = vld [vmem:[%s32702_s9 + $0x501] sm:$0xff] }
 0x1cf   : > { %27814 = vmatprep.mubr.msk.f32.mxu1 %vm428_vm0, %v259_v22  ;;  %29366 = vmatprep.mubr.msk.f32.mxu0 %vm428_vm0, %v37075_v24  ;;  %v23734_v22 = vld [vmem:[%s32702_s9 + $0x509] sm:$0xff]  ;;  %v291_v15 = vld [vmem:[%s32702_s9 + $0x4c0] sm:$0xff]  ;;  %v23735_v24 = vld [vmem:[%s32702_s9 + $0x511] sm:$0xff] }
 0x1d2   : > { %27815 = vmatmul.mubr.msk.f32.gmra.mrb[90].mxu1 %vm428_vm0, %v260_v26  ;;  %29367 = vmatmul.mubr.msk.f32.gmra.mrb[90].mxu0 %vm428_vm0, %v37076_v30  ;;  %v23736_v26 = vld [vmem:[%s32702_s9 + $0x519] sm:$0xff]  ;;  %v23737_v30 = vld [vmem:[%s32702_s9 + $0x529] sm:$0xff] }
 0x1d3   : > { %27817 = vmatprep.mubr.msk.f32.mxu1 %vm428_vm0, %v261_v28  ;;  %29369 = vmatprep.mubr.msk.f32.mxu0 %vm428_vm0, %v37077_v32  ;;  %v293_v28 = vld [vmem:[%s32702_s9 + $0x4d8] sm:$0xff]  ;;  %v294_v32 = vld [vmem:[%s32702_s9 + $0x4e0] sm:$0xff] }
 0x1d6   : > { %27818 = vmatmul.mubr.msk.f32.gmra.mrb[92].mxu1 %vm428_vm0, %v262_v34  ;;  %29370 = vmatmul.mubr.msk.f32.gmra.mrb[92].mxu0 %vm428_vm0, %v37078_v38  ;;  %v23738_v34 = vld [vmem:[%s32702_s9 + $0x531] sm:$0xff]  ;;  %v23739_v38 = vld [vmem:[%s32702_s9 + $0x539] sm:$0xff] }
 0x1d7   : > { %27820 = vmatprep.mubr.msk.f32.mxu1 %vm428_vm0, %v263_v36  ;;  %29372 = vmatprep.mubr.msk.f32.mxu0 %vm428_vm0, %v37079_v40  ;;  %v295_v36 = vld [vmem:[%s32702_s9 + $0x4e8] sm:$0xff]  ;;  %v296_v40 = vld [vmem:[%s32702_s9 + $0x4f0] sm:$0xff] }
 0x1da   : > { %27821 = vmatmul.mubr.msk.f32.gmra.mrb[94].mxu1 %vm428_vm0, %v264_v46  ;;  %29373 = vmatmul.mubr.msk.f32.gmra.mrb[94].mxu0 %vm428_vm0, %v37080_v50  ;;  %v23740_v46 = vld [vmem:[%s32702_s9 + $0x541] sm:$0xff]  ;;  %v23870_v50 = vld [vmem:[%s32702_s9 + $0x52] sm:$0xff] }
 0x1db   : > { %27823 = vmatprep.mubr.msk.f32.mxu1 %vm428_vm0, %v265_v48  ;;  %29375 = vmatprep.mubr.msk.f32.mxu0 %vm428_vm0, %v37081_v52  ;;  %v2607_v48 = vld [vmem:[%s32702_s9 + $0x2] sm:$0xff]  ;;  %v2608_v52 = vld [vmem:[%s32702_s9 + $0xa] sm:$0xff] }
 0x1de   : > { %27824 = vmatmul.mubr.msk.f32.gmra.mrb[96].mxu1 %vm428_vm0, %v266_v54  ;;  %29376 = vmatmul.mubr.msk.f32.gmra.mrb[96].mxu0 %vm428_vm0, %v37082_v58  ;;  %v23871_v54 = vld [vmem:[%s32702_s9 + $0x5a] sm:$0xff]  ;;  %v23872_v58 = vld [vmem:[%s32702_s9 + $0x62] sm:$0xff] }
 0x1df   : > { %27826 = vmatprep.mubr.msk.f32.mxu1 %vm428_vm0, %v267_v56  ;;  %29378 = vmatprep.mubr.msk.f32.mxu0 %vm428_vm0, %v37083_v60  ;;  %v2609_v56 = vld [vmem:[%s32702_s9 + $0x12] sm:$0xff]  ;;  %v2610_v60 = vld [vmem:[%s32702_s9 + $0x1a] sm:$0xff] }
 0x1e2   : > { %27827 = vmatmul.mubr.msk.f32.gmra.mrb[98].mxu1 %vm428_vm0, %v268_v62  ;;  %29379 = vmatmul.mubr.msk.f32.gmra.mrb[98].mxu0 %vm428_vm0, %v37084_v2  ;;  %v23873_v62 = vld [vmem:[%s32702_s9 + $0x6a] sm:$0xff]  ;;  %v23874_v2 = vld [vmem:[%s32702_s9 + $0x7a] sm:$0xff] }
 0x1e3   : > { %27829 = vmatprep.mubr.msk.f32.mxu1 %vm428_vm0, %v269_v0  ;;  %29381 = vmatprep.mubr.msk.f32.mxu0 %vm428_vm0, %v37085_v4  ;;  %v2611_v0 = vld [vmem:[%s32702_s9 + $0x2a] sm:$0xff]  ;;  %v2613_v4 = vld [vmem:[%s32702_s9 + $0x3a] sm:$0xff] }
 0x1e6   : > { %27830 = vmatmul.mubr.msk.f32.gmra.mrb[100].mxu1 %vm428_vm0, %v270_v6  ;;  %29382 = vmatmul.mubr.msk.f32.gmra.mrb[100].mxu0 %vm428_vm0, %v37086_v10  ;;  %v23876_v6 = vld [vmem:[%s32702_s9 + $0x8a] sm:$0xff]  ;;  %v23877_v10 = vld [vmem:[%s32702_s9 + $0x92] sm:$0xff] }
 0x1e7   : > { %27832 = vmatprep.mubr.msk.f32.mxu1 %vm428_vm0, %v271_v8  ;;  %29384 = vmatprep.mubr.msk.f32.mxu0 %vm428_vm0, %v37087_v12  ;;  %v2614_v8 = vld [vmem:[%s32702_s9 + $0x42] sm:$0xff] }
 0x1e8   : > { %v23878_v12 = vld [vmem:[%s32702_s9 + $0xa2] sm:$0xff] }
 0x1ea   : > { %27833 = vmatmul.mubr.msk.f32.gmra.mrb[102].mxu1 %vm428_vm0, %v272_v14  ;;  %29385 = vmatmul.mubr.msk.f32.gmra.mrb[102].mxu0 %vm428_vm0, %v37088_v18  ;;  %v23879_v14 = vld [vmem:[%s32702_s9 + $0xaa] sm:$0xff]  ;;  %v23881_v18 = vld [vmem:[%s32702_s9 + $0xba] sm:$0xff] }
 0x1eb   : > { %27835 = vmatprep.mubr.msk.f32.mxu1 %vm428_vm0, %v273_v16  ;;  %29387 = vmatprep.mubr.msk.f32.mxu0 %vm428_vm0, %v37089_v21  ;;  %v23880_v16 = vld [vmem:[%s32702_s9 + $0xb2] sm:$0xff]  ;;  %v23882_v21 = vld [vmem:[%s32702_s9 + $0xca] sm:$0xff] }
 0x1ee   : > { %27836 = vmatmul.mubr.msk.f32.gmra.mrb[104].mxu1 %vm428_vm0, %v274_v25  ;;  %29388 = vmatmul.mubr.msk.f32.gmra.mrb[104].mxu0 %vm428_vm0, %v37090_v33  ;;  %v23883_v25 = vld [vmem:[%s32702_s9 + $0xd2] sm:$0xff]  ;;  %v23885_v33 = vld [vmem:[%s32702_s9 + $0xe2] sm:$0xff] }
 0x1ef   : > { %27838 = vmatprep.mubr.msk.f32.mxu1 %vm428_vm0, %v275_v29  ;;  %29390 = vmatprep.mubr.msk.f32.mxu0 %vm428_vm0, %v37091_v37  ;;  %v23884_v29 = vld [vmem:[%s32702_s9 + $0xda] sm:$0xff]  ;;  %v23886_v37 = vld [vmem:[%s32702_s9 + $0xf2] sm:$0xff] }
 0x1f2   : > { %27839 = vmatmul.mubr.msk.f32.gmra.mrb[106].mxu1 %vm428_vm0, %v276_v41  ;;  %29391 = vmatmul.mubr.msk.f32.gmra.mrb[106].mxu0 %vm428_vm0, %v37092_v49  ;;  %v23887_v41 = vld [vmem:[%s32702_s9 + $0xfa] sm:$0xff]  ;;  %v23889_v49 = vld [vmem:[%s32702_s9 + $0x10a] sm:$0xff] }
 0x1f3   : > { %27841 = vmatprep.mubr.msk.f32.mxu1 %vm428_vm0, %v277_v45  ;;  %29393 = vmatprep.mubr.msk.f32.mxu0 %vm428_vm0, %v37093_v53  ;;  %v23888_v45 = vld [vmem:[%s32702_s9 + $0x102] sm:$0xff]  ;;  %v23890_v53 = vld [vmem:[%s32702_s9 + $0x11a] sm:$0xff] }
 0x1f6   : > { %27842 = vmatmul.mubr.msk.f32.gmra.mrb[108].mxu1 %vm428_vm0, %v278_v57  ;;  %29394 = vmatmul.mubr.msk.f32.gmra.mrb[108].mxu0 %vm428_vm0, %v37094_v1  ;;  %v23891_v57 = vld [vmem:[%s32702_s9 + $0x122] sm:$0xff]  ;;  %v23893_v1 = vld [vmem:[%s32702_s9 + $0x132] sm:$0xff] }
 0x1f7   : > { %27844 = vmatprep.mubr.msk.f32.mxu1 %vm428_vm0, %v279_v61  ;;  %29396 = vmatprep.mubr.msk.f32.mxu0 %vm428_vm0, %v37095_v5  ;;  %v23892_v61 = vld [vmem:[%s32702_s9 + $0x12a] sm:$0xff]  ;;  %v23894_v5 = vld [vmem:[%s32702_s9 + $0x142] sm:$0xff] }
 0x1fa   : > { %27845 = vmatmul.mubr.msk.f32.gmra.mrb[110].mxu1 %vm428_vm0, %v280_v9  ;;  %29397 = vmatmul.mubr.msk.f32.gmra.mrb[110].mxu0 %vm428_vm0, %v37096_v17  ;;  %v23895_v9 = vld [vmem:[%s32702_s9 + $0x14a] sm:$0xff]  ;;  %v23897_v17 = vld [vmem:[%s32702_s9 + $0x15a] sm:$0xff] }
 0x1fb   : > { %27847 = vmatprep.mubr.msk.f32.mxu1 %vm428_vm0, %v281_v13  ;;  %29399 = vmatprep.mubr.msk.f32.mxu0 %vm428_vm0, %v37097_v23  ;;  %v23896_v13 = vld [vmem:[%s32702_s9 + $0x152] sm:$0xff]  ;;  %v23898_v23 = vld [vmem:[%s32702_s9 + $0x16a] sm:$0xff] }
 0x1fe   : > { %27848 = vmatmul.mubr.msk.f32.gmra.mrb[112].mxu1 %vm428_vm0, %v282_v31  ;;  %29400 = vmatmul.mubr.msk.f32.gmra.mrb[112].mxu0 %vm428_vm0, %v37098_v47  ;;  %v23899_v31 = vld [vmem:[%s32702_s9 + $0x172] sm:$0xff]  ;;  %v23901_v47 = vld [vmem:[%s32702_s9 + $0x182] sm:$0xff] }
 0x1ff   : > { %27850 = vmatprep.mubr.msk.f32.mxu1 %vm428_vm0, %v283_v39  ;;  %29402 = vmatprep.mubr.msk.f32.mxu0 %vm428_vm0, %v37099_v59  ;;  %v23900_v39 = vld [vmem:[%s32702_s9 + $0x17a] sm:$0xff]  ;;  %v23902_v59 = vld [vmem:[%s32702_s9 + $0x192] sm:$0xff] }
 0x202   : > { %27851 = vmatmul.mubr.msk.f32.gmra.mrb[114].mxu1 %vm428_vm0, %v284_v3  ;;  %29403 = vmatmul.mubr.msk.f32.gmra.mrb[114].mxu0 %vm428_vm0, %v33554_v35  ;;  %v288_v35 = vld [vmem:[%s32702_s9 + $0x4a0] sm:$0xff] }
 0x203   : > { %27853 = vmatprep.mubr.msk.f32.mxu1 %vm428_vm0, %v285_v55  ;;  %29405 = vmatprep.mubr.msk.f32.mxu0 %vm428_vm0, %v37100_v63  ;;  %v23903_v3 = vld [vmem:[%s32702_s9 + $0x19a] sm:$0xff]  ;;  %v23904_v55 = vld [vmem:[%s32702_s9 + $0x1a2] sm:$0xff]  ;;  %v23905_v63 = vld [vmem:[%s32702_s9 + $0x1aa] sm:$0xff] }
 0x206   : > { %27854 = vmatmul.mubr.msk.f32.gmra.mrb[116].mxu1 %vm428_vm0, %v286_v11  ;;  %29406 = vmatmul.mubr.msk.f32.gmra.mrb[116].mxu0 %vm428_vm0, %v33568_v51  ;;  %v290_v51 = vld [vmem:[%s32702_s9 + $0x4b8] sm:$0xff] }
 0x207   : > { %27856 = vmatprep.mubr.msk.f32.mxu1 %vm428_vm0, %v287_v27  ;;  %29408 = vmatprep.mubr.msk.f32.mxu0 %vm428_vm0, %v37101_v19  ;;  %v23906_v11 = vld [vmem:[%s32702_s9 + $0x1ba] sm:$0xff]  ;;  %v23907_v27 = vld [vmem:[%s32702_s9 + $0x1c2] sm:$0xff]  ;;  %v23908_v19 = vld [vmem:[%s32702_s9 + $0x1ca] sm:$0xff] }
 0x20a   : > { %27857 = vmatmul.mubr.msk.f32.gmra.mrb[118].mxu1 %vm428_vm0, %v288_v35  ;;  %29409 = vmatmul.mubr.msk.f32.gmra.mrb[118].mxu0 %vm428_vm0, %v33582_v7  ;;  %v292_v7 = vld [vmem:[%s32702_s9 + $0x4c8] sm:$0xff]  ;;  %v23909_v35 = vld [vmem:[%s32702_s9 + $0x1d2] sm:$0xff] }
 0x20b   : > { %27859 = vmatprep.mubr.msk.f32.mxu1 %vm428_vm0, %v289_v43  ;;  %29411 = vmatprep.mubr.msk.f32.mxu0 %vm428_vm0, %v23733_v20  ;;  %v23910_v43 = vld [vmem:[%s32702_s9 + $0x1e2] sm:$0xff]  ;;  %v23911_v20 = vld [vmem:[%s32702_s9 + $0x1ea] sm:$0xff] }
 0x20e   : > { %27860 = vmatmul.mubr.msk.f32.gmra.mrb[120].mxu1 %vm428_vm0, %v290_v51  ;;  %29412 = vmatmul.mubr.msk.f32.gmra.mrb[120].mxu0 %vm428_vm0, %v23734_v22  ;;  %v23912_v51 = vld [vmem:[%s32702_s9 + $0x1f2] sm:$0xff]  ;;  %v23913_v22 = vld [vmem:[%s32702_s9 + $0x1fa] sm:$0xff] }
 0x20f   : > { %27862 = vmatprep.mubr.msk.f32.mxu1 %vm428_vm0, %v291_v15  ;;  %29414 = vmatprep.mubr.msk.f32.mxu0 %vm428_vm0, %v23735_v24  ;;  %v23914_v15 = vld [vmem:[%s32702_s9 + $0x20a] sm:$0xff]  ;;  %v23915_v24 = vld [vmem:[%s32702_s9 + $0x212] sm:$0xff] }
 0x212   : > { %27863 = vmatmul.mubr.msk.f32.gmra.mrb[122].mxu1 %vm428_vm0, %v292_v7  ;;  %29415 = vmatmul.mubr.msk.f32.gmra.mrb[122].mxu0 %vm428_vm0, %v23736_v26  ;;  %v23916_v7 = vld [vmem:[%s32702_s9 + $0x21a] sm:$0xff]  ;;  %v23917_v26 = vld [vmem:[%s32702_s9 + $0x222] sm:$0xff] }
 0x213   : > { %27865 = vmatprep.mubr.msk.f32.mxu1 %vm428_vm0, %v293_v28  ;;  %29417 = vmatprep.mubr.msk.f32.mxu0 %vm428_vm0, %v23737_v30  ;;  %v23918_v28 = vld [vmem:[%s32702_s9 + $0x232] sm:$0xff]  ;;  %v23919_v30 = vld [vmem:[%s32702_s9 + $0x23a] sm:$0xff] }
 0x216   : > { %27866 = vmatmul.mubr.msk.f32.gmra.mrb[124].mxu1 %vm428_vm0, %v294_v32  ;;  %29418 = vmatmul.mubr.msk.f32.gmra.mrb[124].mxu0 %vm428_vm0, %v23738_v34  ;;  %v23920_v32 = vld [vmem:[%s32702_s9 + $0x242] sm:$0xff]  ;;  %v23921_v34 = vld [vmem:[%s32702_s9 + $0x24a] sm:$0xff] }
 0x217   : > { %27868 = vmatprep.mubr.msk.f32.mxu1 %vm428_vm0, %v295_v36  ;;  %29420 = vmatprep.mubr.msk.f32.mxu0 %vm428_vm0, %v23739_v38  ;;  %v23922_v36 = vld [vmem:[%s32702_s9 + $0x25a] sm:$0xff]  ;;  %v23923_v38 = vld [vmem:[%s32702_s9 + $0x262] sm:$0xff] }
 0x21a   : > { %27869 = vmatmul.mubr.msk.f32.gmra.mrb[126].mxu1 %vm428_vm0, %v296_v40  ;;  %29421 = vmatmul.mubr.msk.f32.gmra.mrb[126].mxu0 %vm428_vm0, %v23740_v46  ;;  %v23924_v40 = vld [vmem:[%s32702_s9 + $0x26a] sm:$0xff]  ;;  %v23925_v46 = vld [vmem:[%s32702_s9 + $0x272] sm:$0xff] }
 0x21b   : > { %27873 = vmatprep.mubr.msk.f32.mxu1 %vm428_vm0, %v2607_v48  ;;  %29425 = vmatprep.mubr.msk.f32.mxu0 %vm428_vm0, %v23870_v50  ;;  %v23926_v48 = vld [vmem:[%s32702_s9 + $0x282] sm:$0xff] }
 0x21e   : > { %27874 = vmatmul.mubr.msk.f32.vlgmr.msra.gmra.mrb[0].mxu1 %vm428_vm0, %v2608_v52  ;;  %29426 = vmatmul.mubr.msk.f32.vlgmr.msra.gmra.mrb[0].mxu0 %vm428_vm0, %v23871_v54  ;;  %v23928_v52 = vld [vmem:[%s32702_s9 + $0x292] sm:$0xff] }
 0x21f   : > { %28066 = vmatpush3.msra.mxu1 %v33854_v42  ;;  %29618 = vmatpush3.msra.mxu0 %v33859_v44  ;;  %v2612_v42 = vld [vmem:[%s32702_s9 + $0x32] sm:$0xff]  ;;  %v23875_v44 = vld [vmem:[%s32702_s9 + $0x82] sm:$0xff] }
 0x220   : > { %27876 = vmatprep.mubr.msk.f32.mxu1 %vm428_vm0, %v2609_v56  ;;  %29428 = vmatprep.mubr.msk.f32.mxu0 %vm428_vm0, %v23872_v58  ;;  %v23930_v56 = vld [vmem:[%s32702_s9 + $0x2aa] sm:$0xff] }
 0x222   : > { %27877 = vmatmul.mubr.msk.f32.gmra.mrb[2].mxu1 %vm428_vm0, %v2610_v60  ;;  %29429 = vmatmul.mubr.msk.f32.gmra.mrb[2].mxu0 %vm428_vm0, %v23873_v62  ;;  %v23932_v60 = vld [vmem:[%s32702_s9 + $0x2ba] sm:$0xff] }
 0x223   : > { %27879 = vmatprep.mubr.msk.f32.mxu1 %vm428_vm0, %v2611_v0  ;;  %29431 = vmatprep.mubr.msk.f32.mxu0 %vm428_vm0, %v23874_v2  ;;  %v23934_v0 = vld [vmem:[%s32702_s9 + $0x2d2] sm:$0xff] }
 0x226   : > { %27880 = vmatmul.mubr.msk.f32.gmra.mrb[4].mxu1 %vm428_vm0, %v2612_v42  ;;  %29432 = vmatmul.mubr.msk.f32.gmra.mrb[4].mxu0 %vm428_vm0, %v23875_v44  ;;  %v34323_v42 = vld [vmem:[%s36908_s1 + $0x20] sm:$0xff] }
 0x227   : > { %27882 = vmatprep.mubr.msk.f32.mxu1 %vm428_vm0, %v2613_v4  ;;  %29434 = vmatprep.mubr.msk.f32.mxu0 %vm428_vm0, %v23876_v6  ;;  %v23936_v4 = vld [vmem:[%s32702_s9 + $0x2e2] sm:$0xff] }
 0x228   : > { %28259 = vmatprep.subr.mxu1 %v34323_v42 }
 0x22a   : > { %27883 = vmatmul.mubr.msk.f32.gmra.mrb[6].mxu1 %vm428_vm0, %v2614_v8  ;;  %29435 = vmatmul.mubr.msk.f32.gmra.mrb[6].mxu0 %vm428_vm0, %v23877_v10  ;;  %v23938_v8 = vld [vmem:[%s32702_s9 + $0x2fa] sm:$0xff] }
 0x22b   : > { %27885 = vmatprep.mubr.msk.f32.mxu1 %vm428_vm0, %v23870_v50  ;;  %29437 = vmatprep.mubr.msk.f32.mxu0 %vm428_vm0, %v23878_v12  ;;  %v23927_v50 = vld [vmem:[%s32702_s9 + $0x28a] sm:$0xff] }
 0x22e   : > { %27886 = vmatmul.mubr.msk.f32.gmra.mrb[8].mxu1 %vm428_vm0, %v23871_v54  ;;  %29438 = vmatmul.mubr.msk.f32.gmra.mrb[8].mxu0 %vm428_vm0, %v23879_v14  ;;  %v23929_v54 = vld [vmem:[%s32702_s9 + $0x29a] sm:$0xff] }
 0x22f   : > { %27888 = vmatprep.mubr.msk.f32.mxu1 %vm428_vm0, %v23872_v58  ;;  %29440 = vmatprep.mubr.msk.f32.mxu0 %vm428_vm0, %v23880_v16  ;;  %v23931_v58 = vld [vmem:[%s32702_s9 + $0x2b2] sm:$0xff] }
 0x232   : > { %27889 = vmatmul.mubr.msk.f32.gmra.mrb[10].mxu1 %vm428_vm0, %v23873_v62  ;;  %29441 = vmatmul.mubr.msk.f32.gmra.mrb[10].mxu0 %vm428_vm0, %v23881_v18  ;;  %v23933_v62 = vld [vmem:[%s32702_s9 + $0x2c2] sm:$0xff] }
 0x233   : > { %27891 = vmatprep.mubr.msk.f32.mxu1 %vm428_vm0, %v23874_v2  ;;  %29443 = vmatprep.mubr.msk.f32.mxu0 %vm428_vm0, %v23882_v21  ;;  %v23935_v2 = vld [vmem:[%s32702_s9 + $0x2da] sm:$0xff] }
 0x236   : > { %27892 = vmatmul.mubr.msk.f32.gmra.mrb[12].mxu1 %vm428_vm0, %v23875_v44  ;;  %29444 = vmatmul.mubr.msk.f32.gmra.mrb[12].mxu0 %vm428_vm0, %v23883_v25  ;;  %v34328_v44 = vld [vmem:[%s36908_s1 + $0x60] sm:$0xff] }
 0x237   : > { %27894 = vmatprep.mubr.msk.f32.mxu1 %vm428_vm0, %v23876_v6  ;;  %29446 = vmatprep.mubr.msk.f32.mxu0 %vm428_vm0, %v23884_v29  ;;  %v23937_v6 = vld [vmem:[%s32702_s9 + $0x2ea] sm:$0xff] }
 0x238   : > { %29811 = vmatprep.subr.mxu0 %v34328_v44 }
 0x23a   : > { %27895 = vmatmul.mubr.msk.f32.gmra.mrb[14].mxu1 %vm428_vm0, %v23877_v10  ;;  %29447 = vmatmul.mubr.msk.f32.gmra.mrb[14].mxu0 %vm428_vm0, %v23885_v33  ;;  %v23939_v10 = vld [vmem:[%s32702_s9 + $0x302] sm:$0xff] }
 0x23b   : > { %27897 = vmatprep.mubr.msk.f32.mxu1 %vm428_vm0, %v23878_v12  ;;  %29449 = vmatprep.mubr.msk.f32.mxu0 %vm428_vm0, %v23886_v37  ;;  %v23940_v12 = vld [vmem:[%s32702_s9 + $0x30a] sm:$0xff] }
 0x23e   : > { %27898 = vmatmul.mubr.msk.f32.gmra.mrb[16].mxu1 %vm428_vm0, %v23879_v14  ;;  %29450 = vmatmul.mubr.msk.f32.gmra.mrb[16].mxu0 %vm428_vm0, %v23887_v41  ;;  %v23941_v14 = vld [vmem:[%s32702_s9 + $0x312] sm:$0xff] }
 0x23f   : > { %27900 = vmatprep.mubr.msk.f32.mxu1 %vm428_vm0, %v23880_v16  ;;  %29452 = vmatprep.mubr.msk.f32.mxu0 %vm428_vm0, %v23888_v45  ;;  %v23942_v16 = vld [vmem:[%s32702_s9 + $0x322] sm:$0xff] }
 0x242   : > { %27901 = vmatmul.mubr.msk.f32.gmra.mrb[18].mxu1 %vm428_vm0, %v23881_v18  ;;  %29453 = vmatmul.mubr.msk.f32.gmra.mrb[18].mxu0 %vm428_vm0, %v23889_v49  ;;  %v23943_v18 = vld [vmem:[%s32702_s9 + $0x32a] sm:$0xff] }
 0x243   : > { %27903 = vmatprep.mubr.msk.f32.mxu1 %vm428_vm0, %v23882_v21  ;;  %29455 = vmatprep.mubr.msk.f32.mxu0 %vm428_vm0, %v23890_v53  ;;  %v23944_v21 = vld [vmem:[%s32702_s9 + $0x332] sm:$0xff] }
 0x246   : > { %27904 = vmatmul.mubr.msk.f32.gmra.mrb[20].mxu1 %vm428_vm0, %v23883_v25  ;;  %29456 = vmatmul.mubr.msk.f32.gmra.mrb[20].mxu0 %vm428_vm0, %v23891_v57  ;;  %v23945_v25 = vld [vmem:[%s32702_s9 + $0x33a] sm:$0xff] }
 0x247   : > { %27906 = vmatprep.mubr.msk.f32.mxu1 %vm428_vm0, %v23884_v29  ;;  %29458 = vmatprep.mubr.msk.f32.mxu0 %vm428_vm0, %v23892_v61  ;;  %v23946_v29 = vld [vmem:[%s32702_s9 + $0x34a] sm:$0xff] }
 0x24a   : > { %27907 = vmatmul.mubr.msk.f32.gmra.mrb[22].mxu1 %vm428_vm0, %v23885_v33  ;;  %29459 = vmatmul.mubr.msk.f32.gmra.mrb[22].mxu0 %vm428_vm0, %v23893_v1  ;;  %v23947_v33 = vld [vmem:[%s32702_s9 + $0x352] sm:$0xff] }
 0x24b   : > { %27909 = vmatprep.mubr.msk.f32.mxu1 %vm428_vm0, %v23886_v37  ;;  %29461 = vmatprep.mubr.msk.f32.mxu0 %vm428_vm0, %v23894_v5  ;;  %v23948_v37 = vld [vmem:[%s32702_s9 + $0x35a] sm:$0xff] }
 0x24e   : > { %27910 = vmatmul.mubr.msk.f32.gmra.mrb[24].mxu1 %vm428_vm0, %v23887_v41  ;;  %29462 = vmatmul.mubr.msk.f32.gmra.mrb[24].mxu0 %vm428_vm0, %v23895_v9  ;;  %v23949_v41 = vld [vmem:[%s32702_s9 + $0x362] sm:$0xff] }
 0x24f   : > { %27912 = vmatprep.mubr.msk.f32.mxu1 %vm428_vm0, %v23888_v45  ;;  %29464 = vmatprep.mubr.msk.f32.mxu0 %vm428_vm0, %v23896_v13  ;;  %v23950_v45 = vld [vmem:[%s32702_s9 + $0x372] sm:$0xff] }
 0x252   : > { %27913 = vmatmul.mubr.msk.f32.gmra.mrb[26].mxu1 %vm428_vm0, %v23889_v49  ;;  %29465 = vmatmul.mubr.msk.f32.gmra.mrb[26].mxu0 %vm428_vm0, %v23897_v17  ;;  %v23951_v49 = vld [vmem:[%s32702_s9 + $0x37a] sm:$0xff] }
 0x253   : > { %27915 = vmatprep.mubr.msk.f32.mxu1 %vm428_vm0, %v23890_v53  ;;  %29467 = vmatprep.mubr.msk.f32.mxu0 %vm428_vm0, %v23898_v23  ;;  %v23952_v53 = vld [vmem:[%s32702_s9 + $0x382] sm:$0xff] }
 0x256   : > { %27916 = vmatmul.mubr.msk.f32.gmra.mrb[28].mxu1 %vm428_vm0, %v23891_v57  ;;  %29468 = vmatmul.mubr.msk.f32.gmra.mrb[28].mxu0 %vm428_vm0, %v23899_v31  ;;  %v23953_v57 = vld [vmem:[%s32702_s9 + $0x38a] sm:$0xff] }
 0x257   : > { %27918 = vmatprep.mubr.msk.f32.mxu1 %vm428_vm0, %v23892_v61  ;;  %29470 = vmatprep.mubr.msk.f32.mxu0 %vm428_vm0, %v23900_v39  ;;  %v23954_v61 = vld [vmem:[%s32702_s9 + $0x39a] sm:$0xff] }
 0x25a   : > { %27919 = vmatmul.mubr.msk.f32.gmra.mrb[30].mxu1 %vm428_vm0, %v23893_v1  ;;  %29471 = vmatmul.mubr.msk.f32.gmra.mrb[30].mxu0 %vm428_vm0, %v23901_v47  ;;  %v23955_v1 = vld [vmem:[%s32702_s9 + $0x3a2] sm:$0xff] }
 0x25b   : > { %27921 = vmatprep.mubr.msk.f32.mxu1 %vm428_vm0, %v23894_v5  ;;  %29473 = vmatprep.mubr.msk.f32.mxu0 %vm428_vm0, %v23902_v59  ;;  %v23956_v5 = vld [vmem:[%s32702_s9 + $0x3aa] sm:$0xff] }
 0x25e   : > { %27922 = vmatmul.mubr.msk.f32.gmra.mrb[32].mxu1 %vm428_vm0, %v23895_v9  ;;  %29474 = vmatmul.mubr.msk.f32.gmra.mrb[32].mxu0 %vm428_vm0, %v23903_v3  ;;  %v23957_v9 = vld [vmem:[%s32702_s9 + $0x3b2] sm:$0xff] }
 0x25f   : > { %27924 = vmatprep.mubr.msk.f32.mxu1 %vm428_vm0, %v23896_v13  ;;  %29476 = vmatprep.mubr.msk.f32.mxu0 %vm428_vm0, %v23904_v55  ;;  %v23958_v13 = vld [vmem:[%s32702_s9 + $0x3c2] sm:$0xff] }
 0x262   : > { %27925 = vmatmul.mubr.msk.f32.gmra.mrb[34].mxu1 %vm428_vm0, %v23897_v17  ;;  %29477 = vmatmul.mubr.msk.f32.gmra.mrb[34].mxu0 %vm428_vm0, %v23905_v63  ;;  %v23959_v17 = vld [vmem:[%s32702_s9 + $0x3ca] sm:$0xff] }
 0x263   : > { %27927 = vmatprep.mubr.msk.f32.mxu1 %vm428_vm0, %v23898_v23  ;;  %29479 = vmatprep.mubr.msk.f32.mxu0 %vm428_vm0, %v23906_v11  ;;  %v23960_v23 = vld [vmem:[%s32702_s9 + $0x3d2] sm:$0xff] }
 0x266   : > { %27928 = vmatmul.mubr.msk.f32.gmra.mrb[36].mxu1 %vm428_vm0, %v23899_v31  ;;  %29480 = vmatmul.mubr.msk.f32.gmra.mrb[36].mxu0 %vm428_vm0, %v23907_v27  ;;  %v23961_v31 = vld [vmem:[%s32702_s9 + $0x3da] sm:$0xff] }
 0x267   : > { %27930 = vmatprep.mubr.msk.f32.mxu1 %vm428_vm0, %v23900_v39  ;;  %29482 = vmatprep.mubr.msk.f32.mxu0 %vm428_vm0, %v23908_v19  ;;  %v23962_v39 = vld [vmem:[%s32702_s9 + $0x3ea] sm:$0xff] }
 0x26a   : > { %27931 = vmatmul.mubr.msk.f32.gmra.mrb[38].mxu1 %vm428_vm0, %v23901_v47  ;;  %29483 = vmatmul.mubr.msk.f32.gmra.mrb[38].mxu0 %vm428_vm0, %v23909_v35  ;;  %v23963_v47 = vld [vmem:[%s32702_s9 + $0x3f2] sm:$0xff] }
 0x26b   : > { %27933 = vmatprep.mubr.msk.f32.mxu1 %vm428_vm0, %v23902_v59  ;;  %29485 = vmatprep.mubr.msk.f32.mxu0 %vm428_vm0, %v23910_v43  ;;  %v23964_v59 = vld [vmem:[%s32702_s9 + $0x3fa] sm:$0xff] }
 0x26e   : > { %27934 = vmatmul.mubr.msk.f32.gmra.mrb[40].mxu1 %vm428_vm0, %v23903_v3  ;;  %29486 = vmatmul.mubr.msk.f32.gmra.mrb[40].mxu0 %vm428_vm0, %v23911_v20  ;;  %v23965_v3 = vld [vmem:[%s32702_s9 + $0x402] sm:$0xff] }
 0x26f   : > { %27936 = vmatprep.mubr.msk.f32.mxu1 %vm428_vm0, %v23904_v55  ;;  %29488 = vmatprep.mubr.msk.f32.mxu0 %vm428_vm0, %v23912_v51  ;;  %v23966_v55 = vld [vmem:[%s32702_s9 + $0x412] sm:$0xff] }
 0x272   : > { %27937 = vmatmul.mubr.msk.f32.gmra.mrb[42].mxu1 %vm428_vm0, %v23905_v63  ;;  %29489 = vmatmul.mubr.msk.f32.gmra.mrb[42].mxu0 %vm428_vm0, %v23913_v22  ;;  %v23967_v63 = vld [vmem:[%s32702_s9 + $0x41a] sm:$0xff] }
 0x273   : > { %27939 = vmatprep.mubr.msk.f32.mxu1 %vm428_vm0, %v23906_v11  ;;  %29491 = vmatprep.mubr.msk.f32.mxu0 %vm428_vm0, %v23914_v15  ;;  %v23968_v11 = vld [vmem:[%s32702_s9 + $0x422] sm:$0xff] }
 0x276   : > { %27940 = vmatmul.mubr.msk.f32.gmra.mrb[44].mxu1 %vm428_vm0, %v23907_v27  ;;  %29492 = vmatmul.mubr.msk.f32.gmra.mrb[44].mxu0 %vm428_vm0, %v23915_v24  ;;  %v23969_v27 = vld [vmem:[%s32702_s9 + $0x42a] sm:$0xff] }
 0x277   : > { %27942 = vmatprep.mubr.msk.f32.mxu1 %vm428_vm0, %v23908_v19  ;;  %29494 = vmatprep.mubr.msk.f32.mxu0 %vm428_vm0, %v23916_v7  ;;  %v23970_v19 = vld [vmem:[%s32702_s9 + $0x43a] sm:$0xff] }
 0x27a   : > { %27943 = vmatmul.mubr.msk.f32.gmra.mrb[46].mxu1 %vm428_vm0, %v23909_v35  ;;  %29495 = vmatmul.mubr.msk.f32.gmra.mrb[46].mxu0 %vm428_vm0, %v23917_v26  ;;  %v23971_v35 = vld [vmem:[%s32702_s9 + $0x442] sm:$0xff] }
 0x27b   : > { %27945 = vmatprep.mubr.msk.f32.mxu1 %vm428_vm0, %v23910_v43  ;;  %29497 = vmatprep.mubr.msk.f32.mxu0 %vm428_vm0, %v23918_v28  ;;  %v23972_v43 = vld [vmem:[%s32702_s9 + $0x44a] sm:$0xff] }
 0x27e   : > { %27946 = vmatmul.mubr.msk.f32.gmra.mrb[48].mxu1 %vm428_vm0, %v23911_v20  ;;  %29498 = vmatmul.mubr.msk.f32.gmra.mrb[48].mxu0 %vm428_vm0, %v23919_v30  ;;  %v23973_v20 = vld [vmem:[%s32702_s9 + $0x452] sm:$0xff] }
 0x27f   : > { %27948 = vmatprep.mubr.msk.f32.mxu1 %vm428_vm0, %v23912_v51  ;;  %29500 = vmatprep.mubr.msk.f32.mxu0 %vm428_vm0, %v23920_v32  ;;  %v23974_v51 = vld [vmem:[%s32702_s9 + $0x462] sm:$0xff] }
 0x282   : > { %27949 = vmatmul.mubr.msk.f32.gmra.mrb[50].mxu1 %vm428_vm0, %v23913_v22  ;;  %29501 = vmatmul.mubr.msk.f32.gmra.mrb[50].mxu0 %vm428_vm0, %v23921_v34  ;;  %v23975_v22 = vld [vmem:[%s32702_s9 + $0x46a] sm:$0xff] }
 0x283   : > { %27951 = vmatprep.mubr.msk.f32.mxu1 %vm428_vm0, %v23914_v15  ;;  %29503 = vmatprep.mubr.msk.f32.mxu0 %vm428_vm0, %v23922_v36  ;;  %v23976_v15 = vld [vmem:[%s32702_s9 + $0x472] sm:$0xff] }
 0x286   : > { %27952 = vmatmul.mubr.msk.f32.gmra.mrb[52].mxu1 %vm428_vm0, %v23915_v24  ;;  %29504 = vmatmul.mubr.msk.f32.gmra.mrb[52].mxu0 %vm428_vm0, %v23923_v38  ;;  %v23977_v24 = vld [vmem:[%s32702_s9 + $0x47a] sm:$0xff] }
 0x287   : > { %27954 = vmatprep.mubr.msk.f32.mxu1 %vm428_vm0, %v23916_v7  ;;  %29506 = vmatprep.mubr.msk.f32.mxu0 %vm428_vm0, %v23924_v40  ;;  %v23978_v7 = vld [vmem:[%s32702_s9 + $0x48a] sm:$0xff] }
 0x28a   : > { %27955 = vmatmul.mubr.msk.f32.gmra.mrb[54].mxu1 %vm428_vm0, %v23917_v26  ;;  %29507 = vmatmul.mubr.msk.f32.gmra.mrb[54].mxu0 %vm428_vm0, %v23925_v46  ;;  %v23979_v26 = vld [vmem:[%s32702_s9 + $0x492] sm:$0xff] }
 0x28b   : > { %27957 = vmatprep.mubr.msk.f32.mxu1 %vm428_vm0, %v23918_v28  ;;  %29509 = vmatprep.mubr.msk.f32.mxu0 %vm428_vm0, %v23926_v48  ;;  %v23980_v28 = vld [vmem:[%s32702_s9 + $0x49a] sm:$0xff] }
 0x28e   : > { %27958 = vmatmul.mubr.msk.f32.gmra.mrb[56].mxu1 %vm428_vm0, %v23919_v30  ;;  %29510 = vmatmul.mubr.msk.f32.gmra.mrb[56].mxu0 %vm428_vm0, %v23927_v50  ;;  %v23981_v30 = vld [vmem:[%s32702_s9 + $0x4a2] sm:$0xff] }
 0x28f   : > { %27960 = vmatprep.mubr.msk.f32.mxu1 %vm428_vm0, %v23920_v32  ;;  %29512 = vmatprep.mubr.msk.f32.mxu0 %vm428_vm0, %v23928_v52  ;;  %v23982_v32 = vld [vmem:[%s32702_s9 + $0x4b2] sm:$0xff] }
 0x292   : > { %27961 = vmatmul.mubr.msk.f32.gmra.mrb[58].mxu1 %vm428_vm0, %v23921_v34  ;;  %29513 = vmatmul.mubr.msk.f32.gmra.mrb[58].mxu0 %vm428_vm0, %v23929_v54  ;;  %v23983_v34 = vld [vmem:[%s32702_s9 + $0x4ba] sm:$0xff] }
 0x293   : > { %27963 = vmatprep.mubr.msk.f32.mxu1 %vm428_vm0, %v23922_v36  ;;  %29515 = vmatprep.mubr.msk.f32.mxu0 %vm428_vm0, %v23930_v56  ;;  %v23984_v36 = vld [vmem:[%s32702_s9 + $0x4c2] sm:$0xff] }
 0x296   : > { %27964 = vmatmul.mubr.msk.f32.gmra.mrb[60].mxu1 %vm428_vm0, %v23923_v38  ;;  %29516 = vmatmul.mubr.msk.f32.gmra.mrb[60].mxu0 %vm428_vm0, %v23931_v58  ;;  %v23985_v38 = vld [vmem:[%s32702_s9 + $0x4ca] sm:$0xff] }
 0x297   : > { %27966 = vmatprep.mubr.msk.f32.mxu1 %vm428_vm0, %v23924_v40  ;;  %29518 = vmatprep.mubr.msk.f32.mxu0 %vm428_vm0, %v23932_v60  ;;  %v23986_v40 = vld [vmem:[%s32702_s9 + $0x4da] sm:$0xff] }
 0x29a   : > { %27967 = vmatmul.mubr.msk.f32.gmra.mrb[62].mxu1 %vm428_vm0, %v23925_v46  ;;  %29519 = vmatmul.mubr.msk.f32.gmra.mrb[62].mxu0 %vm428_vm0, %v23933_v62  ;;  %v23987_v46 = vld [vmem:[%s32702_s9 + $0x4e2] sm:$0xff] }
 0x29b   : > { %27969 = vmatprep.mubr.msk.f32.mxu1 %vm428_vm0, %v23926_v48  ;;  %29521 = vmatprep.mubr.msk.f32.mxu0 %vm428_vm0, %v23934_v0  ;;  %v23988_v48 = vld [vmem:[%s32702_s9 + $0x4ea] sm:$0xff] }
 0x29e   : > { %27970 = vmatmul.mubr.msk.f32.gmra.mrb[64].mxu1 %vm428_vm0, %v23927_v50  ;;  %29522 = vmatmul.mubr.msk.f32.gmra.mrb[64].mxu0 %vm428_vm0, %v23935_v2  ;;  %v23989_v50 = vld [vmem:[%s32702_s9 + $0x4f2] sm:$0xff] }
 0x29f   : > { %27972 = vmatprep.mubr.msk.f32.mxu1 %vm428_vm0, %v23928_v52  ;;  %29524 = vmatprep.mubr.msk.f32.mxu0 %vm428_vm0, %v23936_v4  ;;  %v23990_v52 = vld [vmem:[%s32702_s9 + $0x502] sm:$0xff] }
 0x2a2   : > { %27973 = vmatmul.mubr.msk.f32.gmra.mrb[66].mxu1 %vm428_vm0, %v23929_v54  ;;  %29525 = vmatmul.mubr.msk.f32.gmra.mrb[66].mxu0 %vm428_vm0, %v23937_v6  ;;  %v23991_v54 = vld [vmem:[%s32702_s9 + $0x50a] sm:$0xff] }
 0x2a3   : > { %27975 = vmatprep.mubr.msk.f32.mxu1 %vm428_vm0, %v23930_v56  ;;  %29527 = vmatprep.mubr.msk.f32.mxu0 %vm428_vm0, %v23938_v8  ;;  %v23992_v56 = vld [vmem:[%s32702_s9 + $0x512] sm:$0xff] }
 0x2a6   : > { %27976 = vmatmul.mubr.msk.f32.gmra.mrb[68].mxu1 %vm428_vm0, %v23931_v58  ;;  %29528 = vmatmul.mubr.msk.f32.gmra.mrb[68].mxu0 %vm428_vm0, %v23939_v10  ;;  %v23993_v58 = vld [vmem:[%s32702_s9 + $0x51a] sm:$0xff] }
 0x2a7   : > { %27978 = vmatprep.mubr.msk.f32.mxu1 %vm428_vm0, %v23932_v60  ;;  %29530 = vmatprep.mubr.msk.f32.mxu0 %vm428_vm0, %v23940_v12  ;;  %v23994_v60 = vld [vmem:[%s32702_s9 + $0x52a] sm:$0xff] }
 0x2aa   : > { %27979 = vmatmul.mubr.msk.f32.gmra.mrb[70].mxu1 %vm428_vm0, %v23933_v62  ;;  %29531 = vmatmul.mubr.msk.f32.gmra.mrb[70].mxu0 %vm428_vm0, %v23941_v14  ;;  %v23995_v62 = vld [vmem:[%s32702_s9 + $0x532] sm:$0xff] }
 0x2ab   : > { %27981 = vmatprep.mubr.msk.f32.mxu1 %vm428_vm0, %v23934_v0  ;;  %29533 = vmatprep.mubr.msk.f32.mxu0 %vm428_vm0, %v23942_v16  ;;  %v23996_v0 = vld [vmem:[%s32702_s9 + $0x53a] sm:$0xff] }
 0x2ae   : > { %27982 = vmatmul.mubr.msk.f32.gmra.mrb[72].mxu1 %vm428_vm0, %v23935_v2  ;;  %29534 = vmatmul.mubr.msk.f32.gmra.mrb[72].mxu0 %vm428_vm0, %v23943_v18  ;;  %v23997_v2 = vld [vmem:[%s32702_s9 + $0x542] sm:$0xff] }
 0x2af   : > { %27984 = vmatprep.mubr.msk.f32.mxu1 %vm428_vm0, %v23936_v4  ;;  %29536 = vmatprep.mubr.msk.f32.mxu0 %vm428_vm0, %v23944_v21  ;;  %v3954_v4 = vld [vmem:[%s32702_s9 + $0x3] sm:$0xff] }
 0x2b2   : > { %27985 = vmatmul.mubr.msk.f32.gmra.mrb[74].mxu1 %vm428_vm0, %v23937_v6  ;;  %29537 = vmatmul.mubr.msk.f32.gmra.mrb[74].mxu0 %vm428_vm0, %v23945_v25  ;;  %v24127_v6 = vld [vmem:[%s32702_s9 + $0x53] sm:$0xff] }
 0x2b3   : > { %27987 = vmatprep.mubr.msk.f32.mxu1 %vm428_vm0, %v23938_v8  ;;  %29539 = vmatprep.mubr.msk.f32.mxu0 %vm428_vm0, %v23946_v29  ;;  %v3955_v8 = vld [vmem:[%s32702_s9 + $0xb] sm:$0xff] }
 0x2b6   : > { %27988 = vmatmul.mubr.msk.f32.gmra.mrb[76].mxu1 %vm428_vm0, %v23939_v10  ;;  %29540 = vmatmul.mubr.msk.f32.gmra.mrb[76].mxu0 %vm428_vm0, %v23947_v33  ;;  %v24128_v10 = vld [vmem:[%s32702_s9 + $0x5b] sm:$0xff] }
 0x2b7   : > { %27990 = vmatprep.mubr.msk.f32.mxu1 %vm428_vm0, %v23940_v12  ;;  %29542 = vmatprep.mubr.msk.f32.mxu0 %vm428_vm0, %v23948_v37  ;;  %v3956_v12 = vld [vmem:[%s32702_s9 + $0x13] sm:$0xff] }
 0x2ba   : > { %27991 = vmatmul.mubr.msk.f32.gmra.mrb[78].mxu1 %vm428_vm0, %v23941_v14  ;;  %29543 = vmatmul.mubr.msk.f32.gmra.mrb[78].mxu0 %vm428_vm0, %v23949_v41  ;;  %v24129_v14 = vld [vmem:[%s32702_s9 + $0x63] sm:$0xff] }
 0x2bb   : > { %27993 = vmatprep.mubr.msk.f32.mxu1 %vm428_vm0, %v23942_v16  ;;  %29545 = vmatprep.mubr.msk.f32.mxu0 %vm428_vm0, %v23950_v45  ;;  %v3957_v16 = vld [vmem:[%s32702_s9 + $0x1b] sm:$0xff] }
 0x2be   : > { %27994 = vmatmul.mubr.msk.f32.gmra.mrb[80].mxu1 %vm428_vm0, %v23943_v18  ;;  %29546 = vmatmul.mubr.msk.f32.gmra.mrb[80].mxu0 %vm428_vm0, %v23951_v49  ;;  %v24130_v18 = vld [vmem:[%s32702_s9 + $0x6b] sm:$0xff] }
 0x2bf   : > { %27996 = vmatprep.mubr.msk.f32.mxu1 %vm428_vm0, %v23944_v21  ;;  %29548 = vmatprep.mubr.msk.f32.mxu0 %vm428_vm0, %v23952_v53  ;;  %v3958_v21 = vld [vmem:[%s32702_s9 + $0x2b] sm:$0xff] }
 0x2c2   : > { %27997 = vmatmul.mubr.msk.f32.gmra.mrb[82].mxu1 %vm428_vm0, %v23945_v25  ;;  %29549 = vmatmul.mubr.msk.f32.gmra.mrb[82].mxu0 %vm428_vm0, %v23953_v57  ;;  %v24131_v25 = vld [vmem:[%s32702_s9 + $0x7b] sm:$0xff] }
 0x2c3   : > { %27999 = vmatprep.mubr.msk.f32.mxu1 %vm428_vm0, %v23946_v29  ;;  %29551 = vmatprep.mubr.msk.f32.mxu0 %vm428_vm0, %v23954_v61  ;;  %v3960_v29 = vld [vmem:[%s32702_s9 + $0x3b] sm:$0xff] }
 0x2c6   : > { %28000 = vmatmul.mubr.msk.f32.gmra.mrb[84].mxu1 %vm428_vm0, %v23947_v33  ;;  %29552 = vmatmul.mubr.msk.f32.gmra.mrb[84].mxu0 %vm428_vm0, %v23955_v1  ;;  %v24133_v33 = vld [vmem:[%s32702_s9 + $0x8b] sm:$0xff] }
 0x2c7   : > { %28002 = vmatprep.mubr.msk.f32.mxu1 %vm428_vm0, %v23948_v37  ;;  %29554 = vmatprep.mubr.msk.f32.mxu0 %vm428_vm0, %v23956_v5  ;;  %v3961_v37 = vld [vmem:[%s32702_s9 + $0x43] sm:$0xff] }
 0x2ca   : > { %28003 = vmatmul.mubr.msk.f32.gmra.mrb[86].mxu1 %vm428_vm0, %v23949_v41  ;;  %29555 = vmatmul.mubr.msk.f32.gmra.mrb[86].mxu0 %vm428_vm0, %v23957_v9  ;;  %v24134_v41 = vld [vmem:[%s32702_s9 + $0x93] sm:$0xff] }
 0x2cb   : > { %28005 = vmatprep.mubr.msk.f32.mxu1 %vm428_vm0, %v23950_v45  ;;  %29557 = vmatprep.mubr.msk.f32.mxu0 %vm428_vm0, %v23958_v13  ;;  %v24135_v45 = vld [vmem:[%s32702_s9 + $0xa3] sm:$0xff] }
 0x2ce   : > { %28006 = vmatmul.mubr.msk.f32.gmra.mrb[88].mxu1 %vm428_vm0, %v23951_v49  ;;  %29558 = vmatmul.mubr.msk.f32.gmra.mrb[88].mxu0 %vm428_vm0, %v23959_v17  ;;  %v24136_v49 = vld [vmem:[%s32702_s9 + $0xab] sm:$0xff] }
 0x2cf   : > { %28008 = vmatprep.mubr.msk.f32.mxu1 %vm428_vm0, %v23952_v53  ;;  %29560 = vmatprep.mubr.msk.f32.mxu0 %vm428_vm0, %v23960_v23  ;;  %v24137_v53 = vld [vmem:[%s32702_s9 + $0xb3] sm:$0xff] }
 0x2d2   : > { %28009 = vmatmul.mubr.msk.f32.gmra.mrb[90].mxu1 %vm428_vm0, %v23953_v57  ;;  %29561 = vmatmul.mubr.msk.f32.gmra.mrb[90].mxu0 %vm428_vm0, %v23961_v31  ;;  %v24138_v57 = vld [vmem:[%s32702_s9 + $0xbb] sm:$0xff] }
 0x2d3   : > { %28011 = vmatprep.mubr.msk.f32.mxu1 %vm428_vm0, %v23954_v61  ;;  %29563 = vmatprep.mubr.msk.f32.mxu0 %vm428_vm0, %v23962_v39  ;;  %v24139_v61 = vld [vmem:[%s32702_s9 + $0xcb] sm:$0xff] }
 0x2d6   : > { %28012 = vmatmul.mubr.msk.f32.gmra.mrb[92].mxu1 %vm428_vm0, %v23955_v1  ;;  %29564 = vmatmul.mubr.msk.f32.gmra.mrb[92].mxu0 %vm428_vm0, %v23963_v47  ;;  %v24140_v1 = vld [vmem:[%s32702_s9 + $0xd3] sm:$0xff] }
 0x2d7   : > { %28014 = vmatprep.mubr.msk.f32.mxu1 %vm428_vm0, %v23956_v5  ;;  %29566 = vmatprep.mubr.msk.f32.mxu0 %vm428_vm0, %v23964_v59  ;;  %v24141_v5 = vld [vmem:[%s32702_s9 + $0xdb] sm:$0xff] }
 0x2da   : > { %28015 = vmatmul.mubr.msk.f32.gmra.mrb[94].mxu1 %vm428_vm0, %v23957_v9  ;;  %29567 = vmatmul.mubr.msk.f32.gmra.mrb[94].mxu0 %vm428_vm0, %v23965_v3  ;;  %v24142_v9 = vld [vmem:[%s32702_s9 + $0xe3] sm:$0xff] }
 0x2db   : > { %28017 = vmatprep.mubr.msk.f32.mxu1 %vm428_vm0, %v23958_v13  ;;  %29569 = vmatprep.mubr.msk.f32.mxu0 %vm428_vm0, %v23966_v55  ;;  %v24143_v13 = vld [vmem:[%s32702_s9 + $0xf3] sm:$0xff] }
 0x2de   : > { %28018 = vmatmul.mubr.msk.f32.gmra.mrb[96].mxu1 %vm428_vm0, %v23959_v17  ;;  %29570 = vmatmul.mubr.msk.f32.gmra.mrb[96].mxu0 %vm428_vm0, %v23967_v63  ;;  %v24144_v17 = vld [vmem:[%s32702_s9 + $0xfb] sm:$0xff] }
 0x2df   : > { %28020 = vmatprep.mubr.msk.f32.mxu1 %vm428_vm0, %v23960_v23  ;;  %29572 = vmatprep.mubr.msk.f32.mxu0 %vm428_vm0, %v23968_v11  ;;  %v24145_v23 = vld [vmem:[%s32702_s9 + $0x103] sm:$0xff] }
 0x2e2   : > { %28021 = vmatmul.mubr.msk.f32.gmra.mrb[98].mxu1 %vm428_vm0, %v23961_v31  ;;  %29573 = vmatmul.mubr.msk.f32.gmra.mrb[98].mxu0 %vm428_vm0, %v23969_v27  ;;  %v24146_v31 = vld [vmem:[%s32702_s9 + $0x10b] sm:$0xff] }
 0x2e3   : > { %28023 = vmatprep.mubr.msk.f32.mxu1 %vm428_vm0, %v23962_v39  ;;  %29575 = vmatprep.mubr.msk.f32.mxu0 %vm428_vm0, %v23970_v19  ;;  %v24147_v39 = vld [vmem:[%s32702_s9 + $0x11b] sm:$0xff] }
 0x2e6   : > { %28024 = vmatmul.mubr.msk.f32.gmra.mrb[100].mxu1 %vm428_vm0, %v23963_v47  ;;  %29576 = vmatmul.mubr.msk.f32.gmra.mrb[100].mxu0 %vm428_vm0, %v23971_v35  ;;  %v24148_v47 = vld [vmem:[%s32702_s9 + $0x123] sm:$0xff] }
 0x2e7   : > { %28026 = vmatprep.mubr.msk.f32.mxu1 %vm428_vm0, %v23964_v59  ;;  %29578 = vmatprep.mubr.msk.f32.mxu0 %vm428_vm0, %v23972_v43  ;;  %v24149_v59 = vld [vmem:[%s32702_s9 + $0x12b] sm:$0xff] }
 0x2ea   : > { %28027 = vmatmul.mubr.msk.f32.gmra.mrb[102].mxu1 %vm428_vm0, %v23965_v3  ;;  %29579 = vmatmul.mubr.msk.f32.gmra.mrb[102].mxu0 %vm428_vm0, %v23973_v20  ;;  %v24150_v3 = vld [vmem:[%s32702_s9 + $0x133] sm:$0xff] }
 0x2eb   : > { %28029 = vmatprep.mubr.msk.f32.mxu1 %vm428_vm0, %v23966_v55  ;;  %29581 = vmatprep.mubr.msk.f32.mxu0 %vm428_vm0, %v23974_v51  ;;  %v24151_v55 = vld [vmem:[%s32702_s9 + $0x143] sm:$0xff] }
 0x2ee   : > { %28030 = vmatmul.mubr.msk.f32.gmra.mrb[104].mxu1 %vm428_vm0, %v23967_v63  ;;  %29582 = vmatmul.mubr.msk.f32.gmra.mrb[104].mxu0 %vm428_vm0, %v23975_v22  ;;  %v24152_v63 = vld [vmem:[%s32702_s9 + $0x14b] sm:$0xff] }
 0x2ef   : > { %28032 = vmatprep.mubr.msk.f32.mxu1 %vm428_vm0, %v23968_v11  ;;  %29584 = vmatprep.mubr.msk.f32.mxu0 %vm428_vm0, %v23976_v15  ;;  %v24153_v11 = vld [vmem:[%s32702_s9 + $0x153] sm:$0xff] }
 0x2f2   : > { %28033 = vmatmul.mubr.msk.f32.gmra.mrb[106].mxu1 %vm428_vm0, %v23969_v27  ;;  %29585 = vmatmul.mubr.msk.f32.gmra.mrb[106].mxu0 %vm428_vm0, %v23977_v24  ;;  %v24154_v27 = vld [vmem:[%s32702_s9 + $0x15b] sm:$0xff] }
 0x2f3   : > { %28035 = vmatprep.mubr.msk.f32.mxu1 %vm428_vm0, %v23970_v19  ;;  %29587 = vmatprep.mubr.msk.f32.mxu0 %vm428_vm0, %v23978_v7  ;;  %v24155_v19 = vld [vmem:[%s32702_s9 + $0x16b] sm:$0xff] }
 0x2f6   : > { %28036 = vmatmul.mubr.msk.f32.gmra.mrb[108].mxu1 %vm428_vm0, %v23971_v35  ;;  %29588 = vmatmul.mubr.msk.f32.gmra.mrb[108].mxu0 %vm428_vm0, %v23979_v26  ;;  %v24156_v35 = vld [vmem:[%s32702_s9 + $0x173] sm:$0xff] }
 0x2f7   : > { %28038 = vmatprep.mubr.msk.f32.mxu1 %vm428_vm0, %v23972_v43  ;;  %29590 = vmatprep.mubr.msk.f32.mxu0 %vm428_vm0, %v23980_v28  ;;  %v24157_v43 = vld [vmem:[%s32702_s9 + $0x17b] sm:$0xff] }
 0x2fa   : > { %28039 = vmatmul.mubr.msk.f32.gmra.mrb[110].mxu1 %vm428_vm0, %v23973_v20  ;;  %29591 = vmatmul.mubr.msk.f32.gmra.mrb[110].mxu0 %vm428_vm0, %v23981_v30  ;;  %v24158_v20 = vld [vmem:[%s32702_s9 + $0x183] sm:$0xff] }
 0x2fb   : > { %28041 = vmatprep.mubr.msk.f32.mxu1 %vm428_vm0, %v23974_v51  ;;  %29593 = vmatprep.mubr.msk.f32.mxu0 %vm428_vm0, %v23982_v32  ;;  %v24159_v51 = vld [vmem:[%s32702_s9 + $0x193] sm:$0xff] }
 0x2fe   : > { %28042 = vmatmul.mubr.msk.f32.gmra.mrb[112].mxu1 %vm428_vm0, %v23975_v22  ;;  %29594 = vmatmul.mubr.msk.f32.gmra.mrb[112].mxu0 %vm428_vm0, %v23983_v34  ;;  %v24160_v22 = vld [vmem:[%s32702_s9 + $0x19b] sm:$0xff] }
 0x2ff   : > { %28044 = vmatprep.mubr.msk.f32.mxu1 %vm428_vm0, %v23976_v15  ;;  %29596 = vmatprep.mubr.msk.f32.mxu0 %vm428_vm0, %v23984_v36  ;;  %v24161_v15 = vld [vmem:[%s32702_s9 + $0x1a3] sm:$0xff] }
 0x302   : > { %28045 = vmatmul.mubr.msk.f32.gmra.mrb[114].mxu1 %vm428_vm0, %v23977_v24  ;;  %29597 = vmatmul.mubr.msk.f32.gmra.mrb[114].mxu0 %vm428_vm0, %v23985_v38  ;;  %v24162_v24 = vld [vmem:[%s32702_s9 + $0x1ab] sm:$0xff] }
 0x303   : > { %28047 = vmatprep.mubr.msk.f32.mxu1 %vm428_vm0, %v23978_v7  ;;  %29599 = vmatprep.mubr.msk.f32.mxu0 %vm428_vm0, %v23986_v40  ;;  %v24163_v7 = vld [vmem:[%s32702_s9 + $0x1bb] sm:$0xff] }
 0x306   : > { %28048 = vmatmul.mubr.msk.f32.gmra.mrb[116].mxu1 %vm428_vm0, %v23979_v26  ;;  %29600 = vmatmul.mubr.msk.f32.gmra.mrb[116].mxu0 %vm428_vm0, %v23987_v46  ;;  %v24164_v26 = vld [vmem:[%s32702_s9 + $0x1c3] sm:$0xff] }
 0x307   : > { %28050 = vmatprep.mubr.msk.f32.mxu1 %vm428_vm0, %v23980_v28  ;;  %29602 = vmatprep.mubr.msk.f32.mxu0 %vm428_vm0, %v23988_v48  ;;  %v24165_v28 = vld [vmem:[%s32702_s9 + $0x1cb] sm:$0xff] }
 0x30a   : > { %28051 = vmatmul.mubr.msk.f32.gmra.mrb[118].mxu1 %vm428_vm0, %v23981_v30  ;;  %29603 = vmatmul.mubr.msk.f32.gmra.mrb[118].mxu0 %vm428_vm0, %v23989_v50  ;;  %v24166_v30 = vld [vmem:[%s32702_s9 + $0x1d3] sm:$0xff] }
 0x30b   : > { %28053 = vmatprep.mubr.msk.f32.mxu1 %vm428_vm0, %v23982_v32  ;;  %29605 = vmatprep.mubr.msk.f32.mxu0 %vm428_vm0, %v23990_v52  ;;  %v24167_v32 = vld [vmem:[%s32702_s9 + $0x1e3] sm:$0xff]  ;;  %v24175_v52 = vld [vmem:[%s32702_s9 + $0x233] sm:$0xff] }
 0x30e   : > { %28054 = vmatmul.mubr.msk.f32.gmra.mrb[120].mxu1 %vm428_vm0, %v23983_v34  ;;  %29606 = vmatmul.mubr.msk.f32.gmra.mrb[120].mxu0 %vm428_vm0, %v23991_v54  ;;  %v24168_v34 = vld [vmem:[%s32702_s9 + $0x1eb] sm:$0xff]  ;;  %v24176_v54 = vld [vmem:[%s32702_s9 + $0x23b] sm:$0xff] }
 0x30f   : > { %28056 = vmatprep.mubr.msk.f32.mxu1 %vm428_vm0, %v23984_v36  ;;  %29608 = vmatprep.mubr.msk.f32.mxu0 %vm428_vm0, %v23992_v56  ;;  %v24169_v36 = vld [vmem:[%s32702_s9 + $0x1f3] sm:$0xff]  ;;  %v24177_v56 = vld [vmem:[%s32702_s9 + $0x243] sm:$0xff] }
 0x312   : > { %28057 = vmatmul.mubr.msk.f32.gmra.mrb[122].mxu1 %vm428_vm0, %v23985_v38  ;;  %29609 = vmatmul.mubr.msk.f32.gmra.mrb[122].mxu0 %vm428_vm0, %v23993_v58  ;;  %v24170_v38 = vld [vmem:[%s32702_s9 + $0x1fb] sm:$0xff]  ;;  %v24178_v58 = vld [vmem:[%s32702_s9 + $0x24b] sm:$0xff] }
 0x313   : > { %28059 = vmatprep.mubr.msk.f32.mxu1 %vm428_vm0, %v23986_v40  ;;  %29611 = vmatprep.mubr.msk.f32.mxu0 %vm428_vm0, %v23994_v60  ;;  %v24171_v40 = vld [vmem:[%s32702_s9 + $0x20b] sm:$0xff]  ;;  %v24179_v60 = vld [vmem:[%s32702_s9 + $0x25b] sm:$0xff] }
 0x316   : > { %28060 = vmatmul.mubr.msk.f32.gmra.mrb[124].mxu1 %vm428_vm0, %v23987_v46  ;;  %29612 = vmatmul.mubr.msk.f32.gmra.mrb[124].mxu0 %vm428_vm0, %v23995_v62  ;;  %v24172_v46 = vld [vmem:[%s32702_s9 + $0x213] sm:$0xff]  ;;  %v24180_v62 = vld [vmem:[%s32702_s9 + $0x263] sm:$0xff] }
 0x317   : > { %28062 = vmatprep.mubr.msk.f32.mxu1 %vm428_vm0, %v23988_v48  ;;  %29614 = vmatprep.mubr.msk.f32.mxu0 %vm428_vm0, %v23996_v0  ;;  %v24173_v48 = vld [vmem:[%s32702_s9 + $0x21b] sm:$0xff]  ;;  %v24181_v0 = vld [vmem:[%s32702_s9 + $0x26b] sm:$0xff] }
 0x31a   : > { %28063 = vmatmul.mubr.msk.f32.gmra.mrb[126].mxu1 %vm428_vm0, %v23989_v50  ;;  %29615 = vmatmul.mubr.msk.f32.gmra.mrb[126].mxu0 %vm428_vm0, %v23997_v2  ;;  %v24174_v50 = vld [vmem:[%s32702_s9 + $0x223] sm:$0xff]  ;;  %v24182_v2 = vld [vmem:[%s32702_s9 + $0x273] sm:$0xff] }
 0x31b   : > { %28067 = vmatprep.mubr.msk.f32.mxu1 %vm428_vm0, %v3954_v4  ;;  %29619 = vmatprep.mubr.msk.f32.mxu0 %vm428_vm0, %v24127_v6  ;;  %v24183_v4 = vld [vmem:[%s32702_s9 + $0x283] sm:$0xff] }
 0x31e   : > { %28068 = vmatmul.mubr.msk.f32.vlgmr.msra.gmra.mrb[0].mxu1 %vm428_vm0, %v3955_v8  ;;  %29620 = vmatmul.mubr.msk.f32.vlgmr.msra.gmra.mrb[0].mxu0 %vm428_vm0, %v24128_v10  ;;  %v24185_v8 = vld [vmem:[%s32702_s9 + $0x293] sm:$0xff] }
 0x31f   : > { %28260 = vmatpush3.msra.mxu1 %v34323_v42  ;;  %29812 = vmatpush3.msra.mxu0 %v34328_v44  ;;  %v3959_v42 = vld [vmem:[%s32702_s9 + $0x33] sm:$0xff]  ;;  %v24132_v44 = vld [vmem:[%s32702_s9 + $0x83] sm:$0xff] }
 0x320   : > { %28070 = vmatprep.mubr.msk.f32.mxu1 %vm428_vm0, %v3956_v12  ;;  %29622 = vmatprep.mubr.msk.f32.mxu0 %vm428_vm0, %v24129_v14  ;;  %v24187_v12 = vld [vmem:[%s32702_s9 + $0x2ab] sm:$0xff] }
 0x322   : > { %28071 = vmatmul.mubr.msk.f32.gmra.mrb[2].mxu1 %vm428_vm0, %v3957_v16  ;;  %29623 = vmatmul.mubr.msk.f32.gmra.mrb[2].mxu0 %vm428_vm0, %v24130_v18  ;;  %v24189_v16 = vld [vmem:[%s32702_s9 + $0x2bb] sm:$0xff] }
 0x323   : > { %28073 = vmatprep.mubr.msk.f32.mxu1 %vm428_vm0, %v3958_v21  ;;  %29625 = vmatprep.mubr.msk.f32.mxu0 %vm428_vm0, %v24131_v25  ;;  %v24191_v21 = vld [vmem:[%s32702_s9 + $0x2d3] sm:$0xff] }
 0x326   : > { %28074 = vmatmul.mubr.msk.f32.gmra.mrb[4].mxu1 %vm428_vm0, %v3959_v42  ;;  %29626 = vmatmul.mubr.msk.f32.gmra.mrb[4].mxu0 %vm428_vm0, %v24132_v44  ;;  %v34729_v42 = vld [vmem:[%s36908_s1 + $0x28] sm:$0xff] }
 0x327   : > { %28076 = vmatprep.mubr.msk.f32.mxu1 %vm428_vm0, %v3960_v29  ;;  %29628 = vmatprep.mubr.msk.f32.mxu0 %vm428_vm0, %v24133_v33  ;;  %v24193_v29 = vld [vmem:[%s32702_s9 + $0x2e3] sm:$0xff] }
 0x328   : > { %28453 = vmatprep.subr.mxu1 %v34729_v42 }
 0x32a   : > { %28077 = vmatmul.mubr.msk.f32.gmra.mrb[6].mxu1 %vm428_vm0, %v3961_v37  ;;  %29629 = vmatmul.mubr.msk.f32.gmra.mrb[6].mxu0 %vm428_vm0, %v24134_v41  ;;  %v24195_v37 = vld [vmem:[%s32702_s9 + $0x2fb] sm:$0xff] }
 0x32b   : > { %28079 = vmatprep.mubr.msk.f32.mxu1 %vm428_vm0, %v24127_v6  ;;  %29631 = vmatprep.mubr.msk.f32.mxu0 %vm428_vm0, %v24135_v45  ;;  %v24184_v6 = vld [vmem:[%s32702_s9 + $0x28b] sm:$0xff] }
 0x32e   : > { %28080 = vmatmul.mubr.msk.f32.gmra.mrb[8].mxu1 %vm428_vm0, %v24128_v10  ;;  %29632 = vmatmul.mubr.msk.f32.gmra.mrb[8].mxu0 %vm428_vm0, %v24136_v49  ;;  %v24186_v10 = vld [vmem:[%s32702_s9 + $0x29b] sm:$0xff] }
 0x32f   : > { %28082 = vmatprep.mubr.msk.f32.mxu1 %vm428_vm0, %v24129_v14  ;;  %29634 = vmatprep.mubr.msk.f32.mxu0 %vm428_vm0, %v24137_v53  ;;  %v24188_v14 = vld [vmem:[%s32702_s9 + $0x2b3] sm:$0xff] }
 0x332   : > { %28083 = vmatmul.mubr.msk.f32.gmra.mrb[10].mxu1 %vm428_vm0, %v24130_v18  ;;  %29635 = vmatmul.mubr.msk.f32.gmra.mrb[10].mxu0 %vm428_vm0, %v24138_v57  ;;  %v24190_v18 = vld [vmem:[%s32702_s9 + $0x2c3] sm:$0xff] }
 0x333   : > { %28085 = vmatprep.mubr.msk.f32.mxu1 %vm428_vm0, %v24131_v25  ;;  %29637 = vmatprep.mubr.msk.f32.mxu0 %vm428_vm0, %v24139_v61  ;;  %v24192_v25 = vld [vmem:[%s32702_s9 + $0x2db] sm:$0xff] }
 0x336   : > { %28086 = vmatmul.mubr.msk.f32.gmra.mrb[12].mxu1 %vm428_vm0, %v24132_v44  ;;  %29638 = vmatmul.mubr.msk.f32.gmra.mrb[12].mxu0 %vm428_vm0, %v24140_v1  ;;  %v34734_v44 = vld [vmem:[%s36908_s1 + $0x68] sm:$0xff] }
 0x337   : > { %28088 = vmatprep.mubr.msk.f32.mxu1 %vm428_vm0, %v24133_v33  ;;  %29640 = vmatprep.mubr.msk.f32.mxu0 %vm428_vm0, %v24141_v5  ;;  %v24194_v33 = vld [vmem:[%s32702_s9 + $0x2eb] sm:$0xff] }
 0x338   : > { %30005 = vmatprep.subr.mxu0 %v34734_v44 }
 0x33a   : > { %28089 = vmatmul.mubr.msk.f32.gmra.mrb[14].mxu1 %vm428_vm0, %v24134_v41  ;;  %29641 = vmatmul.mubr.msk.f32.gmra.mrb[14].mxu0 %vm428_vm0, %v24142_v9  ;;  %v24196_v41 = vld [vmem:[%s32702_s9 + $0x303] sm:$0xff] }
 0x33b   : > { %28091 = vmatprep.mubr.msk.f32.mxu1 %vm428_vm0, %v24135_v45  ;;  %29643 = vmatprep.mubr.msk.f32.mxu0 %vm428_vm0, %v24143_v13  ;;  %v24197_v45 = vld [vmem:[%s32702_s9 + $0x30b] sm:$0xff] }
 0x33e   : > { %28092 = vmatmul.mubr.msk.f32.gmra.mrb[16].mxu1 %vm428_vm0, %v24136_v49  ;;  %29644 = vmatmul.mubr.msk.f32.gmra.mrb[16].mxu0 %vm428_vm0, %v24144_v17  ;;  %v24198_v49 = vld [vmem:[%s32702_s9 + $0x313] sm:$0xff] }
 0x33f   : > { %28094 = vmatprep.mubr.msk.f32.mxu1 %vm428_vm0, %v24137_v53  ;;  %29646 = vmatprep.mubr.msk.f32.mxu0 %vm428_vm0, %v24145_v23  ;;  %v24199_v53 = vld [vmem:[%s32702_s9 + $0x323] sm:$0xff] }
 0x342   : > { %28095 = vmatmul.mubr.msk.f32.gmra.mrb[18].mxu1 %vm428_vm0, %v24138_v57  ;;  %29647 = vmatmul.mubr.msk.f32.gmra.mrb[18].mxu0 %vm428_vm0, %v24146_v31  ;;  %v24200_v57 = vld [vmem:[%s32702_s9 + $0x32b] sm:$0xff] }
 0x343   : > { %28097 = vmatprep.mubr.msk.f32.mxu1 %vm428_vm0, %v24139_v61  ;;  %29649 = vmatprep.mubr.msk.f32.mxu0 %vm428_vm0, %v24147_v39  ;;  %v24201_v61 = vld [vmem:[%s32702_s9 + $0x333] sm:$0xff] }
 0x346   : > { %28098 = vmatmul.mubr.msk.f32.gmra.mrb[20].mxu1 %vm428_vm0, %v24140_v1  ;;  %29650 = vmatmul.mubr.msk.f32.gmra.mrb[20].mxu0 %vm428_vm0, %v24148_v47  ;;  %v24202_v1 = vld [vmem:[%s32702_s9 + $0x33b] sm:$0xff] }
 0x347   : > { %28100 = vmatprep.mubr.msk.f32.mxu1 %vm428_vm0, %v24141_v5  ;;  %29652 = vmatprep.mubr.msk.f32.mxu0 %vm428_vm0, %v24149_v59  ;;  %v24203_v5 = vld [vmem:[%s32702_s9 + $0x34b] sm:$0xff] }
 0x34a   : > { %28101 = vmatmul.mubr.msk.f32.gmra.mrb[22].mxu1 %vm428_vm0, %v24142_v9  ;;  %29653 = vmatmul.mubr.msk.f32.gmra.mrb[22].mxu0 %vm428_vm0, %v24150_v3  ;;  %v24204_v9 = vld [vmem:[%s32702_s9 + $0x353] sm:$0xff] }
 0x34b   : > { %28103 = vmatprep.mubr.msk.f32.mxu1 %vm428_vm0, %v24143_v13  ;;  %29655 = vmatprep.mubr.msk.f32.mxu0 %vm428_vm0, %v24151_v55  ;;  %v24205_v13 = vld [vmem:[%s32702_s9 + $0x35b] sm:$0xff] }
 0x34e   : > { %28104 = vmatmul.mubr.msk.f32.gmra.mrb[24].mxu1 %vm428_vm0, %v24144_v17  ;;  %29656 = vmatmul.mubr.msk.f32.gmra.mrb[24].mxu0 %vm428_vm0, %v24152_v63  ;;  %v24206_v17 = vld [vmem:[%s32702_s9 + $0x363] sm:$0xff] }
 0x34f   : > { %28106 = vmatprep.mubr.msk.f32.mxu1 %vm428_vm0, %v24145_v23  ;;  %29658 = vmatprep.mubr.msk.f32.mxu0 %vm428_vm0, %v24153_v11  ;;  %v24207_v23 = vld [vmem:[%s32702_s9 + $0x373] sm:$0xff] }
 0x352   : > { %28107 = vmatmul.mubr.msk.f32.gmra.mrb[26].mxu1 %vm428_vm0, %v24146_v31  ;;  %29659 = vmatmul.mubr.msk.f32.gmra.mrb[26].mxu0 %vm428_vm0, %v24154_v27  ;;  %v24208_v31 = vld [vmem:[%s32702_s9 + $0x37b] sm:$0xff] }
 0x353   : > { %28109 = vmatprep.mubr.msk.f32.mxu1 %vm428_vm0, %v24147_v39  ;;  %29661 = vmatprep.mubr.msk.f32.mxu0 %vm428_vm0, %v24155_v19  ;;  %v24209_v39 = vld [vmem:[%s32702_s9 + $0x383] sm:$0xff] }
 0x356   : > { %28110 = vmatmul.mubr.msk.f32.gmra.mrb[28].mxu1 %vm428_vm0, %v24148_v47  ;;  %29662 = vmatmul.mubr.msk.f32.gmra.mrb[28].mxu0 %vm428_vm0, %v24156_v35  ;;  %v24210_v47 = vld [vmem:[%s32702_s9 + $0x38b] sm:$0xff] }
 0x357   : > { %28112 = vmatprep.mubr.msk.f32.mxu1 %vm428_vm0, %v24149_v59  ;;  %29664 = vmatprep.mubr.msk.f32.mxu0 %vm428_vm0, %v24157_v43  ;;  %v24211_v59 = vld [vmem:[%s32702_s9 + $0x39b] sm:$0xff] }
 0x35a   : > { %28113 = vmatmul.mubr.msk.f32.gmra.mrb[30].mxu1 %vm428_vm0, %v24150_v3  ;;  %29665 = vmatmul.mubr.msk.f32.gmra.mrb[30].mxu0 %vm428_vm0, %v24158_v20  ;;  %v24212_v3 = vld [vmem:[%s32702_s9 + $0x3a3] sm:$0xff] }
 0x35b   : > { %28115 = vmatprep.mubr.msk.f32.mxu1 %vm428_vm0, %v24151_v55  ;;  %29667 = vmatprep.mubr.msk.f32.mxu0 %vm428_vm0, %v24159_v51  ;;  %v24213_v55 = vld [vmem:[%s32702_s9 + $0x3ab] sm:$0xff] }
 0x35e   : > { %28116 = vmatmul.mubr.msk.f32.gmra.mrb[32].mxu1 %vm428_vm0, %v24152_v63  ;;  %29668 = vmatmul.mubr.msk.f32.gmra.mrb[32].mxu0 %vm428_vm0, %v24160_v22  ;;  %v24214_v63 = vld [vmem:[%s32702_s9 + $0x3b3] sm:$0xff] }
 0x35f   : > { %28118 = vmatprep.mubr.msk.f32.mxu1 %vm428_vm0, %v24153_v11  ;;  %29670 = vmatprep.mubr.msk.f32.mxu0 %vm428_vm0, %v24161_v15  ;;  %v24215_v11 = vld [vmem:[%s32702_s9 + $0x3c3] sm:$0xff] }
 0x362   : > { %28119 = vmatmul.mubr.msk.f32.gmra.mrb[34].mxu1 %vm428_vm0, %v24154_v27  ;;  %29671 = vmatmul.mubr.msk.f32.gmra.mrb[34].mxu0 %vm428_vm0, %v24162_v24  ;;  %v24216_v27 = vld [vmem:[%s32702_s9 + $0x3cb] sm:$0xff] }
 0x363   : > { %28121 = vmatprep.mubr.msk.f32.mxu1 %vm428_vm0, %v24155_v19  ;;  %29673 = vmatprep.mubr.msk.f32.mxu0 %vm428_vm0, %v24163_v7  ;;  %v24217_v19 = vld [vmem:[%s32702_s9 + $0x3d3] sm:$0xff] }
 0x366   : > { %28122 = vmatmul.mubr.msk.f32.gmra.mrb[36].mxu1 %vm428_vm0, %v24156_v35  ;;  %29674 = vmatmul.mubr.msk.f32.gmra.mrb[36].mxu0 %vm428_vm0, %v24164_v26  ;;  %v24218_v35 = vld [vmem:[%s32702_s9 + $0x3db] sm:$0xff] }
 0x367   : > { %28124 = vmatprep.mubr.msk.f32.mxu1 %vm428_vm0, %v24157_v43  ;;  %29676 = vmatprep.mubr.msk.f32.mxu0 %vm428_vm0, %v24165_v28  ;;  %v24219_v43 = vld [vmem:[%s32702_s9 + $0x3eb] sm:$0xff] }
 0x36a   : > { %28125 = vmatmul.mubr.msk.f32.gmra.mrb[38].mxu1 %vm428_vm0, %v24158_v20  ;;  %29677 = vmatmul.mubr.msk.f32.gmra.mrb[38].mxu0 %vm428_vm0, %v24166_v30  ;;  %v24220_v20 = vld [vmem:[%s32702_s9 + $0x3f3] sm:$0xff] }
 0x36b   : > { %28127 = vmatprep.mubr.msk.f32.mxu1 %vm428_vm0, %v24159_v51  ;;  %29679 = vmatprep.mubr.msk.f32.mxu0 %vm428_vm0, %v24167_v32  ;;  %v24221_v51 = vld [vmem:[%s32702_s9 + $0x3fb] sm:$0xff] }
 0x36e   : > { %28128 = vmatmul.mubr.msk.f32.gmra.mrb[40].mxu1 %vm428_vm0, %v24160_v22  ;;  %29680 = vmatmul.mubr.msk.f32.gmra.mrb[40].mxu0 %vm428_vm0, %v24168_v34  ;;  %v24222_v22 = vld [vmem:[%s32702_s9 + $0x403] sm:$0xff] }
 0x36f   : > { %28130 = vmatprep.mubr.msk.f32.mxu1 %vm428_vm0, %v24161_v15  ;;  %29682 = vmatprep.mubr.msk.f32.mxu0 %vm428_vm0, %v24169_v36  ;;  %v24223_v15 = vld [vmem:[%s32702_s9 + $0x413] sm:$0xff] }
 0x372   : > { %28131 = vmatmul.mubr.msk.f32.gmra.mrb[42].mxu1 %vm428_vm0, %v24162_v24  ;;  %29683 = vmatmul.mubr.msk.f32.gmra.mrb[42].mxu0 %vm428_vm0, %v24170_v38  ;;  %v24224_v24 = vld [vmem:[%s32702_s9 + $0x41b] sm:$0xff] }
 0x373   : > { %28133 = vmatprep.mubr.msk.f32.mxu1 %vm428_vm0, %v24163_v7  ;;  %29685 = vmatprep.mubr.msk.f32.mxu0 %vm428_vm0, %v24171_v40  ;;  %v24225_v7 = vld [vmem:[%s32702_s9 + $0x423] sm:$0xff] }
 0x376   : > { %28134 = vmatmul.mubr.msk.f32.gmra.mrb[44].mxu1 %vm428_vm0, %v24164_v26  ;;  %29686 = vmatmul.mubr.msk.f32.gmra.mrb[44].mxu0 %vm428_vm0, %v24172_v46  ;;  %v24226_v26 = vld [vmem:[%s32702_s9 + $0x42b] sm:$0xff] }
 0x377   : > { %28136 = vmatprep.mubr.msk.f32.mxu1 %vm428_vm0, %v24165_v28  ;;  %29688 = vmatprep.mubr.msk.f32.mxu0 %vm428_vm0, %v24173_v48  ;;  %v24227_v28 = vld [vmem:[%s32702_s9 + $0x43b] sm:$0xff] }
 0x37a   : > { %28137 = vmatmul.mubr.msk.f32.gmra.mrb[46].mxu1 %vm428_vm0, %v24166_v30  ;;  %29689 = vmatmul.mubr.msk.f32.gmra.mrb[46].mxu0 %vm428_vm0, %v24174_v50  ;;  %v24228_v30 = vld [vmem:[%s32702_s9 + $0x443] sm:$0xff] }
 0x37b   : > { %28139 = vmatprep.mubr.msk.f32.mxu1 %vm428_vm0, %v24167_v32  ;;  %29691 = vmatprep.mubr.msk.f32.mxu0 %vm428_vm0, %v24175_v52  ;;  %v24229_v32 = vld [vmem:[%s32702_s9 + $0x44b] sm:$0xff] }
 0x37e   : > { %28140 = vmatmul.mubr.msk.f32.gmra.mrb[48].mxu1 %vm428_vm0, %v24168_v34  ;;  %29692 = vmatmul.mubr.msk.f32.gmra.mrb[48].mxu0 %vm428_vm0, %v24176_v54  ;;  %v24230_v34 = vld [vmem:[%s32702_s9 + $0x453] sm:$0xff] }
 0x37f   : > { %28142 = vmatprep.mubr.msk.f32.mxu1 %vm428_vm0, %v24169_v36  ;;  %29694 = vmatprep.mubr.msk.f32.mxu0 %vm428_vm0, %v24177_v56  ;;  %v24231_v36 = vld [vmem:[%s32702_s9 + $0x463] sm:$0xff] }
 0x382   : > { %28143 = vmatmul.mubr.msk.f32.gmra.mrb[50].mxu1 %vm428_vm0, %v24170_v38  ;;  %29695 = vmatmul.mubr.msk.f32.gmra.mrb[50].mxu0 %vm428_vm0, %v24178_v58  ;;  %v24232_v38 = vld [vmem:[%s32702_s9 + $0x46b] sm:$0xff] }
 0x383   : > { %28145 = vmatprep.mubr.msk.f32.mxu1 %vm428_vm0, %v24171_v40  ;;  %29697 = vmatprep.mubr.msk.f32.mxu0 %vm428_vm0, %v24179_v60  ;;  %v24233_v40 = vld [vmem:[%s32702_s9 + $0x473] sm:$0xff] }
 0x386   : > { %28146 = vmatmul.mubr.msk.f32.gmra.mrb[52].mxu1 %vm428_vm0, %v24172_v46  ;;  %29698 = vmatmul.mubr.msk.f32.gmra.mrb[52].mxu0 %vm428_vm0, %v24180_v62  ;;  %v24234_v46 = vld [vmem:[%s32702_s9 + $0x47b] sm:$0xff] }
 0x387   : > { %28148 = vmatprep.mubr.msk.f32.mxu1 %vm428_vm0, %v24173_v48  ;;  %29700 = vmatprep.mubr.msk.f32.mxu0 %vm428_vm0, %v24181_v0  ;;  %v24235_v48 = vld [vmem:[%s32702_s9 + $0x48b] sm:$0xff] }
 0x38a   : > { %28149 = vmatmul.mubr.msk.f32.gmra.mrb[54].mxu1 %vm428_vm0, %v24174_v50  ;;  %29701 = vmatmul.mubr.msk.f32.gmra.mrb[54].mxu0 %vm428_vm0, %v24182_v2  ;;  %v24236_v50 = vld [vmem:[%s32702_s9 + $0x493] sm:$0xff] }
 0x38b   : > { %28151 = vmatprep.mubr.msk.f32.mxu1 %vm428_vm0, %v24175_v52  ;;  %29703 = vmatprep.mubr.msk.f32.mxu0 %vm428_vm0, %v24183_v4  ;;  %v24237_v52 = vld [vmem:[%s32702_s9 + $0x49b] sm:$0xff] }
 0x38e   : > { %28152 = vmatmul.mubr.msk.f32.gmra.mrb[56].mxu1 %vm428_vm0, %v24176_v54  ;;  %29704 = vmatmul.mubr.msk.f32.gmra.mrb[56].mxu0 %vm428_vm0, %v24184_v6  ;;  %v24238_v54 = vld [vmem:[%s32702_s9 + $0x4a3] sm:$0xff] }
 0x38f   : > { %28154 = vmatprep.mubr.msk.f32.mxu1 %vm428_vm0, %v24177_v56  ;;  %29706 = vmatprep.mubr.msk.f32.mxu0 %vm428_vm0, %v24185_v8  ;;  %v24239_v56 = vld [vmem:[%s32702_s9 + $0x4b3] sm:$0xff] }
 0x392   : > { %28155 = vmatmul.mubr.msk.f32.gmra.mrb[58].mxu1 %vm428_vm0, %v24178_v58  ;;  %29707 = vmatmul.mubr.msk.f32.gmra.mrb[58].mxu0 %vm428_vm0, %v24186_v10  ;;  %v24240_v58 = vld [vmem:[%s32702_s9 + $0x4bb] sm:$0xff] }
 0x393   : > { %28157 = vmatprep.mubr.msk.f32.mxu1 %vm428_vm0, %v24179_v60  ;;  %29709 = vmatprep.mubr.msk.f32.mxu0 %vm428_vm0, %v24187_v12  ;;  %v24241_v60 = vld [vmem:[%s32702_s9 + $0x4c3] sm:$0xff] }
 0x396   : > { %28158 = vmatmul.mubr.msk.f32.gmra.mrb[60].mxu1 %vm428_vm0, %v24180_v62  ;;  %29710 = vmatmul.mubr.msk.f32.gmra.mrb[60].mxu0 %vm428_vm0, %v24188_v14  ;;  %v24242_v62 = vld [vmem:[%s32702_s9 + $0x4cb] sm:$0xff] }
 0x397   : > { %28160 = vmatprep.mubr.msk.f32.mxu1 %vm428_vm0, %v24181_v0  ;;  %29712 = vmatprep.mubr.msk.f32.mxu0 %vm428_vm0, %v24189_v16  ;;  %v24243_v0 = vld [vmem:[%s32702_s9 + $0x4db] sm:$0xff] }
 0x39a   : > { %28161 = vmatmul.mubr.msk.f32.gmra.mrb[62].mxu1 %vm428_vm0, %v24182_v2  ;;  %29713 = vmatmul.mubr.msk.f32.gmra.mrb[62].mxu0 %vm428_vm0, %v24190_v18  ;;  %v24244_v2 = vld [vmem:[%s32702_s9 + $0x4e3] sm:$0xff] }
 0x39b   : > { %28163 = vmatprep.mubr.msk.f32.mxu1 %vm428_vm0, %v24183_v4  ;;  %29715 = vmatprep.mubr.msk.f32.mxu0 %vm428_vm0, %v24191_v21  ;;  %v24245_v4 = vld [vmem:[%s32702_s9 + $0x4eb] sm:$0xff] }
 0x39e   : > { %28164 = vmatmul.mubr.msk.f32.gmra.mrb[64].mxu1 %vm428_vm0, %v24184_v6  ;;  %29716 = vmatmul.mubr.msk.f32.gmra.mrb[64].mxu0 %vm428_vm0, %v24192_v25  ;;  %v24246_v6 = vld [vmem:[%s32702_s9 + $0x4f3] sm:$0xff] }
 0x39f   : > { %28166 = vmatprep.mubr.msk.f32.mxu1 %vm428_vm0, %v24185_v8  ;;  %29718 = vmatprep.mubr.msk.f32.mxu0 %vm428_vm0, %v24193_v29  ;;  %v24247_v8 = vld [vmem:[%s32702_s9 + $0x503] sm:$0xff] }
 0x3a2   : > { %28167 = vmatmul.mubr.msk.f32.gmra.mrb[66].mxu1 %vm428_vm0, %v24186_v10  ;;  %29719 = vmatmul.mubr.msk.f32.gmra.mrb[66].mxu0 %vm428_vm0, %v24194_v33  ;;  %v24248_v10 = vld [vmem:[%s32702_s9 + $0x50b] sm:$0xff] }
 0x3a3   : > { %28169 = vmatprep.mubr.msk.f32.mxu1 %vm428_vm0, %v24187_v12  ;;  %29721 = vmatprep.mubr.msk.f32.mxu0 %vm428_vm0, %v24195_v37  ;;  %v24249_v12 = vld [vmem:[%s32702_s9 + $0x513] sm:$0xff] }
 0x3a6   : > { %28170 = vmatmul.mubr.msk.f32.gmra.mrb[68].mxu1 %vm428_vm0, %v24188_v14  ;;  %29722 = vmatmul.mubr.msk.f32.gmra.mrb[68].mxu0 %vm428_vm0, %v24196_v41  ;;  %v24250_v14 = vld [vmem:[%s32702_s9 + $0x51b] sm:$0xff] }
 0x3a7   : > { %28172 = vmatprep.mubr.msk.f32.mxu1 %vm428_vm0, %v24189_v16  ;;  %29724 = vmatprep.mubr.msk.f32.mxu0 %vm428_vm0, %v24197_v45  ;;  %v24251_v16 = vld [vmem:[%s32702_s9 + $0x52b] sm:$0xff] }
 0x3aa   : > { %28173 = vmatmul.mubr.msk.f32.gmra.mrb[70].mxu1 %vm428_vm0, %v24190_v18  ;;  %29725 = vmatmul.mubr.msk.f32.gmra.mrb[70].mxu0 %vm428_vm0, %v24198_v49  ;;  %v24252_v18 = vld [vmem:[%s32702_s9 + $0x533] sm:$0xff] }
 0x3ab   : > { %28175 = vmatprep.mubr.msk.f32.mxu1 %vm428_vm0, %v24191_v21  ;;  %29727 = vmatprep.mubr.msk.f32.mxu0 %vm428_vm0, %v24199_v53  ;;  %v24253_v21 = vld [vmem:[%s32702_s9 + $0x53b] sm:$0xff] }
 0x3ae   : > { %28176 = vmatmul.mubr.msk.f32.gmra.mrb[72].mxu1 %vm428_vm0, %v24192_v25  ;;  %29728 = vmatmul.mubr.msk.f32.gmra.mrb[72].mxu0 %vm428_vm0, %v24200_v57  ;;  %v24254_v25 = vld [vmem:[%s32702_s9 + $0x543] sm:$0xff] }
 0x3af   : > { %28178 = vmatprep.mubr.msk.f32.mxu1 %vm428_vm0, %v24193_v29  ;;  %29730 = vmatprep.mubr.msk.f32.mxu0 %vm428_vm0, %v24201_v61  ;;  %v22328_v29 = vld [vmem:[%s32702_s9 + $0x28] sm:$0xff] }
 0x3b2   : > { %28179 = vmatmul.mubr.msk.f32.gmra.mrb[74].mxu1 %vm428_vm0, %v24194_v33  ;;  %29731 = vmatmul.mubr.msk.f32.gmra.mrb[74].mxu0 %vm428_vm0, %v24202_v1  ;;  %v24384_v33 = vld [vmem:[%s32702_s9 + $0x78] sm:$0xff] }
 0x3b3   : > { %28181 = vmatprep.mubr.msk.f32.mxu1 %vm428_vm0, %v24195_v37  ;;  %29733 = vmatprep.mubr.msk.f32.mxu0 %vm428_vm0, %v24203_v5  ;;  %v22329_v37 = vld [vmem:[%s32702_s9 + $0x30] sm:$0xff] }
 0x3b6   : > { %28182 = vmatmul.mubr.msk.f32.gmra.mrb[76].mxu1 %vm428_vm0, %v24196_v41  ;;  %29734 = vmatmul.mubr.msk.f32.gmra.mrb[76].mxu0 %vm428_vm0, %v24204_v9  ;;  %v24385_v41 = vld [vmem:[%s32702_s9 + $0x80] sm:$0xff] }
 0x3b7   : > { %28184 = vmatprep.mubr.msk.f32.mxu1 %vm428_vm0, %v24197_v45  ;;  %29736 = vmatprep.mubr.msk.f32.mxu0 %vm428_vm0, %v24205_v13  ;;  %v22330_v45 = vld [vmem:[%s32702_s9 + $0x38] sm:$0xff] }
 0x3ba   : > { %28185 = vmatmul.mubr.msk.f32.gmra.mrb[78].mxu1 %vm428_vm0, %v24198_v49  ;;  %29737 = vmatmul.mubr.msk.f32.gmra.mrb[78].mxu0 %vm428_vm0, %v24206_v17  ;;  %v24386_v49 = vld [vmem:[%s32702_s9 + $0x88] sm:$0xff] }
 0x3bb   : > { %28187 = vmatprep.mubr.msk.f32.mxu1 %vm428_vm0, %v24199_v53  ;;  %29739 = vmatprep.mubr.msk.f32.mxu0 %vm428_vm0, %v24207_v23  ;;  %v22331_v53 = vld [vmem:[%s32702_s9 + $0x40] sm:$0xff] }
 0x3be   : > { %28188 = vmatmul.mubr.msk.f32.gmra.mrb[80].mxu1 %vm428_vm0, %v24200_v57  ;;  %29740 = vmatmul.mubr.msk.f32.gmra.mrb[80].mxu0 %vm428_vm0, %v24208_v31  ;;  %v24387_v57 = vld [vmem:[%s32702_s9 + $0x90] sm:$0xff] }
 0x3bf   : > { %28190 = vmatprep.mubr.msk.f32.mxu1 %vm428_vm0, %v24201_v61  ;;  %29742 = vmatprep.mubr.msk.f32.mxu0 %vm428_vm0, %v24209_v39  ;;  %v22332_v61 = vld [vmem:[%s32702_s9 + $0x50] sm:$0xff] }
 0x3c2   : > { %28191 = vmatmul.mubr.msk.f32.gmra.mrb[82].mxu1 %vm428_vm0, %v24202_v1  ;;  %29743 = vmatmul.mubr.msk.f32.gmra.mrb[82].mxu0 %vm428_vm0, %v24210_v47  ;;  %v24388_v1 = vld [vmem:[%s32702_s9 + $0xa0] sm:$0xff] }
 0x3c3   : > { %28193 = vmatprep.mubr.msk.f32.mxu1 %vm428_vm0, %v24203_v5  ;;  %29745 = vmatprep.mubr.msk.f32.mxu0 %vm428_vm0, %v24211_v59  ;;  %v22334_v5 = vld [vmem:[%s32702_s9 + $0x60] sm:$0xff] }
 0x3c6   : > { %28194 = vmatmul.mubr.msk.f32.gmra.mrb[84].mxu1 %vm428_vm0, %v24204_v9  ;;  %29746 = vmatmul.mubr.msk.f32.gmra.mrb[84].mxu0 %vm428_vm0, %v24212_v3  ;;  %v24390_v9 = vld [vmem:[%s32702_s9 + $0xb0] sm:$0xff] }
 0x3c7   : > { %28196 = vmatprep.mubr.msk.f32.mxu1 %vm428_vm0, %v24205_v13  ;;  %29748 = vmatprep.mubr.msk.f32.mxu0 %vm428_vm0, %v24213_v55  ;;  %v22335_v13 = vld [vmem:[%s32702_s9 + $0x68] sm:$0xff] }
 0x3ca   : > { %28197 = vmatmul.mubr.msk.f32.gmra.mrb[86].mxu1 %vm428_vm0, %v24206_v17  ;;  %29749 = vmatmul.mubr.msk.f32.gmra.mrb[86].mxu0 %vm428_vm0, %v24214_v63  ;;  %v24391_v17 = vld [vmem:[%s32702_s9 + $0xb8] sm:$0xff] }
 0x3cb   : > { %28199 = vmatprep.mubr.msk.f32.mxu1 %vm428_vm0, %v24207_v23  ;;  %29751 = vmatprep.mubr.msk.f32.mxu0 %vm428_vm0, %v24215_v11  ;;  %v24392_v23 = vld [vmem:[%s32702_s9 + $0xc8] sm:$0xff] }
 0x3ce   : > { %28200 = vmatmul.mubr.msk.f32.gmra.mrb[88].mxu1 %vm428_vm0, %v24208_v31  ;;  %29752 = vmatmul.mubr.msk.f32.gmra.mrb[88].mxu0 %vm428_vm0, %v24216_v27  ;;  %v24393_v31 = vld [vmem:[%s32702_s9 + $0xd0] sm:$0xff] }
 0x3cf   : > { %28202 = vmatprep.mubr.msk.f32.mxu1 %vm428_vm0, %v24209_v39  ;;  %29754 = vmatprep.mubr.msk.f32.mxu0 %vm428_vm0, %v24217_v19  ;;  %v24394_v39 = vld [vmem:[%s32702_s9 + $0xd8] sm:$0xff] }
 0x3d2   : > { %28203 = vmatmul.mubr.msk.f32.gmra.mrb[90].mxu1 %vm428_vm0, %v24210_v47  ;;  %29755 = vmatmul.mubr.msk.f32.gmra.mrb[90].mxu0 %vm428_vm0, %v24218_v35  ;;  %v24395_v47 = vld [vmem:[%s32702_s9 + $0xe0] sm:$0xff] }
 0x3d3   : > { %28205 = vmatprep.mubr.msk.f32.mxu1 %vm428_vm0, %v24211_v59  ;;  %29757 = vmatprep.mubr.msk.f32.mxu0 %vm428_vm0, %v24219_v43  ;;  %v24396_v59 = vld [vmem:[%s32702_s9 + $0xf0] sm:$0xff] }
 0x3d6   : > { %28206 = vmatmul.mubr.msk.f32.gmra.mrb[92].mxu1 %vm428_vm0, %v24212_v3  ;;  %29758 = vmatmul.mubr.msk.f32.gmra.mrb[92].mxu0 %vm428_vm0, %v24220_v20  ;;  %v24397_v3 = vld [vmem:[%s32702_s9 + $0xf8] sm:$0xff] }
 0x3d7   : > { %28208 = vmatprep.mubr.msk.f32.mxu1 %vm428_vm0, %v24213_v55  ;;  %29760 = vmatprep.mubr.msk.f32.mxu0 %vm428_vm0, %v24221_v51  ;;  %v24398_v55 = vld [vmem:[%s32702_s9 + $0x100] sm:$0xff] }
 0x3da   : > { %28209 = vmatmul.mubr.msk.f32.gmra.mrb[94].mxu1 %vm428_vm0, %v24214_v63  ;;  %29761 = vmatmul.mubr.msk.f32.gmra.mrb[94].mxu0 %vm428_vm0, %v24222_v22  ;;  %v24399_v63 = vld [vmem:[%s32702_s9 + $0x108] sm:$0xff] }
 0x3db   : > { %28211 = vmatprep.mubr.msk.f32.mxu1 %vm428_vm0, %v24215_v11  ;;  %29763 = vmatprep.mubr.msk.f32.mxu0 %vm428_vm0, %v24223_v15  ;;  %v24400_v11 = vld [vmem:[%s32702_s9 + $0x118] sm:$0xff] }
 0x3de   : > { %28212 = vmatmul.mubr.msk.f32.gmra.mrb[96].mxu1 %vm428_vm0, %v24216_v27  ;;  %29764 = vmatmul.mubr.msk.f32.gmra.mrb[96].mxu0 %vm428_vm0, %v24224_v24  ;;  %v24401_v27 = vld [vmem:[%s32702_s9 + $0x120] sm:$0xff] }
 0x3df   : > { %28214 = vmatprep.mubr.msk.f32.mxu1 %vm428_vm0, %v24217_v19  ;;  %29766 = vmatprep.mubr.msk.f32.mxu0 %vm428_vm0, %v24225_v7  ;;  %v24402_v19 = vld [vmem:[%s32702_s9 + $0x128] sm:$0xff] }
 0x3e2   : > { %28215 = vmatmul.mubr.msk.f32.gmra.mrb[98].mxu1 %vm428_vm0, %v24218_v35  ;;  %29767 = vmatmul.mubr.msk.f32.gmra.mrb[98].mxu0 %vm428_vm0, %v24226_v26  ;;  %v24403_v35 = vld [vmem:[%s32702_s9 + $0x130] sm:$0xff] }
 0x3e3   : > { %28217 = vmatprep.mubr.msk.f32.mxu1 %vm428_vm0, %v24219_v43  ;;  %29769 = vmatprep.mubr.msk.f32.mxu0 %vm428_vm0, %v24227_v28  ;;  %v24404_v43 = vld [vmem:[%s32702_s9 + $0x140] sm:$0xff] }
 0x3e6   : > { %28218 = vmatmul.mubr.msk.f32.gmra.mrb[100].mxu1 %vm428_vm0, %v24220_v20  ;;  %29770 = vmatmul.mubr.msk.f32.gmra.mrb[100].mxu0 %vm428_vm0, %v24228_v30  ;;  %v24405_v20 = vld [vmem:[%s32702_s9 + $0x148] sm:$0xff] }
 0x3e7   : > { %28220 = vmatprep.mubr.msk.f32.mxu1 %vm428_vm0, %v24221_v51  ;;  %29772 = vmatprep.mubr.msk.f32.mxu0 %vm428_vm0, %v24229_v32  ;;  %v24406_v51 = vld [vmem:[%s32702_s9 + $0x150] sm:$0xff] }
 0x3ea   : > { %28221 = vmatmul.mubr.msk.f32.gmra.mrb[102].mxu1 %vm428_vm0, %v24222_v22  ;;  %29773 = vmatmul.mubr.msk.f32.gmra.mrb[102].mxu0 %vm428_vm0, %v24230_v34  ;;  %v24407_v22 = vld [vmem:[%s32702_s9 + $0x158] sm:$0xff] }
 0x3eb   : > { %28223 = vmatprep.mubr.msk.f32.mxu1 %vm428_vm0, %v24223_v15  ;;  %29775 = vmatprep.mubr.msk.f32.mxu0 %vm428_vm0, %v24231_v36  ;;  %v24408_v15 = vld [vmem:[%s32702_s9 + $0x168] sm:$0xff] }
 0x3ee   : > { %28224 = vmatmul.mubr.msk.f32.gmra.mrb[104].mxu1 %vm428_vm0, %v24224_v24  ;;  %29776 = vmatmul.mubr.msk.f32.gmra.mrb[104].mxu0 %vm428_vm0, %v24232_v38  ;;  %v24409_v24 = vld [vmem:[%s32702_s9 + $0x170] sm:$0xff] }
 0x3ef   : > { %28226 = vmatprep.mubr.msk.f32.mxu1 %vm428_vm0, %v24225_v7  ;;  %29778 = vmatprep.mubr.msk.f32.mxu0 %vm428_vm0, %v24233_v40  ;;  %v24410_v7 = vld [vmem:[%s32702_s9 + $0x178] sm:$0xff] }
 0x3f2   : > { %28227 = vmatmul.mubr.msk.f32.gmra.mrb[106].mxu1 %vm428_vm0, %v24226_v26  ;;  %29779 = vmatmul.mubr.msk.f32.gmra.mrb[106].mxu0 %vm428_vm0, %v24234_v46  ;;  %v24411_v26 = vld [vmem:[%s32702_s9 + $0x180] sm:$0xff] }
 0x3f3   : > { %28229 = vmatprep.mubr.msk.f32.mxu1 %vm428_vm0, %v24227_v28  ;;  %29781 = vmatprep.mubr.msk.f32.mxu0 %vm428_vm0, %v24235_v48  ;;  %v24412_v28 = vld [vmem:[%s32702_s9 + $0x190] sm:$0xff] }
 0x3f6   : > { %28230 = vmatmul.mubr.msk.f32.gmra.mrb[108].mxu1 %vm428_vm0, %v24228_v30  ;;  %29782 = vmatmul.mubr.msk.f32.gmra.mrb[108].mxu0 %vm428_vm0, %v24236_v50  ;;  %v24413_v30 = vld [vmem:[%s32702_s9 + $0x198] sm:$0xff] }
 0x3f7   : > { %28232 = vmatprep.mubr.msk.f32.mxu1 %vm428_vm0, %v24229_v32  ;;  %29784 = vmatprep.mubr.msk.f32.mxu0 %vm428_vm0, %v24237_v52  ;;  %v24414_v32 = vld [vmem:[%s32702_s9 + $0x1a0] sm:$0xff] }
 0x3fa   : > { %28233 = vmatmul.mubr.msk.f32.gmra.mrb[110].mxu1 %vm428_vm0, %v24230_v34  ;;  %29785 = vmatmul.mubr.msk.f32.gmra.mrb[110].mxu0 %vm428_vm0, %v24238_v54  ;;  %v24415_v34 = vld [vmem:[%s32702_s9 + $0x1a8] sm:$0xff] }
 0x3fb   : > { %28235 = vmatprep.mubr.msk.f32.mxu1 %vm428_vm0, %v24231_v36  ;;  %29787 = vmatprep.mubr.msk.f32.mxu0 %vm428_vm0, %v24239_v56  ;;  %v24416_v36 = vld [vmem:[%s32702_s9 + $0x1b8] sm:$0xff] }
 0x3fe   : > { %28236 = vmatmul.mubr.msk.f32.gmra.mrb[112].mxu1 %vm428_vm0, %v24232_v38  ;;  %29788 = vmatmul.mubr.msk.f32.gmra.mrb[112].mxu0 %vm428_vm0, %v24240_v58  ;;  %v24417_v38 = vld [vmem:[%s32702_s9 + $0x1c0] sm:$0xff] }
 0x3ff   : > { %28238 = vmatprep.mubr.msk.f32.mxu1 %vm428_vm0, %v24233_v40  ;;  %29790 = vmatprep.mubr.msk.f32.mxu0 %vm428_vm0, %v24241_v60  ;;  %v24418_v40 = vld [vmem:[%s32702_s9 + $0x1c8] sm:$0xff] }
 0x402   : > { %28239 = vmatmul.mubr.msk.f32.gmra.mrb[114].mxu1 %vm428_vm0, %v24234_v46  ;;  %29791 = vmatmul.mubr.msk.f32.gmra.mrb[114].mxu0 %vm428_vm0, %v24242_v62  ;;  %v24419_v46 = vld [vmem:[%s32702_s9 + $0x1d0] sm:$0xff] }
 0x403   : > { %28241 = vmatprep.mubr.msk.f32.mxu1 %vm428_vm0, %v24235_v48  ;;  %29793 = vmatprep.mubr.msk.f32.mxu0 %vm428_vm0, %v24243_v0  ;;  %v24420_v48 = vld [vmem:[%s32702_s9 + $0x1e0] sm:$0xff] }
 0x406   : > { %28242 = vmatmul.mubr.msk.f32.gmra.mrb[116].mxu1 %vm428_vm0, %v24236_v50  ;;  %29794 = vmatmul.mubr.msk.f32.gmra.mrb[116].mxu0 %vm428_vm0, %v24244_v2  ;;  %v24421_v50 = vld [vmem:[%s32702_s9 + $0x1e8] sm:$0xff] }
 0x407   : > { %28244 = vmatprep.mubr.msk.f32.mxu1 %vm428_vm0, %v24237_v52  ;;  %29796 = vmatprep.mubr.msk.f32.mxu0 %vm428_vm0, %v24245_v4  ;;  %v24422_v52 = vld [vmem:[%s32702_s9 + $0x1f0] sm:$0xff] }
 0x40a   : > { %28245 = vmatmul.mubr.msk.f32.gmra.mrb[118].mxu1 %vm428_vm0, %v24238_v54  ;;  %29797 = vmatmul.mubr.msk.f32.gmra.mrb[118].mxu0 %vm428_vm0, %v24246_v6  ;;  %v24423_v54 = vld [vmem:[%s32702_s9 + $0x1f8] sm:$0xff] }
 0x40b   : > { %28247 = vmatprep.mubr.msk.f32.mxu1 %vm428_vm0, %v24239_v56  ;;  %29799 = vmatprep.mubr.msk.f32.mxu0 %vm428_vm0, %v24247_v8  ;;  %v24424_v56 = vld [vmem:[%s32702_s9 + $0x208] sm:$0xff]  ;;  %v24432_v8 = vld [vmem:[%s32702_s9 + $0x258] sm:$0xff] }
 0x40e   : > { %28248 = vmatmul.mubr.msk.f32.gmra.mrb[120].mxu1 %vm428_vm0, %v24240_v58  ;;  %29800 = vmatmul.mubr.msk.f32.gmra.mrb[120].mxu0 %vm428_vm0, %v24248_v10  ;;  %v24425_v58 = vld [vmem:[%s32702_s9 + $0x210] sm:$0xff]  ;;  %v24433_v10 = vld [vmem:[%s32702_s9 + $0x260] sm:$0xff] }
 0x40f   : > { %28250 = vmatprep.mubr.msk.f32.mxu1 %vm428_vm0, %v24241_v60  ;;  %29802 = vmatprep.mubr.msk.f32.mxu0 %vm428_vm0, %v24249_v12  ;;  %v24426_v60 = vld [vmem:[%s32702_s9 + $0x218] sm:$0xff]  ;;  %v24434_v12 = vld [vmem:[%s32702_s9 + $0x268] sm:$0xff] }
 0x412   : > { %28251 = vmatmul.mubr.msk.f32.gmra.mrb[122].mxu1 %vm428_vm0, %v24242_v62  ;;  %29803 = vmatmul.mubr.msk.f32.gmra.mrb[122].mxu0 %vm428_vm0, %v24250_v14  ;;  %v24427_v62 = vld [vmem:[%s32702_s9 + $0x220] sm:$0xff]  ;;  %v24435_v14 = vld [vmem:[%s32702_s9 + $0x270] sm:$0xff] }
 0x413   : > { %28253 = vmatprep.mubr.msk.f32.mxu1 %vm428_vm0, %v24243_v0  ;;  %29805 = vmatprep.mubr.msk.f32.mxu0 %vm428_vm0, %v24251_v16  ;;  %v24428_v0 = vld [vmem:[%s32702_s9 + $0x230] sm:$0xff]  ;;  %v24436_v16 = vld [vmem:[%s32702_s9 + $0x280] sm:$0xff] }
 0x416   : > { %28254 = vmatmul.mubr.msk.f32.gmra.mrb[124].mxu1 %vm428_vm0, %v24244_v2  ;;  %29806 = vmatmul.mubr.msk.f32.gmra.mrb[124].mxu0 %vm428_vm0, %v24252_v18  ;;  %v24429_v2 = vld [vmem:[%s32702_s9 + $0x238] sm:$0xff]  ;;  %v24437_v18 = vld [vmem:[%s32702_s9 + $0x288] sm:$0xff] }
 0x417   : > { %28256 = vmatprep.mubr.msk.f32.mxu1 %vm428_vm0, %v24245_v4  ;;  %29808 = vmatprep.mubr.msk.f32.mxu0 %vm428_vm0, %v24253_v21  ;;  %v24430_v4 = vld [vmem:[%s32702_s9 + $0x240] sm:$0xff]  ;;  %v24438_v21 = vld [vmem:[%s32702_s9 + $0x290] sm:$0xff] }
 0x41a   : > { %28257 = vmatmul.mubr.msk.f32.gmra.mrb[126].mxu1 %vm428_vm0, %v24246_v6  ;;  %29809 = vmatmul.mubr.msk.f32.gmra.mrb[126].mxu0 %vm428_vm0, %v24254_v25  ;;  %v24431_v6 = vld [vmem:[%s32702_s9 + $0x248] sm:$0xff]  ;;  %v24439_v25 = vld [vmem:[%s32702_s9 + $0x298] sm:$0xff] }
 0x41b   : > { %28261 = vmatprep.mubr.msk.f32.mxu1 %vm428_vm0, %v22328_v29  ;;  %29813 = vmatprep.mubr.msk.f32.mxu0 %vm428_vm0, %v24384_v33  ;;  %v24440_v29 = vld [vmem:[%s32702_s9 + $0x2a8] sm:$0xff] }
 0x41e   : > { %28262 = vmatmul.mubr.msk.f32.vlgmr.msra.gmra.mrb[0].mxu1 %vm428_vm0, %v22329_v37  ;;  %29814 = vmatmul.mubr.msk.f32.vlgmr.msra.gmra.mrb[0].mxu0 %vm428_vm0, %v24385_v41  ;;  %v24442_v37 = vld [vmem:[%s32702_s9 + $0x2b8] sm:$0xff] }
 0x41f   : > { %28454 = vmatpush3.msra.mxu1 %v34729_v42  ;;  %30006 = vmatpush3.msra.mxu0 %v34734_v44  ;;  %v22333_v42 = vld [vmem:[%s32702_s9 + $0x58] sm:$0xff]  ;;  %v24389_v44 = vld [vmem:[%s32702_s9 + $0xa8] sm:$0xff] }
 0x420   : > { %28264 = vmatprep.mubr.msk.f32.mxu1 %vm428_vm0, %v22330_v45  ;;  %29816 = vmatprep.mubr.msk.f32.mxu0 %vm428_vm0, %v24386_v49  ;;  %v24444_v45 = vld [vmem:[%s32702_s9 + $0x2d0] sm:$0xff] }
 0x422   : > { %28265 = vmatmul.mubr.msk.f32.gmra.mrb[2].mxu1 %vm428_vm0, %v22331_v53  ;;  %29817 = vmatmul.mubr.msk.f32.gmra.mrb[2].mxu0 %vm428_vm0, %v24387_v57  ;;  %v24446_v53 = vld [vmem:[%s32702_s9 + $0x2e0] sm:$0xff] }
 0x423   : > { %28267 = vmatprep.mubr.msk.f32.mxu1 %vm428_vm0, %v22332_v61  ;;  %29819 = vmatprep.mubr.msk.f32.mxu0 %vm428_vm0, %v24388_v1  ;;  %v24448_v61 = vld [vmem:[%s32702_s9 + $0x2f8] sm:$0xff] }
 0x426   : > { %28268 = vmatmul.mubr.msk.f32.gmra.mrb[4].mxu1 %vm428_vm0, %v22333_v42  ;;  %29820 = vmatmul.mubr.msk.f32.gmra.mrb[4].mxu0 %vm428_vm0, %v24389_v44  ;;  %v35135_v42 = vld [vmem:[%s36908_s1 + $0x30] sm:$0xff] }
 0x427   : > { %28270 = vmatprep.mubr.msk.f32.mxu1 %vm428_vm0, %v22334_v5  ;;  %29822 = vmatprep.mubr.msk.f32.mxu0 %vm428_vm0, %v24390_v9  ;;  %v24450_v5 = vld [vmem:[%s32702_s9 + $0x308] sm:$0xff] }
 0x428   : > { %28647 = vmatprep.subr.mxu1 %v35135_v42 }
 0x42a   : > { %28271 = vmatmul.mubr.msk.f32.gmra.mrb[6].mxu1 %vm428_vm0, %v22335_v13  ;;  %29823 = vmatmul.mubr.msk.f32.gmra.mrb[6].mxu0 %vm428_vm0, %v24391_v17  ;;  %v24452_v13 = vld [vmem:[%s32702_s9 + $0x320] sm:$0xff] }
 0x42b   : > { %28273 = vmatprep.mubr.msk.f32.mxu1 %vm428_vm0, %v24384_v33  ;;  %29825 = vmatprep.mubr.msk.f32.mxu0 %vm428_vm0, %v24392_v23  ;;  %v24441_v33 = vld [vmem:[%s32702_s9 + $0x2b0] sm:$0xff] }
 0x42e   : > { %28274 = vmatmul.mubr.msk.f32.gmra.mrb[8].mxu1 %vm428_vm0, %v24385_v41  ;;  %29826 = vmatmul.mubr.msk.f32.gmra.mrb[8].mxu0 %vm428_vm0, %v24393_v31  ;;  %v24443_v41 = vld [vmem:[%s32702_s9 + $0x2c0] sm:$0xff] }
 0x42f   : > { %28276 = vmatprep.mubr.msk.f32.mxu1 %vm428_vm0, %v24386_v49  ;;  %29828 = vmatprep.mubr.msk.f32.mxu0 %vm428_vm0, %v24394_v39  ;;  %v24445_v49 = vld [vmem:[%s32702_s9 + $0x2d8] sm:$0xff] }
 0x432   : > { %28277 = vmatmul.mubr.msk.f32.gmra.mrb[10].mxu1 %vm428_vm0, %v24387_v57  ;;  %29829 = vmatmul.mubr.msk.f32.gmra.mrb[10].mxu0 %vm428_vm0, %v24395_v47  ;;  %v24447_v57 = vld [vmem:[%s32702_s9 + $0x2e8] sm:$0xff] }
 0x433   : > { %28279 = vmatprep.mubr.msk.f32.mxu1 %vm428_vm0, %v24388_v1  ;;  %29831 = vmatprep.mubr.msk.f32.mxu0 %vm428_vm0, %v24396_v59  ;;  %v24449_v1 = vld [vmem:[%s32702_s9 + $0x300] sm:$0xff] }
 0x436   : > { %28280 = vmatmul.mubr.msk.f32.gmra.mrb[12].mxu1 %vm428_vm0, %v24389_v44  ;;  %29832 = vmatmul.mubr.msk.f32.gmra.mrb[12].mxu0 %vm428_vm0, %v24397_v3  ;;  %v35140_v44 = vld [vmem:[%s36908_s1 + $0x70] sm:$0xff] }
 0x437   : > { %28282 = vmatprep.mubr.msk.f32.mxu1 %vm428_vm0, %v24390_v9  ;;  %29834 = vmatprep.mubr.msk.f32.mxu0 %vm428_vm0, %v24398_v55  ;;  %v24451_v9 = vld [vmem:[%s32702_s9 + $0x310] sm:$0xff] }
 0x438   : > { %30199 = vmatprep.subr.mxu0 %v35140_v44 }
 0x43a   : > { %28283 = vmatmul.mubr.msk.f32.gmra.mrb[14].mxu1 %vm428_vm0, %v24391_v17  ;;  %29835 = vmatmul.mubr.msk.f32.gmra.mrb[14].mxu0 %vm428_vm0, %v24399_v63  ;;  %v24453_v17 = vld [vmem:[%s32702_s9 + $0x328] sm:$0xff] }
 0x43b   : > { %28285 = vmatprep.mubr.msk.f32.mxu1 %vm428_vm0, %v24392_v23  ;;  %29837 = vmatprep.mubr.msk.f32.mxu0 %vm428_vm0, %v24400_v11  ;;  %v24454_v23 = vld [vmem:[%s32702_s9 + $0x330] sm:$0xff] }
 0x43e   : > { %28286 = vmatmul.mubr.msk.f32.gmra.mrb[16].mxu1 %vm428_vm0, %v24393_v31  ;;  %29838 = vmatmul.mubr.msk.f32.gmra.mrb[16].mxu0 %vm428_vm0, %v24401_v27  ;;  %v24455_v31 = vld [vmem:[%s32702_s9 + $0x338] sm:$0xff] }
 0x43f   : > { %28288 = vmatprep.mubr.msk.f32.mxu1 %vm428_vm0, %v24394_v39  ;;  %29840 = vmatprep.mubr.msk.f32.mxu0 %vm428_vm0, %v24402_v19  ;;  %v24456_v39 = vld [vmem:[%s32702_s9 + $0x348] sm:$0xff] }
 0x442   : > { %28289 = vmatmul.mubr.msk.f32.gmra.mrb[18].mxu1 %vm428_vm0, %v24395_v47  ;;  %29841 = vmatmul.mubr.msk.f32.gmra.mrb[18].mxu0 %vm428_vm0, %v24403_v35  ;;  %v24457_v47 = vld [vmem:[%s32702_s9 + $0x350] sm:$0xff] }
 0x443   : > { %28291 = vmatprep.mubr.msk.f32.mxu1 %vm428_vm0, %v24396_v59  ;;  %29843 = vmatprep.mubr.msk.f32.mxu0 %vm428_vm0, %v24404_v43  ;;  %v24458_v59 = vld [vmem:[%s32702_s9 + $0x358] sm:$0xff] }
 0x446   : > { %28292 = vmatmul.mubr.msk.f32.gmra.mrb[20].mxu1 %vm428_vm0, %v24397_v3  ;;  %29844 = vmatmul.mubr.msk.f32.gmra.mrb[20].mxu0 %vm428_vm0, %v24405_v20  ;;  %v24459_v3 = vld [vmem:[%s32702_s9 + $0x360] sm:$0xff] }
 0x447   : > { %28294 = vmatprep.mubr.msk.f32.mxu1 %vm428_vm0, %v24398_v55  ;;  %29846 = vmatprep.mubr.msk.f32.mxu0 %vm428_vm0, %v24406_v51  ;;  %v24460_v55 = vld [vmem:[%s32702_s9 + $0x370] sm:$0xff] }
 0x44a   : > { %28295 = vmatmul.mubr.msk.f32.gmra.mrb[22].mxu1 %vm428_vm0, %v24399_v63  ;;  %29847 = vmatmul.mubr.msk.f32.gmra.mrb[22].mxu0 %vm428_vm0, %v24407_v22  ;;  %v24461_v63 = vld [vmem:[%s32702_s9 + $0x378] sm:$0xff] }
 0x44b   : > { %28297 = vmatprep.mubr.msk.f32.mxu1 %vm428_vm0, %v24400_v11  ;;  %29849 = vmatprep.mubr.msk.f32.mxu0 %vm428_vm0, %v24408_v15  ;;  %v24462_v11 = vld [vmem:[%s32702_s9 + $0x380] sm:$0xff] }
 0x44e   : > { %28298 = vmatmul.mubr.msk.f32.gmra.mrb[24].mxu1 %vm428_vm0, %v24401_v27  ;;  %29850 = vmatmul.mubr.msk.f32.gmra.mrb[24].mxu0 %vm428_vm0, %v24409_v24  ;;  %v24463_v27 = vld [vmem:[%s32702_s9 + $0x388] sm:$0xff] }
 0x44f   : > { %28300 = vmatprep.mubr.msk.f32.mxu1 %vm428_vm0, %v24402_v19  ;;  %29852 = vmatprep.mubr.msk.f32.mxu0 %vm428_vm0, %v24410_v7  ;;  %v24464_v19 = vld [vmem:[%s32702_s9 + $0x398] sm:$0xff] }
 0x452   : > { %28301 = vmatmul.mubr.msk.f32.gmra.mrb[26].mxu1 %vm428_vm0, %v24403_v35  ;;  %29853 = vmatmul.mubr.msk.f32.gmra.mrb[26].mxu0 %vm428_vm0, %v24411_v26  ;;  %v24465_v35 = vld [vmem:[%s32702_s9 + $0x3a0] sm:$0xff] }
 0x453   : > { %28303 = vmatprep.mubr.msk.f32.mxu1 %vm428_vm0, %v24404_v43  ;;  %29855 = vmatprep.mubr.msk.f32.mxu0 %vm428_vm0, %v24412_v28  ;;  %v24466_v43 = vld [vmem:[%s32702_s9 + $0x3a8] sm:$0xff] }
 0x456   : > { %28304 = vmatmul.mubr.msk.f32.gmra.mrb[28].mxu1 %vm428_vm0, %v24405_v20  ;;  %29856 = vmatmul.mubr.msk.f32.gmra.mrb[28].mxu0 %vm428_vm0, %v24413_v30  ;;  %v24467_v20 = vld [vmem:[%s32702_s9 + $0x3b0] sm:$0xff] }
 0x457   : > { %28306 = vmatprep.mubr.msk.f32.mxu1 %vm428_vm0, %v24406_v51  ;;  %29858 = vmatprep.mubr.msk.f32.mxu0 %vm428_vm0, %v24414_v32  ;;  %v24468_v51 = vld [vmem:[%s32702_s9 + $0x3c0] sm:$0xff] }
 0x45a   : > { %28307 = vmatmul.mubr.msk.f32.gmra.mrb[30].mxu1 %vm428_vm0, %v24407_v22  ;;  %29859 = vmatmul.mubr.msk.f32.gmra.mrb[30].mxu0 %vm428_vm0, %v24415_v34  ;;  %v24469_v22 = vld [vmem:[%s32702_s9 + $0x3c8] sm:$0xff] }
 0x45b   : > { %28309 = vmatprep.mubr.msk.f32.mxu1 %vm428_vm0, %v24408_v15  ;;  %29861 = vmatprep.mubr.msk.f32.mxu0 %vm428_vm0, %v24416_v36  ;;  %v24470_v15 = vld [vmem:[%s32702_s9 + $0x3d0] sm:$0xff] }
 0x45e   : > { %28310 = vmatmul.mubr.msk.f32.gmra.mrb[32].mxu1 %vm428_vm0, %v24409_v24  ;;  %29862 = vmatmul.mubr.msk.f32.gmra.mrb[32].mxu0 %vm428_vm0, %v24417_v38  ;;  %v24471_v24 = vld [vmem:[%s32702_s9 + $0x3d8] sm:$0xff] }
 0x45f   : > { %28312 = vmatprep.mubr.msk.f32.mxu1 %vm428_vm0, %v24410_v7  ;;  %29864 = vmatprep.mubr.msk.f32.mxu0 %vm428_vm0, %v24418_v40  ;;  %v24472_v7 = vld [vmem:[%s32702_s9 + $0x3e8] sm:$0xff] }
 0x462   : > { %28313 = vmatmul.mubr.msk.f32.gmra.mrb[34].mxu1 %vm428_vm0, %v24411_v26  ;;  %29865 = vmatmul.mubr.msk.f32.gmra.mrb[34].mxu0 %vm428_vm0, %v24419_v46  ;;  %v24473_v26 = vld [vmem:[%s32702_s9 + $0x3f0] sm:$0xff] }
 0x463   : > { %28315 = vmatprep.mubr.msk.f32.mxu1 %vm428_vm0, %v24412_v28  ;;  %29867 = vmatprep.mubr.msk.f32.mxu0 %vm428_vm0, %v24420_v48  ;;  %v24474_v28 = vld [vmem:[%s32702_s9 + $0x3f8] sm:$0xff] }
 0x466   : > { %28316 = vmatmul.mubr.msk.f32.gmra.mrb[36].mxu1 %vm428_vm0, %v24413_v30  ;;  %29868 = vmatmul.mubr.msk.f32.gmra.mrb[36].mxu0 %vm428_vm0, %v24421_v50  ;;  %v24475_v30 = vld [vmem:[%s32702_s9 + $0x400] sm:$0xff] }
 0x467   : > { %28318 = vmatprep.mubr.msk.f32.mxu1 %vm428_vm0, %v24414_v32  ;;  %29870 = vmatprep.mubr.msk.f32.mxu0 %vm428_vm0, %v24422_v52  ;;  %v24476_v32 = vld [vmem:[%s32702_s9 + $0x410] sm:$0xff] }
 0x46a   : > { %28319 = vmatmul.mubr.msk.f32.gmra.mrb[38].mxu1 %vm428_vm0, %v24415_v34  ;;  %29871 = vmatmul.mubr.msk.f32.gmra.mrb[38].mxu0 %vm428_vm0, %v24423_v54  ;;  %v24477_v34 = vld [vmem:[%s32702_s9 + $0x418] sm:$0xff] }
 0x46b   : > { %28321 = vmatprep.mubr.msk.f32.mxu1 %vm428_vm0, %v24416_v36  ;;  %29873 = vmatprep.mubr.msk.f32.mxu0 %vm428_vm0, %v24424_v56  ;;  %v24478_v36 = vld [vmem:[%s32702_s9 + $0x420] sm:$0xff] }
 0x46e   : > { %28322 = vmatmul.mubr.msk.f32.gmra.mrb[40].mxu1 %vm428_vm0, %v24417_v38  ;;  %29874 = vmatmul.mubr.msk.f32.gmra.mrb[40].mxu0 %vm428_vm0, %v24425_v58  ;;  %v24479_v38 = vld [vmem:[%s32702_s9 + $0x428] sm:$0xff] }
 0x46f   : > { %28324 = vmatprep.mubr.msk.f32.mxu1 %vm428_vm0, %v24418_v40  ;;  %29876 = vmatprep.mubr.msk.f32.mxu0 %vm428_vm0, %v24426_v60  ;;  %v24480_v40 = vld [vmem:[%s32702_s9 + $0x438] sm:$0xff] }
 0x472   : > { %28325 = vmatmul.mubr.msk.f32.gmra.mrb[42].mxu1 %vm428_vm0, %v24419_v46  ;;  %29877 = vmatmul.mubr.msk.f32.gmra.mrb[42].mxu0 %vm428_vm0, %v24427_v62  ;;  %v24481_v46 = vld [vmem:[%s32702_s9 + $0x440] sm:$0xff] }
 0x473   : > { %28327 = vmatprep.mubr.msk.f32.mxu1 %vm428_vm0, %v24420_v48  ;;  %29879 = vmatprep.mubr.msk.f32.mxu0 %vm428_vm0, %v24428_v0  ;;  %v24482_v48 = vld [vmem:[%s32702_s9 + $0x448] sm:$0xff] }
 0x476   : > { %28328 = vmatmul.mubr.msk.f32.gmra.mrb[44].mxu1 %vm428_vm0, %v24421_v50  ;;  %29880 = vmatmul.mubr.msk.f32.gmra.mrb[44].mxu0 %vm428_vm0, %v24429_v2  ;;  %v24483_v50 = vld [vmem:[%s32702_s9 + $0x450] sm:$0xff] }
 0x477   : > { %28330 = vmatprep.mubr.msk.f32.mxu1 %vm428_vm0, %v24422_v52  ;;  %29882 = vmatprep.mubr.msk.f32.mxu0 %vm428_vm0, %v24430_v4  ;;  %v24484_v52 = vld [vmem:[%s32702_s9 + $0x460] sm:$0xff] }
 0x47a   : > { %28331 = vmatmul.mubr.msk.f32.gmra.mrb[46].mxu1 %vm428_vm0, %v24423_v54  ;;  %29883 = vmatmul.mubr.msk.f32.gmra.mrb[46].mxu0 %vm428_vm0, %v24431_v6  ;;  %v24485_v54 = vld [vmem:[%s32702_s9 + $0x468] sm:$0xff] }
 0x47b   : > { %28333 = vmatprep.mubr.msk.f32.mxu1 %vm428_vm0, %v24424_v56  ;;  %29885 = vmatprep.mubr.msk.f32.mxu0 %vm428_vm0, %v24432_v8  ;;  %v24486_v56 = vld [vmem:[%s32702_s9 + $0x470] sm:$0xff] }
 0x47e   : > { %28334 = vmatmul.mubr.msk.f32.gmra.mrb[48].mxu1 %vm428_vm0, %v24425_v58  ;;  %29886 = vmatmul.mubr.msk.f32.gmra.mrb[48].mxu0 %vm428_vm0, %v24433_v10  ;;  %v24487_v58 = vld [vmem:[%s32702_s9 + $0x478] sm:$0xff] }
 0x47f   : > { %28336 = vmatprep.mubr.msk.f32.mxu1 %vm428_vm0, %v24426_v60  ;;  %29888 = vmatprep.mubr.msk.f32.mxu0 %vm428_vm0, %v24434_v12  ;;  %v24488_v60 = vld [vmem:[%s32702_s9 + $0x488] sm:$0xff] }
 0x482   : > { %28337 = vmatmul.mubr.msk.f32.gmra.mrb[50].mxu1 %vm428_vm0, %v24427_v62  ;;  %29889 = vmatmul.mubr.msk.f32.gmra.mrb[50].mxu0 %vm428_vm0, %v24435_v14  ;;  %v24489_v62 = vld [vmem:[%s32702_s9 + $0x490] sm:$0xff] }
 0x483   : > { %28339 = vmatprep.mubr.msk.f32.mxu1 %vm428_vm0, %v24428_v0  ;;  %29891 = vmatprep.mubr.msk.f32.mxu0 %vm428_vm0, %v24436_v16  ;;  %v24490_v0 = vld [vmem:[%s32702_s9 + $0x498] sm:$0xff] }
 0x486   : > { %28340 = vmatmul.mubr.msk.f32.gmra.mrb[52].mxu1 %vm428_vm0, %v24429_v2  ;;  %29892 = vmatmul.mubr.msk.f32.gmra.mrb[52].mxu0 %vm428_vm0, %v24437_v18  ;;  %v24491_v2 = vld [vmem:[%s32702_s9 + $0x4a0] sm:$0xff] }
 0x487   : > { %28342 = vmatprep.mubr.msk.f32.mxu1 %vm428_vm0, %v24430_v4  ;;  %29894 = vmatprep.mubr.msk.f32.mxu0 %vm428_vm0, %v24438_v21  ;;  %v24492_v4 = vld [vmem:[%s32702_s9 + $0x4b0] sm:$0xff] }
 0x48a   : > { %28343 = vmatmul.mubr.msk.f32.gmra.mrb[54].mxu1 %vm428_vm0, %v24431_v6  ;;  %29895 = vmatmul.mubr.msk.f32.gmra.mrb[54].mxu0 %vm428_vm0, %v24439_v25  ;;  %v24493_v6 = vld [vmem:[%s32702_s9 + $0x4b8] sm:$0xff] }
 0x48b   : > { %28345 = vmatprep.mubr.msk.f32.mxu1 %vm428_vm0, %v24432_v8  ;;  %29897 = vmatprep.mubr.msk.f32.mxu0 %vm428_vm0, %v24440_v29  ;;  %v24494_v8 = vld [vmem:[%s32702_s9 + $0x4c0] sm:$0xff] }
 0x48e   : > { %28346 = vmatmul.mubr.msk.f32.gmra.mrb[56].mxu1 %vm428_vm0, %v24433_v10  ;;  %29898 = vmatmul.mubr.msk.f32.gmra.mrb[56].mxu0 %vm428_vm0, %v24441_v33  ;;  %v24495_v10 = vld [vmem:[%s32702_s9 + $0x4c8] sm:$0xff] }
 0x48f   : > { %28348 = vmatprep.mubr.msk.f32.mxu1 %vm428_vm0, %v24434_v12  ;;  %29900 = vmatprep.mubr.msk.f32.mxu0 %vm428_vm0, %v24442_v37  ;;  %v24496_v12 = vld [vmem:[%s32702_s9 + $0x4d8] sm:$0xff] }
 0x492   : > { %28349 = vmatmul.mubr.msk.f32.gmra.mrb[58].mxu1 %vm428_vm0, %v24435_v14  ;;  %29901 = vmatmul.mubr.msk.f32.gmra.mrb[58].mxu0 %vm428_vm0, %v24443_v41  ;;  %v24497_v14 = vld [vmem:[%s32702_s9 + $0x4e0] sm:$0xff] }
 0x493   : > { %28351 = vmatprep.mubr.msk.f32.mxu1 %vm428_vm0, %v24436_v16  ;;  %29903 = vmatprep.mubr.msk.f32.mxu0 %vm428_vm0, %v24444_v45  ;;  %v24498_v16 = vld [vmem:[%s32702_s9 + $0x4e8] sm:$0xff] }
 0x496   : > { %28352 = vmatmul.mubr.msk.f32.gmra.mrb[60].mxu1 %vm428_vm0, %v24437_v18  ;;  %29904 = vmatmul.mubr.msk.f32.gmra.mrb[60].mxu0 %vm428_vm0, %v24445_v49  ;;  %v24499_v18 = vld [vmem:[%s32702_s9 + $0x4f0] sm:$0xff] }
 0x497   : > { %28354 = vmatprep.mubr.msk.f32.mxu1 %vm428_vm0, %v24438_v21  ;;  %29906 = vmatprep.mubr.msk.f32.mxu0 %vm428_vm0, %v24446_v53  ;;  %v24500_v21 = vld [vmem:[%s32702_s9 + $0x500] sm:$0xff] }
 0x49a   : > { %28355 = vmatmul.mubr.msk.f32.gmra.mrb[62].mxu1 %vm428_vm0, %v24439_v25  ;;  %29907 = vmatmul.mubr.msk.f32.gmra.mrb[62].mxu0 %vm428_vm0, %v24447_v57  ;;  %v24501_v25 = vld [vmem:[%s32702_s9 + $0x508] sm:$0xff] }
 0x49b   : > { %28357 = vmatprep.mubr.msk.f32.mxu1 %vm428_vm0, %v24440_v29  ;;  %29909 = vmatprep.mubr.msk.f32.mxu0 %vm428_vm0, %v24448_v61  ;;  %v24502_v29 = vld [vmem:[%s32702_s9 + $0x510] sm:$0xff] }
 0x49e   : > { %28358 = vmatmul.mubr.msk.f32.gmra.mrb[64].mxu1 %vm428_vm0, %v24441_v33  ;;  %29910 = vmatmul.mubr.msk.f32.gmra.mrb[64].mxu0 %vm428_vm0, %v24449_v1  ;;  %v24503_v33 = vld [vmem:[%s32702_s9 + $0x518] sm:$0xff] }
 0x49f   : > { %28360 = vmatprep.mubr.msk.f32.mxu1 %vm428_vm0, %v24442_v37  ;;  %29912 = vmatprep.mubr.msk.f32.mxu0 %vm428_vm0, %v24450_v5  ;;  %v24504_v37 = vld [vmem:[%s32702_s9 + $0x528] sm:$0xff] }
 0x4a2   : > { %28361 = vmatmul.mubr.msk.f32.gmra.mrb[66].mxu1 %vm428_vm0, %v24443_v41  ;;  %29913 = vmatmul.mubr.msk.f32.gmra.mrb[66].mxu0 %vm428_vm0, %v24451_v9  ;;  %v24505_v41 = vld [vmem:[%s32702_s9 + $0x530] sm:$0xff] }
 0x4a3   : > { %28363 = vmatprep.mubr.msk.f32.mxu1 %vm428_vm0, %v24444_v45  ;;  %29915 = vmatprep.mubr.msk.f32.mxu0 %vm428_vm0, %v24452_v13  ;;  %v24506_v45 = vld [vmem:[%s32702_s9 + $0x538] sm:$0xff] }
 0x4a6   : > { %28364 = vmatmul.mubr.msk.f32.gmra.mrb[68].mxu1 %vm428_vm0, %v24445_v49  ;;  %29916 = vmatmul.mubr.msk.f32.gmra.mrb[68].mxu0 %vm428_vm0, %v24453_v17  ;;  %v24507_v49 = vld [vmem:[%s32702_s9 + $0x540] sm:$0xff] }
 0x4a7   : > { %28366 = vmatprep.mubr.msk.f32.mxu1 %vm428_vm0, %v24446_v53  ;;  %29918 = vmatprep.mubr.msk.f32.mxu0 %vm428_vm0, %v24454_v23  ;;  %v24508_v53 = vld [vmem:[%s32702_s9 + $0x550] sm:$0xff] }
 0x4aa   : > { %28367 = vmatmul.mubr.msk.f32.gmra.mrb[70].mxu1 %vm428_vm0, %v24447_v57  ;;  %29919 = vmatmul.mubr.msk.f32.gmra.mrb[70].mxu0 %vm428_vm0, %v24455_v31  ;;  %v24509_v57 = vld [vmem:[%s32702_s9 + $0x558] sm:$0xff] }
 0x4ab   : > { %28369 = vmatprep.mubr.msk.f32.mxu1 %vm428_vm0, %v24448_v61  ;;  %29921 = vmatprep.mubr.msk.f32.mxu0 %vm428_vm0, %v24456_v39  ;;  %v24510_v61 = vld [vmem:[%s32702_s9 + $0x560] sm:$0xff] }
 0x4ae   : > { %28370 = vmatmul.mubr.msk.f32.gmra.mrb[72].mxu1 %vm428_vm0, %v24449_v1  ;;  %29922 = vmatmul.mubr.msk.f32.gmra.mrb[72].mxu0 %vm428_vm0, %v24457_v47  ;;  %v24511_v1 = vld [vmem:[%s32702_s9 + $0x568] sm:$0xff] }
 0x4af   : > { %28372 = vmatprep.mubr.msk.f32.mxu1 %vm428_vm0, %v24450_v5  ;;  %29924 = vmatprep.mubr.msk.f32.mxu0 %vm428_vm0, %v24458_v59  ;;  %v22585_v5 = vld [vmem:[%s32702_s9 + $0x29] sm:$0xff] }
 0x4b2   : > { %28373 = vmatmul.mubr.msk.f32.gmra.mrb[74].mxu1 %vm428_vm0, %v24451_v9  ;;  %29925 = vmatmul.mubr.msk.f32.gmra.mrb[74].mxu0 %vm428_vm0, %v24459_v3  ;;  %v24641_v9 = vld [vmem:[%s32702_s9 + $0x79] sm:$0xff] }
 0x4b3   : > { %28375 = vmatprep.mubr.msk.f32.mxu1 %vm428_vm0, %v24452_v13  ;;  %29927 = vmatprep.mubr.msk.f32.mxu0 %vm428_vm0, %v24460_v55  ;;  %v22586_v13 = vld [vmem:[%s32702_s9 + $0x31] sm:$0xff] }
 0x4b6   : > { %28376 = vmatmul.mubr.msk.f32.gmra.mrb[76].mxu1 %vm428_vm0, %v24453_v17  ;;  %29928 = vmatmul.mubr.msk.f32.gmra.mrb[76].mxu0 %vm428_vm0, %v24461_v63  ;;  %v24642_v17 = vld [vmem:[%s32702_s9 + $0x81] sm:$0xff] }
 0x4b7   : > { %28378 = vmatprep.mubr.msk.f32.mxu1 %vm428_vm0, %v24454_v23  ;;  %29930 = vmatprep.mubr.msk.f32.mxu0 %vm428_vm0, %v24462_v11  ;;  %v22587_v23 = vld [vmem:[%s32702_s9 + $0x39] sm:$0xff] }
 0x4ba   : > { %28379 = vmatmul.mubr.msk.f32.gmra.mrb[78].mxu1 %vm428_vm0, %v24455_v31  ;;  %29931 = vmatmul.mubr.msk.f32.gmra.mrb[78].mxu0 %vm428_vm0, %v24463_v27  ;;  %v24643_v31 = vld [vmem:[%s32702_s9 + $0x89] sm:$0xff] }
 0x4bb   : > { %28381 = vmatprep.mubr.msk.f32.mxu1 %vm428_vm0, %v24456_v39  ;;  %29933 = vmatprep.mubr.msk.f32.mxu0 %vm428_vm0, %v24464_v19  ;;  %v22588_v39 = vld [vmem:[%s32702_s9 + $0x41] sm:$0xff] }
 0x4be   : > { %28382 = vmatmul.mubr.msk.f32.gmra.mrb[80].mxu1 %vm428_vm0, %v24457_v47  ;;  %29934 = vmatmul.mubr.msk.f32.gmra.mrb[80].mxu0 %vm428_vm0, %v24465_v35  ;;  %v24644_v47 = vld [vmem:[%s32702_s9 + $0x91] sm:$0xff] }
 0x4bf   : > { %28384 = vmatprep.mubr.msk.f32.mxu1 %vm428_vm0, %v24458_v59  ;;  %29936 = vmatprep.mubr.msk.f32.mxu0 %vm428_vm0, %v24466_v43  ;;  %v22589_v59 = vld [vmem:[%s32702_s9 + $0x51] sm:$0xff] }
 0x4c2   : > { %28385 = vmatmul.mubr.msk.f32.gmra.mrb[82].mxu1 %vm428_vm0, %v24459_v3  ;;  %29937 = vmatmul.mubr.msk.f32.gmra.mrb[82].mxu0 %vm428_vm0, %v24467_v20  ;;  %v24645_v3 = vld [vmem:[%s32702_s9 + $0xa1] sm:$0xff] }
 0x4c3   : > { %28387 = vmatprep.mubr.msk.f32.mxu1 %vm428_vm0, %v24460_v55  ;;  %29939 = vmatprep.mubr.msk.f32.mxu0 %vm428_vm0, %v24468_v51  ;;  %v22591_v55 = vld [vmem:[%s32702_s9 + $0x61] sm:$0xff] }
 0x4c6   : > { %28388 = vmatmul.mubr.msk.f32.gmra.mrb[84].mxu1 %vm428_vm0, %v24461_v63  ;;  %29940 = vmatmul.mubr.msk.f32.gmra.mrb[84].mxu0 %vm428_vm0, %v24469_v22  ;;  %v24647_v63 = vld [vmem:[%s32702_s9 + $0xb1] sm:$0xff] }
 0x4c7   : > { %28390 = vmatprep.mubr.msk.f32.mxu1 %vm428_vm0, %v24462_v11  ;;  %29942 = vmatprep.mubr.msk.f32.mxu0 %vm428_vm0, %v24470_v15  ;;  %v22592_v11 = vld [vmem:[%s32702_s9 + $0x69] sm:$0xff] }
 0x4ca   : > { %28391 = vmatmul.mubr.msk.f32.gmra.mrb[86].mxu1 %vm428_vm0, %v24463_v27  ;;  %29943 = vmatmul.mubr.msk.f32.gmra.mrb[86].mxu0 %vm428_vm0, %v24471_v24  ;;  %v24648_v27 = vld [vmem:[%s32702_s9 + $0xb9] sm:$0xff] }
 0x4cb   : > { %28393 = vmatprep.mubr.msk.f32.mxu1 %vm428_vm0, %v24464_v19  ;;  %29945 = vmatprep.mubr.msk.f32.mxu0 %vm428_vm0, %v24472_v7  ;;  %v24649_v19 = vld [vmem:[%s32702_s9 + $0xc9] sm:$0xff] }
 0x4ce   : > { %28394 = vmatmul.mubr.msk.f32.gmra.mrb[88].mxu1 %vm428_vm0, %v24465_v35  ;;  %29946 = vmatmul.mubr.msk.f32.gmra.mrb[88].mxu0 %vm428_vm0, %v24473_v26  ;;  %v24650_v35 = vld [vmem:[%s32702_s9 + $0xd1] sm:$0xff] }
 0x4cf   : > { %28396 = vmatprep.mubr.msk.f32.mxu1 %vm428_vm0, %v24466_v43  ;;  %29948 = vmatprep.mubr.msk.f32.mxu0 %vm428_vm0, %v24474_v28  ;;  %v24651_v43 = vld [vmem:[%s32702_s9 + $0xd9] sm:$0xff] }
 0x4d2   : > { %28397 = vmatmul.mubr.msk.f32.gmra.mrb[90].mxu1 %vm428_vm0, %v24467_v20  ;;  %29949 = vmatmul.mubr.msk.f32.gmra.mrb[90].mxu0 %vm428_vm0, %v24475_v30  ;;  %v24652_v20 = vld [vmem:[%s32702_s9 + $0xe1] sm:$0xff] }
 0x4d3   : > { %28399 = vmatprep.mubr.msk.f32.mxu1 %vm428_vm0, %v24468_v51  ;;  %29951 = vmatprep.mubr.msk.f32.mxu0 %vm428_vm0, %v24476_v32  ;;  %v24653_v51 = vld [vmem:[%s32702_s9 + $0xf1] sm:$0xff] }
 0x4d6   : > { %28400 = vmatmul.mubr.msk.f32.gmra.mrb[92].mxu1 %vm428_vm0, %v24469_v22  ;;  %29952 = vmatmul.mubr.msk.f32.gmra.mrb[92].mxu0 %vm428_vm0, %v24477_v34  ;;  %v24654_v22 = vld [vmem:[%s32702_s9 + $0xf9] sm:$0xff] }
 0x4d7   : > { %28402 = vmatprep.mubr.msk.f32.mxu1 %vm428_vm0, %v24470_v15  ;;  %29954 = vmatprep.mubr.msk.f32.mxu0 %vm428_vm0, %v24478_v36  ;;  %v24655_v15 = vld [vmem:[%s32702_s9 + $0x101] sm:$0xff] }
 0x4da   : > { %28403 = vmatmul.mubr.msk.f32.gmra.mrb[94].mxu1 %vm428_vm0, %v24471_v24  ;;  %29955 = vmatmul.mubr.msk.f32.gmra.mrb[94].mxu0 %vm428_vm0, %v24479_v38  ;;  %v24656_v24 = vld [vmem:[%s32702_s9 + $0x109] sm:$0xff] }
 0x4db   : > { %28405 = vmatprep.mubr.msk.f32.mxu1 %vm428_vm0, %v24472_v7  ;;  %29957 = vmatprep.mubr.msk.f32.mxu0 %vm428_vm0, %v24480_v40  ;;  %v24657_v7 = vld [vmem:[%s32702_s9 + $0x119] sm:$0xff] }
 0x4de   : > { %28406 = vmatmul.mubr.msk.f32.gmra.mrb[96].mxu1 %vm428_vm0, %v24473_v26  ;;  %29958 = vmatmul.mubr.msk.f32.gmra.mrb[96].mxu0 %vm428_vm0, %v24481_v46  ;;  %v24658_v26 = vld [vmem:[%s32702_s9 + $0x121] sm:$0xff] }
 0x4df   : > { %28408 = vmatprep.mubr.msk.f32.mxu1 %vm428_vm0, %v24474_v28  ;;  %29960 = vmatprep.mubr.msk.f32.mxu0 %vm428_vm0, %v24482_v48  ;;  %v24659_v28 = vld [vmem:[%s32702_s9 + $0x129] sm:$0xff] }
 0x4e2   : > { %28409 = vmatmul.mubr.msk.f32.gmra.mrb[98].mxu1 %vm428_vm0, %v24475_v30  ;;  %29961 = vmatmul.mubr.msk.f32.gmra.mrb[98].mxu0 %vm428_vm0, %v24483_v50  ;;  %v24660_v30 = vld [vmem:[%s32702_s9 + $0x131] sm:$0xff] }
 0x4e3   : > { %28411 = vmatprep.mubr.msk.f32.mxu1 %vm428_vm0, %v24476_v32  ;;  %29963 = vmatprep.mubr.msk.f32.mxu0 %vm428_vm0, %v24484_v52  ;;  %v24661_v32 = vld [vmem:[%s32702_s9 + $0x141] sm:$0xff] }
 0x4e6   : > { %28412 = vmatmul.mubr.msk.f32.gmra.mrb[100].mxu1 %vm428_vm0, %v24477_v34  ;;  %29964 = vmatmul.mubr.msk.f32.gmra.mrb[100].mxu0 %vm428_vm0, %v24485_v54  ;;  %v24662_v34 = vld [vmem:[%s32702_s9 + $0x149] sm:$0xff] }
 0x4e7   : > { %28414 = vmatprep.mubr.msk.f32.mxu1 %vm428_vm0, %v24478_v36  ;;  %29966 = vmatprep.mubr.msk.f32.mxu0 %vm428_vm0, %v24486_v56  ;;  %v24663_v36 = vld [vmem:[%s32702_s9 + $0x151] sm:$0xff] }
 0x4ea   : > { %28415 = vmatmul.mubr.msk.f32.gmra.mrb[102].mxu1 %vm428_vm0, %v24479_v38  ;;  %29967 = vmatmul.mubr.msk.f32.gmra.mrb[102].mxu0 %vm428_vm0, %v24487_v58  ;;  %v24664_v38 = vld [vmem:[%s32702_s9 + $0x159] sm:$0xff] }
 0x4eb   : > { %28417 = vmatprep.mubr.msk.f32.mxu1 %vm428_vm0, %v24480_v40  ;;  %29969 = vmatprep.mubr.msk.f32.mxu0 %vm428_vm0, %v24488_v60  ;;  %v24665_v40 = vld [vmem:[%s32702_s9 + $0x169] sm:$0xff] }
 0x4ee   : > { %28418 = vmatmul.mubr.msk.f32.gmra.mrb[104].mxu1 %vm428_vm0, %v24481_v46  ;;  %29970 = vmatmul.mubr.msk.f32.gmra.mrb[104].mxu0 %vm428_vm0, %v24489_v62  ;;  %v24666_v46 = vld [vmem:[%s32702_s9 + $0x171] sm:$0xff] }
 0x4ef   : > { %28420 = vmatprep.mubr.msk.f32.mxu1 %vm428_vm0, %v24482_v48  ;;  %29972 = vmatprep.mubr.msk.f32.mxu0 %vm428_vm0, %v24490_v0  ;;  %v24667_v48 = vld [vmem:[%s32702_s9 + $0x179] sm:$0xff] }
 0x4f2   : > { %28421 = vmatmul.mubr.msk.f32.gmra.mrb[106].mxu1 %vm428_vm0, %v24483_v50  ;;  %29973 = vmatmul.mubr.msk.f32.gmra.mrb[106].mxu0 %vm428_vm0, %v24491_v2  ;;  %v24668_v50 = vld [vmem:[%s32702_s9 + $0x181] sm:$0xff] }
 0x4f3   : > { %28423 = vmatprep.mubr.msk.f32.mxu1 %vm428_vm0, %v24484_v52  ;;  %29975 = vmatprep.mubr.msk.f32.mxu0 %vm428_vm0, %v24492_v4  ;;  %v24669_v52 = vld [vmem:[%s32702_s9 + $0x191] sm:$0xff] }
 0x4f6   : > { %28424 = vmatmul.mubr.msk.f32.gmra.mrb[108].mxu1 %vm428_vm0, %v24485_v54  ;;  %29976 = vmatmul.mubr.msk.f32.gmra.mrb[108].mxu0 %vm428_vm0, %v24493_v6  ;;  %v24670_v54 = vld [vmem:[%s32702_s9 + $0x199] sm:$0xff] }
 0x4f7   : > { %28426 = vmatprep.mubr.msk.f32.mxu1 %vm428_vm0, %v24486_v56  ;;  %29978 = vmatprep.mubr.msk.f32.mxu0 %vm428_vm0, %v24494_v8  ;;  %v24671_v56 = vld [vmem:[%s32702_s9 + $0x1a1] sm:$0xff] }
 0x4fa   : > { %28427 = vmatmul.mubr.msk.f32.gmra.mrb[110].mxu1 %vm428_vm0, %v24487_v58  ;;  %29979 = vmatmul.mubr.msk.f32.gmra.mrb[110].mxu0 %vm428_vm0, %v24495_v10  ;;  %v24672_v58 = vld [vmem:[%s32702_s9 + $0x1a9] sm:$0xff] }
 0x4fb   : > { %28429 = vmatprep.mubr.msk.f32.mxu1 %vm428_vm0, %v24488_v60  ;;  %29981 = vmatprep.mubr.msk.f32.mxu0 %vm428_vm0, %v24496_v12  ;;  %v24673_v60 = vld [vmem:[%s32702_s9 + $0x1b9] sm:$0xff] }
 0x4fe   : > { %28430 = vmatmul.mubr.msk.f32.gmra.mrb[112].mxu1 %vm428_vm0, %v24489_v62  ;;  %29982 = vmatmul.mubr.msk.f32.gmra.mrb[112].mxu0 %vm428_vm0, %v24497_v14  ;;  %v24674_v62 = vld [vmem:[%s32702_s9 + $0x1c1] sm:$0xff] }
 0x4ff   : > { %28432 = vmatprep.mubr.msk.f32.mxu1 %vm428_vm0, %v24490_v0  ;;  %29984 = vmatprep.mubr.msk.f32.mxu0 %vm428_vm0, %v24498_v16  ;;  %v24675_v0 = vld [vmem:[%s32702_s9 + $0x1c9] sm:$0xff] }
 0x502   : > { %28433 = vmatmul.mubr.msk.f32.gmra.mrb[114].mxu1 %vm428_vm0, %v24491_v2  ;;  %29985 = vmatmul.mubr.msk.f32.gmra.mrb[114].mxu0 %vm428_vm0, %v24499_v18  ;;  %v24676_v2 = vld [vmem:[%s32702_s9 + $0x1d1] sm:$0xff] }
 0x503   : > { %28435 = vmatprep.mubr.msk.f32.mxu1 %vm428_vm0, %v24492_v4  ;;  %29987 = vmatprep.mubr.msk.f32.mxu0 %vm428_vm0, %v24500_v21  ;;  %v24677_v4 = vld [vmem:[%s32702_s9 + $0x1e1] sm:$0xff] }
 0x506   : > { %28436 = vmatmul.mubr.msk.f32.gmra.mrb[116].mxu1 %vm428_vm0, %v24493_v6  ;;  %29988 = vmatmul.mubr.msk.f32.gmra.mrb[116].mxu0 %vm428_vm0, %v24501_v25  ;;  %v24678_v6 = vld [vmem:[%s32702_s9 + $0x1e9] sm:$0xff] }
 0x507   : > { %28438 = vmatprep.mubr.msk.f32.mxu1 %vm428_vm0, %v24494_v8  ;;  %29990 = vmatprep.mubr.msk.f32.mxu0 %vm428_vm0, %v24502_v29  ;;  %v24679_v8 = vld [vmem:[%s32702_s9 + $0x1f1] sm:$0xff] }
 0x50a   : > { %28439 = vmatmul.mubr.msk.f32.gmra.mrb[118].mxu1 %vm428_vm0, %v24495_v10  ;;  %29991 = vmatmul.mubr.msk.f32.gmra.mrb[118].mxu0 %vm428_vm0, %v24503_v33  ;;  %v24680_v10 = vld [vmem:[%s32702_s9 + $0x1f9] sm:$0xff] }
 0x50b   : > { %28441 = vmatprep.mubr.msk.f32.mxu1 %vm428_vm0, %v24496_v12  ;;  %29993 = vmatprep.mubr.msk.f32.mxu0 %vm428_vm0, %v24504_v37  ;;  %v24681_v12 = vld [vmem:[%s32702_s9 + $0x209] sm:$0xff]  ;;  %v24689_v37 = vld [vmem:[%s32702_s9 + $0x259] sm:$0xff] }
 0x50e   : > { %28442 = vmatmul.mubr.msk.f32.gmra.mrb[120].mxu1 %vm428_vm0, %v24497_v14  ;;  %29994 = vmatmul.mubr.msk.f32.gmra.mrb[120].mxu0 %vm428_vm0, %v24505_v41  ;;  %v24682_v14 = vld [vmem:[%s32702_s9 + $0x211] sm:$0xff]  ;;  %v24690_v41 = vld [vmem:[%s32702_s9 + $0x261] sm:$0xff] }
 0x50f   : > { %28444 = vmatprep.mubr.msk.f32.mxu1 %vm428_vm0, %v24498_v16  ;;  %29996 = vmatprep.mubr.msk.f32.mxu0 %vm428_vm0, %v24506_v45  ;;  %v24683_v16 = vld [vmem:[%s32702_s9 + $0x219] sm:$0xff]  ;;  %v24691_v45 = vld [vmem:[%s32702_s9 + $0x269] sm:$0xff] }
 0x512   : > { %28445 = vmatmul.mubr.msk.f32.gmra.mrb[122].mxu1 %vm428_vm0, %v24499_v18  ;;  %29997 = vmatmul.mubr.msk.f32.gmra.mrb[122].mxu0 %vm428_vm0, %v24507_v49  ;;  %v24684_v18 = vld [vmem:[%s32702_s9 + $0x221] sm:$0xff]  ;;  %v24692_v49 = vld [vmem:[%s32702_s9 + $0x271] sm:$0xff] }
 0x513   : > { %28447 = vmatprep.mubr.msk.f32.mxu1 %vm428_vm0, %v24500_v21  ;;  %29999 = vmatprep.mubr.msk.f32.mxu0 %vm428_vm0, %v24508_v53  ;;  %v24685_v21 = vld [vmem:[%s32702_s9 + $0x231] sm:$0xff]  ;;  %v24693_v53 = vld [vmem:[%s32702_s9 + $0x281] sm:$0xff] }
 0x516   : > { %28448 = vmatmul.mubr.msk.f32.gmra.mrb[124].mxu1 %vm428_vm0, %v24501_v25  ;;  %30000 = vmatmul.mubr.msk.f32.gmra.mrb[124].mxu0 %vm428_vm0, %v24509_v57  ;;  %v24686_v25 = vld [vmem:[%s32702_s9 + $0x239] sm:$0xff]  ;;  %v24694_v57 = vld [vmem:[%s32702_s9 + $0x289] sm:$0xff] }
 0x517   : > { %28450 = vmatprep.mubr.msk.f32.mxu1 %vm428_vm0, %v24502_v29  ;;  %30002 = vmatprep.mubr.msk.f32.mxu0 %vm428_vm0, %v24510_v61  ;;  %v24687_v29 = vld [vmem:[%s32702_s9 + $0x241] sm:$0xff]  ;;  %v24695_v61 = vld [vmem:[%s32702_s9 + $0x291] sm:$0xff] }
 0x51a   : > { %28451 = vmatmul.mubr.msk.f32.gmra.mrb[126].mxu1 %vm428_vm0, %v24503_v33  ;;  %30003 = vmatmul.mubr.msk.f32.gmra.mrb[126].mxu0 %vm428_vm0, %v24511_v1  ;;  %v24688_v33 = vld [vmem:[%s32702_s9 + $0x249] sm:$0xff]  ;;  %v24696_v1 = vld [vmem:[%s32702_s9 + $0x299] sm:$0xff] }
 0x51b   : > { %28455 = vmatprep.mubr.msk.f32.mxu1 %vm428_vm0, %v22585_v5  ;;  %30007 = vmatprep.mubr.msk.f32.mxu0 %vm428_vm0, %v24641_v9  ;;  %v24697_v5 = vld [vmem:[%s32702_s9 + $0x2a9] sm:$0xff] }
 0x51e   : > { %28456 = vmatmul.mubr.msk.f32.vlgmr.msra.gmra.mrb[0].mxu1 %vm428_vm0, %v22586_v13  ;;  %30008 = vmatmul.mubr.msk.f32.vlgmr.msra.gmra.mrb[0].mxu0 %vm428_vm0, %v24642_v17  ;;  %v24699_v13 = vld [vmem:[%s32702_s9 + $0x2b9] sm:$0xff] }
 0x51f   : > { %28648 = vmatpush3.msra.mxu1 %v35135_v42  ;;  %30200 = vmatpush3.msra.mxu0 %v35140_v44  ;;  %v22590_v42 = vld [vmem:[%s32702_s9 + $0x59] sm:$0xff]  ;;  %v24646_v44 = vld [vmem:[%s32702_s9 + $0xa9] sm:$0xff] }
 0x520   : > { %28458 = vmatprep.mubr.msk.f32.mxu1 %vm428_vm0, %v22587_v23  ;;  %30010 = vmatprep.mubr.msk.f32.mxu0 %vm428_vm0, %v24643_v31  ;;  %v24701_v23 = vld [vmem:[%s32702_s9 + $0x2d1] sm:$0xff] }
 0x522   : > { %28459 = vmatmul.mubr.msk.f32.gmra.mrb[2].mxu1 %vm428_vm0, %v22588_v39  ;;  %30011 = vmatmul.mubr.msk.f32.gmra.mrb[2].mxu0 %vm428_vm0, %v24644_v47  ;;  %v24703_v39 = vld [vmem:[%s32702_s9 + $0x2e1] sm:$0xff] }
 0x523   : > { %28461 = vmatprep.mubr.msk.f32.mxu1 %vm428_vm0, %v22589_v59  ;;  %30013 = vmatprep.mubr.msk.f32.mxu0 %vm428_vm0, %v24645_v3  ;;  %v24705_v59 = vld [vmem:[%s32702_s9 + $0x2f9] sm:$0xff] }
 0x526   : > { %28462 = vmatmul.mubr.msk.f32.gmra.mrb[4].mxu1 %vm428_vm0, %v22590_v42  ;;  %30014 = vmatmul.mubr.msk.f32.gmra.mrb[4].mxu0 %vm428_vm0, %v24646_v44  ;;  %v35541_v42 = vld [vmem:[%s36908_s1 + $0x38] sm:$0xff] }
 0x527   : > { %28464 = vmatprep.mubr.msk.f32.mxu1 %vm428_vm0, %v22591_v55  ;;  %30016 = vmatprep.mubr.msk.f32.mxu0 %vm428_vm0, %v24647_v63  ;;  %v24707_v55 = vld [vmem:[%s32702_s9 + $0x309] sm:$0xff] }
 0x528   : > { %28841 = vmatprep.subr.mxu1 %v35541_v42 }
 0x52a   : > { %28465 = vmatmul.mubr.msk.f32.gmra.mrb[6].mxu1 %vm428_vm0, %v22592_v11  ;;  %30017 = vmatmul.mubr.msk.f32.gmra.mrb[6].mxu0 %vm428_vm0, %v24648_v27  ;;  %v24709_v11 = vld [vmem:[%s32702_s9 + $0x321] sm:$0xff] }
 0x52b   : > { %28467 = vmatprep.mubr.msk.f32.mxu1 %vm428_vm0, %v24641_v9  ;;  %30019 = vmatprep.mubr.msk.f32.mxu0 %vm428_vm0, %v24649_v19  ;;  %v24698_v9 = vld [vmem:[%s32702_s9 + $0x2b1] sm:$0xff] }
 0x52e   : > { %28468 = vmatmul.mubr.msk.f32.gmra.mrb[8].mxu1 %vm428_vm0, %v24642_v17  ;;  %30020 = vmatmul.mubr.msk.f32.gmra.mrb[8].mxu0 %vm428_vm0, %v24650_v35  ;;  %v24700_v17 = vld [vmem:[%s32702_s9 + $0x2c1] sm:$0xff] }
 0x52f   : > { %28470 = vmatprep.mubr.msk.f32.mxu1 %vm428_vm0, %v24643_v31  ;;  %30022 = vmatprep.mubr.msk.f32.mxu0 %vm428_vm0, %v24651_v43  ;;  %v24702_v31 = vld [vmem:[%s32702_s9 + $0x2d9] sm:$0xff] }
 0x532   : > { %28471 = vmatmul.mubr.msk.f32.gmra.mrb[10].mxu1 %vm428_vm0, %v24644_v47  ;;  %30023 = vmatmul.mubr.msk.f32.gmra.mrb[10].mxu0 %vm428_vm0, %v24652_v20  ;;  %v24704_v47 = vld [vmem:[%s32702_s9 + $0x2e9] sm:$0xff] }
 0x533   : > { %28473 = vmatprep.mubr.msk.f32.mxu1 %vm428_vm0, %v24645_v3  ;;  %30025 = vmatprep.mubr.msk.f32.mxu0 %vm428_vm0, %v24653_v51  ;;  %v24706_v3 = vld [vmem:[%s32702_s9 + $0x301] sm:$0xff] }
 0x536   : > { %28474 = vmatmul.mubr.msk.f32.gmra.mrb[12].mxu1 %vm428_vm0, %v24646_v44  ;;  %30026 = vmatmul.mubr.msk.f32.gmra.mrb[12].mxu0 %vm428_vm0, %v24654_v22  ;;  %v35546_v44 = vld [vmem:[%s36908_s1 + $0x78] sm:$0xff] }
 0x537   : > { %28476 = vmatprep.mubr.msk.f32.mxu1 %vm428_vm0, %v24647_v63  ;;  %30028 = vmatprep.mubr.msk.f32.mxu0 %vm428_vm0, %v24655_v15  ;;  %v24708_v63 = vld [vmem:[%s32702_s9 + $0x311] sm:$0xff] }
 0x538   : > { %30393 = vmatprep.subr.mxu0 %v35546_v44 }
 0x53a   : > { %28477 = vmatmul.mubr.msk.f32.gmra.mrb[14].mxu1 %vm428_vm0, %v24648_v27  ;;  %30029 = vmatmul.mubr.msk.f32.gmra.mrb[14].mxu0 %vm428_vm0, %v24656_v24  ;;  %v24710_v27 = vld [vmem:[%s32702_s9 + $0x329] sm:$0xff] }
 0x53b   : > { %28479 = vmatprep.mubr.msk.f32.mxu1 %vm428_vm0, %v24649_v19  ;;  %30031 = vmatprep.mubr.msk.f32.mxu0 %vm428_vm0, %v24657_v7  ;;  %v24711_v19 = vld [vmem:[%s32702_s9 + $0x331] sm:$0xff] }
 0x53e   : > { %28480 = vmatmul.mubr.msk.f32.gmra.mrb[16].mxu1 %vm428_vm0, %v24650_v35  ;;  %30032 = vmatmul.mubr.msk.f32.gmra.mrb[16].mxu0 %vm428_vm0, %v24658_v26  ;;  %v24712_v35 = vld [vmem:[%s32702_s9 + $0x339] sm:$0xff] }
 0x53f   : > { %28482 = vmatprep.mubr.msk.f32.mxu1 %vm428_vm0, %v24651_v43  ;;  %30034 = vmatprep.mubr.msk.f32.mxu0 %vm428_vm0, %v24659_v28  ;;  %v24713_v43 = vld [vmem:[%s32702_s9 + $0x349] sm:$0xff] }
 0x542   : > { %28483 = vmatmul.mubr.msk.f32.gmra.mrb[18].mxu1 %vm428_vm0, %v24652_v20  ;;  %30035 = vmatmul.mubr.msk.f32.gmra.mrb[18].mxu0 %vm428_vm0, %v24660_v30  ;;  %v24714_v20 = vld [vmem:[%s32702_s9 + $0x351] sm:$0xff] }
 0x543   : > { %28485 = vmatprep.mubr.msk.f32.mxu1 %vm428_vm0, %v24653_v51  ;;  %30037 = vmatprep.mubr.msk.f32.mxu0 %vm428_vm0, %v24661_v32  ;;  %v24715_v51 = vld [vmem:[%s32702_s9 + $0x359] sm:$0xff] }
 0x546   : > { %28486 = vmatmul.mubr.msk.f32.gmra.mrb[20].mxu1 %vm428_vm0, %v24654_v22  ;;  %30038 = vmatmul.mubr.msk.f32.gmra.mrb[20].mxu0 %vm428_vm0, %v24662_v34  ;;  %v24716_v22 = vld [vmem:[%s32702_s9 + $0x361] sm:$0xff] }
 0x547   : > { %28488 = vmatprep.mubr.msk.f32.mxu1 %vm428_vm0, %v24655_v15  ;;  %30040 = vmatprep.mubr.msk.f32.mxu0 %vm428_vm0, %v24663_v36  ;;  %v24717_v15 = vld [vmem:[%s32702_s9 + $0x371] sm:$0xff] }
 0x54a   : > { %28489 = vmatmul.mubr.msk.f32.gmra.mrb[22].mxu1 %vm428_vm0, %v24656_v24  ;;  %30041 = vmatmul.mubr.msk.f32.gmra.mrb[22].mxu0 %vm428_vm0, %v24664_v38  ;;  %v24718_v24 = vld [vmem:[%s32702_s9 + $0x379] sm:$0xff] }
 0x54b   : > { %28491 = vmatprep.mubr.msk.f32.mxu1 %vm428_vm0, %v24657_v7  ;;  %30043 = vmatprep.mubr.msk.f32.mxu0 %vm428_vm0, %v24665_v40  ;;  %v24719_v7 = vld [vmem:[%s32702_s9 + $0x381] sm:$0xff] }
 0x54e   : > { %28492 = vmatmul.mubr.msk.f32.gmra.mrb[24].mxu1 %vm428_vm0, %v24658_v26  ;;  %30044 = vmatmul.mubr.msk.f32.gmra.mrb[24].mxu0 %vm428_vm0, %v24666_v46  ;;  %v24720_v26 = vld [vmem:[%s32702_s9 + $0x389] sm:$0xff] }
 0x54f   : > { %28494 = vmatprep.mubr.msk.f32.mxu1 %vm428_vm0, %v24659_v28  ;;  %30046 = vmatprep.mubr.msk.f32.mxu0 %vm428_vm0, %v24667_v48  ;;  %v24721_v28 = vld [vmem:[%s32702_s9 + $0x399] sm:$0xff] }
 0x552   : > { %28495 = vmatmul.mubr.msk.f32.gmra.mrb[26].mxu1 %vm428_vm0, %v24660_v30  ;;  %30047 = vmatmul.mubr.msk.f32.gmra.mrb[26].mxu0 %vm428_vm0, %v24668_v50  ;;  %v24722_v30 = vld [vmem:[%s32702_s9 + $0x3a1] sm:$0xff] }
 0x553   : > { %28497 = vmatprep.mubr.msk.f32.mxu1 %vm428_vm0, %v24661_v32  ;;  %30049 = vmatprep.mubr.msk.f32.mxu0 %vm428_vm0, %v24669_v52  ;;  %v24723_v32 = vld [vmem:[%s32702_s9 + $0x3a9] sm:$0xff] }
 0x556   : > { %28498 = vmatmul.mubr.msk.f32.gmra.mrb[28].mxu1 %vm428_vm0, %v24662_v34  ;;  %30050 = vmatmul.mubr.msk.f32.gmra.mrb[28].mxu0 %vm428_vm0, %v24670_v54  ;;  %v24724_v34 = vld [vmem:[%s32702_s9 + $0x3b1] sm:$0xff] }
 0x557   : > { %28500 = vmatprep.mubr.msk.f32.mxu1 %vm428_vm0, %v24663_v36  ;;  %30052 = vmatprep.mubr.msk.f32.mxu0 %vm428_vm0, %v24671_v56  ;;  %v24725_v36 = vld [vmem:[%s32702_s9 + $0x3c1] sm:$0xff] }
 0x55a   : > { %28501 = vmatmul.mubr.msk.f32.gmra.mrb[30].mxu1 %vm428_vm0, %v24664_v38  ;;  %30053 = vmatmul.mubr.msk.f32.gmra.mrb[30].mxu0 %vm428_vm0, %v24672_v58  ;;  %v24726_v38 = vld [vmem:[%s32702_s9 + $0x3c9] sm:$0xff] }
 0x55b   : > { %28503 = vmatprep.mubr.msk.f32.mxu1 %vm428_vm0, %v24665_v40  ;;  %30055 = vmatprep.mubr.msk.f32.mxu0 %vm428_vm0, %v24673_v60  ;;  %v24727_v40 = vld [vmem:[%s32702_s9 + $0x3d1] sm:$0xff] }
 0x55e   : > { %28504 = vmatmul.mubr.msk.f32.gmra.mrb[32].mxu1 %vm428_vm0, %v24666_v46  ;;  %30056 = vmatmul.mubr.msk.f32.gmra.mrb[32].mxu0 %vm428_vm0, %v24674_v62  ;;  %v24728_v46 = vld [vmem:[%s32702_s9 + $0x3d9] sm:$0xff] }
 0x55f   : > { %28506 = vmatprep.mubr.msk.f32.mxu1 %vm428_vm0, %v24667_v48  ;;  %30058 = vmatprep.mubr.msk.f32.mxu0 %vm428_vm0, %v24675_v0  ;;  %v24729_v48 = vld [vmem:[%s32702_s9 + $0x3e9] sm:$0xff] }
 0x562   : > { %28507 = vmatmul.mubr.msk.f32.gmra.mrb[34].mxu1 %vm428_vm0, %v24668_v50  ;;  %30059 = vmatmul.mubr.msk.f32.gmra.mrb[34].mxu0 %vm428_vm0, %v24676_v2  ;;  %v24730_v50 = vld [vmem:[%s32702_s9 + $0x3f1] sm:$0xff] }
 0x563   : > { %28509 = vmatprep.mubr.msk.f32.mxu1 %vm428_vm0, %v24669_v52  ;;  %30061 = vmatprep.mubr.msk.f32.mxu0 %vm428_vm0, %v24677_v4  ;;  %v24731_v52 = vld [vmem:[%s32702_s9 + $0x3f9] sm:$0xff] }
 0x566   : > { %28510 = vmatmul.mubr.msk.f32.gmra.mrb[36].mxu1 %vm428_vm0, %v24670_v54  ;;  %30062 = vmatmul.mubr.msk.f32.gmra.mrb[36].mxu0 %vm428_vm0, %v24678_v6  ;;  %v24732_v54 = vld [vmem:[%s32702_s9 + $0x401] sm:$0xff] }
 0x567   : > { %28512 = vmatprep.mubr.msk.f32.mxu1 %vm428_vm0, %v24671_v56  ;;  %30064 = vmatprep.mubr.msk.f32.mxu0 %vm428_vm0, %v24679_v8  ;;  %v24733_v56 = vld [vmem:[%s32702_s9 + $0x411] sm:$0xff] }
 0x56a   : > { %28513 = vmatmul.mubr.msk.f32.gmra.mrb[38].mxu1 %vm428_vm0, %v24672_v58  ;;  %30065 = vmatmul.mubr.msk.f32.gmra.mrb[38].mxu0 %vm428_vm0, %v24680_v10  ;;  %v24734_v58 = vld [vmem:[%s32702_s9 + $0x419] sm:$0xff] }
 0x56b   : > { %28515 = vmatprep.mubr.msk.f32.mxu1 %vm428_vm0, %v24673_v60  ;;  %30067 = vmatprep.mubr.msk.f32.mxu0 %vm428_vm0, %v24681_v12  ;;  %v24735_v60 = vld [vmem:[%s32702_s9 + $0x421] sm:$0xff] }
 0x56e   : > { %28516 = vmatmul.mubr.msk.f32.gmra.mrb[40].mxu1 %vm428_vm0, %v24674_v62  ;;  %30068 = vmatmul.mubr.msk.f32.gmra.mrb[40].mxu0 %vm428_vm0, %v24682_v14  ;;  %v24736_v62 = vld [vmem:[%s32702_s9 + $0x429] sm:$0xff] }
 0x56f   : > { %28518 = vmatprep.mubr.msk.f32.mxu1 %vm428_vm0, %v24675_v0  ;;  %30070 = vmatprep.mubr.msk.f32.mxu0 %vm428_vm0, %v24683_v16  ;;  %v24737_v0 = vld [vmem:[%s32702_s9 + $0x439] sm:$0xff] }
 0x572   : > { %28519 = vmatmul.mubr.msk.f32.gmra.mrb[42].mxu1 %vm428_vm0, %v24676_v2  ;;  %30071 = vmatmul.mubr.msk.f32.gmra.mrb[42].mxu0 %vm428_vm0, %v24684_v18  ;;  %v24738_v2 = vld [vmem:[%s32702_s9 + $0x441] sm:$0xff] }
 0x573   : > { %28521 = vmatprep.mubr.msk.f32.mxu1 %vm428_vm0, %v24677_v4  ;;  %30073 = vmatprep.mubr.msk.f32.mxu0 %vm428_vm0, %v24685_v21  ;;  %v24739_v4 = vld [vmem:[%s32702_s9 + $0x449] sm:$0xff] }
 0x576   : > { %28522 = vmatmul.mubr.msk.f32.gmra.mrb[44].mxu1 %vm428_vm0, %v24678_v6  ;;  %30074 = vmatmul.mubr.msk.f32.gmra.mrb[44].mxu0 %vm428_vm0, %v24686_v25  ;;  %v24740_v6 = vld [vmem:[%s32702_s9 + $0x451] sm:$0xff] }
 0x577   : > { %28524 = vmatprep.mubr.msk.f32.mxu1 %vm428_vm0, %v24679_v8  ;;  %30076 = vmatprep.mubr.msk.f32.mxu0 %vm428_vm0, %v24687_v29  ;;  %v24741_v8 = vld [vmem:[%s32702_s9 + $0x461] sm:$0xff] }
 0x57a   : > { %28525 = vmatmul.mubr.msk.f32.gmra.mrb[46].mxu1 %vm428_vm0, %v24680_v10  ;;  %30077 = vmatmul.mubr.msk.f32.gmra.mrb[46].mxu0 %vm428_vm0, %v24688_v33  ;;  %v24742_v10 = vld [vmem:[%s32702_s9 + $0x469] sm:$0xff] }
 0x57b   : > { %28527 = vmatprep.mubr.msk.f32.mxu1 %vm428_vm0, %v24681_v12  ;;  %30079 = vmatprep.mubr.msk.f32.mxu0 %vm428_vm0, %v24689_v37  ;;  %v24743_v12 = vld [vmem:[%s32702_s9 + $0x471] sm:$0xff] }
 0x57e   : > { %28528 = vmatmul.mubr.msk.f32.gmra.mrb[48].mxu1 %vm428_vm0, %v24682_v14  ;;  %30080 = vmatmul.mubr.msk.f32.gmra.mrb[48].mxu0 %vm428_vm0, %v24690_v41  ;;  %v24744_v14 = vld [vmem:[%s32702_s9 + $0x479] sm:$0xff] }
 0x57f   : > { %28530 = vmatprep.mubr.msk.f32.mxu1 %vm428_vm0, %v24683_v16  ;;  %30082 = vmatprep.mubr.msk.f32.mxu0 %vm428_vm0, %v24691_v45  ;;  %v24745_v16 = vld [vmem:[%s32702_s9 + $0x489] sm:$0xff] }
 0x582   : > { %28531 = vmatmul.mubr.msk.f32.gmra.mrb[50].mxu1 %vm428_vm0, %v24684_v18  ;;  %30083 = vmatmul.mubr.msk.f32.gmra.mrb[50].mxu0 %vm428_vm0, %v24692_v49  ;;  %v24746_v18 = vld [vmem:[%s32702_s9 + $0x491] sm:$0xff] }
 0x583   : > { %28533 = vmatprep.mubr.msk.f32.mxu1 %vm428_vm0, %v24685_v21  ;;  %30085 = vmatprep.mubr.msk.f32.mxu0 %vm428_vm0, %v24693_v53  ;;  %v24747_v21 = vld [vmem:[%s32702_s9 + $0x499] sm:$0xff] }
 0x586   : > { %28534 = vmatmul.mubr.msk.f32.gmra.mrb[52].mxu1 %vm428_vm0, %v24686_v25  ;;  %30086 = vmatmul.mubr.msk.f32.gmra.mrb[52].mxu0 %vm428_vm0, %v24694_v57  ;;  %v24748_v25 = vld [vmem:[%s32702_s9 + $0x4a1] sm:$0xff] }
 0x587   : > { %28536 = vmatprep.mubr.msk.f32.mxu1 %vm428_vm0, %v24687_v29  ;;  %30088 = vmatprep.mubr.msk.f32.mxu0 %vm428_vm0, %v24695_v61  ;;  %v24749_v29 = vld [vmem:[%s32702_s9 + $0x4b1] sm:$0xff] }
 0x58a   : > { %28537 = vmatmul.mubr.msk.f32.gmra.mrb[54].mxu1 %vm428_vm0, %v24688_v33  ;;  %30089 = vmatmul.mubr.msk.f32.gmra.mrb[54].mxu0 %vm428_vm0, %v24696_v1  ;;  %v24750_v33 = vld [vmem:[%s32702_s9 + $0x4b9] sm:$0xff] }
 0x58b   : > { %28539 = vmatprep.mubr.msk.f32.mxu1 %vm428_vm0, %v24689_v37  ;;  %30091 = vmatprep.mubr.msk.f32.mxu0 %vm428_vm0, %v24697_v5  ;;  %v24751_v37 = vld [vmem:[%s32702_s9 + $0x4c1] sm:$0xff] }
 0x58e   : > { %28540 = vmatmul.mubr.msk.f32.gmra.mrb[56].mxu1 %vm428_vm0, %v24690_v41  ;;  %30092 = vmatmul.mubr.msk.f32.gmra.mrb[56].mxu0 %vm428_vm0, %v24698_v9  ;;  %v24752_v41 = vld [vmem:[%s32702_s9 + $0x4c9] sm:$0xff] }
 0x58f   : > { %28542 = vmatprep.mubr.msk.f32.mxu1 %vm428_vm0, %v24691_v45  ;;  %30094 = vmatprep.mubr.msk.f32.mxu0 %vm428_vm0, %v24699_v13  ;;  %v24753_v45 = vld [vmem:[%s32702_s9 + $0x4d9] sm:$0xff] }
 0x592   : > { %28543 = vmatmul.mubr.msk.f32.gmra.mrb[58].mxu1 %vm428_vm0, %v24692_v49  ;;  %30095 = vmatmul.mubr.msk.f32.gmra.mrb[58].mxu0 %vm428_vm0, %v24700_v17  ;;  %v24754_v49 = vld [vmem:[%s32702_s9 + $0x4e1] sm:$0xff] }
 0x593   : > { %28545 = vmatprep.mubr.msk.f32.mxu1 %vm428_vm0, %v24693_v53  ;;  %30097 = vmatprep.mubr.msk.f32.mxu0 %vm428_vm0, %v24701_v23  ;;  %v24755_v53 = vld [vmem:[%s32702_s9 + $0x4e9] sm:$0xff] }
 0x596   : > { %28546 = vmatmul.mubr.msk.f32.gmra.mrb[60].mxu1 %vm428_vm0, %v24694_v57  ;;  %30098 = vmatmul.mubr.msk.f32.gmra.mrb[60].mxu0 %vm428_vm0, %v24702_v31  ;;  %v24756_v57 = vld [vmem:[%s32702_s9 + $0x4f1] sm:$0xff] }
 0x597   : > { %28548 = vmatprep.mubr.msk.f32.mxu1 %vm428_vm0, %v24695_v61  ;;  %30100 = vmatprep.mubr.msk.f32.mxu0 %vm428_vm0, %v24703_v39  ;;  %v24757_v61 = vld [vmem:[%s32702_s9 + $0x501] sm:$0xff] }
 0x59a   : > { %28549 = vmatmul.mubr.msk.f32.gmra.mrb[62].mxu1 %vm428_vm0, %v24696_v1  ;;  %30101 = vmatmul.mubr.msk.f32.gmra.mrb[62].mxu0 %vm428_vm0, %v24704_v47  ;;  %v24758_v1 = vld [vmem:[%s32702_s9 + $0x509] sm:$0xff] }
 0x59b   : > { %28551 = vmatprep.mubr.msk.f32.mxu1 %vm428_vm0, %v24697_v5  ;;  %30103 = vmatprep.mubr.msk.f32.mxu0 %vm428_vm0, %v24705_v59  ;;  %v24759_v5 = vld [vmem:[%s32702_s9 + $0x511] sm:$0xff] }
 0x59e   : > { %28552 = vmatmul.mubr.msk.f32.gmra.mrb[64].mxu1 %vm428_vm0, %v24698_v9  ;;  %30104 = vmatmul.mubr.msk.f32.gmra.mrb[64].mxu0 %vm428_vm0, %v24706_v3  ;;  %v24760_v9 = vld [vmem:[%s32702_s9 + $0x519] sm:$0xff] }
 0x59f   : > { %28554 = vmatprep.mubr.msk.f32.mxu1 %vm428_vm0, %v24699_v13  ;;  %30106 = vmatprep.mubr.msk.f32.mxu0 %vm428_vm0, %v24707_v55  ;;  %v24761_v13 = vld [vmem:[%s32702_s9 + $0x529] sm:$0xff] }
 0x5a2   : > { %28555 = vmatmul.mubr.msk.f32.gmra.mrb[66].mxu1 %vm428_vm0, %v24700_v17  ;;  %30107 = vmatmul.mubr.msk.f32.gmra.mrb[66].mxu0 %vm428_vm0, %v24708_v63  ;;  %v24762_v17 = vld [vmem:[%s32702_s9 + $0x531] sm:$0xff] }
 0x5a3   : > { %28557 = vmatprep.mubr.msk.f32.mxu1 %vm428_vm0, %v24701_v23  ;;  %30109 = vmatprep.mubr.msk.f32.mxu0 %vm428_vm0, %v24709_v11  ;;  %v24763_v23 = vld [vmem:[%s32702_s9 + $0x539] sm:$0xff] }
 0x5a6   : > { %28558 = vmatmul.mubr.msk.f32.gmra.mrb[68].mxu1 %vm428_vm0, %v24702_v31  ;;  %30110 = vmatmul.mubr.msk.f32.gmra.mrb[68].mxu0 %vm428_vm0, %v24710_v27  ;;  %v24764_v31 = vld [vmem:[%s32702_s9 + $0x541] sm:$0xff] }
 0x5a7   : > { %28560 = vmatprep.mubr.msk.f32.mxu1 %vm428_vm0, %v24703_v39  ;;  %30112 = vmatprep.mubr.msk.f32.mxu0 %vm428_vm0, %v24711_v19  ;;  %v24765_v39 = vld [vmem:[%s32702_s9 + $0x551] sm:$0xff] }
 0x5aa   : > { %28561 = vmatmul.mubr.msk.f32.gmra.mrb[70].mxu1 %vm428_vm0, %v24704_v47  ;;  %30113 = vmatmul.mubr.msk.f32.gmra.mrb[70].mxu0 %vm428_vm0, %v24712_v35  ;;  %v24766_v47 = vld [vmem:[%s32702_s9 + $0x559] sm:$0xff] }
 0x5ab   : > { %28563 = vmatprep.mubr.msk.f32.mxu1 %vm428_vm0, %v24705_v59  ;;  %30115 = vmatprep.mubr.msk.f32.mxu0 %vm428_vm0, %v24713_v43  ;;  %v24767_v59 = vld [vmem:[%s32702_s9 + $0x561] sm:$0xff] }
 0x5ae   : > { %28564 = vmatmul.mubr.msk.f32.gmra.mrb[72].mxu1 %vm428_vm0, %v24706_v3  ;;  %30116 = vmatmul.mubr.msk.f32.gmra.mrb[72].mxu0 %vm428_vm0, %v24714_v20  ;;  %v24768_v3 = vld [vmem:[%s32702_s9 + $0x569] sm:$0xff] }
 0x5af   : > { %28566 = vmatprep.mubr.msk.f32.mxu1 %vm428_vm0, %v24707_v55  ;;  %30118 = vmatprep.mubr.msk.f32.mxu0 %vm428_vm0, %v24715_v51  ;;  %v22842_v55 = vld [vmem:[%s32702_s9 + $0x2a] sm:$0xff] }
 0x5b2   : > { %28567 = vmatmul.mubr.msk.f32.gmra.mrb[74].mxu1 %vm428_vm0, %v24708_v63  ;;  %30119 = vmatmul.mubr.msk.f32.gmra.mrb[74].mxu0 %vm428_vm0, %v24716_v22  ;;  %v24898_v63 = vld [vmem:[%s32702_s9 + $0x7a] sm:$0xff] }
 0x5b3   : > { %28569 = vmatprep.mubr.msk.f32.mxu1 %vm428_vm0, %v24709_v11  ;;  %30121 = vmatprep.mubr.msk.f32.mxu0 %vm428_vm0, %v24717_v15  ;;  %v22843_v11 = vld [vmem:[%s32702_s9 + $0x32] sm:$0xff] }
 0x5b6   : > { %28570 = vmatmul.mubr.msk.f32.gmra.mrb[76].mxu1 %vm428_vm0, %v24710_v27  ;;  %30122 = vmatmul.mubr.msk.f32.gmra.mrb[76].mxu0 %vm428_vm0, %v24718_v24  ;;  %v24899_v27 = vld [vmem:[%s32702_s9 + $0x82] sm:$0xff] }
 0x5b7   : > { %28572 = vmatprep.mubr.msk.f32.mxu1 %vm428_vm0, %v24711_v19  ;;  %30124 = vmatprep.mubr.msk.f32.mxu0 %vm428_vm0, %v24719_v7  ;;  %v22844_v19 = vld [vmem:[%s32702_s9 + $0x3a] sm:$0xff] }
 0x5ba   : > { %28573 = vmatmul.mubr.msk.f32.gmra.mrb[78].mxu1 %vm428_vm0, %v24712_v35  ;;  %30125 = vmatmul.mubr.msk.f32.gmra.mrb[78].mxu0 %vm428_vm0, %v24720_v26  ;;  %v24900_v35 = vld [vmem:[%s32702_s9 + $0x8a] sm:$0xff] }
 0x5bb   : > { %28575 = vmatprep.mubr.msk.f32.mxu1 %vm428_vm0, %v24713_v43  ;;  %30127 = vmatprep.mubr.msk.f32.mxu0 %vm428_vm0, %v24721_v28  ;;  %v22845_v43 = vld [vmem:[%s32702_s9 + $0x42] sm:$0xff] }
 0x5be   : > { %28576 = vmatmul.mubr.msk.f32.gmra.mrb[80].mxu1 %vm428_vm0, %v24714_v20  ;;  %30128 = vmatmul.mubr.msk.f32.gmra.mrb[80].mxu0 %vm428_vm0, %v24722_v30  ;;  %v24901_v20 = vld [vmem:[%s32702_s9 + $0x92] sm:$0xff] }
 0x5bf   : > { %28578 = vmatprep.mubr.msk.f32.mxu1 %vm428_vm0, %v24715_v51  ;;  %30130 = vmatprep.mubr.msk.f32.mxu0 %vm428_vm0, %v24723_v32  ;;  %v22846_v51 = vld [vmem:[%s32702_s9 + $0x52] sm:$0xff] }
 0x5c2   : > { %28579 = vmatmul.mubr.msk.f32.gmra.mrb[82].mxu1 %vm428_vm0, %v24716_v22  ;;  %30131 = vmatmul.mubr.msk.f32.gmra.mrb[82].mxu0 %vm428_vm0, %v24724_v34  ;;  %v24902_v22 = vld [vmem:[%s32702_s9 + $0xa2] sm:$0xff] }
 0x5c3   : > { %28581 = vmatprep.mubr.msk.f32.mxu1 %vm428_vm0, %v24717_v15  ;;  %30133 = vmatprep.mubr.msk.f32.mxu0 %vm428_vm0, %v24725_v36  ;;  %v22848_v15 = vld [vmem:[%s32702_s9 + $0x62] sm:$0xff] }
 0x5c6   : > { %28582 = vmatmul.mubr.msk.f32.gmra.mrb[84].mxu1 %vm428_vm0, %v24718_v24  ;;  %30134 = vmatmul.mubr.msk.f32.gmra.mrb[84].mxu0 %vm428_vm0, %v24726_v38  ;;  %v24904_v24 = vld [vmem:[%s32702_s9 + $0xb2] sm:$0xff] }
 0x5c7   : > { %28584 = vmatprep.mubr.msk.f32.mxu1 %vm428_vm0, %v24719_v7  ;;  %30136 = vmatprep.mubr.msk.f32.mxu0 %vm428_vm0, %v24727_v40  ;;  %v22849_v7 = vld [vmem:[%s32702_s9 + $0x6a] sm:$0xff] }
 0x5ca   : > { %28585 = vmatmul.mubr.msk.f32.gmra.mrb[86].mxu1 %vm428_vm0, %v24720_v26  ;;  %30137 = vmatmul.mubr.msk.f32.gmra.mrb[86].mxu0 %vm428_vm0, %v24728_v46  ;;  %v24905_v26 = vld [vmem:[%s32702_s9 + $0xba] sm:$0xff] }
 0x5cb   : > { %28587 = vmatprep.mubr.msk.f32.mxu1 %vm428_vm0, %v24721_v28  ;;  %30139 = vmatprep.mubr.msk.f32.mxu0 %vm428_vm0, %v24729_v48  ;;  %v24906_v28 = vld [vmem:[%s32702_s9 + $0xca] sm:$0xff] }
 0x5ce   : > { %28588 = vmatmul.mubr.msk.f32.gmra.mrb[88].mxu1 %vm428_vm0, %v24722_v30  ;;  %30140 = vmatmul.mubr.msk.f32.gmra.mrb[88].mxu0 %vm428_vm0, %v24730_v50  ;;  %v24907_v30 = vld [vmem:[%s32702_s9 + $0xd2] sm:$0xff] }
 0x5cf   : > { %28590 = vmatprep.mubr.msk.f32.mxu1 %vm428_vm0, %v24723_v32  ;;  %30142 = vmatprep.mubr.msk.f32.mxu0 %vm428_vm0, %v24731_v52  ;;  %v24908_v32 = vld [vmem:[%s32702_s9 + $0xda] sm:$0xff] }
 0x5d2   : > { %28591 = vmatmul.mubr.msk.f32.gmra.mrb[90].mxu1 %vm428_vm0, %v24724_v34  ;;  %30143 = vmatmul.mubr.msk.f32.gmra.mrb[90].mxu0 %vm428_vm0, %v24732_v54  ;;  %v24909_v34 = vld [vmem:[%s32702_s9 + $0xe2] sm:$0xff] }
 0x5d3   : > { %28593 = vmatprep.mubr.msk.f32.mxu1 %vm428_vm0, %v24725_v36  ;;  %30145 = vmatprep.mubr.msk.f32.mxu0 %vm428_vm0, %v24733_v56  ;;  %v24910_v36 = vld [vmem:[%s32702_s9 + $0xf2] sm:$0xff] }
 0x5d6   : > { %28594 = vmatmul.mubr.msk.f32.gmra.mrb[92].mxu1 %vm428_vm0, %v24726_v38  ;;  %30146 = vmatmul.mubr.msk.f32.gmra.mrb[92].mxu0 %vm428_vm0, %v24734_v58  ;;  %v24911_v38 = vld [vmem:[%s32702_s9 + $0xfa] sm:$0xff] }
 0x5d7   : > { %28596 = vmatprep.mubr.msk.f32.mxu1 %vm428_vm0, %v24727_v40  ;;  %30148 = vmatprep.mubr.msk.f32.mxu0 %vm428_vm0, %v24735_v60  ;;  %v24912_v40 = vld [vmem:[%s32702_s9 + $0x102] sm:$0xff] }
 0x5da   : > { %28597 = vmatmul.mubr.msk.f32.gmra.mrb[94].mxu1 %vm428_vm0, %v24728_v46  ;;  %30149 = vmatmul.mubr.msk.f32.gmra.mrb[94].mxu0 %vm428_vm0, %v24736_v62  ;;  %v24913_v46 = vld [vmem:[%s32702_s9 + $0x10a] sm:$0xff] }
 0x5db   : > { %28599 = vmatprep.mubr.msk.f32.mxu1 %vm428_vm0, %v24729_v48  ;;  %30151 = vmatprep.mubr.msk.f32.mxu0 %vm428_vm0, %v24737_v0  ;;  %v24914_v48 = vld [vmem:[%s32702_s9 + $0x11a] sm:$0xff] }
 0x5de   : > { %28600 = vmatmul.mubr.msk.f32.gmra.mrb[96].mxu1 %vm428_vm0, %v24730_v50  ;;  %30152 = vmatmul.mubr.msk.f32.gmra.mrb[96].mxu0 %vm428_vm0, %v24738_v2  ;;  %v24915_v50 = vld [vmem:[%s32702_s9 + $0x122] sm:$0xff] }
 0x5df   : > { %28602 = vmatprep.mubr.msk.f32.mxu1 %vm428_vm0, %v24731_v52  ;;  %30154 = vmatprep.mubr.msk.f32.mxu0 %vm428_vm0, %v24739_v4  ;;  %v24916_v52 = vld [vmem:[%s32702_s9 + $0x12a] sm:$0xff] }
 0x5e2   : > { %28603 = vmatmul.mubr.msk.f32.gmra.mrb[98].mxu1 %vm428_vm0, %v24732_v54  ;;  %30155 = vmatmul.mubr.msk.f32.gmra.mrb[98].mxu0 %vm428_vm0, %v24740_v6  ;;  %v24917_v54 = vld [vmem:[%s32702_s9 + $0x132] sm:$0xff] }
 0x5e3   : > { %28605 = vmatprep.mubr.msk.f32.mxu1 %vm428_vm0, %v24733_v56  ;;  %30157 = vmatprep.mubr.msk.f32.mxu0 %vm428_vm0, %v24741_v8  ;;  %v24918_v56 = vld [vmem:[%s32702_s9 + $0x142] sm:$0xff] }
 0x5e6   : > { %28606 = vmatmul.mubr.msk.f32.gmra.mrb[100].mxu1 %vm428_vm0, %v24734_v58  ;;  %30158 = vmatmul.mubr.msk.f32.gmra.mrb[100].mxu0 %vm428_vm0, %v24742_v10  ;;  %v24919_v58 = vld [vmem:[%s32702_s9 + $0x14a] sm:$0xff] }
 0x5e7   : > { %28608 = vmatprep.mubr.msk.f32.mxu1 %vm428_vm0, %v24735_v60  ;;  %30160 = vmatprep.mubr.msk.f32.mxu0 %vm428_vm0, %v24743_v12  ;;  %v24920_v60 = vld [vmem:[%s32702_s9 + $0x152] sm:$0xff] }
 0x5ea   : > { %28609 = vmatmul.mubr.msk.f32.gmra.mrb[102].mxu1 %vm428_vm0, %v24736_v62  ;;  %30161 = vmatmul.mubr.msk.f32.gmra.mrb[102].mxu0 %vm428_vm0, %v24744_v14  ;;  %v24921_v62 = vld [vmem:[%s32702_s9 + $0x15a] sm:$0xff] }
 0x5eb   : > { %28611 = vmatprep.mubr.msk.f32.mxu1 %vm428_vm0, %v24737_v0  ;;  %30163 = vmatprep.mubr.msk.f32.mxu0 %vm428_vm0, %v24745_v16  ;;  %v24922_v0 = vld [vmem:[%s32702_s9 + $0x16a] sm:$0xff] }
 0x5ee   : > { %28612 = vmatmul.mubr.msk.f32.gmra.mrb[104].mxu1 %vm428_vm0, %v24738_v2  ;;  %30164 = vmatmul.mubr.msk.f32.gmra.mrb[104].mxu0 %vm428_vm0, %v24746_v18  ;;  %v24923_v2 = vld [vmem:[%s32702_s9 + $0x172] sm:$0xff] }
 0x5ef   : > { %28614 = vmatprep.mubr.msk.f32.mxu1 %vm428_vm0, %v24739_v4  ;;  %30166 = vmatprep.mubr.msk.f32.mxu0 %vm428_vm0, %v24747_v21  ;;  %v24924_v4 = vld [vmem:[%s32702_s9 + $0x17a] sm:$0xff] }
 0x5f2   : > { %28615 = vmatmul.mubr.msk.f32.gmra.mrb[106].mxu1 %vm428_vm0, %v24740_v6  ;;  %30167 = vmatmul.mubr.msk.f32.gmra.mrb[106].mxu0 %vm428_vm0, %v24748_v25  ;;  %v24925_v6 = vld [vmem:[%s32702_s9 + $0x182] sm:$0xff] }
 0x5f3   : > { %28617 = vmatprep.mubr.msk.f32.mxu1 %vm428_vm0, %v24741_v8  ;;  %30169 = vmatprep.mubr.msk.f32.mxu0 %vm428_vm0, %v24749_v29  ;;  %v24926_v8 = vld [vmem:[%s32702_s9 + $0x192] sm:$0xff] }
 0x5f6   : > { %28618 = vmatmul.mubr.msk.f32.gmra.mrb[108].mxu1 %vm428_vm0, %v24742_v10  ;;  %30170 = vmatmul.mubr.msk.f32.gmra.mrb[108].mxu0 %vm428_vm0, %v24750_v33  ;;  %v24927_v10 = vld [vmem:[%s32702_s9 + $0x19a] sm:$0xff] }
 0x5f7   : > { %28620 = vmatprep.mubr.msk.f32.mxu1 %vm428_vm0, %v24743_v12  ;;  %30172 = vmatprep.mubr.msk.f32.mxu0 %vm428_vm0, %v24751_v37  ;;  %v24928_v12 = vld [vmem:[%s32702_s9 + $0x1a2] sm:$0xff] }
 0x5fa   : > { %28621 = vmatmul.mubr.msk.f32.gmra.mrb[110].mxu1 %vm428_vm0, %v24744_v14  ;;  %30173 = vmatmul.mubr.msk.f32.gmra.mrb[110].mxu0 %vm428_vm0, %v24752_v41  ;;  %v24929_v14 = vld [vmem:[%s32702_s9 + $0x1aa] sm:$0xff] }
 0x5fb   : > { %28623 = vmatprep.mubr.msk.f32.mxu1 %vm428_vm0, %v24745_v16  ;;  %30175 = vmatprep.mubr.msk.f32.mxu0 %vm428_vm0, %v24753_v45  ;;  %v24930_v16 = vld [vmem:[%s32702_s9 + $0x1ba] sm:$0xff] }
 0x5fe   : > { %28624 = vmatmul.mubr.msk.f32.gmra.mrb[112].mxu1 %vm428_vm0, %v24746_v18  ;;  %30176 = vmatmul.mubr.msk.f32.gmra.mrb[112].mxu0 %vm428_vm0, %v24754_v49  ;;  %v24931_v18 = vld [vmem:[%s32702_s9 + $0x1c2] sm:$0xff] }
 0x5ff   : > { %28626 = vmatprep.mubr.msk.f32.mxu1 %vm428_vm0, %v24747_v21  ;;  %30178 = vmatprep.mubr.msk.f32.mxu0 %vm428_vm0, %v24755_v53  ;;  %v24932_v21 = vld [vmem:[%s32702_s9 + $0x1ca] sm:$0xff] }
 0x602   : > { %28627 = vmatmul.mubr.msk.f32.gmra.mrb[114].mxu1 %vm428_vm0, %v24748_v25  ;;  %30179 = vmatmul.mubr.msk.f32.gmra.mrb[114].mxu0 %vm428_vm0, %v24756_v57  ;;  %v24933_v25 = vld [vmem:[%s32702_s9 + $0x1d2] sm:$0xff] }
 0x603   : > { %28629 = vmatprep.mubr.msk.f32.mxu1 %vm428_vm0, %v24749_v29  ;;  %30181 = vmatprep.mubr.msk.f32.mxu0 %vm428_vm0, %v24757_v61  ;;  %v24934_v29 = vld [vmem:[%s32702_s9 + $0x1e2] sm:$0xff] }
 0x606   : > { %28630 = vmatmul.mubr.msk.f32.gmra.mrb[116].mxu1 %vm428_vm0, %v24750_v33  ;;  %30182 = vmatmul.mubr.msk.f32.gmra.mrb[116].mxu0 %vm428_vm0, %v24758_v1  ;;  %v24935_v33 = vld [vmem:[%s32702_s9 + $0x1ea] sm:$0xff] }
 0x607   : > { %28632 = vmatprep.mubr.msk.f32.mxu1 %vm428_vm0, %v24751_v37  ;;  %30184 = vmatprep.mubr.msk.f32.mxu0 %vm428_vm0, %v24759_v5  ;;  %v24936_v37 = vld [vmem:[%s32702_s9 + $0x1f2] sm:$0xff] }
 0x60a   : > { %28633 = vmatmul.mubr.msk.f32.gmra.mrb[118].mxu1 %vm428_vm0, %v24752_v41  ;;  %30185 = vmatmul.mubr.msk.f32.gmra.mrb[118].mxu0 %vm428_vm0, %v24760_v9  ;;  %v24937_v41 = vld [vmem:[%s32702_s9 + $0x1fa] sm:$0xff] }
 0x60b   : > { %28635 = vmatprep.mubr.msk.f32.mxu1 %vm428_vm0, %v24753_v45  ;;  %30187 = vmatprep.mubr.msk.f32.mxu0 %vm428_vm0, %v24761_v13  ;;  %v24938_v45 = vld [vmem:[%s32702_s9 + $0x20a] sm:$0xff]  ;;  %v24946_v13 = vld [vmem:[%s32702_s9 + $0x25a] sm:$0xff] }
 0x60e   : > { %28636 = vmatmul.mubr.msk.f32.gmra.mrb[120].mxu1 %vm428_vm0, %v24754_v49  ;;  %30188 = vmatmul.mubr.msk.f32.gmra.mrb[120].mxu0 %vm428_vm0, %v24762_v17  ;;  %v24939_v49 = vld [vmem:[%s32702_s9 + $0x212] sm:$0xff]  ;;  %v24947_v17 = vld [vmem:[%s32702_s9 + $0x262] sm:$0xff] }
 0x60f   : > { %28638 = vmatprep.mubr.msk.f32.mxu1 %vm428_vm0, %v24755_v53  ;;  %30190 = vmatprep.mubr.msk.f32.mxu0 %vm428_vm0, %v24763_v23  ;;  %v24940_v53 = vld [vmem:[%s32702_s9 + $0x21a] sm:$0xff]  ;;  %v24948_v23 = vld [vmem:[%s32702_s9 + $0x26a] sm:$0xff] }
 0x612   : > { %28639 = vmatmul.mubr.msk.f32.gmra.mrb[122].mxu1 %vm428_vm0, %v24756_v57  ;;  %30191 = vmatmul.mubr.msk.f32.gmra.mrb[122].mxu0 %vm428_vm0, %v24764_v31  ;;  %v24941_v57 = vld [vmem:[%s32702_s9 + $0x222] sm:$0xff]  ;;  %v24949_v31 = vld [vmem:[%s32702_s9 + $0x272] sm:$0xff] }
 0x613   : > { %28641 = vmatprep.mubr.msk.f32.mxu1 %vm428_vm0, %v24757_v61  ;;  %30193 = vmatprep.mubr.msk.f32.mxu0 %vm428_vm0, %v24765_v39  ;;  %v24942_v61 = vld [vmem:[%s32702_s9 + $0x232] sm:$0xff]  ;;  %v24950_v39 = vld [vmem:[%s32702_s9 + $0x282] sm:$0xff] }
 0x616   : > { %28642 = vmatmul.mubr.msk.f32.gmra.mrb[124].mxu1 %vm428_vm0, %v24758_v1  ;;  %30194 = vmatmul.mubr.msk.f32.gmra.mrb[124].mxu0 %vm428_vm0, %v24766_v47  ;;  %v24943_v1 = vld [vmem:[%s32702_s9 + $0x23a] sm:$0xff]  ;;  %v24951_v47 = vld [vmem:[%s32702_s9 + $0x28a] sm:$0xff] }
 0x617   : > { %28644 = vmatprep.mubr.msk.f32.mxu1 %vm428_vm0, %v24759_v5  ;;  %30196 = vmatprep.mubr.msk.f32.mxu0 %vm428_vm0, %v24767_v59  ;;  %v24944_v5 = vld [vmem:[%s32702_s9 + $0x242] sm:$0xff]  ;;  %v24952_v59 = vld [vmem:[%s32702_s9 + $0x292] sm:$0xff] }
 0x61a   : > { %28645 = vmatmul.mubr.msk.f32.gmra.mrb[126].mxu1 %vm428_vm0, %v24760_v9  ;;  %30197 = vmatmul.mubr.msk.f32.gmra.mrb[126].mxu0 %vm428_vm0, %v24768_v3  ;;  %v24945_v9 = vld [vmem:[%s32702_s9 + $0x24a] sm:$0xff]  ;;  %v24953_v3 = vld [vmem:[%s32702_s9 + $0x29a] sm:$0xff] }
 0x61b   : > { %28649 = vmatprep.mubr.msk.f32.mxu1 %vm428_vm0, %v22842_v55  ;;  %30201 = vmatprep.mubr.msk.f32.mxu0 %vm428_vm0, %v24898_v63  ;;  %v24954_v55 = vld [vmem:[%s32702_s9 + $0x2aa] sm:$0xff] }
 0x61e   : > { %28650 = vmatmul.mubr.msk.f32.vlgmr.msra.gmra.mrb[0].mxu1 %vm428_vm0, %v22843_v11  ;;  %30202 = vmatmul.mubr.msk.f32.vlgmr.msra.gmra.mrb[0].mxu0 %vm428_vm0, %v24899_v27  ;;  %v24956_v11 = vld [vmem:[%s32702_s9 + $0x2ba] sm:$0xff] }
 0x61f   : > { %28842 = vmatpush3.msra.mxu1 %v35541_v42  ;;  %30394 = vmatpush3.msra.mxu0 %v35546_v44  ;;  %v22847_v42 = vld [vmem:[%s32702_s9 + $0x5a] sm:$0xff]  ;;  %v24903_v44 = vld [vmem:[%s32702_s9 + $0xaa] sm:$0xff] }
 0x620   : > { %28652 = vmatprep.mubr.msk.f32.mxu1 %vm428_vm0, %v22844_v19  ;;  %30204 = vmatprep.mubr.msk.f32.mxu0 %vm428_vm0, %v24900_v35  ;;  %v24958_v19 = vld [vmem:[%s32702_s9 + $0x2d2] sm:$0xff] }
 0x622   : > { %28653 = vmatmul.mubr.msk.f32.gmra.mrb[2].mxu1 %vm428_vm0, %v22845_v43  ;;  %30205 = vmatmul.mubr.msk.f32.gmra.mrb[2].mxu0 %vm428_vm0, %v24901_v20  ;;  %v24960_v43 = vld [vmem:[%s32702_s9 + $0x2e2] sm:$0xff] }
 0x623   : > { %28655 = vmatprep.mubr.msk.f32.mxu1 %vm428_vm0, %v22846_v51  ;;  %30207 = vmatprep.mubr.msk.f32.mxu0 %vm428_vm0, %v24902_v22  ;;  %v24962_v51 = vld [vmem:[%s32702_s9 + $0x2fa] sm:$0xff] }
 0x626   : > { %28656 = vmatmul.mubr.msk.f32.gmra.mrb[4].mxu1 %vm428_vm0, %v22847_v42  ;;  %30208 = vmatmul.mubr.msk.f32.gmra.mrb[4].mxu0 %vm428_vm0, %v24903_v44  ;;  %v24964_v42 = vld [vmem:[%s32702_s9 + $0x30a] sm:$0xff] }
 0x627   : > { %28658 = vmatprep.mubr.msk.f32.mxu1 %vm428_vm0, %v22848_v15  ;;  %30210 = vmatprep.mubr.msk.f32.mxu0 %vm428_vm0, %v24904_v24  ;;  %v24966_v15 = vld [vmem:[%s32702_s9 + $0x322] sm:$0xff] }
 0x62a   : > { %28659 = vmatmul.mubr.msk.f32.gmra.mrb[6].mxu1 %vm428_vm0, %v22849_v7  ;;  %30211 = vmatmul.mubr.msk.f32.gmra.mrb[6].mxu0 %vm428_vm0, %v24905_v26  ;;  %v24968_v7 = vld [vmem:[%s32702_s9 + $0x332] sm:$0xff] }
 0x62b   : > { %28661 = vmatprep.mubr.msk.f32.mxu1 %vm428_vm0, %v24898_v63  ;;  %30213 = vmatprep.mubr.msk.f32.mxu0 %vm428_vm0, %v24906_v28  ;;  %v24955_v63 = vld [vmem:[%s32702_s9 + $0x2b2] sm:$0xff] }
 0x62e   : > { %28662 = vmatmul.mubr.msk.f32.gmra.mrb[8].mxu1 %vm428_vm0, %v24899_v27  ;;  %30214 = vmatmul.mubr.msk.f32.gmra.mrb[8].mxu0 %vm428_vm0, %v24907_v30  ;;  %v24957_v27 = vld [vmem:[%s32702_s9 + $0x2c2] sm:$0xff] }
 0x62f   : > { %28664 = vmatprep.mubr.msk.f32.mxu1 %vm428_vm0, %v24900_v35  ;;  %30216 = vmatprep.mubr.msk.f32.mxu0 %vm428_vm0, %v24908_v32  ;;  %v24959_v35 = vld [vmem:[%s32702_s9 + $0x2da] sm:$0xff] }
 0x632   : > { %28665 = vmatmul.mubr.msk.f32.gmra.mrb[10].mxu1 %vm428_vm0, %v24901_v20  ;;  %30217 = vmatmul.mubr.msk.f32.gmra.mrb[10].mxu0 %vm428_vm0, %v24909_v34  ;;  %v24961_v20 = vld [vmem:[%s32702_s9 + $0x2ea] sm:$0xff] }
 0x633   : > { %28667 = vmatprep.mubr.msk.f32.mxu1 %vm428_vm0, %v24902_v22  ;;  %30219 = vmatprep.mubr.msk.f32.mxu0 %vm428_vm0, %v24910_v36  ;;  %v24963_v22 = vld [vmem:[%s32702_s9 + $0x302] sm:$0xff] }
 0x636   : > { %28668 = vmatmul.mubr.msk.f32.gmra.mrb[12].mxu1 %vm428_vm0, %v24903_v44  ;;  %30220 = vmatmul.mubr.msk.f32.gmra.mrb[12].mxu0 %vm428_vm0, %v24911_v38  ;;  %v24965_v44 = vld [vmem:[%s32702_s9 + $0x312] sm:$0xff] }
 0x637   : > { %28670 = vmatprep.mubr.msk.f32.mxu1 %vm428_vm0, %v24904_v24  ;;  %30222 = vmatprep.mubr.msk.f32.mxu0 %vm428_vm0, %v24912_v40  ;;  %v24967_v24 = vld [vmem:[%s32702_s9 + $0x32a] sm:$0xff] }
 0x63a   : > { %28671 = vmatmul.mubr.msk.f32.gmra.mrb[14].mxu1 %vm428_vm0, %v24905_v26  ;;  %30223 = vmatmul.mubr.msk.f32.gmra.mrb[14].mxu0 %vm428_vm0, %v24913_v46  ;;  %v24969_v26 = vld [vmem:[%s32702_s9 + $0x33a] sm:$0xff] }
 0x63b   : > { %28673 = vmatprep.mubr.msk.f32.mxu1 %vm428_vm0, %v24906_v28  ;;  %30225 = vmatprep.mubr.msk.f32.mxu0 %vm428_vm0, %v24914_v48  ;;  %v24970_v28 = vld [vmem:[%s32702_s9 + $0x34a] sm:$0xff] }
 0x63e   : > { %28674 = vmatmul.mubr.msk.f32.gmra.mrb[16].mxu1 %vm428_vm0, %v24907_v30  ;;  %30226 = vmatmul.mubr.msk.f32.gmra.mrb[16].mxu0 %vm428_vm0, %v24915_v50  ;;  %v24971_v30 = vld [vmem:[%s32702_s9 + $0x352] sm:$0xff] }
 0x63f   : > { %28676 = vmatprep.mubr.msk.f32.mxu1 %vm428_vm0, %v24908_v32  ;;  %30228 = vmatprep.mubr.msk.f32.mxu0 %vm428_vm0, %v24916_v52  ;;  %v24972_v32 = vld [vmem:[%s32702_s9 + $0x35a] sm:$0xff] }
 0x642   : > { %28677 = vmatmul.mubr.msk.f32.gmra.mrb[18].mxu1 %vm428_vm0, %v24909_v34  ;;  %30229 = vmatmul.mubr.msk.f32.gmra.mrb[18].mxu0 %vm428_vm0, %v24917_v54  ;;  %v24973_v34 = vld [vmem:[%s32702_s9 + $0x362] sm:$0xff] }
 0x643   : > { %28679 = vmatprep.mubr.msk.f32.mxu1 %vm428_vm0, %v24910_v36  ;;  %30231 = vmatprep.mubr.msk.f32.mxu0 %vm428_vm0, %v24918_v56  ;;  %v24974_v36 = vld [vmem:[%s32702_s9 + $0x372] sm:$0xff] }
 0x646   : > { %28680 = vmatmul.mubr.msk.f32.gmra.mrb[20].mxu1 %vm428_vm0, %v24911_v38  ;;  %30232 = vmatmul.mubr.msk.f32.gmra.mrb[20].mxu0 %vm428_vm0, %v24919_v58  ;;  %v24975_v38 = vld [vmem:[%s32702_s9 + $0x37a] sm:$0xff] }
 0x647   : > { %28682 = vmatprep.mubr.msk.f32.mxu1 %vm428_vm0, %v24912_v40  ;;  %30234 = vmatprep.mubr.msk.f32.mxu0 %vm428_vm0, %v24920_v60  ;;  %v24976_v40 = vld [vmem:[%s32702_s9 + $0x382] sm:$0xff] }
 0x64a   : > { %28683 = vmatmul.mubr.msk.f32.gmra.mrb[22].mxu1 %vm428_vm0, %v24913_v46  ;;  %30235 = vmatmul.mubr.msk.f32.gmra.mrb[22].mxu0 %vm428_vm0, %v24921_v62  ;;  %v24977_v46 = vld [vmem:[%s32702_s9 + $0x38a] sm:$0xff] }
 0x64b   : > { %28685 = vmatprep.mubr.msk.f32.mxu1 %vm428_vm0, %v24914_v48  ;;  %30237 = vmatprep.mubr.msk.f32.mxu0 %vm428_vm0, %v24922_v0  ;;  %v24978_v48 = vld [vmem:[%s32702_s9 + $0x39a] sm:$0xff] }
 0x64e   : > { %28686 = vmatmul.mubr.msk.f32.gmra.mrb[24].mxu1 %vm428_vm0, %v24915_v50  ;;  %30238 = vmatmul.mubr.msk.f32.gmra.mrb[24].mxu0 %vm428_vm0, %v24923_v2  ;;  %v24979_v50 = vld [vmem:[%s32702_s9 + $0x3a2] sm:$0xff] }
 0x64f   : > { %28688 = vmatprep.mubr.msk.f32.mxu1 %vm428_vm0, %v24916_v52  ;;  %30240 = vmatprep.mubr.msk.f32.mxu0 %vm428_vm0, %v24924_v4  ;;  %v24980_v52 = vld [vmem:[%s32702_s9 + $0x3aa] sm:$0xff] }
 0x652   : > { %28689 = vmatmul.mubr.msk.f32.gmra.mrb[26].mxu1 %vm428_vm0, %v24917_v54  ;;  %30241 = vmatmul.mubr.msk.f32.gmra.mrb[26].mxu0 %vm428_vm0, %v24925_v6  ;;  %v24981_v54 = vld [vmem:[%s32702_s9 + $0x3b2] sm:$0xff] }
 0x653   : > { %28691 = vmatprep.mubr.msk.f32.mxu1 %vm428_vm0, %v24918_v56  ;;  %30243 = vmatprep.mubr.msk.f32.mxu0 %vm428_vm0, %v24926_v8  ;;  %v24982_v56 = vld [vmem:[%s32702_s9 + $0x3c2] sm:$0xff] }
 0x656   : > { %28692 = vmatmul.mubr.msk.f32.gmra.mrb[28].mxu1 %vm428_vm0, %v24919_v58  ;;  %30244 = vmatmul.mubr.msk.f32.gmra.mrb[28].mxu0 %vm428_vm0, %v24927_v10  ;;  %v24983_v58 = vld [vmem:[%s32702_s9 + $0x3ca] sm:$0xff] }
 0x657   : > { %28694 = vmatprep.mubr.msk.f32.mxu1 %vm428_vm0, %v24920_v60  ;;  %30246 = vmatprep.mubr.msk.f32.mxu0 %vm428_vm0, %v24928_v12  ;;  %v24984_v60 = vld [vmem:[%s32702_s9 + $0x3d2] sm:$0xff] }
 0x65a   : > { %28695 = vmatmul.mubr.msk.f32.gmra.mrb[30].mxu1 %vm428_vm0, %v24921_v62  ;;  %30247 = vmatmul.mubr.msk.f32.gmra.mrb[30].mxu0 %vm428_vm0, %v24929_v14  ;;  %v24985_v62 = vld [vmem:[%s32702_s9 + $0x3da] sm:$0xff] }
 0x65b   : > { %28697 = vmatprep.mubr.msk.f32.mxu1 %vm428_vm0, %v24922_v0  ;;  %30249 = vmatprep.mubr.msk.f32.mxu0 %vm428_vm0, %v24930_v16  ;;  %v24986_v0 = vld [vmem:[%s32702_s9 + $0x3ea] sm:$0xff] }
 0x65e   : > { %28698 = vmatmul.mubr.msk.f32.gmra.mrb[32].mxu1 %vm428_vm0, %v24923_v2  ;;  %30250 = vmatmul.mubr.msk.f32.gmra.mrb[32].mxu0 %vm428_vm0, %v24931_v18  ;;  %v24987_v2 = vld [vmem:[%s32702_s9 + $0x3f2] sm:$0xff] }
 0x65f   : > { %28700 = vmatprep.mubr.msk.f32.mxu1 %vm428_vm0, %v24924_v4  ;;  %30252 = vmatprep.mubr.msk.f32.mxu0 %vm428_vm0, %v24932_v21  ;;  %v24988_v4 = vld [vmem:[%s32702_s9 + $0x3fa] sm:$0xff] }
 0x662   : > { %28701 = vmatmul.mubr.msk.f32.gmra.mrb[34].mxu1 %vm428_vm0, %v24925_v6  ;;  %30253 = vmatmul.mubr.msk.f32.gmra.mrb[34].mxu0 %vm428_vm0, %v24933_v25  ;;  %v24989_v6 = vld [vmem:[%s32702_s9 + $0x402] sm:$0xff] }
 0x663   : > { %28703 = vmatprep.mubr.msk.f32.mxu1 %vm428_vm0, %v24926_v8  ;;  %30255 = vmatprep.mubr.msk.f32.mxu0 %vm428_vm0, %v24934_v29  ;;  %v24990_v8 = vld [vmem:[%s32702_s9 + $0x412] sm:$0xff] }
 0x666   : > { %28704 = vmatmul.mubr.msk.f32.gmra.mrb[36].mxu1 %vm428_vm0, %v24927_v10  ;;  %30256 = vmatmul.mubr.msk.f32.gmra.mrb[36].mxu0 %vm428_vm0, %v24935_v33  ;;  %v24991_v10 = vld [vmem:[%s32702_s9 + $0x41a] sm:$0xff] }
 0x667   : > { %28706 = vmatprep.mubr.msk.f32.mxu1 %vm428_vm0, %v24928_v12  ;;  %30258 = vmatprep.mubr.msk.f32.mxu0 %vm428_vm0, %v24936_v37  ;;  %v24992_v12 = vld [vmem:[%s32702_s9 + $0x422] sm:$0xff] }
 0x66a   : > { %28707 = vmatmul.mubr.msk.f32.gmra.mrb[38].mxu1 %vm428_vm0, %v24929_v14  ;;  %30259 = vmatmul.mubr.msk.f32.gmra.mrb[38].mxu0 %vm428_vm0, %v24937_v41  ;;  %v24993_v14 = vld [vmem:[%s32702_s9 + $0x42a] sm:$0xff] }
 0x66b   : > { %28709 = vmatprep.mubr.msk.f32.mxu1 %vm428_vm0, %v24930_v16  ;;  %30261 = vmatprep.mubr.msk.f32.mxu0 %vm428_vm0, %v24938_v45  ;;  %v24994_v16 = vld [vmem:[%s32702_s9 + $0x43a] sm:$0xff] }
 0x66e   : > { %28710 = vmatmul.mubr.msk.f32.gmra.mrb[40].mxu1 %vm428_vm0, %v24931_v18  ;;  %30262 = vmatmul.mubr.msk.f32.gmra.mrb[40].mxu0 %vm428_vm0, %v24939_v49  ;;  %v24995_v18 = vld [vmem:[%s32702_s9 + $0x442] sm:$0xff] }
 0x66f   : > { %28712 = vmatprep.mubr.msk.f32.mxu1 %vm428_vm0, %v24932_v21  ;;  %30264 = vmatprep.mubr.msk.f32.mxu0 %vm428_vm0, %v24940_v53  ;;  %v24996_v21 = vld [vmem:[%s32702_s9 + $0x44a] sm:$0xff] }
 0x672   : > { %28713 = vmatmul.mubr.msk.f32.gmra.mrb[42].mxu1 %vm428_vm0, %v24933_v25  ;;  %30265 = vmatmul.mubr.msk.f32.gmra.mrb[42].mxu0 %vm428_vm0, %v24941_v57  ;;  %v24997_v25 = vld [vmem:[%s32702_s9 + $0x452] sm:$0xff] }
 0x673   : > { %28715 = vmatprep.mubr.msk.f32.mxu1 %vm428_vm0, %v24934_v29  ;;  %30267 = vmatprep.mubr.msk.f32.mxu0 %vm428_vm0, %v24942_v61  ;;  %v24998_v29 = vld [vmem:[%s32702_s9 + $0x462] sm:$0xff] }
 0x676   : > { %28716 = vmatmul.mubr.msk.f32.gmra.mrb[44].mxu1 %vm428_vm0, %v24935_v33  ;;  %30268 = vmatmul.mubr.msk.f32.gmra.mrb[44].mxu0 %vm428_vm0, %v24943_v1  ;;  %v24999_v33 = vld [vmem:[%s32702_s9 + $0x46a] sm:$0xff] }
 0x677   : > { %28718 = vmatprep.mubr.msk.f32.mxu1 %vm428_vm0, %v24936_v37  ;;  %30270 = vmatprep.mubr.msk.f32.mxu0 %vm428_vm0, %v24944_v5  ;;  %v25000_v37 = vld [vmem:[%s32702_s9 + $0x472] sm:$0xff] }
 0x67a   : > { %28719 = vmatmul.mubr.msk.f32.gmra.mrb[46].mxu1 %vm428_vm0, %v24937_v41  ;;  %30271 = vmatmul.mubr.msk.f32.gmra.mrb[46].mxu0 %vm428_vm0, %v24945_v9  ;;  %v25001_v41 = vld [vmem:[%s32702_s9 + $0x47a] sm:$0xff] }
 0x67b   : > { %28721 = vmatprep.mubr.msk.f32.mxu1 %vm428_vm0, %v24938_v45  ;;  %30273 = vmatprep.mubr.msk.f32.mxu0 %vm428_vm0, %v24946_v13  ;;  %v25002_v45 = vld [vmem:[%s32702_s9 + $0x48a] sm:$0xff] }
 0x67e   : > { %28722 = vmatmul.mubr.msk.f32.gmra.mrb[48].mxu1 %vm428_vm0, %v24939_v49  ;;  %30274 = vmatmul.mubr.msk.f32.gmra.mrb[48].mxu0 %vm428_vm0, %v24947_v17  ;;  %v25003_v49 = vld [vmem:[%s32702_s9 + $0x492] sm:$0xff] }
 0x67f   : > { %28724 = vmatprep.mubr.msk.f32.mxu1 %vm428_vm0, %v24940_v53  ;;  %30276 = vmatprep.mubr.msk.f32.mxu0 %vm428_vm0, %v24948_v23  ;;  %v25004_v53 = vld [vmem:[%s32702_s9 + $0x49a] sm:$0xff] }
 0x682   : > { %28725 = vmatmul.mubr.msk.f32.gmra.mrb[50].mxu1 %vm428_vm0, %v24941_v57  ;;  %30277 = vmatmul.mubr.msk.f32.gmra.mrb[50].mxu0 %vm428_vm0, %v24949_v31  ;;  %v25005_v57 = vld [vmem:[%s32702_s9 + $0x4a2] sm:$0xff] }
 0x683   : > { %28727 = vmatprep.mubr.msk.f32.mxu1 %vm428_vm0, %v24942_v61  ;;  %30279 = vmatprep.mubr.msk.f32.mxu0 %vm428_vm0, %v24950_v39  ;;  %v25006_v61 = vld [vmem:[%s32702_s9 + $0x4b2] sm:$0xff] }
 0x686   : > { %28728 = vmatmul.mubr.msk.f32.gmra.mrb[52].mxu1 %vm428_vm0, %v24943_v1  ;;  %30280 = vmatmul.mubr.msk.f32.gmra.mrb[52].mxu0 %vm428_vm0, %v24951_v47  ;;  %v25007_v1 = vld [vmem:[%s32702_s9 + $0x4ba] sm:$0xff] }
 0x687   : > { %28730 = vmatprep.mubr.msk.f32.mxu1 %vm428_vm0, %v24944_v5  ;;  %30282 = vmatprep.mubr.msk.f32.mxu0 %vm428_vm0, %v24952_v59  ;;  %v25008_v5 = vld [vmem:[%s32702_s9 + $0x4c2] sm:$0xff] }
 0x68a   : > { %28731 = vmatmul.mubr.msk.f32.gmra.mrb[54].mxu1 %vm428_vm0, %v24945_v9  ;;  %30283 = vmatmul.mubr.msk.f32.gmra.mrb[54].mxu0 %vm428_vm0, %v24953_v3  ;;  %v25009_v9 = vld [vmem:[%s32702_s9 + $0x4ca] sm:$0xff] }
 0x68b   : > { %28733 = vmatprep.mubr.msk.f32.mxu1 %vm428_vm0, %v24946_v13  ;;  %30285 = vmatprep.mubr.msk.f32.mxu0 %vm428_vm0, %v24954_v55  ;;  %v25010_v13 = vld [vmem:[%s32702_s9 + $0x4da] sm:$0xff] }
 0x68e   : > { %28734 = vmatmul.mubr.msk.f32.gmra.mrb[56].mxu1 %vm428_vm0, %v24947_v17  ;;  %30286 = vmatmul.mubr.msk.f32.gmra.mrb[56].mxu0 %vm428_vm0, %v24955_v63  ;;  %v25011_v17 = vld [vmem:[%s32702_s9 + $0x4e2] sm:$0xff] }
 0x68f   : > { %28736 = vmatprep.mubr.msk.f32.mxu1 %vm428_vm0, %v24948_v23  ;;  %30288 = vmatprep.mubr.msk.f32.mxu0 %vm428_vm0, %v24956_v11  ;;  %v25012_v23 = vld [vmem:[%s32702_s9 + $0x4ea] sm:$0xff] }
 0x692   : > { %28737 = vmatmul.mubr.msk.f32.gmra.mrb[58].mxu1 %vm428_vm0, %v24949_v31  ;;  %30289 = vmatmul.mubr.msk.f32.gmra.mrb[58].mxu0 %vm428_vm0, %v24957_v27  ;;  %v25013_v31 = vld [vmem:[%s32702_s9 + $0x4f2] sm:$0xff] }
 0x693   : > { %28739 = vmatprep.mubr.msk.f32.mxu1 %vm428_vm0, %v24950_v39  ;;  %30291 = vmatprep.mubr.msk.f32.mxu0 %vm428_vm0, %v24958_v19  ;;  %v25014_v39 = vld [vmem:[%s32702_s9 + $0x502] sm:$0xff] }
 0x696   : > { %28740 = vmatmul.mubr.msk.f32.gmra.mrb[60].mxu1 %vm428_vm0, %v24951_v47  ;;  %30292 = vmatmul.mubr.msk.f32.gmra.mrb[60].mxu0 %vm428_vm0, %v24959_v35  ;;  %v25015_v47 = vld [vmem:[%s32702_s9 + $0x50a] sm:$0xff] }
 0x697   : > { %28742 = vmatprep.mubr.msk.f32.mxu1 %vm428_vm0, %v24952_v59  ;;  %30294 = vmatprep.mubr.msk.f32.mxu0 %vm428_vm0, %v24960_v43  ;;  %v25016_v59 = vld [vmem:[%s32702_s9 + $0x512] sm:$0xff] }
 0x69a   : > { %28743 = vmatmul.mubr.msk.f32.gmra.mrb[62].mxu1 %vm428_vm0, %v24953_v3  ;;  %30295 = vmatmul.mubr.msk.f32.gmra.mrb[62].mxu0 %vm428_vm0, %v24961_v20  ;;  %v25017_v3 = vld [vmem:[%s32702_s9 + $0x51a] sm:$0xff] }
 0x69b   : > { %28745 = vmatprep.mubr.msk.f32.mxu1 %vm428_vm0, %v24954_v55  ;;  %30297 = vmatprep.mubr.msk.f32.mxu0 %vm428_vm0, %v24962_v51  ;;  %v25018_v55 = vld [vmem:[%s32702_s9 + $0x52a] sm:$0xff] }
 0x69e   : > { %28746 = vmatmul.mubr.msk.f32.gmra.mrb[64].mxu1 %vm428_vm0, %v24955_v63  ;;  %30298 = vmatmul.mubr.msk.f32.gmra.mrb[64].mxu0 %vm428_vm0, %v24963_v22  ;;  %v25019_v63 = vld [vmem:[%s32702_s9 + $0x532] sm:$0xff] }
 0x69f   : > { %28748 = vmatprep.mubr.msk.f32.mxu1 %vm428_vm0, %v24956_v11  ;;  %30300 = vmatprep.mubr.msk.f32.mxu0 %vm428_vm0, %v24964_v42  ;;  %v25020_v11 = vld [vmem:[%s32702_s9 + $0x53a] sm:$0xff] }
 0x6a2   : > { %28749 = vmatmul.mubr.msk.f32.gmra.mrb[66].mxu1 %vm428_vm0, %v24957_v27  ;;  %30301 = vmatmul.mubr.msk.f32.gmra.mrb[66].mxu0 %vm428_vm0, %v24965_v44  ;;  %v25021_v27 = vld [vmem:[%s32702_s9 + $0x542] sm:$0xff] }
 0x6a3   : > { %28751 = vmatprep.mubr.msk.f32.mxu1 %vm428_vm0, %v24958_v19  ;;  %30303 = vmatprep.mubr.msk.f32.mxu0 %vm428_vm0, %v24966_v15  ;;  %v25022_v19 = vld [vmem:[%s32702_s9 + $0x552] sm:$0xff] }
 0x6a6   : > { %28752 = vmatmul.mubr.msk.f32.gmra.mrb[68].mxu1 %vm428_vm0, %v24959_v35  ;;  %30304 = vmatmul.mubr.msk.f32.gmra.mrb[68].mxu0 %vm428_vm0, %v24967_v24  ;;  %v25023_v35 = vld [vmem:[%s32702_s9 + $0x55a] sm:$0xff] }
 0x6a7   : > { %28754 = vmatprep.mubr.msk.f32.mxu1 %vm428_vm0, %v24960_v43  ;;  %30306 = vmatprep.mubr.msk.f32.mxu0 %vm428_vm0, %v24968_v7  ;;  %v25024_v43 = vld [vmem:[%s32702_s9 + $0x562] sm:$0xff] }
 0x6aa   : > { %28755 = vmatmul.mubr.msk.f32.gmra.mrb[70].mxu1 %vm428_vm0, %v24961_v20  ;;  %30307 = vmatmul.mubr.msk.f32.gmra.mrb[70].mxu0 %vm428_vm0, %v24969_v26  ;;  %v25025_v20 = vld [vmem:[%s32702_s9 + $0x56a] sm:$0xff] }
 0x6ab   : > { %28757 = vmatprep.mubr.msk.f32.mxu1 %vm428_vm0, %v24962_v51  ;;  %30309 = vmatprep.mubr.msk.f32.mxu0 %vm428_vm0, %v24970_v28  ;;  %v23099_v51 = vld [vmem:[%s32702_s9 + $0x2b] sm:$0xff] }
 0x6ae   : > { %28758 = vmatmul.mubr.msk.f32.gmra.mrb[72].mxu1 %vm428_vm0, %v24963_v22  ;;  %30310 = vmatmul.mubr.msk.f32.gmra.mrb[72].mxu0 %vm428_vm0, %v24971_v30  ;;  %v25155_v22 = vld [vmem:[%s32702_s9 + $0x7b] sm:$0xff] }
 0x6af   : > { %28760 = vmatprep.mubr.msk.f32.mxu1 %vm428_vm0, %v24964_v42  ;;  %30312 = vmatprep.mubr.msk.f32.mxu0 %vm428_vm0, %v24972_v32  ;;  %v23100_v42 = vld [vmem:[%s32702_s9 + $0x33] sm:$0xff] }
 0x6b2   : > { %28761 = vmatmul.mubr.msk.f32.gmra.mrb[74].mxu1 %vm428_vm0, %v24965_v44  ;;  %30313 = vmatmul.mubr.msk.f32.gmra.mrb[74].mxu0 %vm428_vm0, %v24973_v34  ;;  %v25156_v44 = vld [vmem:[%s32702_s9 + $0x83] sm:$0xff] }
 0x6b3   : > { %28763 = vmatprep.mubr.msk.f32.mxu1 %vm428_vm0, %v24966_v15  ;;  %30315 = vmatprep.mubr.msk.f32.mxu0 %vm428_vm0, %v24974_v36  ;;  %v23101_v15 = vld [vmem:[%s32702_s9 + $0x3b] sm:$0xff] }
 0x6b6   : > { %28764 = vmatmul.mubr.msk.f32.gmra.mrb[76].mxu1 %vm428_vm0, %v24967_v24  ;;  %30316 = vmatmul.mubr.msk.f32.gmra.mrb[76].mxu0 %vm428_vm0, %v24975_v38  ;;  %v25157_v24 = vld [vmem:[%s32702_s9 + $0x8b] sm:$0xff] }
 0x6b7   : > { %28766 = vmatprep.mubr.msk.f32.mxu1 %vm428_vm0, %v24968_v7  ;;  %30318 = vmatprep.mubr.msk.f32.mxu0 %vm428_vm0, %v24976_v40  ;;  %v23102_v7 = vld [vmem:[%s32702_s9 + $0x43] sm:$0xff] }
 0x6ba   : > { %28767 = vmatmul.mubr.msk.f32.gmra.mrb[78].mxu1 %vm428_vm0, %v24969_v26  ;;  %30319 = vmatmul.mubr.msk.f32.gmra.mrb[78].mxu0 %vm428_vm0, %v24977_v46  ;;  %v25158_v26 = vld [vmem:[%s32702_s9 + $0x93] sm:$0xff] }
 0x6bb   : > { %28769 = vmatprep.mubr.msk.f32.mxu1 %vm428_vm0, %v24970_v28  ;;  %30321 = vmatprep.mubr.msk.f32.mxu0 %vm428_vm0, %v24978_v48  ;;  %v23103_v28 = vld [vmem:[%s32702_s9 + $0x53] sm:$0xff] }
 0x6be   : > { %28770 = vmatmul.mubr.msk.f32.gmra.mrb[80].mxu1 %vm428_vm0, %v24971_v30  ;;  %30322 = vmatmul.mubr.msk.f32.gmra.mrb[80].mxu0 %vm428_vm0, %v24979_v50  ;;  %v25159_v30 = vld [vmem:[%s32702_s9 + $0xa3] sm:$0xff] }
 0x6bf   : > { %28772 = vmatprep.mubr.msk.f32.mxu1 %vm428_vm0, %v24972_v32  ;;  %30324 = vmatprep.mubr.msk.f32.mxu0 %vm428_vm0, %v24980_v52  ;;  %v23104_v32 = vld [vmem:[%s32702_s9 + $0x5b] sm:$0xff] }
 0x6c2   : > { %28773 = vmatmul.mubr.msk.f32.gmra.mrb[82].mxu1 %vm428_vm0, %v24973_v34  ;;  %30325 = vmatmul.mubr.msk.f32.gmra.mrb[82].mxu0 %vm428_vm0, %v24981_v54  ;;  %v25160_v34 = vld [vmem:[%s32702_s9 + $0xab] sm:$0xff] }
 0x6c3   : > { %28775 = vmatprep.mubr.msk.f32.mxu1 %vm428_vm0, %v24974_v36  ;;  %30327 = vmatprep.mubr.msk.f32.mxu0 %vm428_vm0, %v24982_v56  ;;  %v23105_v36 = vld [vmem:[%s32702_s9 + $0x63] sm:$0xff] }
 0x6c6   : > { %28776 = vmatmul.mubr.msk.f32.gmra.mrb[84].mxu1 %vm428_vm0, %v24975_v38  ;;  %30328 = vmatmul.mubr.msk.f32.gmra.mrb[84].mxu0 %vm428_vm0, %v24983_v58  ;;  %v25161_v38 = vld [vmem:[%s32702_s9 + $0xb3] sm:$0xff] }
 0x6c7   : > { %28778 = vmatprep.mubr.msk.f32.mxu1 %vm428_vm0, %v24976_v40  ;;  %30330 = vmatprep.mubr.msk.f32.mxu0 %vm428_vm0, %v24984_v60  ;;  %v23106_v40 = vld [vmem:[%s32702_s9 + $0x6b] sm:$0xff] }
 0x6ca   : > { %28779 = vmatmul.mubr.msk.f32.gmra.mrb[86].mxu1 %vm428_vm0, %v24977_v46  ;;  %30331 = vmatmul.mubr.msk.f32.gmra.mrb[86].mxu0 %vm428_vm0, %v24985_v62  ;;  %v25162_v46 = vld [vmem:[%s32702_s9 + $0xbb] sm:$0xff] }
 0x6cb   : > { %28781 = vmatprep.mubr.msk.f32.mxu1 %vm428_vm0, %v24978_v48  ;;  %30333 = vmatprep.mubr.msk.f32.mxu0 %vm428_vm0, %v24986_v0  ;;  %v25163_v48 = vld [vmem:[%s32702_s9 + $0xcb] sm:$0xff] }
 0x6ce   : > { %28782 = vmatmul.mubr.msk.f32.gmra.mrb[88].mxu1 %vm428_vm0, %v24979_v50  ;;  %30334 = vmatmul.mubr.msk.f32.gmra.mrb[88].mxu0 %vm428_vm0, %v24987_v2  ;;  %v25164_v50 = vld [vmem:[%s32702_s9 + $0xd3] sm:$0xff] }
 0x6cf   : > { %28784 = vmatprep.mubr.msk.f32.mxu1 %vm428_vm0, %v24980_v52  ;;  %30336 = vmatprep.mubr.msk.f32.mxu0 %vm428_vm0, %v24988_v4  ;;  %v25165_v52 = vld [vmem:[%s32702_s9 + $0xdb] sm:$0xff] }
 0x6d2   : > { %28785 = vmatmul.mubr.msk.f32.gmra.mrb[90].mxu1 %vm428_vm0, %v24981_v54  ;;  %30337 = vmatmul.mubr.msk.f32.gmra.mrb[90].mxu0 %vm428_vm0, %v24989_v6  ;;  %v25166_v54 = vld [vmem:[%s32702_s9 + $0xe3] sm:$0xff] }
 0x6d3   : > { %28787 = vmatprep.mubr.msk.f32.mxu1 %vm428_vm0, %v24982_v56  ;;  %30339 = vmatprep.mubr.msk.f32.mxu0 %vm428_vm0, %v24990_v8  ;;  %v25167_v56 = vld [vmem:[%s32702_s9 + $0xf3] sm:$0xff] }
 0x6d6   : > { %28788 = vmatmul.mubr.msk.f32.gmra.mrb[92].mxu1 %vm428_vm0, %v24983_v58  ;;  %30340 = vmatmul.mubr.msk.f32.gmra.mrb[92].mxu0 %vm428_vm0, %v24991_v10  ;;  %v25168_v58 = vld [vmem:[%s32702_s9 + $0xfb] sm:$0xff] }
 0x6d7   : > { %28790 = vmatprep.mubr.msk.f32.mxu1 %vm428_vm0, %v24984_v60  ;;  %30342 = vmatprep.mubr.msk.f32.mxu0 %vm428_vm0, %v24992_v12  ;;  %v25169_v60 = vld [vmem:[%s32702_s9 + $0x103] sm:$0xff] }
 0x6da   : > { %28791 = vmatmul.mubr.msk.f32.gmra.mrb[94].mxu1 %vm428_vm0, %v24985_v62  ;;  %30343 = vmatmul.mubr.msk.f32.gmra.mrb[94].mxu0 %vm428_vm0, %v24993_v14  ;;  %v25170_v62 = vld [vmem:[%s32702_s9 + $0x10b] sm:$0xff] }
 0x6db   : > { %28793 = vmatprep.mubr.msk.f32.mxu1 %vm428_vm0, %v24986_v0  ;;  %30345 = vmatprep.mubr.msk.f32.mxu0 %vm428_vm0, %v24994_v16  ;;  %v25171_v0 = vld [vmem:[%s32702_s9 + $0x11b] sm:$0xff] }
 0x6de   : > { %28794 = vmatmul.mubr.msk.f32.gmra.mrb[96].mxu1 %vm428_vm0, %v24987_v2  ;;  %30346 = vmatmul.mubr.msk.f32.gmra.mrb[96].mxu0 %vm428_vm0, %v24995_v18  ;;  %v25172_v2 = vld [vmem:[%s32702_s9 + $0x123] sm:$0xff] }
 0x6df   : > { %28796 = vmatprep.mubr.msk.f32.mxu1 %vm428_vm0, %v24988_v4  ;;  %30348 = vmatprep.mubr.msk.f32.mxu0 %vm428_vm0, %v24996_v21  ;;  %v25173_v4 = vld [vmem:[%s32702_s9 + $0x12b] sm:$0xff] }
 0x6e2   : > { %28797 = vmatmul.mubr.msk.f32.gmra.mrb[98].mxu1 %vm428_vm0, %v24989_v6  ;;  %30349 = vmatmul.mubr.msk.f32.gmra.mrb[98].mxu0 %vm428_vm0, %v24997_v25  ;;  %v25174_v6 = vld [vmem:[%s32702_s9 + $0x133] sm:$0xff] }
 0x6e3   : > { %28799 = vmatprep.mubr.msk.f32.mxu1 %vm428_vm0, %v24990_v8  ;;  %30351 = vmatprep.mubr.msk.f32.mxu0 %vm428_vm0, %v24998_v29  ;;  %v25175_v8 = vld [vmem:[%s32702_s9 + $0x143] sm:$0xff] }
 0x6e6   : > { %28800 = vmatmul.mubr.msk.f32.gmra.mrb[100].mxu1 %vm428_vm0, %v24991_v10  ;;  %30352 = vmatmul.mubr.msk.f32.gmra.mrb[100].mxu0 %vm428_vm0, %v24999_v33  ;;  %v25176_v10 = vld [vmem:[%s32702_s9 + $0x14b] sm:$0xff] }
 0x6e7   : > { %28802 = vmatprep.mubr.msk.f32.mxu1 %vm428_vm0, %v24992_v12  ;;  %30354 = vmatprep.mubr.msk.f32.mxu0 %vm428_vm0, %v25000_v37  ;;  %v25177_v12 = vld [vmem:[%s32702_s9 + $0x153] sm:$0xff] }
 0x6ea   : > { %28803 = vmatmul.mubr.msk.f32.gmra.mrb[102].mxu1 %vm428_vm0, %v24993_v14  ;;  %30355 = vmatmul.mubr.msk.f32.gmra.mrb[102].mxu0 %vm428_vm0, %v25001_v41  ;;  %v25178_v14 = vld [vmem:[%s32702_s9 + $0x15b] sm:$0xff] }
 0x6eb   : > { %28805 = vmatprep.mubr.msk.f32.mxu1 %vm428_vm0, %v24994_v16  ;;  %30357 = vmatprep.mubr.msk.f32.mxu0 %vm428_vm0, %v25002_v45  ;;  %v25179_v16 = vld [vmem:[%s32702_s9 + $0x16b] sm:$0xff] }
 0x6ee   : > { %28806 = vmatmul.mubr.msk.f32.gmra.mrb[104].mxu1 %vm428_vm0, %v24995_v18  ;;  %30358 = vmatmul.mubr.msk.f32.gmra.mrb[104].mxu0 %vm428_vm0, %v25003_v49  ;;  %v25180_v18 = vld [vmem:[%s32702_s9 + $0x173] sm:$0xff] }
 0x6ef   : > { %28808 = vmatprep.mubr.msk.f32.mxu1 %vm428_vm0, %v24996_v21  ;;  %30360 = vmatprep.mubr.msk.f32.mxu0 %vm428_vm0, %v25004_v53  ;;  %v25181_v21 = vld [vmem:[%s32702_s9 + $0x17b] sm:$0xff] }
 0x6f2   : > { %28809 = vmatmul.mubr.msk.f32.gmra.mrb[106].mxu1 %vm428_vm0, %v24997_v25  ;;  %30361 = vmatmul.mubr.msk.f32.gmra.mrb[106].mxu0 %vm428_vm0, %v25005_v57  ;;  %v25182_v25 = vld [vmem:[%s32702_s9 + $0x183] sm:$0xff] }
 0x6f3   : > { %28811 = vmatprep.mubr.msk.f32.mxu1 %vm428_vm0, %v24998_v29  ;;  %30363 = vmatprep.mubr.msk.f32.mxu0 %vm428_vm0, %v25006_v61  ;;  %v25183_v29 = vld [vmem:[%s32702_s9 + $0x193] sm:$0xff] }
 0x6f6   : > { %28812 = vmatmul.mubr.msk.f32.gmra.mrb[108].mxu1 %vm428_vm0, %v24999_v33  ;;  %30364 = vmatmul.mubr.msk.f32.gmra.mrb[108].mxu0 %vm428_vm0, %v25007_v1  ;;  %v25184_v33 = vld [vmem:[%s32702_s9 + $0x19b] sm:$0xff] }
 0x6f7   : > { %28814 = vmatprep.mubr.msk.f32.mxu1 %vm428_vm0, %v25000_v37  ;;  %30366 = vmatprep.mubr.msk.f32.mxu0 %vm428_vm0, %v25008_v5  ;;  %v25185_v37 = vld [vmem:[%s32702_s9 + $0x1a3] sm:$0xff] }
 0x6fa   : > { %28815 = vmatmul.mubr.msk.f32.gmra.mrb[110].mxu1 %vm428_vm0, %v25001_v41  ;;  %30367 = vmatmul.mubr.msk.f32.gmra.mrb[110].mxu0 %vm428_vm0, %v25009_v9  ;;  %v25186_v41 = vld [vmem:[%s32702_s9 + $0x1ab] sm:$0xff] }
 0x6fb   : > { %28817 = vmatprep.mubr.msk.f32.mxu1 %vm428_vm0, %v25002_v45  ;;  %30369 = vmatprep.mubr.msk.f32.mxu0 %vm428_vm0, %v25010_v13  ;;  %v25187_v45 = vld [vmem:[%s32702_s9 + $0x1bb] sm:$0xff] }
 0x6fe   : > { %28818 = vmatmul.mubr.msk.f32.gmra.mrb[112].mxu1 %vm428_vm0, %v25003_v49  ;;  %30370 = vmatmul.mubr.msk.f32.gmra.mrb[112].mxu0 %vm428_vm0, %v25011_v17  ;;  %v25188_v49 = vld [vmem:[%s32702_s9 + $0x1c3] sm:$0xff] }
 0x6ff   : > { %28820 = vmatprep.mubr.msk.f32.mxu1 %vm428_vm0, %v25004_v53  ;;  %30372 = vmatprep.mubr.msk.f32.mxu0 %vm428_vm0, %v25012_v23  ;;  %v25189_v53 = vld [vmem:[%s32702_s9 + $0x1cb] sm:$0xff] }
 0x702   : > { %28821 = vmatmul.mubr.msk.f32.gmra.mrb[114].mxu1 %vm428_vm0, %v25005_v57  ;;  %30373 = vmatmul.mubr.msk.f32.gmra.mrb[114].mxu0 %vm428_vm0, %v25013_v31  ;;  %v25190_v57 = vld [vmem:[%s32702_s9 + $0x1d3] sm:$0xff] }
 0x703   : > { %28823 = vmatprep.mubr.msk.f32.mxu1 %vm428_vm0, %v25006_v61  ;;  %30375 = vmatprep.mubr.msk.f32.mxu0 %vm428_vm0, %v25014_v39  ;;  %v25191_v61 = vld [vmem:[%s32702_s9 + $0x1e3] sm:$0xff] }
 0x706   : > { %28824 = vmatmul.mubr.msk.f32.gmra.mrb[116].mxu1 %vm428_vm0, %v25007_v1  ;;  %30376 = vmatmul.mubr.msk.f32.gmra.mrb[116].mxu0 %vm428_vm0, %v25015_v47  ;;  %v25192_v1 = vld [vmem:[%s32702_s9 + $0x1eb] sm:$0xff] }
 0x707   : > { %28826 = vmatprep.mubr.msk.f32.mxu1 %vm428_vm0, %v25008_v5  ;;  %30378 = vmatprep.mubr.msk.f32.mxu0 %vm428_vm0, %v25016_v59  ;;  %v25193_v5 = vld [vmem:[%s32702_s9 + $0x1f3] sm:$0xff] }
 0x70a   : > { %28827 = vmatmul.mubr.msk.f32.gmra.mrb[118].mxu1 %vm428_vm0, %v25009_v9  ;;  %30379 = vmatmul.mubr.msk.f32.gmra.mrb[118].mxu0 %vm428_vm0, %v25017_v3  ;;  %v25194_v9 = vld [vmem:[%s32702_s9 + $0x1fb] sm:$0xff] }
 0x70b   : > { %28829 = vmatprep.mubr.msk.f32.mxu1 %vm428_vm0, %v25010_v13  ;;  %30381 = vmatprep.mubr.msk.f32.mxu0 %vm428_vm0, %v25018_v55  ;;  %v25195_v13 = vld [vmem:[%s32702_s9 + $0x20b] sm:$0xff]  ;;  %v25203_v55 = vld [vmem:[%s32702_s9 + $0x25b] sm:$0xff] }
 0x70e   : > { %28830 = vmatmul.mubr.msk.f32.gmra.mrb[120].mxu1 %vm428_vm0, %v25011_v17  ;;  %30382 = vmatmul.mubr.msk.f32.gmra.mrb[120].mxu0 %vm428_vm0, %v25019_v63  ;;  %v25196_v17 = vld [vmem:[%s32702_s9 + $0x213] sm:$0xff]  ;;  %v25204_v63 = vld [vmem:[%s32702_s9 + $0x263] sm:$0xff] }
 0x70f   : > { %28832 = vmatprep.mubr.msk.f32.mxu1 %vm428_vm0, %v25012_v23  ;;  %30384 = vmatprep.mubr.msk.f32.mxu0 %vm428_vm0, %v25020_v11  ;;  %v25197_v23 = vld [vmem:[%s32702_s9 + $0x21b] sm:$0xff]  ;;  %v25205_v11 = vld [vmem:[%s32702_s9 + $0x26b] sm:$0xff] }
 0x712   : > { %28833 = vmatmul.mubr.msk.f32.gmra.mrb[122].mxu1 %vm428_vm0, %v25013_v31  ;;  %30385 = vmatmul.mubr.msk.f32.gmra.mrb[122].mxu0 %vm428_vm0, %v25021_v27  ;;  %v25198_v31 = vld [vmem:[%s32702_s9 + $0x223] sm:$0xff]  ;;  %v25206_v27 = vld [vmem:[%s32702_s9 + $0x273] sm:$0xff] }
 0x713   : > { %28835 = vmatprep.mubr.msk.f32.mxu1 %vm428_vm0, %v25014_v39  ;;  %30387 = vmatprep.mubr.msk.f32.mxu0 %vm428_vm0, %v25022_v19  ;;  %v25199_v39 = vld [vmem:[%s32702_s9 + $0x233] sm:$0xff]  ;;  %v25207_v19 = vld [vmem:[%s32702_s9 + $0x283] sm:$0xff] }
 0x716   : > { %28836 = vmatmul.mubr.msk.f32.gmra.mrb[124].mxu1 %vm428_vm0, %v25015_v47  ;;  %30388 = vmatmul.mubr.msk.f32.gmra.mrb[124].mxu0 %vm428_vm0, %v25023_v35  ;;  %v25200_v47 = vld [vmem:[%s32702_s9 + $0x23b] sm:$0xff]  ;;  %v25208_v35 = vld [vmem:[%s32702_s9 + $0x28b] sm:$0xff] }
 0x717   : > { %28838 = vmatprep.mubr.msk.f32.mxu1 %vm428_vm0, %v25016_v59  ;;  %30390 = vmatprep.mubr.msk.f32.mxu0 %vm428_vm0, %v25024_v43  ;;  %v25201_v59 = vld [vmem:[%s32702_s9 + $0x243] sm:$0xff]  ;;  %v25209_v43 = vld [vmem:[%s32702_s9 + $0x293] sm:$0xff] }
 0x71a   : > { %28839 = vmatmul.mubr.msk.f32.gmra.mrb[126].mxu1 %vm428_vm0, %v25017_v3  ;;  %30391 = vmatmul.mubr.msk.f32.gmra.mrb[126].mxu0 %vm428_vm0, %v25025_v20  ;;  %v25202_v3 = vld [vmem:[%s32702_s9 + $0x24b] sm:$0xff]  ;;  %v25210_v20 = vld [vmem:[%s32702_s9 + $0x29b] sm:$0xff] }
 0x71b   : > { %28843 = vmatprep.mubr.msk.f32.mxu1 %vm428_vm0, %v23099_v51  ;;  %30395 = vmatprep.mubr.msk.f32.mxu0 %vm428_vm0, %v25155_v22  ;;  %v25211_v51 = vld [vmem:[%s32702_s9 + $0x2ab] sm:$0xff] }
 0x71e   : > { %28844 = vmatmul.mubr.msk.f32.vlgmr.msra.gmra.mrb[0].mxu1 %vm428_vm0, %v23100_v42  ;;  %30396 = vmatmul.mubr.msk.f32.vlgmr.msra.gmra.mrb[0].mxu0 %vm428_vm0, %v25156_v44  ;;  %v25213_v42 = vld [vmem:[%s32702_s9 + $0x2bb] sm:$0xff] }
 0x71f   : > { %28846 = vmatprep.mubr.msk.f32.mxu1 %vm428_vm0, %v23101_v15  ;;  %30398 = vmatprep.mubr.msk.f32.mxu0 %vm428_vm0, %v25157_v24  ;;  %v25215_v15 = vld [vmem:[%s32702_s9 + $0x2d3] sm:$0xff] }
 0x722   : > { %28847 = vmatmul.mubr.msk.f32.gmra.mrb[2].mxu1 %vm428_vm0, %v23102_v7  ;;  %30399 = vmatmul.mubr.msk.f32.gmra.mrb[2].mxu0 %vm428_vm0, %v25158_v26  ;;  %v25217_v7 = vld [vmem:[%s32702_s9 + $0x2e3] sm:$0xff] }
 0x723   : > { %28849 = vmatprep.mubr.msk.f32.mxu1 %vm428_vm0, %v23103_v28  ;;  %30401 = vmatprep.mubr.msk.f32.mxu0 %vm428_vm0, %v25159_v30  ;;  %v25219_v28 = vld [vmem:[%s32702_s9 + $0x2fb] sm:$0xff] }
 0x726   : > { %28850 = vmatmul.mubr.msk.f32.gmra.mrb[4].mxu1 %vm428_vm0, %v23104_v32  ;;  %30402 = vmatmul.mubr.msk.f32.gmra.mrb[4].mxu0 %vm428_vm0, %v25160_v34  ;;  %v25221_v32 = vld [vmem:[%s32702_s9 + $0x30b] sm:$0xff] }
 0x727   : > { %28852 = vmatprep.mubr.msk.f32.mxu1 %vm428_vm0, %v23105_v36  ;;  %30404 = vmatprep.mubr.msk.f32.mxu0 %vm428_vm0, %v25161_v38  ;;  %v25223_v36 = vld [vmem:[%s32702_s9 + $0x323] sm:$0xff] }
 0x72a   : > { %28853 = vmatmul.mubr.msk.f32.gmra.mrb[6].mxu1 %vm428_vm0, %v23106_v40  ;;  %30405 = vmatmul.mubr.msk.f32.gmra.mrb[6].mxu0 %vm428_vm0, %v25162_v46  ;;  %v25225_v40 = vld [vmem:[%s32702_s9 + $0x333] sm:$0xff] }
 0x72b   : > { %28855 = vmatprep.mubr.msk.f32.mxu1 %vm428_vm0, %v25155_v22  ;;  %30407 = vmatprep.mubr.msk.f32.mxu0 %vm428_vm0, %v25163_v48  ;;  %v25212_v22 = vld [vmem:[%s32702_s9 + $0x2b3] sm:$0xff] }
 0x72e   : > { %28856 = vmatmul.mubr.msk.f32.gmra.mrb[8].mxu1 %vm428_vm0, %v25156_v44  ;;  %30408 = vmatmul.mubr.msk.f32.gmra.mrb[8].mxu0 %vm428_vm0, %v25164_v50  ;;  %v25214_v44 = vld [vmem:[%s32702_s9 + $0x2c3] sm:$0xff] }
 0x72f   : > { %28858 = vmatprep.mubr.msk.f32.mxu1 %vm428_vm0, %v25157_v24  ;;  %30410 = vmatprep.mubr.msk.f32.mxu0 %vm428_vm0, %v25165_v52  ;;  %v25216_v24 = vld [vmem:[%s32702_s9 + $0x2db] sm:$0xff] }
 0x732   : > { %28859 = vmatmul.mubr.msk.f32.gmra.mrb[10].mxu1 %vm428_vm0, %v25158_v26  ;;  %30411 = vmatmul.mubr.msk.f32.gmra.mrb[10].mxu0 %vm428_vm0, %v25166_v54  ;;  %v25218_v26 = vld [vmem:[%s32702_s9 + $0x2eb] sm:$0xff] }
 0x733   : > { %28861 = vmatprep.mubr.msk.f32.mxu1 %vm428_vm0, %v25159_v30  ;;  %30413 = vmatprep.mubr.msk.f32.mxu0 %vm428_vm0, %v25167_v56  ;;  %v25220_v30 = vld [vmem:[%s32702_s9 + $0x303] sm:$0xff] }
 0x736   : > { %28862 = vmatmul.mubr.msk.f32.gmra.mrb[12].mxu1 %vm428_vm0, %v25160_v34  ;;  %30414 = vmatmul.mubr.msk.f32.gmra.mrb[12].mxu0 %vm428_vm0, %v25168_v58  ;;  %v25222_v34 = vld [vmem:[%s32702_s9 + $0x313] sm:$0xff] }
 0x737   : > { %28864 = vmatprep.mubr.msk.f32.mxu1 %vm428_vm0, %v25161_v38  ;;  %30416 = vmatprep.mubr.msk.f32.mxu0 %vm428_vm0, %v25169_v60  ;;  %v25224_v38 = vld [vmem:[%s32702_s9 + $0x32b] sm:$0xff] }
 0x73a   : > { %28865 = vmatmul.mubr.msk.f32.gmra.mrb[14].mxu1 %vm428_vm0, %v25162_v46  ;;  %30417 = vmatmul.mubr.msk.f32.gmra.mrb[14].mxu0 %vm428_vm0, %v25170_v62  ;;  %v25226_v46 = vld [vmem:[%s32702_s9 + $0x33b] sm:$0xff] }
 0x73b   : > { %28867 = vmatprep.mubr.msk.f32.mxu1 %vm428_vm0, %v25163_v48  ;;  %30419 = vmatprep.mubr.msk.f32.mxu0 %vm428_vm0, %v25171_v0  ;;  %v25227_v48 = vld [vmem:[%s32702_s9 + $0x34b] sm:$0xff] }
 0x73e   : > { %28868 = vmatmul.mubr.msk.f32.gmra.mrb[16].mxu1 %vm428_vm0, %v25164_v50  ;;  %30420 = vmatmul.mubr.msk.f32.gmra.mrb[16].mxu0 %vm428_vm0, %v25172_v2  ;;  %v25228_v50 = vld [vmem:[%s32702_s9 + $0x353] sm:$0xff] }
 0x73f   : > { %28870 = vmatprep.mubr.msk.f32.mxu1 %vm428_vm0, %v25165_v52  ;;  %30422 = vmatprep.mubr.msk.f32.mxu0 %vm428_vm0, %v25173_v4  ;;  %v25229_v52 = vld [vmem:[%s32702_s9 + $0x35b] sm:$0xff] }
 0x742   : > { %28871 = vmatmul.mubr.msk.f32.gmra.mrb[18].mxu1 %vm428_vm0, %v25166_v54  ;;  %30423 = vmatmul.mubr.msk.f32.gmra.mrb[18].mxu0 %vm428_vm0, %v25174_v6  ;;  %v25230_v54 = vld [vmem:[%s32702_s9 + $0x363] sm:$0xff] }
 0x743   : > { %28873 = vmatprep.mubr.msk.f32.mxu1 %vm428_vm0, %v25167_v56  ;;  %30425 = vmatprep.mubr.msk.f32.mxu0 %vm428_vm0, %v25175_v8  ;;  %v25231_v56 = vld [vmem:[%s32702_s9 + $0x373] sm:$0xff] }
 0x746   : > { %28874 = vmatmul.mubr.msk.f32.gmra.mrb[20].mxu1 %vm428_vm0, %v25168_v58  ;;  %30426 = vmatmul.mubr.msk.f32.gmra.mrb[20].mxu0 %vm428_vm0, %v25176_v10  ;;  %v25232_v58 = vld [vmem:[%s32702_s9 + $0x37b] sm:$0xff] }
 0x747   : > { %28876 = vmatprep.mubr.msk.f32.mxu1 %vm428_vm0, %v25169_v60  ;;  %30428 = vmatprep.mubr.msk.f32.mxu0 %vm428_vm0, %v25177_v12  ;;  %v25233_v60 = vld [vmem:[%s32702_s9 + $0x383] sm:$0xff] }
 0x74a   : > { %28877 = vmatmul.mubr.msk.f32.gmra.mrb[22].mxu1 %vm428_vm0, %v25170_v62  ;;  %30429 = vmatmul.mubr.msk.f32.gmra.mrb[22].mxu0 %vm428_vm0, %v25178_v14  ;;  %v25234_v62 = vld [vmem:[%s32702_s9 + $0x38b] sm:$0xff] }
 0x74b   : > { %28879 = vmatprep.mubr.msk.f32.mxu1 %vm428_vm0, %v25171_v0  ;;  %30431 = vmatprep.mubr.msk.f32.mxu0 %vm428_vm0, %v25179_v16  ;;  %v25235_v0 = vld [vmem:[%s32702_s9 + $0x39b] sm:$0xff] }
 0x74e   : > { %28880 = vmatmul.mubr.msk.f32.gmra.mrb[24].mxu1 %vm428_vm0, %v25172_v2  ;;  %30432 = vmatmul.mubr.msk.f32.gmra.mrb[24].mxu0 %vm428_vm0, %v25180_v18  ;;  %v25236_v2 = vld [vmem:[%s32702_s9 + $0x3a3] sm:$0xff] }
 0x74f   : > { %28882 = vmatprep.mubr.msk.f32.mxu1 %vm428_vm0, %v25173_v4  ;;  %30434 = vmatprep.mubr.msk.f32.mxu0 %vm428_vm0, %v25181_v21  ;;  %v25237_v4 = vld [vmem:[%s32702_s9 + $0x3ab] sm:$0xff] }
 0x752   : > { %28883 = vmatmul.mubr.msk.f32.gmra.mrb[26].mxu1 %vm428_vm0, %v25174_v6  ;;  %30435 = vmatmul.mubr.msk.f32.gmra.mrb[26].mxu0 %vm428_vm0, %v25182_v25  ;;  %v25238_v6 = vld [vmem:[%s32702_s9 + $0x3b3] sm:$0xff] }
 0x753   : > { %28885 = vmatprep.mubr.msk.f32.mxu1 %vm428_vm0, %v25175_v8  ;;  %30437 = vmatprep.mubr.msk.f32.mxu0 %vm428_vm0, %v25183_v29  ;;  %v25239_v8 = vld [vmem:[%s32702_s9 + $0x3c3] sm:$0xff] }
 0x756   : > { %28886 = vmatmul.mubr.msk.f32.gmra.mrb[28].mxu1 %vm428_vm0, %v25176_v10  ;;  %30438 = vmatmul.mubr.msk.f32.gmra.mrb[28].mxu0 %vm428_vm0, %v25184_v33  ;;  %v25240_v10 = vld [vmem:[%s32702_s9 + $0x3cb] sm:$0xff] }
 0x757   : > { %28888 = vmatprep.mubr.msk.f32.mxu1 %vm428_vm0, %v25177_v12  ;;  %30440 = vmatprep.mubr.msk.f32.mxu0 %vm428_vm0, %v25185_v37  ;;  %v25241_v12 = vld [vmem:[%s32702_s9 + $0x3d3] sm:$0xff] }
 0x75a   : > { %28889 = vmatmul.mubr.msk.f32.gmra.mrb[30].mxu1 %vm428_vm0, %v25178_v14  ;;  %30441 = vmatmul.mubr.msk.f32.gmra.mrb[30].mxu0 %vm428_vm0, %v25186_v41  ;;  %v25242_v14 = vld [vmem:[%s32702_s9 + $0x3db] sm:$0xff] }
 0x75b   : > { %28891 = vmatprep.mubr.msk.f32.mxu1 %vm428_vm0, %v25179_v16  ;;  %30443 = vmatprep.mubr.msk.f32.mxu0 %vm428_vm0, %v25187_v45  ;;  %v25243_v16 = vld [vmem:[%s32702_s9 + $0x3eb] sm:$0xff] }
 0x75e   : > { %28892 = vmatmul.mubr.msk.f32.gmra.mrb[32].mxu1 %vm428_vm0, %v25180_v18  ;;  %30444 = vmatmul.mubr.msk.f32.gmra.mrb[32].mxu0 %vm428_vm0, %v25188_v49  ;;  %v25244_v18 = vld [vmem:[%s32702_s9 + $0x3f3] sm:$0xff] }
 0x75f   : > { %28894 = vmatprep.mubr.msk.f32.mxu1 %vm428_vm0, %v25181_v21  ;;  %30446 = vmatprep.mubr.msk.f32.mxu0 %vm428_vm0, %v25189_v53  ;;  %v25245_v21 = vld [vmem:[%s32702_s9 + $0x3fb] sm:$0xff] }
 0x762   : > { %28895 = vmatmul.mubr.msk.f32.gmra.mrb[34].mxu1 %vm428_vm0, %v25182_v25  ;;  %30447 = vmatmul.mubr.msk.f32.gmra.mrb[34].mxu0 %vm428_vm0, %v25190_v57  ;;  %v25246_v25 = vld [vmem:[%s32702_s9 + $0x403] sm:$0xff] }
 0x763   : > { %28897 = vmatprep.mubr.msk.f32.mxu1 %vm428_vm0, %v25183_v29  ;;  %30449 = vmatprep.mubr.msk.f32.mxu0 %vm428_vm0, %v25191_v61  ;;  %v25247_v29 = vld [vmem:[%s32702_s9 + $0x413] sm:$0xff] }
 0x766   : > { %28898 = vmatmul.mubr.msk.f32.gmra.mrb[36].mxu1 %vm428_vm0, %v25184_v33  ;;  %30450 = vmatmul.mubr.msk.f32.gmra.mrb[36].mxu0 %vm428_vm0, %v25192_v1  ;;  %v25248_v33 = vld [vmem:[%s32702_s9 + $0x41b] sm:$0xff] }
 0x767   : > { %28900 = vmatprep.mubr.msk.f32.mxu1 %vm428_vm0, %v25185_v37  ;;  %30452 = vmatprep.mubr.msk.f32.mxu0 %vm428_vm0, %v25193_v5  ;;  %v25249_v37 = vld [vmem:[%s32702_s9 + $0x423] sm:$0xff] }
 0x76a   : > { %28901 = vmatmul.mubr.msk.f32.gmra.mrb[38].mxu1 %vm428_vm0, %v25186_v41  ;;  %30453 = vmatmul.mubr.msk.f32.gmra.mrb[38].mxu0 %vm428_vm0, %v25194_v9  ;;  %v25250_v41 = vld [vmem:[%s32702_s9 + $0x42b] sm:$0xff] }
 0x76b   : > { %28903 = vmatprep.mubr.msk.f32.mxu1 %vm428_vm0, %v25187_v45  ;;  %30455 = vmatprep.mubr.msk.f32.mxu0 %vm428_vm0, %v25195_v13  ;;  %v25251_v45 = vld [vmem:[%s32702_s9 + $0x43b] sm:$0xff] }
 0x76e   : > { %28904 = vmatmul.mubr.msk.f32.gmra.mrb[40].mxu1 %vm428_vm0, %v25188_v49  ;;  %30456 = vmatmul.mubr.msk.f32.gmra.mrb[40].mxu0 %vm428_vm0, %v25196_v17  ;;  %v25252_v49 = vld [vmem:[%s32702_s9 + $0x443] sm:$0xff] }
 0x76f   : > { %28906 = vmatprep.mubr.msk.f32.mxu1 %vm428_vm0, %v25189_v53  ;;  %30458 = vmatprep.mubr.msk.f32.mxu0 %vm428_vm0, %v25197_v23  ;;  %v25253_v53 = vld [vmem:[%s32702_s9 + $0x44b] sm:$0xff] }
 0x772   : > { %28907 = vmatmul.mubr.msk.f32.gmra.mrb[42].mxu1 %vm428_vm0, %v25190_v57  ;;  %30459 = vmatmul.mubr.msk.f32.gmra.mrb[42].mxu0 %vm428_vm0, %v25198_v31  ;;  %v25254_v57 = vld [vmem:[%s32702_s9 + $0x453] sm:$0xff] }
 0x773   : > { %28909 = vmatprep.mubr.msk.f32.mxu1 %vm428_vm0, %v25191_v61  ;;  %30461 = vmatprep.mubr.msk.f32.mxu0 %vm428_vm0, %v25199_v39  ;;  %v25255_v61 = vld [vmem:[%s32702_s9 + $0x463] sm:$0xff] }
 0x776   : > { %28910 = vmatmul.mubr.msk.f32.gmra.mrb[44].mxu1 %vm428_vm0, %v25192_v1  ;;  %30462 = vmatmul.mubr.msk.f32.gmra.mrb[44].mxu0 %vm428_vm0, %v25200_v47  ;;  %v25256_v1 = vld [vmem:[%s32702_s9 + $0x46b] sm:$0xff] }
 0x777   : > { %28912 = vmatprep.mubr.msk.f32.mxu1 %vm428_vm0, %v25193_v5  ;;  %30464 = vmatprep.mubr.msk.f32.mxu0 %vm428_vm0, %v25201_v59  ;;  %v25257_v5 = vld [vmem:[%s32702_s9 + $0x473] sm:$0xff] }
 0x77a   : > { %28913 = vmatmul.mubr.msk.f32.gmra.mrb[46].mxu1 %vm428_vm0, %v25194_v9  ;;  %30465 = vmatmul.mubr.msk.f32.gmra.mrb[46].mxu0 %vm428_vm0, %v25202_v3  ;;  %v25258_v9 = vld [vmem:[%s32702_s9 + $0x47b] sm:$0xff] }
 0x77b   : > { %28915 = vmatprep.mubr.msk.f32.mxu1 %vm428_vm0, %v25195_v13  ;;  %30467 = vmatprep.mubr.msk.f32.mxu0 %vm428_vm0, %v25203_v55  ;;  %v25259_v13 = vld [vmem:[%s32702_s9 + $0x48b] sm:$0xff] }
 0x77e   : > { %28916 = vmatmul.mubr.msk.f32.gmra.mrb[48].mxu1 %vm428_vm0, %v25196_v17  ;;  %30468 = vmatmul.mubr.msk.f32.gmra.mrb[48].mxu0 %vm428_vm0, %v25204_v63  ;;  %v36456_v17 = vld [vmem:[%s32702_s9 + $0x493] sm:$0xff] }
 0x77f   : > { %28918 = vmatprep.mubr.msk.f32.mxu1 %vm428_vm0, %v25197_v23  ;;  %30470 = vmatprep.mubr.msk.f32.mxu0 %vm428_vm0, %v25205_v11  ;;  %v36459_v23 = vld [vmem:[%s32702_s9 + $0x49b] sm:$0xff] }
 0x782   : > { %28919 = vmatmul.mubr.msk.f32.gmra.mrb[50].mxu1 %vm428_vm0, %v25198_v31  ;;  %30471 = vmatmul.mubr.msk.f32.gmra.mrb[50].mxu0 %vm428_vm0, %v25206_v27  ;;  %v36469_v31 = vld [vmem:[%s32702_s9 + $0x4a3] sm:$0xff] }
 0x783   : > { %28921 = vmatprep.mubr.msk.f32.mxu1 %vm428_vm0, %v25199_v39  ;;  %30473 = vmatprep.mubr.msk.f32.mxu0 %vm428_vm0, %v25207_v19  ;;  %v36474_v39 = vld [vmem:[%s32702_s9 + $0x4b3] sm:$0xff] }
 0x786   : > { %28922 = vmatmul.mubr.msk.f32.gmra.mrb[52].mxu1 %vm428_vm0, %v25200_v47  ;;  %30474 = vmatmul.mubr.msk.f32.gmra.mrb[52].mxu0 %vm428_vm0, %v25208_v35 }
 0x787   : > { %28924 = vmatprep.mubr.msk.f32.mxu1 %vm428_vm0, %v25201_v59  ;;  %30476 = vmatprep.mubr.msk.f32.mxu0 %vm428_vm0, %v25209_v43 }
 0x78a   : > { %28925 = vmatmul.mubr.msk.f32.gmra.mrb[54].mxu1 %vm428_vm0, %v25202_v3  ;;  %30477 = vmatmul.mubr.msk.f32.gmra.mrb[54].mxu0 %vm428_vm0, %v25210_v20  ;;  %v36479_v3 = vld [vmem:[%s36909_s2] ss:$0 sm:$0xff] }
 0x78b   : > { %28927 = vmatprep.mubr.msk.f32.mxu1 %vm428_vm0, %v25203_v55  ;;  %30479 = vmatprep.mubr.msk.f32.mxu0 %vm428_vm0, %v25211_v51 }
 0x78e   : > { %28928 = vmatmul.mubr.msk.f32.gmra.mrb[56].mxu1 %vm428_vm0, %v25204_v63  ;;  %30480 = vmatmul.mubr.msk.f32.gmra.mrb[56].mxu0 %vm428_vm0, %v25212_v22 }
 0x78f   : > { %28930 = vmatprep.mubr.msk.f32.mxu1 %vm428_vm0, %v25205_v11  ;;  %30482 = vmatprep.mubr.msk.f32.mxu0 %vm428_vm0, %v25213_v42 }
 0x792   : > { %28931 = vmatmul.mubr.msk.f32.gmra.mrb[58].mxu1 %vm428_vm0, %v25206_v27  ;;  %30483 = vmatmul.mubr.msk.f32.gmra.mrb[58].mxu0 %vm428_vm0, %v25214_v44 }
 0x793   : > { %28933 = vmatprep.mubr.msk.f32.mxu1 %vm428_vm0, %v25207_v19  ;;  %30485 = vmatprep.mubr.msk.f32.mxu0 %vm428_vm0, %v25215_v15  ;;  %v36488_v19 = vld [vmem:[%s32702_s9 + $0x4bb] sm:$0xff] }
 0x796   : > { %28934 = vmatmul.mubr.msk.f32.gmra.mrb[60].mxu1 %vm428_vm0, %v25208_v35  ;;  %30486 = vmatmul.mubr.msk.f32.gmra.mrb[60].mxu0 %vm428_vm0, %v25216_v24 }
 0x797   : > { %28936 = vmatprep.mubr.msk.f32.mxu1 %vm428_vm0, %v25209_v43  ;;  %30488 = vmatprep.mubr.msk.f32.mxu0 %vm428_vm0, %v25217_v7  ;;  %v36492_v43 = vld [vmem:[%s32702_s9 + $0x4c3] sm:$0xff] }
 0x79a   : > { %28937 = vmatmul.mubr.msk.f32.gmra.mrb[62].mxu1 %vm428_vm0, %v25210_v20  ;;  %30489 = vmatmul.mubr.msk.f32.gmra.mrb[62].mxu0 %vm428_vm0, %v25218_v26 }
 0x79b   : > { %28939 = vmatprep.mubr.msk.f32.mxu1 %vm428_vm0, %v25211_v51  ;;  %30491 = vmatprep.mubr.msk.f32.mxu0 %vm428_vm0, %v25219_v28 }
 0x79e   : > { %28940 = vmatmul.mubr.msk.f32.gmra.mrb[64].mxu1 %vm428_vm0, %v25212_v22  ;;  %30492 = vmatmul.mubr.msk.f32.gmra.mrb[64].mxu0 %vm428_vm0, %v25220_v30 }
 0x79f   : > { %28942 = vmatprep.mubr.msk.f32.mxu1 %vm428_vm0, %v25213_v42  ;;  %30494 = vmatprep.mubr.msk.f32.mxu0 %vm428_vm0, %v25221_v32 }
 0x7a2   : > { %28943 = vmatmul.mubr.msk.f32.gmra.mrb[66].mxu1 %vm428_vm0, %v25214_v44  ;;  %30495 = vmatmul.mubr.msk.f32.gmra.mrb[66].mxu0 %vm428_vm0, %v25222_v34 }
 0x7a3   : > { %28945 = vmatprep.mubr.msk.f32.mxu1 %vm428_vm0, %v25215_v15  ;;  %30497 = vmatprep.mubr.msk.f32.mxu0 %vm428_vm0, %v25223_v36 }
 0x7a6   : > { %28946 = vmatmul.mubr.msk.f32.gmra.mrb[68].mxu1 %vm428_vm0, %v25216_v24  ;;  %30498 = vmatmul.mubr.msk.f32.gmra.mrb[68].mxu0 %vm428_vm0, %v25224_v38 }
 0x7a7   : > { %28948 = vmatprep.mubr.msk.f32.mxu1 %vm428_vm0, %v25217_v7  ;;  %30500 = vmatprep.mubr.msk.f32.mxu0 %vm428_vm0, %v25225_v40  ;;  %v36506_v7 = vld [vmem:[%s32702_s9 + $0x4cb] sm:$0xff] }
 0x7aa   : > { %28949 = vmatmul.mubr.msk.f32.gmra.mrb[70].mxu1 %vm428_vm0, %v25218_v26  ;;  %30501 = vmatmul.mubr.msk.f32.gmra.mrb[70].mxu0 %vm428_vm0, %v25226_v46 }
 0x7ab   : > { %28951 = vmatprep.mubr.msk.f32.mxu1 %vm428_vm0, %v25219_v28  ;;  %30503 = vmatprep.mubr.msk.f32.mxu0 %vm428_vm0, %v25227_v48  ;;  %v36510_v28 = vld [vmem:[%s32702_s9 + $0x4db] sm:$0xff] }
 0x7ae   : > { %28952 = vmatmul.mubr.msk.f32.gmra.mrb[72].mxu1 %vm428_vm0, %v25220_v30  ;;  %30504 = vmatmul.mubr.msk.f32.gmra.mrb[72].mxu0 %vm428_vm0, %v25228_v50 }
 0x7af   : > { %28954 = vmatprep.mubr.msk.f32.mxu1 %vm428_vm0, %v25221_v32  ;;  %30506 = vmatprep.mubr.msk.f32.mxu0 %vm428_vm0, %v25229_v52 }
 0x7b2   : > { %28955 = vmatmul.mubr.msk.f32.gmra.mrb[74].mxu1 %vm428_vm0, %v25222_v34  ;;  %30507 = vmatmul.mubr.msk.f32.gmra.mrb[74].mxu0 %vm428_vm0, %v25230_v54 }
 0x7b3   : > { %28957 = vmatprep.mubr.msk.f32.mxu1 %vm428_vm0, %v25223_v36  ;;  %30509 = vmatprep.mubr.msk.f32.mxu0 %vm428_vm0, %v25231_v56 }
 0x7b6   : > { %28958 = vmatmul.mubr.msk.f32.gmra.mrb[76].mxu1 %vm428_vm0, %v25224_v38  ;;  %30510 = vmatmul.mubr.msk.f32.gmra.mrb[76].mxu0 %vm428_vm0, %v25232_v58 }
 0x7b7   : > { %28960 = vmatprep.mubr.msk.f32.mxu1 %vm428_vm0, %v25225_v40  ;;  %30512 = vmatprep.mubr.msk.f32.mxu0 %vm428_vm0, %v25233_v60 }
 0x7ba   : > { %28961 = vmatmul.mubr.msk.f32.gmra.mrb[78].mxu1 %vm428_vm0, %v25226_v46  ;;  %30513 = vmatmul.mubr.msk.f32.gmra.mrb[78].mxu0 %vm428_vm0, %v25234_v62 }
 0x7bb   : > { %28963 = vmatprep.mubr.msk.f32.mxu1 %vm428_vm0, %v25227_v48  ;;  %30515 = vmatprep.mubr.msk.f32.mxu0 %vm428_vm0, %v25235_v0  ;;  %v36522_v48 = vld [vmem:[%s32702_s9 + $0x4e3] sm:$0xff] }
 0x7be   : > { %28964 = vmatmul.mubr.msk.f32.gmra.mrb[80].mxu1 %vm428_vm0, %v25228_v50  ;;  %30516 = vmatmul.mubr.msk.f32.gmra.mrb[80].mxu0 %vm428_vm0, %v25236_v2 }
 0x7bf   : > { %28966 = vmatprep.mubr.msk.f32.mxu1 %vm428_vm0, %v25229_v52  ;;  %30518 = vmatprep.mubr.msk.f32.mxu0 %vm428_vm0, %v25237_v4  ;;  %v36526_v52 = vld [vmem:[%s32702_s9 + $0x4eb] sm:$0xff] }
 0x7c2   : > { %28967 = vmatmul.mubr.msk.f32.gmra.mrb[82].mxu1 %vm428_vm0, %v25230_v54  ;;  %30519 = vmatmul.mubr.msk.f32.gmra.mrb[82].mxu0 %vm428_vm0, %v25238_v6 }
 0x7c3   : > { %28969 = vmatprep.mubr.msk.f32.mxu1 %vm428_vm0, %v25231_v56  ;;  %30521 = vmatprep.mubr.msk.f32.mxu0 %vm428_vm0, %v25239_v8 }
 0x7c6   : > { %28970 = vmatmul.mubr.msk.f32.gmra.mrb[84].mxu1 %vm428_vm0, %v25232_v58  ;;  %30522 = vmatmul.mubr.msk.f32.gmra.mrb[84].mxu0 %vm428_vm0, %v25240_v10 }
 0x7c7   : > { %28972 = vmatprep.mubr.msk.f32.mxu1 %vm428_vm0, %v25233_v60  ;;  %30524 = vmatprep.mubr.msk.f32.mxu0 %vm428_vm0, %v25241_v12 }
 0x7ca   : > { %28973 = vmatmul.mubr.msk.f32.gmra.mrb[86].mxu1 %vm428_vm0, %v25234_v62  ;;  %30525 = vmatmul.mubr.msk.f32.gmra.mrb[86].mxu0 %vm428_vm0, %v25242_v14 }
 0x7cb   : > { %28975 = vmatprep.mubr.msk.f32.mxu1 %vm428_vm0, %v25235_v0  ;;  %30527 = vmatprep.mubr.msk.f32.mxu0 %vm428_vm0, %v25243_v16 }
 0x7ce   : > { %28976 = vmatmul.mubr.msk.f32.gmra.mrb[88].mxu1 %vm428_vm0, %v25236_v2  ;;  %30528 = vmatmul.mubr.msk.f32.gmra.mrb[88].mxu0 %vm428_vm0, %v25244_v18 }
 0x7cf   : > { %28978 = vmatprep.mubr.msk.f32.mxu1 %vm428_vm0, %v25237_v4  ;;  %30530 = vmatprep.mubr.msk.f32.mxu0 %vm428_vm0, %v25245_v21  ;;  %v36540_v4 = vld [vmem:[%s32702_s9 + $0x4f3] sm:$0xff] }
 0x7d2   : > { %28979 = vmatmul.mubr.msk.f32.gmra.mrb[90].mxu1 %vm428_vm0, %v25238_v6  ;;  %30531 = vmatmul.mubr.msk.f32.gmra.mrb[90].mxu0 %vm428_vm0, %v25246_v25 }
 0x7d3   : > { %28981 = vmatprep.mubr.msk.f32.mxu1 %vm428_vm0, %v25239_v8  ;;  %30533 = vmatprep.mubr.msk.f32.mxu0 %vm428_vm0, %v25247_v29  ;;  %v36544_v8 = vld [vmem:[%s32702_s9 + $0x503] sm:$0xff] }
 0x7d6   : > { %28982 = vmatmul.mubr.msk.f32.gmra.mrb[92].mxu1 %vm428_vm0, %v25240_v10  ;;  %30534 = vmatmul.mubr.msk.f32.gmra.mrb[92].mxu0 %vm428_vm0, %v25248_v33 }
 0x7d7   : > { %28984 = vmatprep.mubr.msk.f32.mxu1 %vm428_vm0, %v25241_v12  ;;  %30536 = vmatprep.mubr.msk.f32.mxu0 %vm428_vm0, %v25249_v37 }
 0x7da   : > { %28985 = vmatmul.mubr.msk.f32.gmra.mrb[94].mxu1 %vm428_vm0, %v25242_v14  ;;  %30537 = vmatmul.mubr.msk.f32.gmra.mrb[94].mxu0 %vm428_vm0, %v25250_v41 }
 0x7db   : > { %28987 = vmatprep.mubr.msk.f32.mxu1 %vm428_vm0, %v25243_v16  ;;  %30539 = vmatprep.mubr.msk.f32.mxu0 %vm428_vm0, %v25251_v45 }
 0x7de   : > { %28988 = vmatmul.mubr.msk.f32.gmra.mrb[96].mxu1 %vm428_vm0, %v25244_v18  ;;  %30540 = vmatmul.mubr.msk.f32.gmra.mrb[96].mxu0 %vm428_vm0, %v25252_v49 }
 0x7df   : > { %28990 = vmatprep.mubr.msk.f32.mxu1 %vm428_vm0, %v25245_v21  ;;  %30542 = vmatprep.mubr.msk.f32.mxu0 %vm428_vm0, %v25253_v53 }
 0x7e2   : > { %28991 = vmatmul.mubr.msk.f32.gmra.mrb[98].mxu1 %vm428_vm0, %v25246_v25  ;;  %30543 = vmatmul.mubr.msk.f32.gmra.mrb[98].mxu0 %vm428_vm0, %v25254_v57 }
 0x7e3   : > { %28993 = vmatprep.mubr.msk.f32.mxu1 %vm428_vm0, %v25247_v29  ;;  %30545 = vmatprep.mubr.msk.f32.mxu0 %vm428_vm0, %v25255_v61  ;;  %v36558_v29 = vld [vmem:[%s32702_s9 + $0x50b] sm:$0xff] }
 0x7e6   : > { %28994 = vmatmul.mubr.msk.f32.gmra.mrb[100].mxu1 %vm428_vm0, %v25248_v33  ;;  %30546 = vmatmul.mubr.msk.f32.gmra.mrb[100].mxu0 %vm428_vm0, %v25256_v1 }
 0x7e7   : > { %28996 = vmatprep.mubr.msk.f32.mxu1 %vm428_vm0, %v25249_v37  ;;  %30548 = vmatprep.mubr.msk.f32.mxu0 %vm428_vm0, %v25257_v5  ;;  %v36562_v37 = vld [vmem:[%s32702_s9 + $0x513] sm:$0xff] }
 0x7ea   : > { %28997 = vmatmul.mubr.msk.f32.gmra.mrb[102].mxu1 %vm428_vm0, %v25250_v41  ;;  %30549 = vmatmul.mubr.msk.f32.gmra.mrb[102].mxu0 %vm428_vm0, %v25258_v9 }
 0x7eb   : > { %28999 = vmatprep.mubr.msk.f32.mxu1 %vm428_vm0, %v25251_v45  ;;  %30551 = vmatprep.mubr.msk.f32.mxu0 %vm428_vm0, %v25259_v13 }
 0x7ee   : > { %29000 = vmatmul.mubr.msk.f32.gmra.mrb[104].mxu1 %vm428_vm0, %v25252_v49  ;;  %30552 = vmatmul.mubr.msk.f32.gmra.mrb[104].mxu0 %vm428_vm0, %v36456_v17 }
 0x7ef   : > { %29002 = vmatprep.mubr.msk.f32.mxu1 %vm428_vm0, %v25253_v53  ;;  %30554 = vmatprep.mubr.msk.f32.mxu0 %vm428_vm0, %v36459_v23 }
 0x7f1   : > { %v28845_v47 = vpop.f32.mrb[0].mxu1  ;;  %v30397_v59 = vpop.f32.mrb[0].mxu0 }
 0x7f2   : > { %v30587_v55 = vadd.f32 %v30397_v59, %v28845_v47  ;;  %v9923_v63 = vpop.f32.mrb[1].mxu1  ;;  %29003 = vmatmul.mubr.msk.f32.gmra.mrb[106].mxu1 %vm428_vm0, %v25254_v57  ;;  %v20701_v11 = vpop.f32.mrb[1].mxu0  ;;  %30555 = vmatmul.mubr.msk.f32.gmra.mrb[106].mxu0 %vm428_vm0, %v36469_v31 }
 0x7f3   : > { %v30588_v27 = vadd.f32 %v20701_v11, %v9923_v63  ;;  %29005 = vmatprep.mubr.msk.f32.mxu1 %vm428_vm0, %v25255_v61  ;;  %30557 = vmatprep.mubr.msk.f32.mxu0 %vm428_vm0, %v36474_v39  ;;  %v25276_v63 = vld [vmem:[%s32702_s9 + $0x533] sm:$0xff] }
 0x7f4   : > { %v21476_v35 = vadd.f32 %v30587_v55, %v36479_v3 }
 0x7f5   : > { %v21475_v20 = vadd.f32 %v30588_v27, %v36479_v3  ;;  %v28848_v51 = vpop.f32.mrb[2].mxu1  ;;  %v30400_v22 = vpop.f32.mrb[2].mxu0  ;;  %v25277_v27 = vld [vmem:[%s32702_s9 + $0x53b] sm:$0xff] }
 0x7f6   : > { %21604 = vst [vmem:[%s36495_s30 + $0x8] sm:$0xff] %v21476_v35  ;;  %v30589_v42 = vadd.f32 %v30400_v22, %v28848_v51  ;;  %v9933_v44 = vpop.f32.mrb[3].mxu1  ;;  %29006 = vmatmul.mubr.msk.f32.gmra.mrb[108].mxu1 %vm428_vm0, %v25256_v1  ;;  %v20711_v15 = vpop.f32.mrb[3].mxu0  ;;  %30558 = vmatmul.mubr.msk.f32.gmra.mrb[108].mxu0 %vm428_vm0, %v36488_v19 }
 0x7f7   : > { %21603 = vst [vmem:[%s36495_s30] sm:$0xff] %v21475_v20  ;;  %v30590_v24 = vadd.f32 %v20711_v15, %v9933_v44  ;;  %29008 = vmatprep.mubr.msk.f32.mxu1 %vm428_vm0, %v25257_v5  ;;  %30560 = vmatprep.mubr.msk.f32.mxu0 %vm428_vm0, %v36492_v43  ;;  %v36576_v5 = vld [vmem:[%s32702_s9 + $0x51b] sm:$0xff]  ;;  %v25278_v44 = vld [vmem:[%s32702_s9 + $0x543] sm:$0xff] }
 0x7f8   : > { %v21478_v26 = vadd.f32 %v30589_v42, %v36479_v3 }
 0x7f9   : > { %v21477_v30 = vadd.f32 %v30590_v24, %v36479_v3  ;;  %v28851_v32 = vpop.f32.mrb[4].mxu1  ;;  %v30403_v34 = vpop.f32.mrb[4].mxu0  ;;  %v25279_v24 = vld [vmem:[%s32702_s9 + $0x553] sm:$0xff] }
 0x7fa   : > { %21606 = vst [vmem:[%s36495_s30 + $0x18] sm:$0xff] %v21478_v26  ;;  %v30591_v36 = vadd.f32 %v30403_v34, %v28851_v32  ;;  %v9943_v38 = vpop.f32.mrb[5].mxu1  ;;  %29009 = vmatmul.mubr.msk.f32.gmra.mrb[110].mxu1 %vm428_vm0, %v25258_v9  ;;  %v20721_v40 = vpop.f32.mrb[5].mxu0  ;;  %30561 = vmatmul.mubr.msk.f32.gmra.mrb[110].mxu0 %vm428_vm0, %v36506_v7 }
 0x7fb   : > { %21605 = vst [vmem:[%s36495_s30 + $0x10] sm:$0xff] %v21477_v30  ;;  %v30592_v46 = vadd.f32 %v20721_v40, %v9943_v38  ;;  %29011 = vmatprep.mubr.msk.f32.mxu1 %vm428_vm0, %v25259_v13  ;;  %30563 = vmatprep.mubr.msk.f32.mxu0 %vm428_vm0, %v36510_v28  ;;  %v25275_v13 = vld [vmem:[%s32702_s9 + $0x52b] sm:$0xff]  ;;  %v25280_v38 = vld [vmem:[%s32702_s9 + $0x55b] sm:$0xff] }
 0x7fc   : > { %v21480_v50 = vadd.f32 %v30591_v36, %v36479_v3 }
 0x7fd   : > { %v21479_v54 = vadd.f32 %v30592_v46, %v36479_v3  ;;  %v28854_v56 = vpop.f32.mrb[6].mxu1  ;;  %v30406_v58 = vpop.f32.mrb[6].mxu0  ;;  %v25281_v46 = vld [vmem:[%s32702_s9 + $0x563] sm:$0xff] }
 0x7fe   : > { %21608 = vst [vmem:[%s36495_s30 + $0x28] sm:$0xff] %v21480_v50  ;;  %v30593_v60 = vadd.f32 %v30406_v58, %v28854_v56  ;;  %v9953_v62 = vpop.f32.mrb[7].mxu1  ;;  %29012 = vmatmul.mubr.msk.f32.gmra.mrb[112].mxu1 %vm428_vm0, %v36456_v17  ;;  %v20731_v0 = vpop.f32.mrb[7].mxu0  ;;  %30564 = vmatmul.mubr.msk.f32.gmra.mrb[112].mxu0 %vm428_vm0, %v36522_v48 }
 0x7ff   : > { %21607 = vst [vmem:[%s36495_s30 + $0x20] sm:$0xff] %v21479_v54  ;;  %v30594_v2 = vadd.f32 %v20731_v0, %v9953_v62  ;;  %29014 = vmatprep.mubr.msk.f32.mxu1 %vm428_vm0, %v36459_v23  ;;  %30566 = vmatprep.mubr.msk.f32.mxu0 %vm428_vm0, %v36526_v52  ;;  %v25282_v62 = vld [vmem:[%s32702_s9 + $0x56b] sm:$0xff] }
 0x800   : > { %v21482_v6 = vadd.f32 %v30593_v60, %v36479_v3 }
 0x801   : > { %v21481_v10 = vadd.f32 %v30594_v2, %v36479_v3  ;;  %v28857_v12 = vpop.f32.mrb[8].mxu1  ;;  %v30409_v14 = vpop.f32.mrb[8].mxu0 }
 0x802   : > { %21610 = vst [vmem:[%s36495_s30 + $0x38] sm:$0xff] %v21482_v6  ;;  %v30595_v16 = vadd.f32 %v30409_v14, %v28857_v12  ;;  %v9963_v18 = vpop.f32.mrb[9].mxu1  ;;  %29015 = vmatmul.mubr.msk.f32.gmra.mrb[114].mxu1 %vm428_vm0, %v36469_v31  ;;  %v20741_v21 = vpop.f32.mrb[9].mxu0  ;;  %30567 = vmatmul.mubr.msk.f32.gmra.mrb[114].mxu0 %vm428_vm0, %v36540_v4 }
 0x803   : > { %21609 = vst [vmem:[%s36495_s30 + $0x30] sm:$0xff] %v21481_v10  ;;  %v30596_v25 = vadd.f32 %v20741_v21, %v9963_v18  ;;  %29017 = vmatprep.mubr.msk.f32.mxu1 %vm428_vm0, %v36474_v39  ;;  %30569 = vmatprep.mubr.msk.f32.mxu0 %vm428_vm0, %v36544_v8 }
 0x804   : > { %v21484_v33 = vadd.f32 %v30595_v16, %v36479_v3 }
 0x805   : > { %v21483_v41 = vadd.f32 %v30596_v25, %v36479_v3  ;;  %v28860_v45 = vpop.f32.mrb[10].mxu1  ;;  %v30412_v49 = vpop.f32.mrb[10].mxu0 }
 0x806   : > { %21612 = vst [vmem:[%s36495_s30 + $0x48] sm:$0xff] %v21484_v33  ;;  %v30597_v53 = vadd.f32 %v30412_v49, %v28860_v45  ;;  %v9973_v57 = vpop.f32.mrb[11].mxu1  ;;  %29018 = vmatmul.mubr.msk.f32.gmra.mrb[116].mxu1 %vm428_vm0, %v36488_v19  ;;  %v20751_v61 = vpop.f32.mrb[11].mxu0  ;;  %30570 = vmatmul.mubr.msk.f32.gmra.mrb[116].mxu0 %vm428_vm0, %v36558_v29 }
 0x807   : > { %21611 = vst [vmem:[%s36495_s30 + $0x40] sm:$0xff] %v21483_v41  ;;  %v30598_v1 = vadd.f32 %v20751_v61, %v9973_v57  ;;  %29020 = vmatprep.mubr.msk.f32.mxu1 %vm428_vm0, %v36492_v43  ;;  %30572 = vmatprep.mubr.msk.f32.mxu0 %vm428_vm0, %v36562_v37 }
 0x808   : > { %v21486_v9 = vadd.f32 %v30597_v53, %v36479_v3 }
 0x809   : > { %v21485_v17 = vadd.f32 %v30598_v1, %v36479_v3  ;;  %v28863_v23 = vpop.f32.mrb[12].mxu1  ;;  %v30415_v31 = vpop.f32.mrb[12].mxu0 }
 0x80a   : > { %21614 = vst [vmem:[%s36495_s30 + $0x58] sm:$0xff] %v21486_v9  ;;  %v30599_v39 = vadd.f32 %v30415_v31, %v28863_v23  ;;  %v9983_v47 = vpop.f32.mrb[13].mxu1  ;;  %29021 = vmatmul.mubr.msk.f32.gmra.mrb[118].mxu1 %vm428_vm0, %v36506_v7  ;;  %v20761_v59 = vpop.f32.mrb[13].mxu0  ;;  %30573 = vmatmul.mubr.msk.f32.gmra.mrb[118].mxu0 %vm428_vm0, %v36576_v5 }
 0x80b   : > { %21613 = vst [vmem:[%s36495_s30 + $0x50] sm:$0xff] %v21485_v17  ;;  %v30600_v55 = vadd.f32 %v20761_v59, %v9983_v47  ;;  %29023 = vmatprep.mubr.msk.f32.mxu1 %vm428_vm0, %v36510_v28  ;;  %30575 = vmatprep.mubr.msk.f32.mxu0 %vm428_vm0, %v25275_v13 }
 0x80c   : > { %v21488_v11 = vadd.f32 %v30599_v39, %v36479_v3 }
 0x80d   : > { %v21487_v19 = vadd.f32 %v30600_v55, %v36479_v3  ;;  %v28866_v35 = vpop.f32.mrb[14].mxu1  ;;  %v30418_v43 = vpop.f32.mrb[14].mxu0 }
 0x80e   : > { %21616 = vst [vmem:[%s36495_s30 + $0x68] sm:$0xff] %v21488_v11  ;;  %v30601_v20 = vadd.f32 %v30418_v43, %v28866_v35  ;;  %v9993_v51 = vpop.f32.mrb[15].mxu1  ;;  %29024 = vmatmul.mubr.msk.f32.gmra.mrb[120].mxu1 %vm428_vm0, %v36522_v48  ;;  %v20771_v22 = vpop.f32.mrb[15].mxu0  ;;  %30576 = vmatmul.mubr.msk.f32.gmra.mrb[120].mxu0 %vm428_vm0, %v25276_v63 }
 0x80f   : > { %21615 = vst [vmem:[%s36495_s30 + $0x60] sm:$0xff] %v21487_v19  ;;  %v30602_v42 = vadd.f32 %v20771_v22, %v9993_v51  ;;  %29026 = vmatprep.mubr.msk.f32.mxu1 %vm428_vm0, %v36526_v52  ;;  %30578 = vmatprep.mubr.msk.f32.mxu0 %vm428_vm0, %v25277_v27 }
 0x810   : > { %v21490_v15 = vadd.f32 %v30601_v20, %v36479_v3 }
 0x811   : > { %v21489_v7 = vadd.f32 %v30602_v42, %v36479_v3  ;;  %v28869_v26 = vpop.f32.mrb[16].mxu1  ;;  %v30421_v28 = vpop.f32.mrb[16].mxu0 }
 0x812   : > { %21618 = vst [vmem:[%s36495_s30 + $0x78] sm:$0xff] %v21490_v15  ;;  %v30603_v30 = vadd.f32 %v30421_v28, %v28869_v26  ;;  %v10003_v32 = vpop.f32.mrb[17].mxu1  ;;  %29027 = vmatmul.mubr.msk.f32.gmra.mrb[122].mxu1 %vm428_vm0, %v36540_v4  ;;  %v20781_v34 = vpop.f32.mrb[17].mxu0  ;;  %30579 = vmatmul.mubr.msk.f32.gmra.mrb[122].mxu0 %vm428_vm0, %v25278_v44 }
 0x813   : > { %21617 = vst [vmem:[%s36495_s30 + $0x70] sm:$0xff] %v21489_v7  ;;  %v30604_v36 = vadd.f32 %v20781_v34, %v10003_v32  ;;  %29029 = vmatprep.mubr.msk.f32.mxu1 %vm428_vm0, %v36544_v8  ;;  %30581 = vmatprep.mubr.msk.f32.mxu0 %vm428_vm0, %v25279_v24 }
 0x814   : > { %v21492_v40 = vadd.f32 %v30603_v30, %v36479_v3 }
 0x815   : > { %v21491_v48 = vadd.f32 %v30604_v36, %v36479_v3  ;;  %v28872_v50 = vpop.f32.mrb[18].mxu1  ;;  %v30424_v52 = vpop.f32.mrb[18].mxu0 }
 0x816   : > { %21620 = vst [vmem:[%s36495_s30 + $0x88] sm:$0xff] %v21492_v40  ;;  %v30605_v54 = vadd.f32 %v30424_v52, %v28872_v50  ;;  %v10013_v56 = vpop.f32.mrb[19].mxu1  ;;  %29030 = vmatmul.mubr.msk.f32.gmra.mrb[124].mxu1 %vm428_vm0, %v36558_v29  ;;  %v20791_v58 = vpop.f32.mrb[19].mxu0  ;;  %30582 = vmatmul.mubr.msk.f32.gmra.mrb[124].mxu0 %vm428_vm0, %v25280_v38 }
 0x817   : > { %21619 = vst [vmem:[%s36495_s30 + $0x80] sm:$0xff] %v21491_v48  ;;  %v30606_v60 = vadd.f32 %v20791_v58, %v10013_v56  ;;  %29032 = vmatprep.mubr.msk.f32.mxu1 %vm428_vm0, %v36562_v37  ;;  %30584 = vmatprep.mubr.msk.f32.mxu0 %vm428_vm0, %v25281_v46 }
 0x818   : > { %v21494_v0 = vadd.f32 %v30605_v54, %v36479_v3 }
 0x819   : > { %v21493_v2 = vadd.f32 %v30606_v60, %v36479_v3  ;;  %v28875_v4 = vpop.f32.mrb[20].mxu1  ;;  %v30427_v6 = vpop.f32.mrb[20].mxu0 }
 0x81a   : > { %21622 = vst [vmem:[%s36495_s30 + $0x98] sm:$0xff] %v21494_v0  ;;  %v30607_v8 = vadd.f32 %v30427_v6, %v28875_v4  ;;  %v10023_v10 = vpop.f32.mrb[21].mxu1  ;;  %29033 = vmatmul.mubr.msk.f32.gmra.mrb[126].mxu1 %vm428_vm0, %v36576_v5  ;;  %v20801_v12 = vpop.f32.mrb[21].mxu0  ;;  %30585 = vmatmul.mubr.msk.f32.gmra.mrb[126].mxu0 %vm428_vm0, %v25282_v62 }
 0x81b   : > { %21621 = vst [vmem:[%s36495_s30 + $0x90] sm:$0xff] %v21493_v2  ;;  %v30608_v14 = vadd.f32 %v20801_v12, %v10023_v10 }
 0x81c   : > { %v21496_v16 = vadd.f32 %v30607_v8, %v36479_v3 }
 0x81d   : > { %v21495_v18 = vadd.f32 %v30608_v14, %v36479_v3  ;;  %v28878_v21 = vpop.f32.mrb[22].mxu1  ;;  %v30430_v25 = vpop.f32.mrb[22].mxu0 }
 0x81e   : > { %21624 = vst [vmem:[%s36495_s30 + $0xa8] sm:$0xff] %v21496_v16  ;;  %v30609_v29 = vadd.f32 %v30430_v25, %v28878_v21  ;;  %v10033_v33 = vpop.f32.mrb[23].mxu1  ;;  %v20811_v37 = vpop.f32.mrb[23].mxu0 }
 0x81f   : > { %21623 = vst [vmem:[%s36495_s30 + $0xa0] sm:$0xff] %v21495_v18  ;;  %v30610_v41 = vadd.f32 %v20811_v37, %v10033_v33 }
 0x820   : > { %v21498_v45 = vadd.f32 %v30609_v29, %v36479_v3 }
 0x821   : > { %v21497_v49 = vadd.f32 %v30610_v41, %v36479_v3  ;;  %v28881_v53 = vpop.f32.mrb[24].mxu1  ;;  %v30433_v57 = vpop.f32.mrb[24].mxu0 }
 0x822   : > { %21626 = vst [vmem:[%s36495_s30 + $0xb8] sm:$0xff] %v21498_v45  ;;  %v30611_v61 = vadd.f32 %v30433_v57, %v28881_v53  ;;  %v10043_v1 = vpop.f32.mrb[25].mxu1  ;;  %v20821_v5 = vpop.f32.mrb[25].mxu0 }
 0x823   : > { %21625 = vst [vmem:[%s36495_s30 + $0xb0] sm:$0xff] %v21497_v49  ;;  %v30612_v9 = vadd.f32 %v20821_v5, %v10043_v1 }
 0x824   : > { %v21500_v13 = vadd.f32 %v30611_v61, %v36479_v3 }
 0x825   : > { %v21499_v17 = vadd.f32 %v30612_v9, %v36479_v3  ;;  %v28884_v23 = vpop.f32.mrb[26].mxu1  ;;  %v30436_v31 = vpop.f32.mrb[26].mxu0 }
 0x826   : > { %21628 = vst [vmem:[%s36495_s30 + $0xc8] sm:$0xff] %v21500_v13  ;;  %v30613_v39 = vadd.f32 %v30436_v31, %v28884_v23  ;;  %v10053_v47 = vpop.f32.mrb[27].mxu1  ;;  %v20831_v59 = vpop.f32.mrb[27].mxu0 }
 0x827   : > { %21627 = vst [vmem:[%s36495_s30 + $0xc0] sm:$0xff] %v21499_v17  ;;  %v30614_v55 = vadd.f32 %v20831_v59, %v10053_v47 }
 0x828   : > { %v21502_v63 = vadd.f32 %v30613_v39, %v36479_v3 }
 0x829   : > { %v21501_v11 = vadd.f32 %v30614_v55, %v36479_v3  ;;  %v28887_v27 = vpop.f32.mrb[28].mxu1  ;;  %v30439_v19 = vpop.f32.mrb[28].mxu0 }
 0x82a   : > { %21630 = vst [vmem:[%s36495_s30 + $0xd8] sm:$0xff] %v21502_v63  ;;  %v30615_v35 = vadd.f32 %v30439_v19, %v28887_v27  ;;  %v10063_v43 = vpop.f32.mrb[29].mxu1  ;;  %v20841_v20 = vpop.f32.mrb[29].mxu0 }
 0x82b   : > { %21629 = vst [vmem:[%s36495_s30 + $0xd0] sm:$0xff] %v21501_v11  ;;  %v30616_v51 = vadd.f32 %v20841_v20, %v10063_v43 }
 0x82c   : > { %v21504_v22 = vadd.f32 %v30615_v35, %v36479_v3 }
 0x82d   : > { %v21503_v42 = vadd.f32 %v30616_v51, %v36479_v3  ;;  %v28890_v44 = vpop.f32.mrb[30].mxu1  ;;  %v30442_v15 = vpop.f32.mrb[30].mxu0 }
 0x82e   : > { %21632 = vst [vmem:[%s36495_s30 + $0xe8] sm:$0xff] %v21504_v22  ;;  %v30617_v24 = vadd.f32 %v30442_v15, %v28890_v44  ;;  %v10073_v7 = vpop.f32.mrb[31].mxu1  ;;  %v20851_v26 = vpop.f32.mrb[31].mxu0 }
 0x82f   : > { %21631 = vst [vmem:[%s36495_s30 + $0xe0] sm:$0xff] %v21503_v42  ;;  %v30618_v28 = vadd.f32 %v20851_v26, %v10073_v7 }
 0x830   : > { %v21506_v30 = vadd.f32 %v30617_v24, %v36479_v3 }
 0x831   : > { %v21505_v32 = vadd.f32 %v30618_v28, %v36479_v3  ;;  %v28893_v34 = vpop.f32.mrb[32].mxu1  ;;  %v30445_v36 = vpop.f32.mrb[32].mxu0 }
 0x832   : > { %21634 = vst [vmem:[%s36495_s30 + $0xf8] sm:$0xff] %v21506_v30  ;;  %v30619_v38 = vadd.f32 %v30445_v36, %v28893_v34  ;;  %v10083_v40 = vpop.f32.mrb[33].mxu1  ;;  %v20861_v46 = vpop.f32.mrb[33].mxu0 }
 0x833   : > { %21633 = vst [vmem:[%s36495_s30 + $0xf0] sm:$0xff] %v21505_v32  ;;  %v30620_v48 = vadd.f32 %v20861_v46, %v10083_v40 }
 0x834   : > { %v21508_v50 = vadd.f32 %v30619_v38, %v36479_v3 }
 0x835   : > { %v21507_v52 = vadd.f32 %v30620_v48, %v36479_v3  ;;  %v28896_v54 = vpop.f32.mrb[34].mxu1  ;;  %v30448_v56 = vpop.f32.mrb[34].mxu0 }
 0x836   : > { %21636 = vst [vmem:[%s36495_s30 + $0x108] sm:$0xff] %v21508_v50  ;;  %v30621_v58 = vadd.f32 %v30448_v56, %v28896_v54  ;;  %v10093_v60 = vpop.f32.mrb[35].mxu1  ;;  %v20871_v62 = vpop.f32.mrb[35].mxu0 }
 0x837   : > { %21635 = vst [vmem:[%s36495_s30 + $0x100] sm:$0xff] %v21507_v52  ;;  %v30622_v0 = vadd.f32 %v20871_v62, %v10093_v60 }
 0x838   : > { %v21510_v2 = vadd.f32 %v30621_v58, %v36479_v3 }
 0x839   : > { %v21509_v4 = vadd.f32 %v30622_v0, %v36479_v3  ;;  %v28899_v6 = vpop.f32.mrb[36].mxu1  ;;  %v30451_v8 = vpop.f32.mrb[36].mxu0 }
 0x83a   : > { %21638 = vst [vmem:[%s36495_s30 + $0x118] sm:$0xff] %v21510_v2  ;;  %v30623_v10 = vadd.f32 %v30451_v8, %v28899_v6  ;;  %v10103_v12 = vpop.f32.mrb[37].mxu1  ;;  %v20881_v14 = vpop.f32.mrb[37].mxu0 }
 0x83b   : > { %21637 = vst [vmem:[%s36495_s30 + $0x110] sm:$0xff] %v21509_v4  ;;  %v30624_v16 = vadd.f32 %v20881_v14, %v10103_v12 }
 0x83c   : > { %v21512_v18 = vadd.f32 %v30623_v10, %v36479_v3 }
 0x83d   : > { %v21511_v21 = vadd.f32 %v30624_v16, %v36479_v3  ;;  %v28902_v25 = vpop.f32.mrb[38].mxu1  ;;  %v30454_v29 = vpop.f32.mrb[38].mxu0 }
 0x83e   : > { %21640 = vst [vmem:[%s36495_s30 + $0x128] sm:$0xff] %v21512_v18  ;;  %v30625_v33 = vadd.f32 %v30454_v29, %v28902_v25  ;;  %v10113_v37 = vpop.f32.mrb[39].mxu1  ;;  %v20891_v41 = vpop.f32.mrb[39].mxu0 }
 0x83f   : > { %21639 = vst [vmem:[%s36495_s30 + $0x120] sm:$0xff] %v21511_v21  ;;  %v30626_v45 = vadd.f32 %v20891_v41, %v10113_v37 }
 0x840   : > { %v21514_v49 = vadd.f32 %v30625_v33, %v36479_v3 }
 0x841   : > { %v21513_v53 = vadd.f32 %v30626_v45, %v36479_v3  ;;  %v28905_v57 = vpop.f32.mrb[40].mxu1  ;;  %v30457_v61 = vpop.f32.mrb[40].mxu0 }
 0x842   : > { %21642 = vst [vmem:[%s36495_s30 + $0x138] sm:$0xff] %v21514_v49  ;;  %v30627_v1 = vadd.f32 %v30457_v61, %v28905_v57  ;;  %v10123_v5 = vpop.f32.mrb[41].mxu1  ;;  %v20901_v9 = vpop.f32.mrb[41].mxu0 }
 0x843   : > { %21641 = vst [vmem:[%s36495_s30 + $0x130] sm:$0xff] %v21513_v53  ;;  %v30628_v13 = vadd.f32 %v20901_v9, %v10123_v5 }
 0x844   : > { %v21516_v17 = vadd.f32 %v30627_v1, %v36479_v3 }
 0x845   : > { %v21515_v23 = vadd.f32 %v30628_v13, %v36479_v3  ;;  %v28908_v31 = vpop.f32.mrb[42].mxu1  ;;  %v30460_v39 = vpop.f32.mrb[42].mxu0 }
 0x846   : > { %21644 = vst [vmem:[%s36495_s30 + $0x148] sm:$0xff] %v21516_v17  ;;  %v30629_v47 = vadd.f32 %v30460_v39, %v28908_v31  ;;  %v10133_v59 = vpop.f32.mrb[43].mxu1  ;;  %v20911_v55 = vpop.f32.mrb[43].mxu0 }
 0x847   : > { %21643 = vst [vmem:[%s36495_s30 + $0x140] sm:$0xff] %v21515_v23  ;;  %v30630_v63 = vadd.f32 %v20911_v55, %v10133_v59 }
 0x848   : > { %v21518_v11 = vadd.f32 %v30629_v47, %v36479_v3 }
 0x849   : > { %v21517_v27 = vadd.f32 %v30630_v63, %v36479_v3  ;;  %v28911_v19 = vpop.f32.mrb[44].mxu1  ;;  %v30463_v35 = vpop.f32.mrb[44].mxu0 }
 0x84a   : > { %21646 = vst [vmem:[%s36495_s30 + $0x158] sm:$0xff] %v21518_v11  ;;  %v30631_v43 = vadd.f32 %v30463_v35, %v28911_v19  ;;  %v10143_v20 = vpop.f32.mrb[45].mxu1  ;;  %v20921_v51 = vpop.f32.mrb[45].mxu0 }
 0x84b   : > { %21645 = vst [vmem:[%s36495_s30 + $0x150] sm:$0xff] %v21517_v27  ;;  %v30632_v22 = vadd.f32 %v20921_v51, %v10143_v20 }
 0x84c   : > { %v21520_v42 = vadd.f32 %v30631_v43, %v36479_v3 }
 0x84d   : > { %v21519_v44 = vadd.f32 %v30632_v22, %v36479_v3  ;;  %v28914_v15 = vpop.f32.mrb[46].mxu1  ;;  %v30466_v24 = vpop.f32.mrb[46].mxu0 }
 0x84e   : > { %21648 = vst [vmem:[%s36495_s30 + $0x168] sm:$0xff] %v21520_v42  ;;  %v30633_v7 = vadd.f32 %v30466_v24, %v28914_v15  ;;  %v10153_v26 = vpop.f32.mrb[47].mxu1  ;;  %v20931_v28 = vpop.f32.mrb[47].mxu0 }
 0x84f   : > { %21647 = vst [vmem:[%s36495_s30 + $0x160] sm:$0xff] %v21519_v44  ;;  %v30634_v30 = vadd.f32 %v20931_v28, %v10153_v26 }
 0x850   : > { %v21522_v32 = vadd.f32 %v30633_v7, %v36479_v3 }
 0x851   : > { %v21521_v34 = vadd.f32 %v30634_v30, %v36479_v3  ;;  %v28917_v36 = vpop.f32.mrb[48].mxu1  ;;  %v30469_v38 = vpop.f32.mrb[48].mxu0 }
 0x852   : > { %21650 = vst [vmem:[%s36495_s30 + $0x178] sm:$0xff] %v21522_v32  ;;  %v30635_v40 = vadd.f32 %v30469_v38, %v28917_v36  ;;  %v10163_v46 = vpop.f32.mrb[49].mxu1  ;;  %v20941_v48 = vpop.f32.mrb[49].mxu0 }
 0x853   : > { %21649 = vst [vmem:[%s36495_s30 + $0x170] sm:$0xff] %v21521_v34  ;;  %v30636_v50 = vadd.f32 %v20941_v48, %v10163_v46 }
 0x854   : > { %v21524_v52 = vadd.f32 %v30635_v40, %v36479_v3 }
 0x855   : > { %v21523_v54 = vadd.f32 %v30636_v50, %v36479_v3  ;;  %v28920_v56 = vpop.f32.mrb[50].mxu1  ;;  %v30472_v58 = vpop.f32.mrb[50].mxu0 }
 0x856   : > { %21652 = vst [vmem:[%s36495_s30 + $0x188] sm:$0xff] %v21524_v52  ;;  %v30637_v60 = vadd.f32 %v30472_v58, %v28920_v56  ;;  %v10173_v62 = vpop.f32.mrb[51].mxu1  ;;  %v20951_v0 = vpop.f32.mrb[51].mxu0 }
 0x857   : > { %21651 = vst [vmem:[%s36495_s30 + $0x180] sm:$0xff] %v21523_v54  ;;  %v30638_v2 = vadd.f32 %v20951_v0, %v10173_v62 }
 0x858   : > { %v21526_v4 = vadd.f32 %v30637_v60, %v36479_v3 }
 0x859   : > { %v21525_v6 = vadd.f32 %v30638_v2, %v36479_v3  ;;  %v28923_v8 = vpop.f32.mrb[52].mxu1  ;;  %v30475_v10 = vpop.f32.mrb[52].mxu0 }
 0x85a   : > { %21654 = vst [vmem:[%s36495_s30 + $0x198] sm:$0xff] %v21526_v4  ;;  %v30639_v12 = vadd.f32 %v30475_v10, %v28923_v8  ;;  %v10183_v14 = vpop.f32.mrb[53].mxu1  ;;  %v20961_v16 = vpop.f32.mrb[53].mxu0 }
 0x85b   : > { %21653 = vst [vmem:[%s36495_s30 + $0x190] sm:$0xff] %v21525_v6  ;;  %v30640_v18 = vadd.f32 %v20961_v16, %v10183_v14 }
 0x85c   : > { %v21528_v21 = vadd.f32 %v30639_v12, %v36479_v3 }
 0x85d   : > { %v21527_v25 = vadd.f32 %v30640_v18, %v36479_v3  ;;  %v28926_v29 = vpop.f32.mrb[54].mxu1  ;;  %v30478_v33 = vpop.f32.mrb[54].mxu0 }
 0x85e   : > { %21656 = vst [vmem:[%s36495_s30 + $0x1a8] sm:$0xff] %v21528_v21  ;;  %v30641_v37 = vadd.f32 %v30478_v33, %v28926_v29  ;;  %v10193_v41 = vpop.f32.mrb[55].mxu1  ;;  %v20971_v45 = vpop.f32.mrb[55].mxu0 }
 0x85f   : > { %21655 = vst [vmem:[%s36495_s30 + $0x1a0] sm:$0xff] %v21527_v25  ;;  %v30642_v49 = vadd.f32 %v20971_v45, %v10193_v41 }
 0x860   : > { %v21530_v53 = vadd.f32 %v30641_v37, %v36479_v3 }
 0x861   : > { %v21529_v57 = vadd.f32 %v30642_v49, %v36479_v3  ;;  %v28929_v61 = vpop.f32.mrb[56].mxu1  ;;  %v30481_v1 = vpop.f32.mrb[56].mxu0 }
 0x862   : > { %21658 = vst [vmem:[%s36495_s30 + $0x1b8] sm:$0xff] %v21530_v53  ;;  %v30643_v5 = vadd.f32 %v30481_v1, %v28929_v61  ;;  %v10203_v9 = vpop.f32.mrb[57].mxu1  ;;  %v20981_v13 = vpop.f32.mrb[57].mxu0 }
 0x863   : > { %21657 = vst [vmem:[%s36495_s30 + $0x1b0] sm:$0xff] %v21529_v57  ;;  %v30644_v17 = vadd.f32 %v20981_v13, %v10203_v9 }
 0x864   : > { %v21532_v23 = vadd.f32 %v30643_v5, %v36479_v3 }
 0x865   : > { %v21531_v31 = vadd.f32 %v30644_v17, %v36479_v3  ;;  %v28932_v39 = vpop.f32.mrb[58].mxu1  ;;  %v30484_v47 = vpop.f32.mrb[58].mxu0 }
 0x866   : > { %21660 = vst [vmem:[%s36495_s30 + $0x1c8] sm:$0xff] %v21532_v23  ;;  %v30645_v59 = vadd.f32 %v30484_v47, %v28932_v39  ;;  %v10213_v55 = vpop.f32.mrb[59].mxu1  ;;  %v20991_v63 = vpop.f32.mrb[59].mxu0 }
 0x867   : > { %21659 = vst [vmem:[%s36495_s30 + $0x1c0] sm:$0xff] %v21531_v31  ;;  %v30646_v11 = vadd.f32 %v20991_v63, %v10213_v55 }
 0x868   : > { %v21534_v27 = vadd.f32 %v30645_v59, %v36479_v3 }
 0x869   : > { %v21533_v19 = vadd.f32 %v30646_v11, %v36479_v3  ;;  %v28935_v35 = vpop.f32.mrb[60].mxu1  ;;  %v30487_v43 = vpop.f32.mrb[60].mxu0 }
 0x86a   : > { %21662 = vst [vmem:[%s36495_s30 + $0x1d8] sm:$0xff] %v21534_v27  ;;  %v30647_v20 = vadd.f32 %v30487_v43, %v28935_v35  ;;  %v10223_v51 = vpop.f32.mrb[61].mxu1  ;;  %v21001_v22 = vpop.f32.mrb[61].mxu0 }
 0x86b   : > { %21661 = vst [vmem:[%s36495_s30 + $0x1d0] sm:$0xff] %v21533_v19  ;;  %v30648_v42 = vadd.f32 %v21001_v22, %v10223_v51 }
 0x86c   : > { %v21536_v44 = vadd.f32 %v30647_v20, %v36479_v3 }
 0x86d   : > { %v21535_v15 = vadd.f32 %v30648_v42, %v36479_v3  ;;  %v28938_v24 = vpop.f32.mrb[62].mxu1  ;;  %v30490_v7 = vpop.f32.mrb[62].mxu0 }
 0x86e   : > { %21664 = vst [vmem:[%s36495_s30 + $0x1e8] sm:$0xff] %v21536_v44  ;;  %v30649_v26 = vadd.f32 %v30490_v7, %v28938_v24  ;;  %v10233_v28 = vpop.f32.mrb[63].mxu1  ;;  %v21011_v30 = vpop.f32.mrb[63].mxu0 }
 0x86f   : > { %21663 = vst [vmem:[%s36495_s30 + $0x1e0] sm:$0xff] %v21535_v15  ;;  %v30650_v32 = vadd.f32 %v21011_v30, %v10233_v28 }
 0x870   : > { %v21538_v34 = vadd.f32 %v30649_v26, %v36479_v3 }
 0x871   : > { %v21537_v36 = vadd.f32 %v30650_v32, %v36479_v3  ;;  %v28941_v38 = vpop.f32.mrb[64].mxu1  ;;  %v30493_v40 = vpop.f32.mrb[64].mxu0 }
 0x872   : > { %21666 = vst [vmem:[%s36495_s30 + $0x1f8] sm:$0xff] %v21538_v34  ;;  %v30651_v46 = vadd.f32 %v30493_v40, %v28941_v38  ;;  %v10243_v48 = vpop.f32.mrb[65].mxu1  ;;  %v21021_v50 = vpop.f32.mrb[65].mxu0 }
 0x873   : > { %21665 = vst [vmem:[%s36495_s30 + $0x1f0] sm:$0xff] %v21537_v36  ;;  %v30652_v52 = vadd.f32 %v21021_v50, %v10243_v48 }
 0x874   : > { %v21540_v54 = vadd.f32 %v30651_v46, %v36479_v3 }
 0x875   : > { %v21539_v56 = vadd.f32 %v30652_v52, %v36479_v3  ;;  %v28944_v58 = vpop.f32.mrb[66].mxu1  ;;  %v30496_v60 = vpop.f32.mrb[66].mxu0 }
 0x876   : > { %21668 = vst [vmem:[%s36495_s30 + $0x208] sm:$0xff] %v21540_v54  ;;  %v30653_v62 = vadd.f32 %v30496_v60, %v28944_v58  ;;  %v10253_v0 = vpop.f32.mrb[67].mxu1  ;;  %v21031_v2 = vpop.f32.mrb[67].mxu0 }
 0x877   : > { %21667 = vst [vmem:[%s36495_s30 + $0x200] sm:$0xff] %v21539_v56  ;;  %v30654_v4 = vadd.f32 %v21031_v2, %v10253_v0 }
 0x878   : > { %v21542_v6 = vadd.f32 %v30653_v62, %v36479_v3 }
 0x879   : > { %v21541_v8 = vadd.f32 %v30654_v4, %v36479_v3  ;;  %v28947_v10 = vpop.f32.mrb[68].mxu1  ;;  %v30499_v12 = vpop.f32.mrb[68].mxu0 }
 0x87a   : > { %21670 = vst [vmem:[%s36495_s30 + $0x218] sm:$0xff] %v21542_v6  ;;  %v30655_v14 = vadd.f32 %v30499_v12, %v28947_v10  ;;  %v10263_v16 = vpop.f32.mrb[69].mxu1  ;;  %v21041_v18 = vpop.f32.mrb[69].mxu0 }
 0x87b   : > { %21669 = vst [vmem:[%s36495_s30 + $0x210] sm:$0xff] %v21541_v8  ;;  %v30656_v21 = vadd.f32 %v21041_v18, %v10263_v16 }
 0x87c   : > { %v21544_v25 = vadd.f32 %v30655_v14, %v36479_v3 }
 0x87d   : > { %v21543_v29 = vadd.f32 %v30656_v21, %v36479_v3  ;;  %v28950_v33 = vpop.f32.mrb[70].mxu1  ;;  %v30502_v37 = vpop.f32.mrb[70].mxu0 }
 0x87e   : > { %21672 = vst [vmem:[%s36495_s30 + $0x228] sm:$0xff] %v21544_v25  ;;  %v30657_v41 = vadd.f32 %v30502_v37, %v28950_v33  ;;  %v10273_v45 = vpop.f32.mrb[71].mxu1  ;;  %v21051_v49 = vpop.f32.mrb[71].mxu0 }
 0x87f   : > { %21671 = vst [vmem:[%s36495_s30 + $0x220] sm:$0xff] %v21543_v29  ;;  %v30658_v53 = vadd.f32 %v21051_v49, %v10273_v45 }
 0x880   : > { %v21546_v57 = vadd.f32 %v30657_v41, %v36479_v3 }
 0x881   : > { %v21545_v61 = vadd.f32 %v30658_v53, %v36479_v3  ;;  %v28953_v1 = vpop.f32.mrb[72].mxu1  ;;  %v30505_v5 = vpop.f32.mrb[72].mxu0 }
 0x882   : > { %21674 = vst [vmem:[%s36495_s30 + $0x238] sm:$0xff] %v21546_v57  ;;  %v30659_v9 = vadd.f32 %v30505_v5, %v28953_v1  ;;  %v10283_v13 = vpop.f32.mrb[73].mxu1  ;;  %v21061_v17 = vpop.f32.mrb[73].mxu0 }
 0x883   : > { %21673 = vst [vmem:[%s36495_s30 + $0x230] sm:$0xff] %v21545_v61  ;;  %v30660_v23 = vadd.f32 %v21061_v17, %v10283_v13 }
 0x884   : > { %v21548_v31 = vadd.f32 %v30659_v9, %v36479_v3 }
 0x885   : > { %v21547_v39 = vadd.f32 %v30660_v23, %v36479_v3  ;;  %v28956_v47 = vpop.f32.mrb[74].mxu1  ;;  %v30508_v59 = vpop.f32.mrb[74].mxu0 }
 0x886   : > { %21676 = vst [vmem:[%s36495_s30 + $0x248] sm:$0xff] %v21548_v31  ;;  %v30661_v55 = vadd.f32 %v30508_v59, %v28956_v47  ;;  %v10293_v63 = vpop.f32.mrb[75].mxu1  ;;  %v21071_v11 = vpop.f32.mrb[75].mxu0 }
 0x887   : > { %21675 = vst [vmem:[%s36495_s30 + $0x240] sm:$0xff] %v21547_v39  ;;  %v30662_v27 = vadd.f32 %v21071_v11, %v10293_v63 }
 0x888   : > { %v21550_v19 = vadd.f32 %v30661_v55, %v36479_v3 }
 0x889   : > { %v21549_v35 = vadd.f32 %v30662_v27, %v36479_v3  ;;  %v28959_v43 = vpop.f32.mrb[76].mxu1  ;;  %v30511_v20 = vpop.f32.mrb[76].mxu0 }
 0x88a   : > { %21678 = vst [vmem:[%s36495_s30 + $0x258] sm:$0xff] %v21550_v19  ;;  %v30663_v51 = vadd.f32 %v30511_v20, %v28959_v43  ;;  %v10303_v22 = vpop.f32.mrb[77].mxu1  ;;  %v21081_v42 = vpop.f32.mrb[77].mxu0 }
 0x88b   : > { %21677 = vst [vmem:[%s36495_s30 + $0x250] sm:$0xff] %v21549_v35  ;;  %v30664_v44 = vadd.f32 %v21081_v42, %v10303_v22  ;;  %v36777_v35 = vld [vmem:[%s36909_s2] ss:$0 sm:$0xff] }
 0x88c   : > { %v21552_v15 = vadd.f32 %v30663_v51, %v36479_v3 }
 0x88d   : > { %v21551_v24 = vadd.f32 %v30664_v44, %v36479_v3  ;;  %v28962_v7 = vpop.f32.mrb[78].mxu1  ;;  %v30514_v26 = vpop.f32.mrb[78].mxu0 }
 0x88e   : > { %21680 = vst [vmem:[%s36495_s30 + $0x268] sm:$0xff] %v21552_v15  ;;  %v30665_v28 = vadd.f32 %v30514_v26, %v28962_v7  ;;  %v10313_v30 = vpop.f32.mrb[79].mxu1  ;;  %v21091_v32 = vpop.f32.mrb[79].mxu0 }
 0x88f   : > { %21679 = vst [vmem:[%s36495_s30 + $0x260] sm:$0xff] %v21551_v24  ;;  %v30666_v34 = vadd.f32 %v21091_v32, %v10313_v30 }
 0x890   : > { %v21554_v36 = vadd.f32 %v30665_v28, %v36479_v3 }
 0x891   : > { %v21553_v38 = vadd.f32 %v30666_v34, %v36479_v3  ;;  %v28965_v40 = vpop.f32.mrb[80].mxu1  ;;  %v30517_v46 = vpop.f32.mrb[80].mxu0 }
 0x892   : > { %21682 = vst [vmem:[%s36495_s30 + $0x278] sm:$0xff] %v21554_v36  ;;  %v30667_v48 = vadd.f32 %v30517_v46, %v28965_v40  ;;  %v10323_v50 = vpop.f32.mrb[81].mxu1  ;;  %v21101_v52 = vpop.f32.mrb[81].mxu0 }
 0x893   : > { %21681 = vst [vmem:[%s36495_s30 + $0x270] sm:$0xff] %v21553_v38  ;;  %v30668_v54 = vadd.f32 %v21101_v52, %v10323_v50 }
 0x894   : > { %v21556_v56 = vadd.f32 %v30667_v48, %v36479_v3 }
 0x895   : > { %v21555_v58 = vadd.f32 %v30668_v54, %v36479_v3  ;;  %v28968_v60 = vpop.f32.mrb[82].mxu1  ;;  %v30520_v62 = vpop.f32.mrb[82].mxu0 }
 0x896   : > { %21684 = vst [vmem:[%s36495_s30 + $0x288] sm:$0xff] %v21556_v56  ;;  %v30669_v0 = vadd.f32 %v30520_v62, %v28968_v60  ;;  %v10333_v2 = vpop.f32.mrb[83].mxu1  ;;  %v21111_v4 = vpop.f32.mrb[83].mxu0 }
 0x897   : > { %21683 = vst [vmem:[%s36495_s30 + $0x280] sm:$0xff] %v21555_v58  ;;  %v30670_v6 = vadd.f32 %v21111_v4, %v10333_v2 }
 0x898   : > { %v21558_v8 = vadd.f32 %v30669_v0, %v36479_v3 }
 0x899   : > { %v21557_v10 = vadd.f32 %v30670_v6, %v36479_v3  ;;  %v28971_v12 = vpop.f32.mrb[84].mxu1  ;;  %v30523_v14 = vpop.f32.mrb[84].mxu0 }
 0x89a   : > { %21686 = vst [vmem:[%s36495_s30 + $0x298] sm:$0xff] %v21558_v8  ;;  %v30671_v16 = vadd.f32 %v30523_v14, %v28971_v12  ;;  %v10343_v18 = vpop.f32.mrb[85].mxu1  ;;  %v21121_v21 = vpop.f32.mrb[85].mxu0 }
 0x89b   : > { %21685 = vst [vmem:[%s36495_s30 + $0x290] sm:$0xff] %v21557_v10  ;;  %v30672_v25 = vadd.f32 %v21121_v21, %v10343_v18 }
 0x89c   : > { %v21560_v29 = vadd.f32 %v30671_v16, %v36479_v3 }
 0x89d   : > { %v21559_v33 = vadd.f32 %v30672_v25, %v36479_v3  ;;  %v28974_v37 = vpop.f32.mrb[86].mxu1  ;;  %v30526_v41 = vpop.f32.mrb[86].mxu0 }
 0x89e   : > { %21688 = vst [vmem:[%s36495_s30 + $0x2a8] sm:$0xff] %v21560_v29  ;;  %v30673_v45 = vadd.f32 %v30526_v41, %v28974_v37  ;;  %v10353_v49 = vpop.f32.mrb[87].mxu1  ;;  %v21131_v53 = vpop.f32.mrb[87].mxu0 }
 0x89f   : > { %21687 = vst [vmem:[%s36495_s30 + $0x2a0] sm:$0xff] %v21559_v33  ;;  %v30674_v57 = vadd.f32 %v21131_v53, %v10353_v49 }
 0x8a0   : > { %v21562_v61 = vadd.f32 %v30673_v45, %v36479_v3 }
 0x8a1   : > { %v21561_v1 = vadd.f32 %v30674_v57, %v36479_v3  ;;  %v28977_v5 = vpop.f32.mrb[88].mxu1  ;;  %v30529_v9 = vpop.f32.mrb[88].mxu0 }
 0x8a2   : > { %21690 = vst [vmem:[%s36495_s30 + $0x2b8] sm:$0xff] %v21562_v61  ;;  %v30675_v13 = vadd.f32 %v30529_v9, %v28977_v5  ;;  %v10363_v17 = vpop.f32.mrb[89].mxu1  ;;  %v21141_v23 = vpop.f32.mrb[89].mxu0 }
 0x8a3   : > { %21689 = vst [vmem:[%s36495_s30 + $0x2b0] sm:$0xff] %v21561_v1  ;;  %v30676_v31 = vadd.f32 %v21141_v23, %v10363_v17 }
 0x8a4   : > { %v21564_v39 = vadd.f32 %v30675_v13, %v36479_v3 }
 0x8a5   : > { %v21563_v47 = vadd.f32 %v30676_v31, %v36479_v3  ;;  %v28980_v59 = vpop.f32.mrb[90].mxu1  ;;  %v30532_v55 = vpop.f32.mrb[90].mxu0 }
 0x8a6   : > { %21692 = vst [vmem:[%s36495_s30 + $0x2c8] sm:$0xff] %v21564_v39  ;;  %v30677_v63 = vadd.f32 %v30532_v55, %v28980_v59  ;;  %v10373_v11 = vpop.f32.mrb[91].mxu1  ;;  %v21151_v27 = vpop.f32.mrb[91].mxu0 }
 0x8a7   : > { %21691 = vst [vmem:[%s36495_s30 + $0x2c0] sm:$0xff] %v21563_v47  ;;  %v30678_v19 = vadd.f32 %v21151_v27, %v10373_v11 }
 0x8a8   : > { %v21566_v43 = vadd.f32 %v36777_v35, %v30677_v63 }
 0x8a9   : > { %v21565_v20 = vadd.f32 %v36777_v35, %v30678_v19  ;;  %v28983_v3 = vpop.f32.mrb[92].mxu1  ;;  %v30535_v51 = vpop.f32.mrb[92].mxu0 }
 0x8aa   : > { %21694 = vst [vmem:[%s36495_s30 + $0x2d8] sm:$0xff] %v21566_v43  ;;  %v30679_v22 = vadd.f32 %v30535_v51, %v28983_v3  ;;  %v10383_v42 = vpop.f32.mrb[93].mxu1  ;;  %v21161_v44 = vpop.f32.mrb[93].mxu0 }
 0x8ab   : > { %21693 = vst [vmem:[%s36495_s30 + $0x2d0] sm:$0xff] %v21565_v20  ;;  %v30680_v15 = vadd.f32 %v21161_v44, %v10383_v42 }
 0x8ac   : > { %v21568_v24 = vadd.f32 %v36777_v35, %v30679_v22 }
 0x8ad   : > { %v21567_v7 = vadd.f32 %v36777_v35, %v30680_v15  ;;  %v28986_v26 = vpop.f32.mrb[94].mxu1  ;;  %v30538_v28 = vpop.f32.mrb[94].mxu0 }
 0x8ae   : > { %21696 = vst [vmem:[%s36495_s30 + $0x2e8] sm:$0xff] %v21568_v24  ;;  %v30681_v30 = vadd.f32 %v30538_v28, %v28986_v26  ;;  %v10393_v32 = vpop.f32.mrb[95].mxu1  ;;  %v21171_v34 = vpop.f32.mrb[95].mxu0 }
 0x8af   : > { %21695 = vst [vmem:[%s36495_s30 + $0x2e0] sm:$0xff] %v21567_v7  ;;  %v30682_v36 = vadd.f32 %v21171_v34, %v10393_v32 }
 0x8b0   : > { %v21570_v38 = vadd.f32 %v36777_v35, %v30681_v30 }
 0x8b1   : > { %v21569_v40 = vadd.f32 %v36777_v35, %v30682_v36  ;;  %v28989_v46 = vpop.f32.mrb[96].mxu1  ;;  %v30541_v48 = vpop.f32.mrb[96].mxu0 }
 0x8b2   : > { %21698 = vst [vmem:[%s36495_s30 + $0x2f8] sm:$0xff] %v21570_v38  ;;  %v30683_v50 = vadd.f32 %v30541_v48, %v28989_v46  ;;  %v10403_v52 = vpop.f32.mrb[97].mxu1  ;;  %v21181_v54 = vpop.f32.mrb[97].mxu0 }
 0x8b3   : > { %21697 = vst [vmem:[%s36495_s30 + $0x2f0] sm:$0xff] %v21569_v40  ;;  %v30684_v56 = vadd.f32 %v21181_v54, %v10403_v52 }
 0x8b4   : > { %v21572_v58 = vadd.f32 %v36777_v35, %v30683_v50 }
 0x8b5   : > { %v21571_v60 = vadd.f32 %v36777_v35, %v30684_v56  ;;  %v28992_v62 = vpop.f32.mrb[98].mxu1  ;;  %v30544_v0 = vpop.f32.mrb[98].mxu0 }
 0x8b6   : > { %21700 = vst [vmem:[%s36495_s30 + $0x308] sm:$0xff] %v21572_v58  ;;  %v30685_v2 = vadd.f32 %v30544_v0, %v28992_v62  ;;  %v10413_v4 = vpop.f32.mrb[99].mxu1  ;;  %v21191_v6 = vpop.f32.mrb[99].mxu0 }
 0x8b7   : > { %21699 = vst [vmem:[%s36495_s30 + $0x300] sm:$0xff] %v21571_v60  ;;  %v30686_v8 = vadd.f32 %v21191_v6, %v10413_v4 }
 0x8b8   : > { %v21574_v10 = vadd.f32 %v36777_v35, %v30685_v2 }
 0x8b9   : > { %v21573_v12 = vadd.f32 %v36777_v35, %v30686_v8  ;;  %v28995_v14 = vpop.f32.mrb[100].mxu1  ;;  %v30547_v16 = vpop.f32.mrb[100].mxu0 }
 0x8ba   : > { %21702 = vst [vmem:[%s36495_s30 + $0x318] sm:$0xff] %v21574_v10  ;;  %v30687_v18 = vadd.f32 %v30547_v16, %v28995_v14  ;;  %v10423_v21 = vpop.f32.mrb[101].mxu1  ;;  %v21201_v25 = vpop.f32.mrb[101].mxu0 }
 0x8bb   : > { %21701 = vst [vmem:[%s36495_s30 + $0x310] sm:$0xff] %v21573_v12  ;;  %v30688_v29 = vadd.f32 %v21201_v25, %v10423_v21 }
 0x8bc   : > { %v21576_v33 = vadd.f32 %v36777_v35, %v30687_v18 }
 0x8bd   : > { %v21575_v37 = vadd.f32 %v36777_v35, %v30688_v29  ;;  %v28998_v41 = vpop.f32.mrb[102].mxu1  ;;  %v30550_v45 = vpop.f32.mrb[102].mxu0 }
 0x8be   : > { %21704 = vst [vmem:[%s36495_s30 + $0x328] sm:$0xff] %v21576_v33  ;;  %v30689_v49 = vadd.f32 %v30550_v45, %v28998_v41  ;;  %v10433_v53 = vpop.f32.mrb[103].mxu1  ;;  %v21211_v57 = vpop.f32.mrb[103].mxu0 }
 0x8bf   : > { %21703 = vst [vmem:[%s36495_s30 + $0x320] sm:$0xff] %v21575_v37  ;;  %v30690_v61 = vadd.f32 %v21211_v57, %v10433_v53 }
 0x8c0   : > { %v21578_v1 = vadd.f32 %v36777_v35, %v30689_v49 }
 0x8c1   : > { %v21577_v5 = vadd.f32 %v36777_v35, %v30690_v61  ;;  %v29001_v9 = vpop.f32.mrb[104].mxu1  ;;  %v30553_v13 = vpop.f32.mrb[104].mxu0 }
 0x8c2   : > { %21706 = vst [vmem:[%s36495_s30 + $0x338] sm:$0xff] %v21578_v1  ;;  %v30691_v17 = vadd.f32 %v30553_v13, %v29001_v9  ;;  %v10443_v23 = vpop.f32.mrb[105].mxu1  ;;  %v21221_v31 = vpop.f32.mrb[105].mxu0 }
 0x8c3   : > { %21705 = vst [vmem:[%s36495_s30 + $0x330] sm:$0xff] %v21577_v5  ;;  %v30692_v39 = vadd.f32 %v21221_v31, %v10443_v23 }
 0x8c4   : > { %v21580_v47 = vadd.f32 %v36777_v35, %v30691_v17 }
 0x8c5   : > { %v21579_v59 = vadd.f32 %v36777_v35, %v30692_v39  ;;  %v29004_v55 = vpop.f32.mrb[106].mxu1  ;;  %v30556_v63 = vpop.f32.mrb[106].mxu0 }
 0x8c6   : > { %21708 = vst [vmem:[%s36495_s30 + $0x348] sm:$0xff] %v21580_v47  ;;  %v30693_v11 = vadd.f32 %v30556_v63, %v29004_v55  ;;  %v10453_v27 = vpop.f32.mrb[107].mxu1  ;;  %v21231_v19 = vpop.f32.mrb[107].mxu0 }
 0x8c7   : > { %21707 = vst [vmem:[%s36495_s30 + $0x340] sm:$0xff] %v21579_v59  ;;  %v30694_v43 = vadd.f32 %v21231_v19, %v10453_v27 }
 0x8c8   : > { %v21582_v20 = vadd.f32 %v36777_v35, %v30693_v11 }
 0x8c9   : > { %v21581_v3 = vadd.f32 %v36777_v35, %v30694_v43  ;;  %v29007_v51 = vpop.f32.mrb[108].mxu1  ;;  %v30559_v22 = vpop.f32.mrb[108].mxu0 }
 0x8ca   : > { %21710 = vst [vmem:[%s36495_s30 + $0x358] sm:$0xff] %v21582_v20  ;;  %v30695_v42 = vadd.f32 %v30559_v22, %v29007_v51  ;;  %v10463_v44 = vpop.f32.mrb[109].mxu1  ;;  %v21241_v15 = vpop.f32.mrb[109].mxu0 }
 0x8cb   : > { %21709 = vst [vmem:[%s36495_s30 + $0x350] sm:$0xff] %v21581_v3  ;;  %v30696_v24 = vadd.f32 %v21241_v15, %v10463_v44 }
 0x8cc   : > { %v21584_v7 = vadd.f32 %v36777_v35, %v30695_v42 }
 0x8cd   : > { %v21583_v26 = vadd.f32 %v36777_v35, %v30696_v24  ;;  %v29010_v28 = vpop.f32.mrb[110].mxu1  ;;  %v30562_v30 = vpop.f32.mrb[110].mxu0 }
 0x8ce   : > { %21712 = vst [vmem:[%s36495_s30 + $0x368] sm:$0xff] %v21584_v7  ;;  %v30697_v32 = vadd.f32 %v30562_v30, %v29010_v28  ;;  %v10473_v34 = vpop.f32.mrb[111].mxu1  ;;  %v21251_v36 = vpop.f32.mrb[111].mxu0 }
 0x8cf   : > { %21711 = vst [vmem:[%s36495_s30 + $0x360] sm:$0xff] %v21583_v26  ;;  %v30698_v38 = vadd.f32 %v21251_v36, %v10473_v34 }
 0x8d0   : > { %v21586_v40 = vadd.f32 %v36777_v35, %v30697_v32 }
 0x8d1   : > { %v21585_v46 = vadd.f32 %v36777_v35, %v30698_v38  ;;  %v29013_v48 = vpop.f32.mrb[112].mxu1  ;;  %v30565_v50 = vpop.f32.mrb[112].mxu0 }
 0x8d2   : > { %21714 = vst [vmem:[%s36495_s30 + $0x378] sm:$0xff] %v21586_v40  ;;  %v30699_v52 = vadd.f32 %v30565_v50, %v29013_v48  ;;  %v10483_v54 = vpop.f32.mrb[113].mxu1  ;;  %v21261_v56 = vpop.f32.mrb[113].mxu0 }
 0x8d3   : > { %21713 = vst [vmem:[%s36495_s30 + $0x370] sm:$0xff] %v21585_v46  ;;  %v30700_v58 = vadd.f32 %v21261_v56, %v10483_v54 }
 0x8d4   : > { %v21588_v60 = vadd.f32 %v36777_v35, %v30699_v52 }
 0x8d5   : > { %v21587_v62 = vadd.f32 %v36777_v35, %v30700_v58  ;;  %v29016_v0 = vpop.f32.mrb[114].mxu1  ;;  %v30568_v2 = vpop.f32.mrb[114].mxu0 }
 0x8d6   : > { %21716 = vst [vmem:[%s36495_s30 + $0x388] sm:$0xff] %v21588_v60  ;;  %v30701_v4 = vadd.f32 %v30568_v2, %v29016_v0  ;;  %v10493_v6 = vpop.f32.mrb[115].mxu1  ;;  %v21271_v8 = vpop.f32.mrb[115].mxu0 }
 0x8d7   : > { %21715 = vst [vmem:[%s36495_s30 + $0x380] sm:$0xff] %v21587_v62  ;;  %v30702_v10 = vadd.f32 %v21271_v8, %v10493_v6 }
 0x8d8   : > { %v21590_v12 = vadd.f32 %v36777_v35, %v30701_v4 }
 0x8d9   : > { %v21589_v14 = vadd.f32 %v36777_v35, %v30702_v10  ;;  %v29019_v16 = vpop.f32.mrb[116].mxu1  ;;  %v30571_v18 = vpop.f32.mrb[116].mxu0 }
 0x8da   : > { %21718 = vst [vmem:[%s36495_s30 + $0x398] sm:$0xff] %v21590_v12  ;;  %v30703_v21 = vadd.f32 %v30571_v18, %v29019_v16  ;;  %v10503_v25 = vpop.f32.mrb[117].mxu1  ;;  %v21281_v29 = vpop.f32.mrb[117].mxu0 }
 0x8db   : > { %21717 = vst [vmem:[%s36495_s30 + $0x390] sm:$0xff] %v21589_v14  ;;  %v30704_v33 = vadd.f32 %v21281_v29, %v10503_v25 }
 0x8dc   : > { %v21592_v37 = vadd.f32 %v36777_v35, %v30703_v21 }
 0x8dd   : > { %v21591_v41 = vadd.f32 %v36777_v35, %v30704_v33  ;;  %v29022_v45 = vpop.f32.mrb[118].mxu1  ;;  %v30574_v49 = vpop.f32.mrb[118].mxu0 }
 0x8de   : > { %21720 = vst [vmem:[%s36495_s30 + $0x3a8] sm:$0xff] %v21592_v37  ;;  %v30705_v53 = vadd.f32 %v30574_v49, %v29022_v45  ;;  %v10513_v57 = vpop.f32.mrb[119].mxu1  ;;  %v21291_v61 = vpop.f32.mrb[119].mxu0 }
 0x8df   : > { %21719 = vst [vmem:[%s36495_s30 + $0x3a0] sm:$0xff] %v21591_v41  ;;  %v30706_v1 = vadd.f32 %v21291_v61, %v10513_v57 }
 0x8e0   : > { %v21594_v5 = vadd.f32 %v36777_v35, %v30705_v53 }
 0x8e1   : > { %v21593_v9 = vadd.f32 %v36777_v35, %v30706_v1  ;;  %v29025_v13 = vpop.f32.mrb[120].mxu1  ;;  %v30577_v17 = vpop.f32.mrb[120].mxu0 }
 0x8e2   : > { %21722 = vst [vmem:[%s36495_s30 + $0x3b8] sm:$0xff] %v21594_v5  ;;  %v30707_v23 = vadd.f32 %v30577_v17, %v29025_v13  ;;  %v10523_v31 = vpop.f32.mrb[121].mxu1  ;;  %v21301_v39 = vpop.f32.mrb[121].mxu0 }
 0x8e3   : > { %21721 = vst [vmem:[%s36495_s30 + $0x3b0] sm:$0xff] %v21593_v9  ;;  %v30708_v47 = vadd.f32 %v21301_v39, %v10523_v31 }
 0x8e4   : > { %v21596_v59 = vadd.f32 %v36777_v35, %v30707_v23 }
 0x8e5   : > { %v21595_v55 = vadd.f32 %v36777_v35, %v30708_v47  ;;  %v29028_v63 = vpop.f32.mrb[122].mxu1  ;;  %v30580_v11 = vpop.f32.mrb[122].mxu0 }
 0x8e6   : > { %21724 = vst [vmem:[%s36495_s30 + $0x3c8] sm:$0xff] %v21596_v59  ;;  %v30709_v27 = vadd.f32 %v30580_v11, %v29028_v63  ;;  %v10533_v19 = vpop.f32.mrb[123].mxu1  ;;  %v21311_v43 = vpop.f32.mrb[123].mxu0 }
 0x8e7   : > { %21723 = vst [vmem:[%s36495_s30 + $0x3c0] sm:$0xff] %v21595_v55  ;;  %v30710_v20 = vadd.f32 %v21311_v43, %v10533_v19 }
 0x8e8   : > { %v21598_v3 = vadd.f32 %v36777_v35, %v30709_v27 }
 0x8e9   : > { %v21597_v51 = vadd.f32 %v36777_v35, %v30710_v20  ;;  %v29031_v22 = vpop.f32.mrb[124].mxu1  ;;  %v30583_v42 = vpop.f32.mrb[124].mxu0 }
 0x8ea   : > { %21726 = vst [vmem:[%s36495_s30 + $0x3d8] sm:$0xff] %v21598_v3  ;;  %v30711_v44 = vadd.f32 %v30583_v42, %v29031_v22  ;;  %v10543_v15 = vpop.f32.mrb[125].mxu1  ;;  %v21321_v24 = vpop.f32.mrb[125].mxu0 }
 0x8eb   : > { %21725 = vst [vmem:[%s36495_s30 + $0x3d0] sm:$0xff] %v21597_v51  ;;  %v30712_v7 = vadd.f32 %v21321_v24, %v10543_v15 }
 0x8ec   : > { %v21600_v26 = vadd.f32 %v36777_v35, %v30711_v44 }
 0x8ed   : > { %v21599_v28 = vadd.f32 %v36777_v35, %v30712_v7  ;;  %v29034_v30 = vpop.f32.mrb[126].mxu1  ;;  %v30586_v32 = vpop.f32.mrb[126].mxu0 }
 0x8ee   : > { %21728 = vst [vmem:[%s36495_s30 + $0x3e8] sm:$0xff] %v21600_v26  ;;  %v30713_v34 = vadd.f32 %v30586_v32, %v29034_v30  ;;  %v10553_v36 = vpop.f32.mrb[127].mxu1  ;;  %v21331_v38 = vpop.f32.mrb[127].mxu0 }
 0x8ef   : > { %21727 = vst [vmem:[%s36495_s30 + $0x3e0] sm:$0xff] %v21599_v28  ;;  %v30714_v40 = vadd.f32 %v21331_v38, %v10553_v36 }
 0x8f0   : > { %v21602_v46 = vadd.f32 %v36777_v35, %v30713_v34 }
 0x8f1   : > { %v21601_v48 = vadd.f32 %v36777_v35, %v30714_v40 }
 0x8f2   : > { %21730 = vst [vmem:[%s36495_s30 + $0x3f8] sm:$0xff] %v21602_v46 }
 0x8f3   : > { %21729 = vst [vmem:[%s36495_s30 + $0x3f0] sm:$0xff] %v21601_v48 }
 0x8f4   : > { %32563 = shalt.err (!%p32560_p3)
}
 0x8f5   : > { %s32564_s24 = scalar_lea.hbm %s36857_s10, 16384  ;;  %s32568_s27 = scalar_lea.hbm %s36910_s3, 32768 }
 0x8f6   : > { %p32565_p4 = scmp.ne.s32.totalorder %s36857_s10, %s32564_s24  ;;  %p32569_p9 = scmp.lt.u32.totalorder %s36857_s10, %s36910_s3 }
 0x8f7   : > { %p32570_p10 = scmp.lt.u32.totalorder %s32568_s27, %s32564_s24  ;;  %p32572_p12 = scmp.lt.u32.totalorder %s32564_s24, %s36857_s10 }
 0x8f8   : > { %p32566_p7 = pnand %p32565_p4, %p32675_p5 }
 0x8f9   : > { %p32571_p11 = por %p32570_p10, %p32569_p9 }
 0x8fa   : > { %p32567_p8 = pneg %p32566_p7 }
 0x8fb   : > { %p32573_p13 = por %p32572_p12, %p32571_p11 }
 0x8fd   : > { %p32574_p0 = pnand %p32573_p13, %p32567_p8 }
 0x8ff   : > { %32577 = shalt.err (!%p32574_p0)
}
 0x900   : > { %s32615_s30 = smov 128   ;;  %s32616_s9 = smov 8  }
 0x901   : > { %32508 = dma.vmem_to_hbm [thread:$0]  (%p32675_p5), %s36859_s6, 16384, %s36857_s10, %s36866_s16, %s32615_s30, %s32615_s30, %s32616_s9  }
 0x902 PF: > { %p32514_p1 = scmp.ge.s32.totalorder %s32612_s15, 2  ;;  %s21760_s4 = sand.u32 1, %s32600_s12  }
 0x903   : > { %s21761_s5 = scalar_lea.sflag [#allocation3], %s21760_s4 }
 0x904   : > { %p32511_p2 = pnand %p32514_p1, %p32679_p6 }
 0x906   : > { %32595 = dma.done.wait (!%p32511_p2), %s21761_s5, 16384  }
 0x907   : > { %32597 = vsyncadd (!%p32511_p2), %s21761_s5, 4294950912  ;;  %p13_p3 = scmp.ge.s32.totalorder %s32662_s18, 4   ;;  %s37102_s12 = smov %s32604_s13 }
 0x908   : > { %s37103_s13 = smov %s32608_s14  ;;  %s37104_s14 = smov %s32673_s21 }
 0x909   : > { %s37105_s15 = smov %s32662_s18  ;;  %15 = sbr.rel (!%p13_p3) target bundleno = 3 (0x3), region = 85 }
 0x910   :  { %21766 = vsyncpa [#allocation3], 1 }
 0x911   :  { %21768 = vsyncpa [#allocation3 + $0x1], 1 }

</bundles_post_ra>
